<compile_context>
chip_gen: v6e
topology: v6e:2x2x1
jax: 0.10.0
libtpu: 0.0.40
codegen_flags: <defaults>
</compile_context>

<pallas_src>
import functools

import jax
import jax.numpy as jnp
from jax.experimental import pallas as pl
from jax.experimental.pallas import tpu as pltpu

LANE = 128
NODE_PAD = 512                       # node dim padded to 512 -> 512-wide tiles
_TILE_VMEM_BUDGET = 36 * 1024 * 1024 # tile footprint budget (fits v7x 64 MiB/TC)
_A_TILE_BUFFERS = 2                  # set to 3 on v5e (lowest HBM BW) to deepen
                                     # the A-tile pipeline via pl.Buffered(3)


def _round_up(x, m):
    return ((x + m - 1) // m) * m


def _largest_tile(dim, cands=(512, 256, 128)):
    for t in cands:
        if dim >= t and dim % t == 0:
            return t
    return dim


def _plan_tiles(m, ka, n, asz, bsz, osz, use_scratch):
    """Pick (tm, tn, tk, b_resident) under an explicit VMEM footprint budget."""
    tm = _largest_tile(m)
    tn = _largest_tile(n)

    def footprint(tk, resident):
        a_bytes = _A_TILE_BUFFERS * tm * tk * asz
        b_bytes = 2 * ka * tn * bsz if resident else 2 * tk * tn * bsz
        out_bytes = 2 * tm * tn * osz
        acc_bytes = tm * tn * 4 if use_scratch else 0
        misc = 2 * 2 * tn * 4 * 2          # bias + lb rows, double-buffered
        return a_bytes + b_bytes + out_bytes + acc_bytes + misc

    # Prefer holding the dense RHS panel VMEM-resident (removes M/tm - 1
    # re-reads of the panel), and grow tk for longer DMA bursts / fewer steps.
    for resident in (True, False):
        for tk in (2048, 1024, 512, 256, 128):
            if tk <= ka and ka % tk == 0 and footprint(tk, resident) <= _TILE_VMEM_BUDGET:
                return tm, tn, tk, resident, footprint(tk, resident)
    tk = _largest_tile(ka)
    return tm, tn, tk, False, footprint(tk, False)


# ----------------------------------------------------------------------------
# Kernel 1: tiled matmul with fused bias + (per-column masked) ReLU epilogue.
#   out = max(A @ B + bias, lb)
# ----------------------------------------------------------------------------
def _matmul_bias_act_kernel(a_ref, b_ref, bias_ref, lb_ref, out_ref, *acc_scratch,
                            tk, b_resident):
    # f32 outputs accumulate directly into out_ref (its block index is constant
    # across k); bf16 outputs accumulate in a f32 scratch and cast in the epilogue.
    acc_ref = acc_scratch[0] if acc_scratch else out_ref
    k = pl.program_id(2)

    @pl.when(k == 0)
    def _():
        acc_ref[...] = jnp.zeros_like(acc_ref)

    if b_resident:
        kk = pl.multiple_of(k * tk, tk)
        b_tile = b_ref[pl.ds(kk, tk), :]
    else:
        b_tile = b_ref[...]

    acc_ref[...] += jnp.dot(a_ref[...], b_tile,
                            preferred_element_type=jnp.float32)

    @pl.when(k == pl.num_programs(2) - 1)
    def _():
        # Epilogue only on the final reduction step: bias broadcast + masked
        # ReLU via the per-column lower bound (0.0 => ReLU, -inf => linear).
        out_ref[...] = jnp.maximum(acc_ref[...] + bias_ref[...],
                                   lb_ref[...]).astype(out_ref.dtype)


def tiled_matmul(a, b, bias, lb, *, out_dtype=jnp.float32):
    """out = max(a @ b + bias, lb). All dims must be multiples of 128."""
    m, ka = a.shape
    kb, n = b.shape
    assert ka == kb, (a.shape, b.shape)
    asz = jnp.dtype(a.dtype).itemsize
    bsz = jnp.dtype(b.dtype).itemsize
    osz = jnp.dtype(out_dtype).itemsize
    use_scratch = jnp.dtype(out_dtype) != jnp.dtype(jnp.float32)

    tm, tn, tk, b_resident, footprint = _plan_tiles(m, ka, n, asz, bsz, osz,
                                                    use_scratch)

    if _A_TILE_BUFFERS != 2:
        a_spec = pl.BlockSpec((tm, tk), lambda i, j, k: (i, k),
                              pipeline_mode=pl.Buffered(_A_TILE_BUFFERS))
    else:
        a_spec = pl.BlockSpec((tm, tk), lambda i, j, k: (i, k))

    if b_resident:
        # Whole K-panel of B lives in VMEM; constant block index => loaded once
        # (per j), never re-streamed per row tile i.
        b_spec = pl.BlockSpec((ka, tn), lambda i, j, k: (0, j))
    else:
        b_spec = pl.BlockSpec((tk, tn), lambda i, j, k: (k, j))

    scratch = [pltpu.VMEM((tm, tn), jnp.float32)] if use_scratch else []
    vmem_limit = int(min(max(footprint * 5 // 4 + (1 << 20), 8 << 20), 52 << 20))

    return pl.pallas_call(
        functools.partial(_matmul_bias_act_kernel, tk=tk, b_resident=b_resident),
        out_shape=jax.ShapeDtypeStruct((m, n), out_dtype),
        grid_spec=pltpu.PrefetchScalarGridSpec(
            num_scalar_prefetch=0,
            grid=(m // tm, n // tn, ka // tk),
            in_specs=[
                a_spec,
                b_spec,
                pl.BlockSpec((1, tn), lambda i, j, k: (0, j)),
                pl.BlockSpec((1, tn), lambda i, j, k: (0, j)),
            ],
            out_specs=pl.BlockSpec((tm, tn), lambda i, j, k: (i, j)),
            scratch_shapes=scratch,
        ),
        compiler_params=pltpu.CompilerParams(
            dimension_semantics=("parallel", "parallel", "arbitrary"),
            vmem_limit_bytes=vmem_limit,
        ),
    )(a, b, bias, lb)


# ----------------------------------------------------------------------------
# Kernel 2: 2-way attention (softmax over the stack of two feature maps).
# Consumes the packed tower outputs directly: the score weight row is zero
# outside the shared-mu columns, so no re-pad copies are needed. Scores via
# VPU multiply + lane reduce; scalar bias in SMEM; approx reciprocal softmax.
# ----------------------------------------------------------------------------
def _attention_kernel(x1_ref, x2_ref, w_ref, b_ref, out_ref):
    x1 = x1_ref[...]
    x2 = x2_ref[...]
    w = w_ref[...]                    # (1, D) broadcast row
    b = b_ref[0, 0]                   # scalar bias from SMEM
    s1 = jnp.sum(x1 * w, axis=-1, keepdims=True) + b   # (TM, 1)
    s2 = jnp.sum(x2 * w, axis=-1, keepdims=True) + b
    m = jnp.maximum(s1, s2)
    e1 = jnp.exp(s1 - m)
    e2 = jnp.exp(s2 - m)
    inv = pl.reciprocal(e1 + e2, approx=True)
    out_ref[...] = x1 * (e1 * inv) + x2 * (e2 * inv)


def attention(x1, x2, w_row, b):
    n_pad, d_pad = x1.shape
    tm = _largest_tile(n_pad)
    return pl.pallas_call(
        _attention_kernel,
        out_shape=jax.ShapeDtypeStruct((n_pad, d_pad), jnp.float32),
        grid=(n_pad // tm,),
        in_specs=[
            pl.BlockSpec((tm, d_pad), lambda i: (i, 0)),
            pl.BlockSpec((tm, d_pad), lambda i: (i, 0)),
            pl.BlockSpec((1, d_pad), lambda i: (0, 0)),
            pl.BlockSpec(memory_space=pltpu.MemorySpace.SMEM),
        ],
        out_specs=pl.BlockSpec((tm, d_pad), lambda i: (i, 0)),
        compiler_params=pltpu.CompilerParams(
            dimension_semantics=("parallel",)),
    )(x1, x2, w_row, b)


# ----------------------------------------------------------------------------
# Parameter construction (deterministic, mimics torch init scales)
# ----------------------------------------------------------------------------
def init_gc(key, input_dim, output_dim):
    std = 1.0 / (output_dim ** 0.5)
    kw, kb = jax.random.split(key)
    w = jax.random.uniform(kw, (input_dim, output_dim), jnp.float32, -std, std)
    b = jax.random.uniform(kb, (1, output_dim), jnp.float32, -std, std)
    return {"w": w, "b": b}


def init_three_layer_encoder(key, input_dim, hid_dim, output_dim):
    k1, k2, k3 = jax.random.split(key, 3)
    return {
        "gc1": init_gc(k1, input_dim, hid_dim),
        "gc2": init_gc(k2, hid_dim, output_dim),
        "gc3": init_gc(k3, hid_dim, output_dim),
    }


def init_encoder_params(key, input_dim, hid_dim, output_dim):
    kpl, kpg, ksl, ksg, katt = jax.random.split(key, 5)
    std = 1.0 / (output_dim ** 0.5)
    kaw, kab = jax.random.split(katt)
    return {
        "private_local": init_three_layer_encoder(kpl, input_dim, hid_dim, output_dim),
        "private_global": init_three_layer_encoder(kpg, input_dim, hid_dim, output_dim),
        "shared_local": init_three_layer_encoder(ksl, input_dim, hid_dim, output_dim),
        "shared_global": init_three_layer_encoder(ksg, input_dim, hid_dim, output_dim),
        # nn.Linear(output_dim, 1): weight stored transposed (output_dim, 1)
        "att_w_t": jax.random.uniform(kaw, (output_dim, 1), jnp.float32, -std, std),
        "att_b": jax.random.uniform(kab, (1, 1), jnp.float32, -std, std),
    }


# ----------------------------------------------------------------------------
# Fused / padded parameter packing for one adjacency group
# (private GCNVAE tower + shared GCN tower over the same adjacency).
# Padded weight/bias columns are exactly zero so padded outputs stay 0.
# ----------------------------------------------------------------------------
def build_group_params(priv, shrd, input_dim, hid_dim, out_dim):
    id_pad = _round_up(input_dim, LANE)
    h2_pad = _round_up(2 * hid_dim, LANE)
    o4_pad = _round_up(4 * out_dim, LANE)

    # Layer 1: feat @ [W1_priv | W1_shared]
    w1 = jnp.zeros((id_pad, h2_pad), jnp.float32)
    w1 = w1.at[:input_dim, :hid_dim].set(priv["gc1"]["w"])
    w1 = w1.at[:input_dim, hid_dim:2 * hid_dim].set(shrd["gc1"]["w"])
    b1 = jnp.zeros((1, h2_pad), jnp.float32)
    b1 = b1.at[:, :hid_dim].set(priv["gc1"]["b"])
    b1 = b1.at[:, hid_dim:2 * hid_dim].set(shrd["gc1"]["b"])
    # ReLU only on the shared (GCN) half; private (GCNVAE) half stays linear.
    lb1 = jnp.full((1, h2_pad), -jnp.inf, jnp.float32)
    lb1 = lb1.at[:, hid_dim:2 * hid_dim].set(0.0)

    # Layers 2+3 of both towers as one block-diagonal weight.
    w23 = jnp.zeros((h2_pad, o4_pad), jnp.float32)
    w23 = w23.at[:hid_dim, 0:out_dim].set(priv["gc2"]["w"])
    w23 = w23.at[:hid_dim, out_dim:2 * out_dim].set(priv["gc3"]["w"])
    w23 = w23.at[hid_dim:2 * hid_dim, 2 * out_dim:3 * out_dim].set(shrd["gc2"]["w"])
    w23 = w23.at[hid_dim:2 * hid_dim, 3 * out_dim:4 * out_dim].set(shrd["gc3"]["w"])
    b23 = jnp.zeros((1, o4_pad), jnp.float32)
    b23 = b23.at[:, 0:out_dim].set(priv["gc2"]["b"])
    b23 = b23.at[:, out_dim:2 * out_dim].set(priv["gc3"]["b"])
    b23 = b23.at[:, 2 * out_dim:3 * out_dim].set(shrd["gc2"]["b"])
    b23 = b23.at[:, 3 * out_dim:4 * out_dim].set(shrd["gc3"]["b"])
    lb23 = jnp.full((1, o4_pad), -jnp.inf, jnp.float32)

    return {"w1": w1, "b1": b1, "lb1": lb1,
            "w23": w23, "b23": b23, "lb23": lb23}


def _pad_2d(x, shape, dtype):
    """Single-pass pad + dtype cast; no-op copy when already padded/cast."""
    if x.shape == shape:
        return x if x.dtype == dtype else x.astype(dtype)
    out = jnp.zeros(shape, dtype)
    return out.at[:x.shape[0], :x.shape[1]].set(x.astype(dtype))


# ----------------------------------------------------------------------------
# Forward pass (eval mode)
# ----------------------------------------------------------------------------
def encoder_forward(params, feat, adj, ppmi, *, bf16_adjacency=False):
    n, input_dim = feat.shape
    hid_dim = params["private_local"]["gc1"]["w"].shape[1]
    out_dim = params["private_local"]["gc2"]["w"].shape[1]

    # Node dim padded to 512 so the dominant adjacency matmuls always get
    # 512-wide row/K tiles; feature dims padded to 128 (lane-dense).
    n_pad = _round_up(n, NODE_PAD)
    id_pad = _round_up(input_dim, LANE)

    adj_dtype = jnp.bfloat16 if bf16_adjacency else jnp.float32
    rhs_dtype = jnp.bfloat16 if bf16_adjacency else jnp.float32

    feat_p = _pad_2d(feat, (n_pad, id_pad), jnp.float32)
    adj_p = _pad_2d(adj, (n_pad, n_pad), adj_dtype)     # pad + cast in one pass
    ppmi_p = _pad_2d(ppmi, (n_pad, n_pad), adj_dtype)

    gl = build_group_params(params["private_local"], params["shared_local"],
                            input_dim, hid_dim, out_dim)
    gg = build_group_params(params["private_global"], params["shared_global"],
                            input_dim, hid_dim, out_dim)
    h2_pad = gl["w1"].shape[1]
    o4_pad = gl["w23"].shape[1]

    # Fused layer 1 across BOTH adjacency groups: feat is read once and the
    # MXU sees a 2x wider N. rhs panels are produced directly in the streaming
    # dtype (bf16 when enabled) so the adjacency matmuls consume them natively.
    w1_all = jnp.concatenate([gl["w1"], gg["w1"]], axis=1)
    zero_h4 = jnp.zeros((1, 2 * h2_pad), jnp.float32)
    neg_h4 = jnp.full((1, 2 * h2_pad), -jnp.inf, jnp.float32)
    rhs1_all = tiled_matmul(feat_p, w1_all, zero_h4, neg_h4, out_dtype=rhs_dtype)
    rhs1_l = rhs1_all[:, :h2_pad]
    rhs1_g = rhs1_all[:, h2_pad:]

    zero_o4 = jnp.zeros((1, o4_pad), jnp.float32)
    neg_o4 = jnp.full((1, o4_pad), -jnp.inf, jnp.float32)

    def group(gp, rhs1, a_p):
        supp = tiled_matmul(a_p, rhs1, gp["b1"], gp["lb1"])             # f32
        rhs2 = tiled_matmul(supp, gp["w23"], zero_o4, neg_o4,
                            out_dtype=rhs_dtype)
        res = tiled_matmul(a_p, rhs2, gp["b23"], gp["lb23"])            # f32
        return res   # (N_pad, o4_pad): [res1_p | res2_p | res1_s | res2_s | pad]

    res_l = group(gl, rhs1_l, adj_p)
    res_g = group(gg, rhs1_g, ppmi_p)

    o = out_dim
    # Attention directly on the packed tower outputs: the weight row is zero
    # outside the shared-mu columns, so scores/weighted-sum are exact for
    # those columns and no re-pad copies are materialized.
    w_row = jnp.zeros((1, o4_pad), jnp.float32)
    w_row = w_row.at[:, 2 * o:3 * o].set(params["att_w_t"][:, 0])
    att_out = attention(res_l, res_g, w_row, params["att_b"])
    shared = att_out[:n, 2 * o:3 * o]

    def split(res):
        return (res[:n, 0:o], res[:n, o:2 * o],
                res[:n, 2 * o:3 * o], res[:n, 3 * o:4 * o])

    r1pl, r2pl, r1sl, r2sl = split(res_l)
    r1pg, r2pg, r1sg, r2sg = split(res_g)

    return ([r1pl, r1pl, r2pl], [r1pg, r1pg, r2pg],
            [r1sl, r1sl, r2sl], [r1sg, r1sg, r2sg], shared)


# ----------------------------------------------------------------------------
# Pure-JAX reference (for correctness check)
# ----------------------------------------------------------------------------
def _ref_gc(p, feat, a):
    return a @ (feat @ p["w"]) + p["b"]


def _ref_encoder(params, feat, adj, ppmi):
    def vae(p, a):
        s = _ref_gc(p["gc1"], feat, a)
        return _ref_gc(p["gc2"], s, a), _ref_gc(p["gc3"], s, a)

    def gcn(p, a):
        s = jnp.maximum(_ref_gc(p["gc1"], feat, a), 0.0)
        return _ref_gc(p["gc2"], s, a), _ref_gc(p["gc3"], s, a)

    r1pl, r2pl = vae(params["private_local"], adj)
    r1pg, r2pg = vae(params["private_global"], ppmi)
    r1sl, r2sl = gcn(params["shared_local"], adj)
    r1sg, r2sg = gcn(params["shared_global"], ppmi)

    stacked = jnp.stack([r1sl, r1sg], axis=1)                     # (N, 2, D)
    scores = stacked @ params["att_w_t"] + params["att_b"][0, 0]  # (N, 2, 1)
    w = jax.nn.softmax(scores, axis=1)
    shared = jnp.sum(stacked * w, axis=1)
    return ([r1pl, r1pl, r2pl], [r1pg, r1pg, r2pg],
            [r1sl, r1sl, r2sl], [r1sg, r1sg, r2sg], shared)


# ----------------------------------------------------------------------------
if __name__ == "__main__":
    N, INPUT_DIM, HID_DIM, OUTPUT_DIM = 16, 8, 32, 16

    key = jax.random.PRNGKey(0)
    k_feat, k_adj, k_ppmi, k_params = jax.random.split(key, 4)

    feat = jax.random.normal(k_feat, (N, INPUT_DIM), jnp.float32)
    adj_raw = jax.random.uniform(k_adj, (N, N), jnp.float32)
    adj = adj_raw / jnp.sum(adj_raw, axis=1, keepdims=True)
    ppmi_raw = jax.random.uniform(k_ppmi, (N, N), jnp.float32)
    ppmi = ppmi_raw / jnp.sum(ppmi_raw, axis=1, keepdims=True)

    params = init_encoder_params(k_params, INPUT_DIM, HID_DIM, OUTPUT_DIM)
    ref = _ref_encoder(params, feat, adj, ppmi)

    fwd = jax.jit(encoder_forward, static_argnames=("bf16_adjacency",))

    # --- f32 path: tight tolerance ---------------------------------------
    out = jax.block_until_ready(fwd(params, feat, adj, ppmi, bf16_adjacency=False))
    for out_list, ref_list in zip(out[:4], ref[:4]):
        for a, b in zip(out_list, ref_list):
            assert a.shape == b.shape and a.dtype == jnp.float32
            assert jnp.allclose(a, b, atol=1e-4, rtol=1e-4), "GCN mismatch vs reference"
    a, b = out[4], ref[4]
    assert a.shape == b.shape and a.dtype == jnp.float32
    # Attention output uses the approximate EUP reciprocal -> slightly looser.
    assert jnp.allclose(a, b, atol=2e-3, rtol=2e-3), "attention mismatch vs reference"

    # --- bf16 adjacency path: looser tolerance (validated before enabling) --
    out_bf = jax.block_until_ready(fwd(params, feat, adj, ppmi, bf16_adjacency=True))
    for out_list, ref_list in zip(out_bf[:4], ref[:4]):
        for a, b in zip(out_list, ref_list):
            assert a.shape == b.shape and a.dtype == jnp.float32
            assert jnp.allclose(a, b, atol=5e-2, rtol=5e-2), "bf16 GCN mismatch vs reference"
    assert jnp.allclose(out_bf[4], ref[4], atol=5e-2, rtol=5e-2), "bf16 attention mismatch"

    print("KERNEL_OK")
</pallas_src>

<mosaic_0001>
module attributes {stable_mosaic.version = 11 : i64} {
  func.func @_matmul_bias_act_kernel(%arg0: i32, %arg1: i32, %arg2: i32, %arg3: memref<512x128xf32, #tpu.memory_space<vmem>>, %arg4: memref<128x256xf32, #tpu.memory_space<vmem>>, %arg5: memref<1x256xf32, #tpu.memory_space<vmem>>, %arg6: memref<1x256xf32, #tpu.memory_space<vmem>>, %arg7: memref<512x256xf32, #tpu.memory_space<vmem>>) attributes {dimension_semantics = [#tpu.dimension_semantics<parallel>, #tpu.dimension_semantics<parallel>, #tpu.dimension_semantics<arbitrary>], iteration_bounds = array<i64: 1, 1, 1>, scalar_prefetch = 0 : i64, scratch_operands = 0 : i64, tpu.core_type = #tpu.core_type<tc>, window_params = [{transform_indices = @transform_0, window_bounds = array<i64: 512, 128>}, {transform_indices = @transform_1, window_bounds = array<i64: 128, 256>}, {transform_indices = @transform_2, window_bounds = array<i64: 1, 256>}, {transform_indices = @transform_3, window_bounds = array<i64: 1, 256>}, {transform_indices = @transform_4, window_bounds = array<i64: 512, 256>}]} {
    %c0_i32 = arith.constant 0 : i32
    %0 = arith.cmpi eq, %arg2, %c0_i32 : i32
    %1 = arith.extui %0 : i1 to i32
    %c0_i32_0 = arith.constant 0 : i32
    %2 = arith.cmpi ne, %1, %c0_i32_0 : i32
    scf.if %2 {
      %cst_9 = arith.constant 0.000000e+00 : f32
      %15 = vector.broadcast %cst_9 : f32 to vector<512x256xf32>
      %c0_10 = arith.constant 0 : index
      %c0_11 = arith.constant 0 : index
      %16 = vector.load %arg7[%c0_10, %c0_11] : memref<512x256xf32, #tpu.memory_space<vmem>>, vector<512x256xf32>
      tpu.vector_store %arg7[%c0_10, %c0_11], %15 {strides = array<i32>} : memref<512x256xf32, #tpu.memory_space<vmem>>, vector<512x256xf32>,
    } else {
    }
    %c128_i32 = arith.constant 128 : i32
    %3 = arith.muli %arg2, %c128_i32 : i32
    %4 = tpu.assume_multiple %3, 128 : i32
    %5 = arith.index_cast %4 : i32 to index
    %c0 = arith.constant 0 : index
    %6 = vector.load %arg4[%5, %c0] : memref<128x256xf32, #tpu.memory_space<vmem>>, vector<128x256xf32>
    %c0_1 = arith.constant 0 : index
    %c0_2 = arith.constant 0 : index
    %7 = vector.load %arg7[%c0_1, %c0_2] : memref<512x256xf32, #tpu.memory_space<vmem>>, vector<512x256xf32>
    %c0_3 = arith.constant 0 : index
    %c0_4 = arith.constant 0 : index
    %8 = vector.load %arg3[%c0_3, %c0_4] : memref<512x128xf32, #tpu.memory_space<vmem>>, vector<512x128xf32>
    %cst = arith.constant dense<0.000000e+00> : vector<512x256xf32>
    %9 = tpu.matmul %8, %6, %cst {dimension_numbers = #tpu.dot_dimension_numbers<[1], [0], [0], [1], [0, 0, 1, 1], [], []>} : vector<512x128xf32>, vector<128x256xf32>, vector<512x256xf32> -> vector<512x256xf32>
    %10 = arith.addf %7, %9 : vector<512x256xf32>
    %c0_5 = arith.constant 0 : index
    %c0_6 = arith.constant 0 : index
    %11 = vector.load %arg7[%c0_5, %c0_6] : memref<512x256xf32, #tpu.memory_space<vmem>>, vector<512x256xf32>
    tpu.vector_store %arg7[%c0_5, %c0_6], %10 {strides = array<i32>} : memref<512x256xf32, #tpu.memory_space<vmem>>, vector<512x256xf32>,
    %c0_i32_7 = arith.constant 0 : i32
    %12 = arith.cmpi eq, %arg2, %c0_i32_7 : i32
    %13 = arith.extui %12 : i1 to i32
    %c0_i32_8 = arith.constant 0 : i32
    %14 = arith.cmpi ne, %13, %c0_i32_8 : i32
    scf.if %14 {
      %c0_9 = arith.constant 0 : index
      %c0_10 = arith.constant 0 : index
      %15 = vector.load %arg7[%c0_9, %c0_10] : memref<512x256xf32, #tpu.memory_space<vmem>>, vector<512x256xf32>
      %c0_11 = arith.constant 0 : index
      %c0_12 = arith.constant 0 : index
      %16 = vector.load %arg5[%c0_11, %c0_12] : memref<1x256xf32, #tpu.memory_space<vmem>>, vector<1x256xf32>
      %17 = vector.broadcast %16 : vector<1x256xf32> to vector<512x256xf32>
      %18 = arith.addf %15, %17 : vector<512x256xf32>
      %c0_13 = arith.constant 0 : index
      %c0_14 = arith.constant 0 : index
      %19 = vector.load %arg6[%c0_13, %c0_14] : memref<1x256xf32, #tpu.memory_space<vmem>>, vector<1x256xf32>
      %20 = vector.broadcast %19 : vector<1x256xf32> to vector<512x256xf32>
      %21 = arith.maximumf %18, %20 : vector<512x256xf32>
      %c0_15 = arith.constant 0 : index
      %c0_16 = arith.constant 0 : index
      %22 = vector.load %arg7[%c0_15, %c0_16] : memref<512x256xf32, #tpu.memory_space<vmem>>, vector<512x256xf32>
      tpu.vector_store %arg7[%c0_15, %c0_16], %21 {strides = array<i32>} : memref<512x256xf32, #tpu.memory_space<vmem>>, vector<512x256xf32>,
    } else {
    }
    return
  }
  func.func @transform_0(%arg0: i32, %arg1: i32, %arg2: i32) -> (i32, i32) {
    %c0_i32 = arith.constant 0 : i32
    return %arg0, %arg2 : i32, i32
  }
  func.func @transform_1(%arg0: i32, %arg1: i32, %arg2: i32) -> (i32, i32) {
    %c0_i32 = arith.constant 0 : i32
    %c0_i32_0 = arith.constant 0 : i32
    return %c0_i32, %arg1 : i32, i32
  }
  func.func @transform_2(%arg0: i32, %arg1: i32, %arg2: i32) -> (i32, i32) {
    %c0_i32 = arith.constant 0 : i32
    %c0_i32_0 = arith.constant 0 : i32
    return %c0_i32, %arg1 : i32, i32
  }
  func.func @transform_3(%arg0: i32, %arg1: i32, %arg2: i32) -> (i32, i32) {
    %c0_i32 = arith.constant 0 : i32
    %c0_i32_0 = arith.constant 0 : i32
    return %c0_i32, %arg1 : i32, i32
  }
  func.func @transform_4(%arg0: i32, %arg1: i32, %arg2: i32) -> (i32, i32) {
    %c0_i32 = arith.constant 0 : i32
    return %arg0, %arg1 : i32, i32
  }
}

module attributes {stable_mosaic.version = 11 : i64} {
  func.func @_matmul_bias_act_kernel(%arg0: i32, %arg1: i32, %arg2: i32, %arg3: memref<512x512xf32, #tpu.memory_space<vmem>>, %arg4: memref<512x128xf32, #tpu.memory_space<vmem>>, %arg5: memref<1x128xf32, #tpu.memory_space<vmem>>, %arg6: memref<1x128xf32, #tpu.memory_space<vmem>>, %arg7: memref<512x128xf32, #tpu.memory_space<vmem>>) attributes {dimension_semantics = [#tpu.dimension_semantics<parallel>, #tpu.dimension_semantics<parallel>, #tpu.dimension_semantics<arbitrary>], iteration_bounds = array<i64: 1, 1, 1>, scalar_prefetch = 0 : i64, scratch_operands = 0 : i64, tpu.core_type = #tpu.core_type<tc>, window_params = [{transform_indices = @transform_0, window_bounds = array<i64: 512, 512>}, {transform_indices = @transform_1, window_bounds = array<i64: 512, 128>}, {transform_indices = @transform_2, window_bounds = array<i64: 1, 128>}, {transform_indices = @transform_3, window_bounds = array<i64: 1, 128>}, {transform_indices = @transform_4, window_bounds = array<i64: 512, 128>}]} {
    %c0_i32 = arith.constant 0 : i32
    %0 = arith.cmpi eq, %arg2, %c0_i32 : i32
    %1 = arith.extui %0 : i1 to i32
    %c0_i32_0 = arith.constant 0 : i32
    %2 = arith.cmpi ne, %1, %c0_i32_0 : i32
    scf.if %2 {
      %cst_9 = arith.constant 0.000000e+00 : f32
      %15 = vector.broadcast %cst_9 : f32 to vector<512x128xf32>
      %c0_10 = arith.constant 0 : index
      %c0_11 = arith.constant 0 : index
      %16 = vector.load %arg7[%c0_10, %c0_11] : memref<512x128xf32, #tpu.memory_space<vmem>>, vector<512x128xf32>
      tpu.vector_store %arg7[%c0_10, %c0_11], %15 {strides = array<i32>} : memref<512x128xf32, #tpu.memory_space<vmem>>, vector<512x128xf32>,
    } else {
    }
    %c512_i32 = arith.constant 512 : i32
    %3 = arith.muli %arg2, %c512_i32 : i32
    %4 = tpu.assume_multiple %3, 512 : i32
    %5 = arith.index_cast %4 : i32 to index
    %c0 = arith.constant 0 : index
    %6 = vector.load %arg4[%5, %c0] : memref<512x128xf32, #tpu.memory_space<vmem>>, vector<512x128xf32>
    %c0_1 = arith.constant 0 : index
    %c0_2 = arith.constant 0 : index
    %7 = vector.load %arg7[%c0_1, %c0_2] : memref<512x128xf32, #tpu.memory_space<vmem>>, vector<512x128xf32>
    %c0_3 = arith.constant 0 : index
    %c0_4 = arith.constant 0 : index
    %8 = vector.load %arg3[%c0_3, %c0_4] : memref<512x512xf32, #tpu.memory_space<vmem>>, vector<512x512xf32>
    %cst = arith.constant dense<0.000000e+00> : vector<512x128xf32>
    %9 = tpu.matmul %8, %6, %cst {dimension_numbers = #tpu.dot_dimension_numbers<[1], [0], [0], [1], [0, 0, 1, 1], [], []>} : vector<512x512xf32>, vector<512x128xf32>, vector<512x128xf32> -> vector<512x128xf32>
    %10 = arith.addf %7, %9 : vector<512x128xf32>
    %c0_5 = arith.constant 0 : index
    %c0_6 = arith.constant 0 : index
    %11 = vector.load %arg7[%c0_5, %c0_6] : memref<512x128xf32, #tpu.memory_space<vmem>>, vector<512x128xf32>
    tpu.vector_store %arg7[%c0_5, %c0_6], %10 {strides = array<i32>} : memref<512x128xf32, #tpu.memory_space<vmem>>, vector<512x128xf32>,
    %c0_i32_7 = arith.constant 0 : i32
    %12 = arith.cmpi eq, %arg2, %c0_i32_7 : i32
    %13 = arith.extui %12 : i1 to i32
    %c0_i32_8 = arith.constant 0 : i32
    %14 = arith.cmpi ne, %13, %c0_i32_8 : i32
    scf.if %14 {
      %c0_9 = arith.constant 0 : index
      %c0_10 = arith.constant 0 : index
      %15 = vector.load %arg7[%c0_9, %c0_10] : memref<512x128xf32, #tpu.memory_space<vmem>>, vector<512x128xf32>
      %c0_11 = arith.constant 0 : index
      %c0_12 = arith.constant 0 : index
      %16 = vector.load %arg5[%c0_11, %c0_12] : memref<1x128xf32, #tpu.memory_space<vmem>>, vector<1x128xf32>
      %17 = vector.broadcast %16 : vector<1x128xf32> to vector<512x128xf32>
      %18 = arith.addf %15, %17 : vector<512x128xf32>
      %c0_13 = arith.constant 0 : index
      %c0_14 = arith.constant 0 : index
      %19 = vector.load %arg6[%c0_13, %c0_14] : memref<1x128xf32, #tpu.memory_space<vmem>>, vector<1x128xf32>
      %20 = vector.broadcast %19 : vector<1x128xf32> to vector<512x128xf32>
      %21 = arith.maximumf %18, %20 : vector<512x128xf32>
      %c0_15 = arith.constant 0 : index
      %c0_16 = arith.constant 0 : index
      %22 = vector.load %arg7[%c0_15, %c0_16] : memref<512x128xf32, #tpu.memory_space<vmem>>, vector<512x128xf32>
      tpu.vector_store %arg7[%c0_15, %c0_16], %21 {strides = array<i32>} : memref<512x128xf32, #tpu.memory_space<vmem>>, vector<512x128xf32>,
    } else {
    }
    return
  }
  func.func @transform_0(%arg0: i32, %arg1: i32, %arg2: i32) -> (i32, i32) {
    %c0_i32 = arith.constant 0 : i32
    return %arg0, %arg2 : i32, i32
  }
  func.func @transform_1(%arg0: i32, %arg1: i32, %arg2: i32) -> (i32, i32) {
    %c0_i32 = arith.constant 0 : i32
    %c0_i32_0 = arith.constant 0 : i32
    return %c0_i32, %arg1 : i32, i32
  }
  func.func @transform_2(%arg0: i32, %arg1: i32, %arg2: i32) -> (i32, i32) {
    %c0_i32 = arith.constant 0 : i32
    %c0_i32_0 = arith.constant 0 : i32
    return %c0_i32, %arg1 : i32, i32
  }
  func.func @transform_3(%arg0: i32, %arg1: i32, %arg2: i32) -> (i32, i32) {
    %c0_i32 = arith.constant 0 : i32
    %c0_i32_0 = arith.constant 0 : i32
    return %c0_i32, %arg1 : i32, i32
  }
  func.func @transform_4(%arg0: i32, %arg1: i32, %arg2: i32) -> (i32, i32) {
    %c0_i32 = arith.constant 0 : i32
    return %arg0, %arg1 : i32, i32
  }
}

module attributes {stable_mosaic.version = 11 : i64} {
  func.func @_matmul_bias_act_kernel(%arg0: i32, %arg1: i32, %arg2: i32, %arg3: memref<512x128xf32, #tpu.memory_space<vmem>>, %arg4: memref<128x128xf32, #tpu.memory_space<vmem>>, %arg5: memref<1x128xf32, #tpu.memory_space<vmem>>, %arg6: memref<1x128xf32, #tpu.memory_space<vmem>>, %arg7: memref<512x128xf32, #tpu.memory_space<vmem>>) attributes {dimension_semantics = [#tpu.dimension_semantics<parallel>, #tpu.dimension_semantics<parallel>, #tpu.dimension_semantics<arbitrary>], iteration_bounds = array<i64: 1, 1, 1>, scalar_prefetch = 0 : i64, scratch_operands = 0 : i64, tpu.core_type = #tpu.core_type<tc>, window_params = [{transform_indices = @transform_0, window_bounds = array<i64: 512, 128>}, {transform_indices = @transform_1, window_bounds = array<i64: 128, 128>}, {transform_indices = @transform_2, window_bounds = array<i64: 1, 128>}, {transform_indices = @transform_3, window_bounds = array<i64: 1, 128>}, {transform_indices = @transform_4, window_bounds = array<i64: 512, 128>}]} {
    %c0_i32 = arith.constant 0 : i32
    %0 = arith.cmpi eq, %arg2, %c0_i32 : i32
    %1 = arith.extui %0 : i1 to i32
    %c0_i32_0 = arith.constant 0 : i32
    %2 = arith.cmpi ne, %1, %c0_i32_0 : i32
    scf.if %2 {
      %cst_9 = arith.constant 0.000000e+00 : f32
      %15 = vector.broadcast %cst_9 : f32 to vector<512x128xf32>
      %c0_10 = arith.constant 0 : index
      %c0_11 = arith.constant 0 : index
      %16 = vector.load %arg7[%c0_10, %c0_11] : memref<512x128xf32, #tpu.memory_space<vmem>>, vector<512x128xf32>
      tpu.vector_store %arg7[%c0_10, %c0_11], %15 {strides = array<i32>} : memref<512x128xf32, #tpu.memory_space<vmem>>, vector<512x128xf32>,
    } else {
    }
    %c128_i32 = arith.constant 128 : i32
    %3 = arith.muli %arg2, %c128_i32 : i32
    %4 = tpu.assume_multiple %3, 128 : i32
    %5 = arith.index_cast %4 : i32 to index
    %c0 = arith.constant 0 : index
    %6 = vector.load %arg4[%5, %c0] : memref<128x128xf32, #tpu.memory_space<vmem>>, vector<128x128xf32>
    %c0_1 = arith.constant 0 : index
    %c0_2 = arith.constant 0 : index
    %7 = vector.load %arg7[%c0_1, %c0_2] : memref<512x128xf32, #tpu.memory_space<vmem>>, vector<512x128xf32>
    %c0_3 = arith.constant 0 : index
    %c0_4 = arith.constant 0 : index
    %8 = vector.load %arg3[%c0_3, %c0_4] : memref<512x128xf32, #tpu.memory_space<vmem>>, vector<512x128xf32>
    %cst = arith.constant dense<0.000000e+00> : vector<512x128xf32>
    %9 = tpu.matmul %8, %6, %cst {dimension_numbers = #tpu.dot_dimension_numbers<[1], [0], [0], [1], [0, 0, 1, 1], [], []>} : vector<512x128xf32>, vector<128x128xf32>, vector<512x128xf32> -> vector<512x128xf32>
    %10 = arith.addf %7, %9 : vector<512x128xf32>
    %c0_5 = arith.constant 0 : index
    %c0_6 = arith.constant 0 : index
    %11 = vector.load %arg7[%c0_5, %c0_6] : memref<512x128xf32, #tpu.memory_space<vmem>>, vector<512x128xf32>
    tpu.vector_store %arg7[%c0_5, %c0_6], %10 {strides = array<i32>} : memref<512x128xf32, #tpu.memory_space<vmem>>, vector<512x128xf32>,
    %c0_i32_7 = arith.constant 0 : i32
    %12 = arith.cmpi eq, %arg2, %c0_i32_7 : i32
    %13 = arith.extui %12 : i1 to i32
    %c0_i32_8 = arith.constant 0 : i32
    %14 = arith.cmpi ne, %13, %c0_i32_8 : i32
    scf.if %14 {
      %c0_9 = arith.constant 0 : index
      %c0_10 = arith.constant 0 : index
      %15 = vector.load %arg7[%c0_9, %c0_10] : memref<512x128xf32, #tpu.memory_space<vmem>>, vector<512x128xf32>
      %c0_11 = arith.constant 0 : index
      %c0_12 = arith.constant 0 : index
      %16 = vector.load %arg5[%c0_11, %c0_12] : memref<1x128xf32, #tpu.memory_space<vmem>>, vector<1x128xf32>
      %17 = vector.broadcast %16 : vector<1x128xf32> to vector<512x128xf32>
      %18 = arith.addf %15, %17 : vector<512x128xf32>
      %c0_13 = arith.constant 0 : index
      %c0_14 = arith.constant 0 : index
      %19 = vector.load %arg6[%c0_13, %c0_14] : memref<1x128xf32, #tpu.memory_space<vmem>>, vector<1x128xf32>
      %20 = vector.broadcast %19 : vector<1x128xf32> to vector<512x128xf32>
      %21 = arith.maximumf %18, %20 : vector<512x128xf32>
      %c0_15 = arith.constant 0 : index
      %c0_16 = arith.constant 0 : index
      %22 = vector.load %arg7[%c0_15, %c0_16] : memref<512x128xf32, #tpu.memory_space<vmem>>, vector<512x128xf32>
      tpu.vector_store %arg7[%c0_15, %c0_16], %21 {strides = array<i32>} : memref<512x128xf32, #tpu.memory_space<vmem>>, vector<512x128xf32>,
    } else {
    }
    return
  }
  func.func @transform_0(%arg0: i32, %arg1: i32, %arg2: i32) -> (i32, i32) {
    %c0_i32 = arith.constant 0 : i32
    return %arg0, %arg2 : i32, i32
  }
  func.func @transform_1(%arg0: i32, %arg1: i32, %arg2: i32) -> (i32, i32) {
    %c0_i32 = arith.constant 0 : i32
    %c0_i32_0 = arith.constant 0 : i32
    return %c0_i32, %arg1 : i32, i32
  }
  func.func @transform_2(%arg0: i32, %arg1: i32, %arg2: i32) -> (i32, i32) {
    %c0_i32 = arith.constant 0 : i32
    %c0_i32_0 = arith.constant 0 : i32
    return %c0_i32, %arg1 : i32, i32
  }
  func.func @transform_3(%arg0: i32, %arg1: i32, %arg2: i32) -> (i32, i32) {
    %c0_i32 = arith.constant 0 : i32
    %c0_i32_0 = arith.constant 0 : i32
    return %c0_i32, %arg1 : i32, i32
  }
  func.func @transform_4(%arg0: i32, %arg1: i32, %arg2: i32) -> (i32, i32) {
    %c0_i32 = arith.constant 0 : i32
    return %arg0, %arg1 : i32, i32
  }
}

module attributes {stable_mosaic.version = 11 : i64} {
  func.func @_attention_kernel(%arg0: i32, %arg1: memref<512x128xf32, #tpu.memory_space<vmem>>, %arg2: memref<512x128xf32, #tpu.memory_space<vmem>>, %arg3: memref<1x128xf32, #tpu.memory_space<vmem>>, %arg4: memref<1x1xf32, #tpu.memory_space<smem>>, %arg5: memref<512x128xf32, #tpu.memory_space<vmem>>) attributes {dimension_semantics = [#tpu.dimension_semantics<parallel>], iteration_bounds = array<i64: 1>, scalar_prefetch = 0 : i64, scratch_operands = 0 : i64, tpu.core_type = #tpu.core_type<tc>, window_params = [{transform_indices = @transform_0, window_bounds = array<i64: 512, 128>}, {transform_indices = @transform_1, window_bounds = array<i64: 512, 128>}, {pipeline_mode = #tpu.pipeline_mode<synchronous>, transform_indices = @transform_2, window_bounds = array<i64: 1, 128>}, {transform_indices = @transform_3, window_bounds = array<i64: 1, 1>}, {transform_indices = @transform_4, window_bounds = array<i64: 512, 128>}]} {
    %c0 = arith.constant 0 : index
    %c0_0 = arith.constant 0 : index
    %0 = vector.load %arg1[%c0, %c0_0] : memref<512x128xf32, #tpu.memory_space<vmem>>, vector<512x128xf32>
    %c0_1 = arith.constant 0 : index
    %c0_2 = arith.constant 0 : index
    %1 = vector.load %arg2[%c0_1, %c0_2] : memref<512x128xf32, #tpu.memory_space<vmem>>, vector<512x128xf32>
    %c0_3 = arith.constant 0 : index
    %c0_4 = arith.constant 0 : index
    %2 = vector.load %arg3[%c0_3, %c0_4] : memref<1x128xf32, #tpu.memory_space<vmem>>, vector<1x128xf32>
    %c0_5 = arith.constant 0 : index
    %c0_6 = arith.constant 0 : index
    %3 = memref.load %arg4[%c0_5, %c0_6] : memref<1x1xf32, #tpu.memory_space<smem>>
    %4 = vector.broadcast %2 : vector<1x128xf32> to vector<512x128xf32>
    %5 = arith.mulf %0, %4 : vector<512x128xf32>
    %cst = arith.constant dense<0.000000e+00> : vector<512xf32>
    %6 = vector.multi_reduction <add>, %5, %cst [1] : vector<512x128xf32> to vector<512xf32>
    %7 = vector.shape_cast %6 : vector<512xf32> to vector<512x1xf32>
    %8 = vector.broadcast %3 : f32 to vector<512x1xf32>
    %9 = arith.addf %7, %8 : vector<512x1xf32>
    %10 = vector.broadcast %2 : vector<1x128xf32> to vector<512x128xf32>
    %11 = arith.mulf %1, %10 : vector<512x128xf32>
    %cst_7 = arith.constant dense<0.000000e+00> : vector<512xf32>
    %12 = vector.multi_reduction <add>, %11, %cst_7 [1] : vector<512x128xf32> to vector<512xf32>
    %13 = vector.shape_cast %12 : vector<512xf32> to vector<512x1xf32>
    %14 = vector.broadcast %3 : f32 to vector<512x1xf32>
    %15 = arith.addf %13, %14 : vector<512x1xf32>
    %16 = arith.maximumf %9, %15 : vector<512x1xf32>
    %17 = arith.subf %9, %16 : vector<512x1xf32>
    %18 = math.exp %17 : vector<512x1xf32>
    %19 = arith.subf %15, %16 : vector<512x1xf32>
    %20 = math.exp %19 : vector<512x1xf32>
    %21 = arith.addf %18, %20 : vector<512x1xf32>
    %22 = tpu.reciprocal %21 {approx = true} : vector<512x1xf32> -> vector<512x1xf32>
    %23 = arith.mulf %18, %22 : vector<512x1xf32>
    %24 = vector.broadcast %23 : vector<512x1xf32> to vector<512x128xf32>
    %25 = arith.mulf %0, %24 : vector<512x128xf32>
    %26 = arith.mulf %20, %22 : vector<512x1xf32>
    %27 = vector.broadcast %26 : vector<512x1xf32> to vector<512x128xf32>
    %28 = arith.mulf %1, %27 : vector<512x128xf32>
    %29 = arith.addf %25, %28 : vector<512x128xf32>
    %c0_8 = arith.constant 0 : index
    %c0_9 = arith.constant 0 : index
    %30 = vector.load %arg5[%c0_8, %c0_9] : memref<512x128xf32, #tpu.memory_space<vmem>>, vector<512x128xf32>
    tpu.vector_store %arg5[%c0_8, %c0_9], %29 {strides = array<i32>} : memref<512x128xf32, #tpu.memory_space<vmem>>, vector<512x128xf32>,
    return
  }
  func.func @transform_0(%arg0: i32) -> (i32, i32) {
    %c0_i32 = arith.constant 0 : i32
    %c0_i32_0 = arith.constant 0 : i32
    return %arg0, %c0_i32 : i32, i32
  }
  func.func @transform_1(%arg0: i32) -> (i32, i32) {
    %c0_i32 = arith.constant 0 : i32
    %c0_i32_0 = arith.constant 0 : i32
    return %arg0, %c0_i32 : i32, i32
  }
  func.func @transform_2(%arg0: i32) -> (i32, i32) {
    %c0_i32 = arith.constant 0 : i32
    %c0_i32_0 = arith.constant 0 : i32
    %c0_i32_1 = arith.constant 0 : i32
    return %c0_i32, %c0_i32_0 : i32, i32
  }
  func.func @transform_3(%arg0: i32) -> (i32, i32) {
    %c0_i32 = arith.constant 0 : i32
    %c0_i32_0 = arith.constant 0 : i32
    %c0_i32_1 = arith.constant 0 : i32
    return %c0_i32, %c0_i32_0 : i32, i32
  }
  func.func @transform_4(%arg0: i32) -> (i32, i32) {
    %c0_i32 = arith.constant 0 : i32
    %c0_i32_0 = arith.constant 0 : i32
    return %arg0, %c0_i32 : i32, i32
  }
}

</mosaic_0001>

<bundles_post_ra>
// kernel: encoder_forward.8
= control target key start
LH: loop header
LB: loop body
LE: loop exit
PB: predicated region body
PF: predicated region fallthrough
CT: control target
= control target key end

     0   :  { %v1662_v3 = vmov 0.0   ;;  %s2694_s1 = inlined_call_operand.vmem [shape: f32[128,256], index: 1, kind: input, shape index: {}]   ;;  %s2695_s0 = inlined_call_operand.vmem [shape: f32[512,128], index: 0, kind: input, shape index: {}]   ;;  %s2696_s2 = inlined_call_operand.vmem [shape: f32[1,256], index: 2, kind: input, shape index: {}]   ;;  %s2697_s3 = inlined_call_operand.vmem [shape: f32[1,256], index: 3, kind: input, shape index: {}]   ;;  %s2698_s4 = inlined_call_operand.vmem [shape: f32[512,256], index: 4, kind: output, shape index: {}]  }
   0x1   :  { %v186_v0 = vld [vmem:[%s2694_s1 + $0xf8] sm:$0xff]  ;;  %v185_v1 = vld [vmem:[%s2694_s1 + $0xf0] sm:$0xff]  ;;  %v184_v2 = vld [vmem:[%s2694_s1 + $0xe8] sm:$0xff]  ;;  %443 = vmatprep.mubr.f32.mxu0 %v1662_v3  ;;  %635 = vmatprep.mubr.f32.mxu1 %v1662_v3 }
   0x2   :  { %379 = vmatprep.subr.mxu0 %v186_v0  ;;  %1629 = vmatprep.subr.mxu1 %v186_v0  ;;  %v183_v4 = vld [vmem:[%s2694_s1 + $0xe0] sm:$0xff]  ;;  %v182_v5 = vld [vmem:[%s2694_s1 + $0xd8] sm:$0xff]  ;;  %v181_v6 = vld [vmem:[%s2694_s1 + $0xd0] sm:$0xff] }
   0x3   :  { %380 = vmatpush1.msra.mxu0 %v185_v1  ;;  %1645 = vmatpush1.msra.mxu1 %v185_v1  ;;  %v180_v7 = vld [vmem:[%s2694_s1 + $0xc8] sm:$0xff]  ;;  %v179_v8 = vld [vmem:[%s2694_s1 + $0xc0] sm:$0xff]  ;;  %v178_v9 = vld [vmem:[%s2694_s1 + $0xb8] sm:$0xff] }
   0x4   :  { %381 = vmatprep.subr.mxu0 %v184_v2  ;;  %1630 = vmatprep.subr.mxu1 %v184_v2  ;;  %v177_v10 = vld [vmem:[%s2694_s1 + $0xb0] sm:$0xff]  ;;  %v176_v11 = vld [vmem:[%s2694_s1 + $0xa8] sm:$0xff]  ;;  %v175_v12 = vld [vmem:[%s2694_s1 + $0xa0] sm:$0xff] }
   0x5   :  { %382 = vmatpush1.msra.mxu0 %v183_v4  ;;  %1646 = vmatpush1.msra.mxu1 %v183_v4  ;;  %v174_v13 = vld [vmem:[%s2694_s1 + $0x98] sm:$0xff]  ;;  %v173_v14 = vld [vmem:[%s2694_s1 + $0x90] sm:$0xff]  ;;  %v172_v15 = vld [vmem:[%s2694_s1 + $0x88] sm:$0xff] }
   0x6   :  { %383 = vmatprep.subr.mxu0 %v182_v5  ;;  %1631 = vmatprep.subr.mxu1 %v182_v5  ;;  %v171_v16 = vld [vmem:[%s2694_s1 + $0x80] sm:$0xff]  ;;  %v170_v17 = vld [vmem:[%s2694_s1 + $0x78] sm:$0xff]  ;;  %v169_v18 = vld [vmem:[%s2694_s1 + $0x70] sm:$0xff] }
   0x7   :  { %384 = vmatpush1.msra.mxu0 %v181_v6  ;;  %1647 = vmatpush1.msra.mxu1 %v181_v6  ;;  %v168_v19 = vld [vmem:[%s2694_s1 + $0x68] sm:$0xff]  ;;  %v167_v20 = vld [vmem:[%s2694_s1 + $0x60] sm:$0xff]  ;;  %v166_v21 = vld [vmem:[%s2694_s1 + $0x58] sm:$0xff] }
   0x8   :  { %385 = vmatprep.subr.mxu0 %v180_v7  ;;  %1632 = vmatprep.subr.mxu1 %v180_v7  ;;  %v165_v22 = vld [vmem:[%s2694_s1 + $0x50] sm:$0xff]  ;;  %v164_v23 = vld [vmem:[%s2694_s1 + $0x48] sm:$0xff]  ;;  %v163_v24 = vld [vmem:[%s2694_s1 + $0x40] sm:$0xff] }
   0x9   :  { %386 = vmatpush1.msra.mxu0 %v179_v8  ;;  %1648 = vmatpush1.msra.mxu1 %v179_v8  ;;  %v162_v25 = vld [vmem:[%s2694_s1 + $0x38] sm:$0xff]  ;;  %v161_v26 = vld [vmem:[%s2694_s1 + $0x30] sm:$0xff]  ;;  %v160_v27 = vld [vmem:[%s2694_s1 + $0x28] sm:$0xff] }
   0xa   :  { %387 = vmatprep.subr.mxu0 %v178_v9  ;;  %1633 = vmatprep.subr.mxu1 %v178_v9  ;;  %v159_v28 = vld [vmem:[%s2694_s1 + $0x20] sm:$0xff]  ;;  %v158_v29 = vld [vmem:[%s2694_s1 + $0x18] sm:$0xff]  ;;  %v157_v30 = vld [vmem:[%s2694_s1 + $0x10] sm:$0xff] }
   0xb   :  { %388 = vmatpush1.msra.mxu0 %v177_v10  ;;  %1649 = vmatpush1.msra.mxu1 %v177_v10  ;;  %v156_v31 = vld [vmem:[%s2694_s1 + $0x8] sm:$0xff]  ;;  %v155_v32 = vld [vmem:[%s2694_s1] sm:$0xff]  ;;  %v317_v37 = vld [vmem:[%s2695_s0 + $0x10] sm:$0xff] }
   0xc   :  { %389 = vmatprep.subr.mxu0 %v176_v11  ;;  %1634 = vmatprep.subr.mxu1 %v176_v11  ;;  %v315_v33 = vld [vmem:[%s2695_s0] sm:$0xff]  ;;  %v316_v35 = vld [vmem:[%s2695_s0 + $0x8] sm:$0xff]  ;;  %v349_v38 = vld [vmem:[%s2695_s0 + $0x110] sm:$0xff] }
   0xd   :  { %390 = vmatpush1.msra.mxu0 %v175_v12  ;;  %1650 = vmatpush1.msra.mxu1 %v175_v12  ;;  %v347_v34 = vld [vmem:[%s2695_s0 + $0x100] sm:$0xff]  ;;  %v348_v36 = vld [vmem:[%s2695_s0 + $0x108] sm:$0xff]  ;;  %v318_v39 = vld [vmem:[%s2695_s0 + $0x18] sm:$0xff] }
   0xe   :  { %391 = vmatprep.subr.mxu0 %v174_v13  ;;  %1635 = vmatprep.subr.mxu1 %v174_v13  ;;  %v350_v40 = vld [vmem:[%s2695_s0 + $0x118] sm:$0xff]  ;;  %v319_v41 = vld [vmem:[%s2695_s0 + $0x20] sm:$0xff]  ;;  %v320_v43 = vld [vmem:[%s2695_s0 + $0x28] sm:$0xff] }
   0xf   :  { %392 = vmatpush1.msra.mxu0 %v173_v14  ;;  %1651 = vmatpush1.msra.mxu1 %v173_v14  ;;  %v351_v42 = vld [vmem:[%s2695_s0 + $0x120] sm:$0xff]  ;;  %v352_v44 = vld [vmem:[%s2695_s0 + $0x128] sm:$0xff]  ;;  %v321_v45 = vld [vmem:[%s2695_s0 + $0x30] sm:$0xff] }
  0x10   :  { %393 = vmatprep.subr.mxu0 %v172_v15  ;;  %1636 = vmatprep.subr.mxu1 %v172_v15  ;;  %v353_v46 = vld [vmem:[%s2695_s0 + $0x130] sm:$0xff]  ;;  %v322_v47 = vld [vmem:[%s2695_s0 + $0x38] sm:$0xff]  ;;  %v323_v49 = vld [vmem:[%s2695_s0 + $0x40] sm:$0xff] }
  0x11   :  { %394 = vmatpush1.msra.mxu0 %v171_v16  ;;  %1652 = vmatpush1.msra.mxu1 %v171_v16  ;;  %v354_v48 = vld [vmem:[%s2695_s0 + $0x138] sm:$0xff]  ;;  %v355_v50 = vld [vmem:[%s2695_s0 + $0x140] sm:$0xff]  ;;  %v324_v51 = vld [vmem:[%s2695_s0 + $0x48] sm:$0xff] }
  0x12   :  { %395 = vmatprep.subr.mxu0 %v170_v17  ;;  %1637 = vmatprep.subr.mxu1 %v170_v17  ;;  %v356_v52 = vld [vmem:[%s2695_s0 + $0x148] sm:$0xff]  ;;  %v325_v53 = vld [vmem:[%s2695_s0 + $0x50] sm:$0xff]  ;;  %v326_v55 = vld [vmem:[%s2695_s0 + $0x58] sm:$0xff] }
  0x13   :  { %396 = vmatpush1.msra.mxu0 %v169_v18  ;;  %1653 = vmatpush1.msra.mxu1 %v169_v18  ;;  %v357_v54 = vld [vmem:[%s2695_s0 + $0x150] sm:$0xff]  ;;  %v358_v56 = vld [vmem:[%s2695_s0 + $0x158] sm:$0xff]  ;;  %v327_v57 = vld [vmem:[%s2695_s0 + $0x60] sm:$0xff] }
  0x14   :  { %397 = vmatprep.subr.mxu0 %v168_v19  ;;  %1638 = vmatprep.subr.mxu1 %v168_v19  ;;  %v359_v58 = vld [vmem:[%s2695_s0 + $0x160] sm:$0xff]  ;;  %v328_v59 = vld [vmem:[%s2695_s0 + $0x68] sm:$0xff]  ;;  %v329_v61 = vld [vmem:[%s2695_s0 + $0x70] sm:$0xff] }
  0x15   :  { %398 = vmatpush1.msra.mxu0 %v167_v20  ;;  %1654 = vmatpush1.msra.mxu1 %v167_v20  ;;  %v360_v60 = vld [vmem:[%s2695_s0 + $0x168] sm:$0xff]  ;;  %v361_v62 = vld [vmem:[%s2695_s0 + $0x170] sm:$0xff]  ;;  %v330_v63 = vld [vmem:[%s2695_s0 + $0x78] sm:$0xff] }
  0x16   :  { %399 = vmatprep.subr.mxu0 %v166_v21  ;;  %1639 = vmatprep.subr.mxu1 %v166_v21  ;;  %v362_v0 = vld [vmem:[%s2695_s0 + $0x178] sm:$0xff]  ;;  %v331_v1 = vld [vmem:[%s2695_s0 + $0x80] sm:$0xff]  ;;  %v332_v4 = vld [vmem:[%s2695_s0 + $0x88] sm:$0xff] }
  0x17   :  { %400 = vmatpush1.msra.mxu0 %v165_v22  ;;  %1655 = vmatpush1.msra.mxu1 %v165_v22  ;;  %v363_v2 = vld [vmem:[%s2695_s0 + $0x180] sm:$0xff]  ;;  %v364_v5 = vld [vmem:[%s2695_s0 + $0x188] sm:$0xff]  ;;  %v333_v6 = vld [vmem:[%s2695_s0 + $0x90] sm:$0xff] }
  0x18   :  { %401 = vmatprep.subr.mxu0 %v164_v23  ;;  %1640 = vmatprep.subr.mxu1 %v164_v23  ;;  %v365_v7 = vld [vmem:[%s2695_s0 + $0x190] sm:$0xff]  ;;  %v334_v8 = vld [vmem:[%s2695_s0 + $0x98] sm:$0xff]  ;;  %v335_v10 = vld [vmem:[%s2695_s0 + $0xa0] sm:$0xff] }
  0x19   :  { %402 = vmatpush1.msra.mxu0 %v163_v24  ;;  %1656 = vmatpush1.msra.mxu1 %v163_v24  ;;  %v366_v9 = vld [vmem:[%s2695_s0 + $0x198] sm:$0xff]  ;;  %v367_v11 = vld [vmem:[%s2695_s0 + $0x1a0] sm:$0xff]  ;;  %v336_v12 = vld [vmem:[%s2695_s0 + $0xa8] sm:$0xff] }
  0x1a   :  { %403 = vmatprep.subr.mxu0 %v162_v25  ;;  %1641 = vmatprep.subr.mxu1 %v162_v25  ;;  %v368_v13 = vld [vmem:[%s2695_s0 + $0x1a8] sm:$0xff]  ;;  %v337_v14 = vld [vmem:[%s2695_s0 + $0xb0] sm:$0xff]  ;;  %v338_v16 = vld [vmem:[%s2695_s0 + $0xb8] sm:$0xff] }
  0x1b   :  { %404 = vmatpush1.msra.mxu0 %v161_v26  ;;  %1657 = vmatpush1.msra.mxu1 %v161_v26  ;;  %v369_v15 = vld [vmem:[%s2695_s0 + $0x1b0] sm:$0xff]  ;;  %v370_v17 = vld [vmem:[%s2695_s0 + $0x1b8] sm:$0xff]  ;;  %v339_v18 = vld [vmem:[%s2695_s0 + $0xc0] sm:$0xff] }
  0x1c   :  { %405 = vmatprep.subr.mxu0 %v160_v27  ;;  %1642 = vmatprep.subr.mxu1 %v160_v27  ;;  %v371_v19 = vld [vmem:[%s2695_s0 + $0x1c0] sm:$0xff]  ;;  %v340_v20 = vld [vmem:[%s2695_s0 + $0xc8] sm:$0xff]  ;;  %v341_v22 = vld [vmem:[%s2695_s0 + $0xd0] sm:$0xff] }
  0x1d   :  { %406 = vmatpush1.msra.mxu0 %v159_v28  ;;  %1658 = vmatpush1.msra.mxu1 %v159_v28  ;;  %v372_v21 = vld [vmem:[%s2695_s0 + $0x1c8] sm:$0xff]  ;;  %v373_v23 = vld [vmem:[%s2695_s0 + $0x1d0] sm:$0xff]  ;;  %v342_v24 = vld [vmem:[%s2695_s0 + $0xd8] sm:$0xff] }
  0x1e   :  { %407 = vmatprep.subr.mxu0 %v158_v29  ;;  %1643 = vmatprep.subr.mxu1 %v158_v29  ;;  %v374_v25 = vld [vmem:[%s2695_s0 + $0x1d8] sm:$0xff]  ;;  %v343_v26 = vld [vmem:[%s2695_s0 + $0xe0] sm:$0xff]  ;;  %v344_v28 = vld [vmem:[%s2695_s0 + $0xe8] sm:$0xff] }
  0x1f   :  { %408 = vmatpush1.msra.mxu0 %v157_v30  ;;  %1659 = vmatpush1.msra.mxu1 %v157_v30  ;;  %v375_v27 = vld [vmem:[%s2695_s0 + $0x1e0] sm:$0xff]  ;;  %v376_v29 = vld [vmem:[%s2695_s0 + $0x1e8] sm:$0xff]  ;;  %v345_v30 = vld [vmem:[%s2695_s0 + $0xf0] sm:$0xff] }
  0x20   :  { %409 = vmatprep.subr.mxu0 %v156_v31  ;;  %1644 = vmatprep.subr.mxu1 %v156_v31  ;;  %v377_v31 = vld [vmem:[%s2695_s0 + $0x1f0] sm:$0xff] }
  0x21   :  { %410 = vmatpush1.msra.mxu0 %v155_v32  ;;  %1660 = vmatpush1.msra.mxu1 %v155_v32  ;;  %v346_v32 = vld [vmem:[%s2695_s0 + $0xf8] sm:$0xff] }
  0x22   :  { %444 = vmatmul.mubr.f32.vlgmr.msra.gmra.mxu0 %v315_v33  ;;  %636 = vmatmul.mubr.f32.vlgmr.msra.gmra.mxu1 %v347_v34  ;;  %v378_v33 = vld [vmem:[%s2695_s0 + $0x1f8] sm:$0xff]  ;;  %v1217_v34 = vlaneseq }
  0x23   :  { %449 = vmatprep.mubr.f32.mxu0 %v1662_v3  ;;  %641 = vmatprep.mubr.f32.mxu1 %v1662_v3 }
  0x26   :  { %450 = vmatmul.mubr.f32.gmra.mxu0 %v316_v35  ;;  %642 = vmatmul.mubr.f32.gmra.mxu1 %v348_v36  ;;  %v1218_v35 = vshrl.u32 %v1217_v34, 7 }
  0x27   :  { %455 = vmatprep.mubr.f32.mxu0 %v1662_v3  ;;  %647 = vmatprep.mubr.f32.mxu1 %v1662_v3 }
  0x28   :  { %v1219_v36 = vsub.s32 0, %v1218_v35 }
  0x2a   :  { %456 = vmatmul.mubr.f32.gmra.mxu0 %v317_v37  ;;  %648 = vmatmul.mubr.f32.gmra.mxu1 %v349_v38  ;;  %v1215_v37 = vld [vmem:[%s2696_s2] sm:$0x3]  ;;  %v1223_v38 = vsub.s32 1, %v1218_v35 }
  0x2b   :  { %461 = vmatprep.mubr.f32.mxu0 %v1662_v3  ;;  %653 = vmatprep.mubr.f32.mxu1 %v1662_v3 }
  0x2e   :  { %462 = vmatmul.mubr.f32.gmra.mxu0 %v318_v39  ;;  %654 = vmatmul.mubr.f32.gmra.mxu1 %v350_v40  ;;  %v2046_v39 = vrot.slane %v1215_v37, %v1219_v36 }
  0x2f   :  { %467 = vmatprep.mubr.f32.mxu0 %v1662_v3  ;;  %659 = vmatprep.mubr.f32.mxu1 %v1662_v3 }
  0x32   :  { %468 = vmatmul.mubr.f32.gmra.mxu0 %v319_v41  ;;  %660 = vmatmul.mubr.f32.gmra.mxu1 %v351_v42 }
  0x33   :  { %473 = vmatprep.mubr.f32.mxu0 %v1662_v3  ;;  %665 = vmatprep.mubr.f32.mxu1 %v1662_v3 }
  0x36   :  { %474 = vmatmul.mubr.f32.gmra.mxu0 %v320_v43  ;;  %666 = vmatmul.mubr.f32.gmra.mxu1 %v352_v44  ;;  %v2050_v43 = vrot.slane %v1215_v37, %v1223_v38 }
  0x37   :  { %479 = vmatprep.mubr.f32.mxu0 %v1662_v3  ;;  %671 = vmatprep.mubr.f32.mxu1 %v1662_v3 }
  0x3a   :  { %480 = vmatmul.mubr.f32.gmra.mxu0 %v321_v45  ;;  %672 = vmatmul.mubr.f32.gmra.mxu1 %v353_v46 }
  0x3b   :  { %485 = vmatprep.mubr.f32.mxu0 %v1662_v3  ;;  %677 = vmatprep.mubr.f32.mxu1 %v1662_v3 }
  0x3e   :  { %486 = vmatmul.mubr.f32.gmra.mxu0 %v322_v47  ;;  %678 = vmatmul.mubr.f32.gmra.mxu1 %v354_v48 }
  0x3f   :  { %491 = vmatprep.mubr.f32.mxu0 %v1662_v3  ;;  %683 = vmatprep.mubr.f32.mxu1 %v1662_v3 }
  0x42   :  { %492 = vmatmul.mubr.f32.gmra.mxu0 %v323_v49  ;;  %684 = vmatmul.mubr.f32.gmra.mxu1 %v355_v50 }
  0x43   :  { %497 = vmatprep.mubr.f32.mxu0 %v1662_v3  ;;  %689 = vmatprep.mubr.f32.mxu1 %v1662_v3 }
  0x46   :  { %498 = vmatmul.mubr.f32.gmra.mxu0 %v324_v51  ;;  %690 = vmatmul.mubr.f32.gmra.mxu1 %v356_v52 }
  0x47   :  { %503 = vmatprep.mubr.f32.mxu0 %v1662_v3  ;;  %695 = vmatprep.mubr.f32.mxu1 %v1662_v3 }
  0x4a   :  { %504 = vmatmul.mubr.f32.gmra.mxu0 %v325_v53  ;;  %696 = vmatmul.mubr.f32.gmra.mxu1 %v357_v54 }
  0x4b   :  { %509 = vmatprep.mubr.f32.mxu0 %v1662_v3  ;;  %701 = vmatprep.mubr.f32.mxu1 %v1662_v3 }
  0x4e   :  { %510 = vmatmul.mubr.f32.gmra.mxu0 %v326_v55  ;;  %702 = vmatmul.mubr.f32.gmra.mxu1 %v358_v56 }
  0x4f   :  { %515 = vmatprep.mubr.f32.mxu0 %v1662_v3  ;;  %707 = vmatprep.mubr.f32.mxu1 %v1662_v3 }
  0x52   :  { %516 = vmatmul.mubr.f32.gmra.mxu0 %v327_v57  ;;  %708 = vmatmul.mubr.f32.gmra.mxu1 %v359_v58 }
  0x53   :  { %521 = vmatprep.mubr.f32.mxu0 %v1662_v3  ;;  %713 = vmatprep.mubr.f32.mxu1 %v1662_v3 }
  0x56   :  { %522 = vmatmul.mubr.f32.gmra.mxu0 %v328_v59  ;;  %714 = vmatmul.mubr.f32.gmra.mxu1 %v360_v60 }
  0x57   :  { %527 = vmatprep.mubr.f32.mxu0 %v1662_v3  ;;  %719 = vmatprep.mubr.f32.mxu1 %v1662_v3 }
  0x5a   :  { %528 = vmatmul.mubr.f32.gmra.mxu0 %v329_v61  ;;  %720 = vmatmul.mubr.f32.gmra.mxu1 %v361_v62 }
  0x5b   :  { %533 = vmatprep.mubr.f32.mxu0 %v1662_v3  ;;  %725 = vmatprep.mubr.f32.mxu1 %v1662_v3 }
  0x5e   :  { %534 = vmatmul.mubr.f32.gmra.mxu0 %v330_v63  ;;  %726 = vmatmul.mubr.f32.gmra.mxu1 %v362_v0 }
  0x5f   :  { %539 = vmatprep.mubr.f32.mxu0 %v1662_v3  ;;  %731 = vmatprep.mubr.f32.mxu1 %v1662_v3 }
  0x62   :  { %540 = vmatmul.mubr.f32.gmra.mxu0 %v331_v1  ;;  %732 = vmatmul.mubr.f32.gmra.mxu1 %v363_v2 }
  0x63   :  { %545 = vmatprep.mubr.f32.mxu0 %v1662_v3  ;;  %737 = vmatprep.mubr.f32.mxu1 %v1662_v3 }
  0x66   :  { %546 = vmatmul.mubr.f32.gmra.mxu0 %v332_v4  ;;  %738 = vmatmul.mubr.f32.gmra.mxu1 %v364_v5 }
  0x67   :  { %551 = vmatprep.mubr.f32.mxu0 %v1662_v3  ;;  %743 = vmatprep.mubr.f32.mxu1 %v1662_v3 }
  0x6a   :  { %552 = vmatmul.mubr.f32.gmra.mxu0 %v333_v6  ;;  %744 = vmatmul.mubr.f32.gmra.mxu1 %v365_v7 }
  0x6b   :  { %557 = vmatprep.mubr.f32.mxu0 %v1662_v3  ;;  %749 = vmatprep.mubr.f32.mxu1 %v1662_v3 }
  0x6e   :  { %558 = vmatmul.mubr.f32.gmra.mxu0 %v334_v8  ;;  %750 = vmatmul.mubr.f32.gmra.mxu1 %v366_v9 }
  0x6f   :  { %563 = vmatprep.mubr.f32.mxu0 %v1662_v3  ;;  %755 = vmatprep.mubr.f32.mxu1 %v1662_v3 }
  0x72   :  { %564 = vmatmul.mubr.f32.gmra.mxu0 %v335_v10  ;;  %756 = vmatmul.mubr.f32.gmra.mxu1 %v367_v11 }
  0x73   :  { %569 = vmatprep.mubr.f32.mxu0 %v1662_v3  ;;  %761 = vmatprep.mubr.f32.mxu1 %v1662_v3 }
  0x76   :  { %570 = vmatmul.mubr.f32.gmra.mxu0 %v336_v12  ;;  %762 = vmatmul.mubr.f32.gmra.mxu1 %v368_v13 }
  0x77   :  { %575 = vmatprep.mubr.f32.mxu0 %v1662_v3  ;;  %767 = vmatprep.mubr.f32.mxu1 %v1662_v3 }
  0x7a   :  { %576 = vmatmul.mubr.f32.gmra.mxu0 %v337_v14  ;;  %768 = vmatmul.mubr.f32.gmra.mxu1 %v369_v15 }
  0x7b   :  { %581 = vmatprep.mubr.f32.mxu0 %v1662_v3  ;;  %773 = vmatprep.mubr.f32.mxu1 %v1662_v3 }
  0x7e   :  { %582 = vmatmul.mubr.f32.gmra.mxu0 %v338_v16  ;;  %774 = vmatmul.mubr.f32.gmra.mxu1 %v370_v17 }
  0x7f   :  { %587 = vmatprep.mubr.f32.mxu0 %v1662_v3  ;;  %779 = vmatprep.mubr.f32.mxu1 %v1662_v3 }
  0x82   :  { %588 = vmatmul.mubr.f32.gmra.mxu0 %v339_v18  ;;  %780 = vmatmul.mubr.f32.gmra.mxu1 %v371_v19 }
  0x83   :  { %593 = vmatprep.mubr.f32.mxu0 %v1662_v3  ;;  %785 = vmatprep.mubr.f32.mxu1 %v1662_v3 }
  0x86   :  { %594 = vmatmul.mubr.f32.gmra.mxu0 %v340_v20  ;;  %786 = vmatmul.mubr.f32.gmra.mxu1 %v372_v21 }
  0x87   :  { %599 = vmatprep.mubr.f32.mxu0 %v1662_v3  ;;  %791 = vmatprep.mubr.f32.mxu1 %v1662_v3 }
  0x8a   :  { %600 = vmatmul.mubr.f32.gmra.mxu0 %v341_v22  ;;  %792 = vmatmul.mubr.f32.gmra.mxu1 %v373_v23 }
  0x8b   :  { %605 = vmatprep.mubr.f32.mxu0 %v1662_v3  ;;  %797 = vmatprep.mubr.f32.mxu1 %v1662_v3 }
  0x8e   :  { %606 = vmatmul.mubr.f32.gmra.mxu0 %v342_v24  ;;  %798 = vmatmul.mubr.f32.gmra.mxu1 %v374_v25 }
  0x8f   :  { %611 = vmatprep.mubr.f32.mxu0 %v1662_v3  ;;  %803 = vmatprep.mubr.f32.mxu1 %v1662_v3 }
  0x92   :  { %612 = vmatmul.mubr.f32.gmra.mxu0 %v343_v26  ;;  %804 = vmatmul.mubr.f32.gmra.mxu1 %v375_v27 }
  0x93   :  { %617 = vmatprep.mubr.f32.mxu0 %v1662_v3  ;;  %809 = vmatprep.mubr.f32.mxu1 %v1662_v3 }
  0x96   :  { %618 = vmatmul.mubr.f32.gmra.mxu0 %v344_v28  ;;  %810 = vmatmul.mubr.f32.gmra.mxu1 %v376_v29 }
  0x97   :  { %623 = vmatprep.mubr.f32.mxu0 %v1662_v3  ;;  %815 = vmatprep.mubr.f32.mxu1 %v1662_v3 }
  0x9a   :  { %624 = vmatmul.mubr.f32.gmra.mxu0 %v345_v30  ;;  %816 = vmatmul.mubr.f32.gmra.mxu1 %v377_v31 }
  0x9b   :  { %629 = vmatprep.mubr.f32.mxu0 %v1662_v3  ;;  %821 = vmatprep.mubr.f32.mxu1 %v1662_v3  ;;  %v1355_v3 = vld [vmem:[%s2697_s3] sm:$0x3] }
  0x9c   :  { %v2048_v42 = vrot.slane %v1355_v3, %v1219_v36  ;;  %v2052_v45 = vrot.slane %v1355_v3, %v1223_v38 }
  0x9e   :  { %630 = vmatmul.mubr.f32.gmra.mxu0 %v346_v32  ;;  %822 = vmatmul.mubr.f32.gmra.mxu1 %v378_v33 }
  0xe2   :  { %v445_v40 = vpop.f32.mrf.mxu0  ;;  %v637_v41 = vpop.f32.mrf.mxu1 }
  0xe3   :  { %v1227_v47 = vadd.f32 %v2046_v39, %v445_v40  ;;  %v1291_v48 = vadd.f32 %v2046_v39, %v637_v41 }
  0xe4   :  { %v447_v44 = vpop.f32.mrf.mxu0  ;;  %v639_v46 = vpop.f32.mrf.mxu1 }
  0xe5   :  { %v1367_v51 = vmax.f32 %v1227_v47, %v2048_v42  ;;  %v1431_v52 = vmax.f32 %v1291_v48, %v2048_v42  ;;  %v1228_v53 = vadd.f32 %v2050_v43, %v447_v44  ;;  %v1292_v54 = vadd.f32 %v2050_v43, %v639_v46 }
  0xe6   :  { %v451_v49 = vpop.f32.mrf.mxu0  ;;  %v643_v50 = vpop.f32.mrf.mxu1 }
  0xe7   :  { %1495 = vst [vmem:[%s2698_s4] sm:$0xff] %v1367_v51  ;;  %1559 = vst [vmem:[%s2698_s4 + $0x200] sm:$0xff] %v1431_v52  ;;  %v1368_v57 = vmax.f32 %v1228_v53, %v2052_v45  ;;  %v1432_v58 = vmax.f32 %v1292_v54, %v2052_v45  ;;  %v1229_v59 = vadd.f32 %v2046_v39, %v451_v49 }
  0xe8   :  { %v453_v55 = vpop.f32.mrf.mxu0  ;;  %v645_v56 = vpop.f32.mrf.mxu1  ;;  %v1293_v60 = vadd.f32 %v2046_v39, %v643_v50 }
  0xe9   :  { %1496 = vst [vmem:[%s2698_s4 + $0x8] sm:$0xff] %v1368_v57  ;;  %1560 = vst [vmem:[%s2698_s4 + $0x208] sm:$0xff] %v1432_v58  ;;  %v1230_v63 = vadd.f32 %v2050_v43, %v453_v55  ;;  %v1294_v0 = vadd.f32 %v2050_v43, %v645_v56  ;;  %v1369_v1 = vmax.f32 %v1229_v59, %v2048_v42 }
  0xea   :  { %v457_v61 = vpop.f32.mrf.mxu0  ;;  %v649_v62 = vpop.f32.mrf.mxu1  ;;  %v1433_v2 = vmax.f32 %v1293_v60, %v2048_v42 }
  0xeb   :  { %v1370_v6 = vmax.f32 %v1230_v63, %v2052_v45  ;;  %v1434_v7 = vmax.f32 %v1294_v0, %v2052_v45  ;;  %v1231_v8 = vadd.f32 %v2046_v39, %v457_v61  ;;  %v1295_v9 = vadd.f32 %v2046_v39, %v649_v62  ;;  %1497 = vst [vmem:[%s2698_s4 + $0x10] sm:$0xff] %v1369_v1 }
  0xec   :  { %v459_v4 = vpop.f32.mrf.mxu0  ;;  %v651_v5 = vpop.f32.mrf.mxu1  ;;  %1561 = vst [vmem:[%s2698_s4 + $0x210] sm:$0xff] %v1433_v2 }
  0xed   :  { %1498 = vst [vmem:[%s2698_s4 + $0x18] sm:$0xff] %v1370_v6  ;;  %1562 = vst [vmem:[%s2698_s4 + $0x218] sm:$0xff] %v1434_v7  ;;  %v1371_v12 = vmax.f32 %v1231_v8, %v2048_v42  ;;  %v1435_v13 = vmax.f32 %v1295_v9, %v2048_v42  ;;  %v1232_v14 = vadd.f32 %v2050_v43, %v459_v4 }
  0xee   :  { %v463_v10 = vpop.f32.mrf.mxu0  ;;  %v655_v11 = vpop.f32.mrf.mxu1  ;;  %v1296_v15 = vadd.f32 %v2050_v43, %v651_v5 }
  0xef   :  { %1499 = vst [vmem:[%s2698_s4 + $0x20] sm:$0xff] %v1371_v12  ;;  %1563 = vst [vmem:[%s2698_s4 + $0x220] sm:$0xff] %v1435_v13  ;;  %v1233_v18 = vadd.f32 %v2046_v39, %v463_v10  ;;  %v1297_v19 = vadd.f32 %v2046_v39, %v655_v11  ;;  %v1372_v20 = vmax.f32 %v1232_v14, %v2052_v45 }
  0xf0   :  { %v465_v16 = vpop.f32.mrf.mxu0  ;;  %v657_v17 = vpop.f32.mrf.mxu1  ;;  %v1436_v21 = vmax.f32 %v1296_v15, %v2052_v45 }
  0xf1   :  { %v1373_v24 = vmax.f32 %v1233_v18, %v2048_v42  ;;  %v1437_v25 = vmax.f32 %v1297_v19, %v2048_v42  ;;  %v1234_v26 = vadd.f32 %v2050_v43, %v465_v16  ;;  %v1298_v27 = vadd.f32 %v2050_v43, %v657_v17  ;;  %1500 = vst [vmem:[%s2698_s4 + $0x28] sm:$0xff] %v1372_v20 }
  0xf2   :  { %v469_v22 = vpop.f32.mrf.mxu0  ;;  %v661_v23 = vpop.f32.mrf.mxu1  ;;  %1564 = vst [vmem:[%s2698_s4 + $0x228] sm:$0xff] %v1436_v21 }
  0xf3   :  { %1501 = vst [vmem:[%s2698_s4 + $0x30] sm:$0xff] %v1373_v24  ;;  %1565 = vst [vmem:[%s2698_s4 + $0x230] sm:$0xff] %v1437_v25  ;;  %v1374_v30 = vmax.f32 %v1234_v26, %v2052_v45  ;;  %v1438_v31 = vmax.f32 %v1298_v27, %v2052_v45  ;;  %v1235_v32 = vadd.f32 %v2046_v39, %v469_v22 }
  0xf4   :  { %v471_v28 = vpop.f32.mrf.mxu0  ;;  %v663_v29 = vpop.f32.mrf.mxu1  ;;  %v1299_v33 = vadd.f32 %v2046_v39, %v661_v23 }
  0xf5   :  { %1502 = vst [vmem:[%s2698_s4 + $0x38] sm:$0xff] %v1374_v30  ;;  %1566 = vst [vmem:[%s2698_s4 + $0x238] sm:$0xff] %v1438_v31  ;;  %v1236_v36 = vadd.f32 %v2050_v43, %v471_v28  ;;  %v1300_v37 = vadd.f32 %v2050_v43, %v663_v29  ;;  %v1375_v38 = vmax.f32 %v1235_v32, %v2048_v42 }
  0xf6   :  { %v475_v34 = vpop.f32.mrf.mxu0  ;;  %v667_v35 = vpop.f32.mrf.mxu1  ;;  %v1439_v3 = vmax.f32 %v1299_v33, %v2048_v42 }
  0xf7   :  { %v1376_v44 = vmax.f32 %v1236_v36, %v2052_v45  ;;  %v1440_v46 = vmax.f32 %v1300_v37, %v2052_v45  ;;  %v1237_v47 = vadd.f32 %v2046_v39, %v475_v34  ;;  %v1301_v48 = vadd.f32 %v2046_v39, %v667_v35  ;;  %1503 = vst [vmem:[%s2698_s4 + $0x40] sm:$0xff] %v1375_v38 }
  0xf8   :  { %v477_v40 = vpop.f32.mrf.mxu0  ;;  %v669_v41 = vpop.f32.mrf.mxu1  ;;  %1567 = vst [vmem:[%s2698_s4 + $0x240] sm:$0xff] %v1439_v3 }
  0xf9   :  { %1504 = vst [vmem:[%s2698_s4 + $0x48] sm:$0xff] %v1376_v44  ;;  %1568 = vst [vmem:[%s2698_s4 + $0x248] sm:$0xff] %v1440_v46  ;;  %v1377_v51 = vmax.f32 %v1237_v47, %v2048_v42  ;;  %v1441_v52 = vmax.f32 %v1301_v48, %v2048_v42  ;;  %v1238_v53 = vadd.f32 %v2050_v43, %v477_v40 }
  0xfa   :  { %v481_v49 = vpop.f32.mrf.mxu0  ;;  %v673_v50 = vpop.f32.mrf.mxu1  ;;  %v1302_v54 = vadd.f32 %v2050_v43, %v669_v41 }
  0xfb   :  { %1505 = vst [vmem:[%s2698_s4 + $0x50] sm:$0xff] %v1377_v51  ;;  %1569 = vst [vmem:[%s2698_s4 + $0x250] sm:$0xff] %v1441_v52  ;;  %v1239_v57 = vadd.f32 %v2046_v39, %v481_v49  ;;  %v1303_v58 = vadd.f32 %v2046_v39, %v673_v50  ;;  %v1378_v59 = vmax.f32 %v1238_v53, %v2052_v45 }
  0xfc   :  { %v483_v55 = vpop.f32.mrf.mxu0  ;;  %v675_v56 = vpop.f32.mrf.mxu1  ;;  %v1442_v60 = vmax.f32 %v1302_v54, %v2052_v45 }
  0xfd   :  { %v1379_v63 = vmax.f32 %v1239_v57, %v2048_v42  ;;  %v1443_v0 = vmax.f32 %v1303_v58, %v2048_v42  ;;  %v1240_v1 = vadd.f32 %v2050_v43, %v483_v55  ;;  %v1304_v2 = vadd.f32 %v2050_v43, %v675_v56  ;;  %1506 = vst [vmem:[%s2698_s4 + $0x58] sm:$0xff] %v1378_v59 }
  0xfe   :  { %v487_v61 = vpop.f32.mrf.mxu0  ;;  %v679_v62 = vpop.f32.mrf.mxu1  ;;  %1570 = vst [vmem:[%s2698_s4 + $0x258] sm:$0xff] %v1442_v60 }
  0xff   :  { %1507 = vst [vmem:[%s2698_s4 + $0x60] sm:$0xff] %v1379_v63  ;;  %1571 = vst [vmem:[%s2698_s4 + $0x260] sm:$0xff] %v1443_v0  ;;  %v1380_v6 = vmax.f32 %v1240_v1, %v2052_v45  ;;  %v1444_v7 = vmax.f32 %v1304_v2, %v2052_v45  ;;  %v1241_v8 = vadd.f32 %v2046_v39, %v487_v61 }
 0x100   :  { %v489_v4 = vpop.f32.mrf.mxu0  ;;  %v681_v5 = vpop.f32.mrf.mxu1  ;;  %v1305_v9 = vadd.f32 %v2046_v39, %v679_v62 }
 0x101   :  { %1508 = vst [vmem:[%s2698_s4 + $0x68] sm:$0xff] %v1380_v6  ;;  %1572 = vst [vmem:[%s2698_s4 + $0x268] sm:$0xff] %v1444_v7  ;;  %v1242_v12 = vadd.f32 %v2050_v43, %v489_v4  ;;  %v1306_v13 = vadd.f32 %v2050_v43, %v681_v5  ;;  %v1381_v14 = vmax.f32 %v1241_v8, %v2048_v42 }
 0x102   :  { %v493_v10 = vpop.f32.mrf.mxu0  ;;  %v685_v11 = vpop.f32.mrf.mxu1  ;;  %v1445_v15 = vmax.f32 %v1305_v9, %v2048_v42 }
 0x103   :  { %v1382_v18 = vmax.f32 %v1242_v12, %v2052_v45  ;;  %v1446_v19 = vmax.f32 %v1306_v13, %v2052_v45  ;;  %v1243_v20 = vadd.f32 %v2046_v39, %v493_v10  ;;  %v1307_v21 = vadd.f32 %v2046_v39, %v685_v11  ;;  %1509 = vst [vmem:[%s2698_s4 + $0x70] sm:$0xff] %v1381_v14 }
 0x104   :  { %v495_v16 = vpop.f32.mrf.mxu0  ;;  %v687_v17 = vpop.f32.mrf.mxu1  ;;  %1573 = vst [vmem:[%s2698_s4 + $0x270] sm:$0xff] %v1445_v15 }
 0x105   :  { %1510 = vst [vmem:[%s2698_s4 + $0x78] sm:$0xff] %v1382_v18  ;;  %1574 = vst [vmem:[%s2698_s4 + $0x278] sm:$0xff] %v1446_v19  ;;  %v1383_v24 = vmax.f32 %v1243_v20, %v2048_v42  ;;  %v1447_v25 = vmax.f32 %v1307_v21, %v2048_v42  ;;  %v1244_v26 = vadd.f32 %v2050_v43, %v495_v16 }
 0x106   :  { %v499_v22 = vpop.f32.mrf.mxu0  ;;  %v691_v23 = vpop.f32.mrf.mxu1  ;;  %v1308_v27 = vadd.f32 %v2050_v43, %v687_v17 }
 0x107   :  { %1511 = vst [vmem:[%s2698_s4 + $0x80] sm:$0xff] %v1383_v24  ;;  %1575 = vst [vmem:[%s2698_s4 + $0x280] sm:$0xff] %v1447_v25  ;;  %v1245_v30 = vadd.f32 %v2046_v39, %v499_v22  ;;  %v1309_v31 = vadd.f32 %v2046_v39, %v691_v23  ;;  %v1384_v32 = vmax.f32 %v1244_v26, %v2052_v45 }
 0x108   :  { %v501_v28 = vpop.f32.mrf.mxu0  ;;  %v693_v29 = vpop.f32.mrf.mxu1  ;;  %v1448_v33 = vmax.f32 %v1308_v27, %v2052_v45 }
 0x109   :  { %v1385_v36 = vmax.f32 %v1245_v30, %v2048_v42  ;;  %v1449_v37 = vmax.f32 %v1309_v31, %v2048_v42  ;;  %v1246_v38 = vadd.f32 %v2050_v43, %v501_v28  ;;  %v1310_v3 = vadd.f32 %v2050_v43, %v693_v29  ;;  %1512 = vst [vmem:[%s2698_s4 + $0x88] sm:$0xff] %v1384_v32 }
 0x10a   :  { %v505_v34 = vpop.f32.mrf.mxu0  ;;  %v697_v35 = vpop.f32.mrf.mxu1  ;;  %1576 = vst [vmem:[%s2698_s4 + $0x288] sm:$0xff] %v1448_v33 }
 0x10b   :  { %1513 = vst [vmem:[%s2698_s4 + $0x90] sm:$0xff] %v1385_v36  ;;  %1577 = vst [vmem:[%s2698_s4 + $0x290] sm:$0xff] %v1449_v37  ;;  %v1386_v44 = vmax.f32 %v1246_v38, %v2052_v45  ;;  %v1450_v46 = vmax.f32 %v1310_v3, %v2052_v45  ;;  %v1247_v47 = vadd.f32 %v2046_v39, %v505_v34 }
 0x10c   :  { %v507_v40 = vpop.f32.mrf.mxu0  ;;  %v699_v41 = vpop.f32.mrf.mxu1  ;;  %v1311_v48 = vadd.f32 %v2046_v39, %v697_v35 }
 0x10d   :  { %1514 = vst [vmem:[%s2698_s4 + $0x98] sm:$0xff] %v1386_v44  ;;  %1578 = vst [vmem:[%s2698_s4 + $0x298] sm:$0xff] %v1450_v46  ;;  %v1248_v51 = vadd.f32 %v2050_v43, %v507_v40  ;;  %v1312_v52 = vadd.f32 %v2050_v43, %v699_v41  ;;  %v1387_v53 = vmax.f32 %v1247_v47, %v2048_v42 }
 0x10e   :  { %v511_v49 = vpop.f32.mrf.mxu0  ;;  %v703_v50 = vpop.f32.mrf.mxu1  ;;  %v1451_v54 = vmax.f32 %v1311_v48, %v2048_v42 }
 0x10f   :  { %v1388_v57 = vmax.f32 %v1248_v51, %v2052_v45  ;;  %v1452_v58 = vmax.f32 %v1312_v52, %v2052_v45  ;;  %v1249_v59 = vadd.f32 %v2046_v39, %v511_v49  ;;  %v1313_v60 = vadd.f32 %v2046_v39, %v703_v50  ;;  %1515 = vst [vmem:[%s2698_s4 + $0xa0] sm:$0xff] %v1387_v53 }
 0x110   :  { %v513_v55 = vpop.f32.mrf.mxu0  ;;  %v705_v56 = vpop.f32.mrf.mxu1  ;;  %1579 = vst [vmem:[%s2698_s4 + $0x2a0] sm:$0xff] %v1451_v54 }
 0x111   :  { %1516 = vst [vmem:[%s2698_s4 + $0xa8] sm:$0xff] %v1388_v57  ;;  %1580 = vst [vmem:[%s2698_s4 + $0x2a8] sm:$0xff] %v1452_v58  ;;  %v1389_v63 = vmax.f32 %v1249_v59, %v2048_v42  ;;  %v1453_v0 = vmax.f32 %v1313_v60, %v2048_v42  ;;  %v1250_v1 = vadd.f32 %v2050_v43, %v513_v55 }
 0x112   :  { %v517_v61 = vpop.f32.mrf.mxu0  ;;  %v709_v62 = vpop.f32.mrf.mxu1  ;;  %v1314_v2 = vadd.f32 %v2050_v43, %v705_v56 }
 0x113   :  { %1517 = vst [vmem:[%s2698_s4 + $0xb0] sm:$0xff] %v1389_v63  ;;  %1581 = vst [vmem:[%s2698_s4 + $0x2b0] sm:$0xff] %v1453_v0  ;;  %v1251_v6 = vadd.f32 %v2046_v39, %v517_v61  ;;  %v1315_v7 = vadd.f32 %v2046_v39, %v709_v62  ;;  %v1390_v8 = vmax.f32 %v1250_v1, %v2052_v45 }
 0x114   :  { %v519_v4 = vpop.f32.mrf.mxu0  ;;  %v711_v5 = vpop.f32.mrf.mxu1  ;;  %v1454_v9 = vmax.f32 %v1314_v2, %v2052_v45 }
 0x115   :  { %v1391_v12 = vmax.f32 %v1251_v6, %v2048_v42  ;;  %v1455_v13 = vmax.f32 %v1315_v7, %v2048_v42  ;;  %v1252_v14 = vadd.f32 %v2050_v43, %v519_v4  ;;  %v1316_v15 = vadd.f32 %v2050_v43, %v711_v5  ;;  %1518 = vst [vmem:[%s2698_s4 + $0xb8] sm:$0xff] %v1390_v8 }
 0x116   :  { %v523_v10 = vpop.f32.mrf.mxu0  ;;  %v715_v11 = vpop.f32.mrf.mxu1  ;;  %1582 = vst [vmem:[%s2698_s4 + $0x2b8] sm:$0xff] %v1454_v9 }
 0x117   :  { %1519 = vst [vmem:[%s2698_s4 + $0xc0] sm:$0xff] %v1391_v12  ;;  %1583 = vst [vmem:[%s2698_s4 + $0x2c0] sm:$0xff] %v1455_v13  ;;  %v1392_v18 = vmax.f32 %v1252_v14, %v2052_v45  ;;  %v1456_v19 = vmax.f32 %v1316_v15, %v2052_v45  ;;  %v1253_v20 = vadd.f32 %v2046_v39, %v523_v10 }
 0x118   :  { %v525_v16 = vpop.f32.mrf.mxu0  ;;  %v717_v17 = vpop.f32.mrf.mxu1  ;;  %v1317_v21 = vadd.f32 %v2046_v39, %v715_v11 }
 0x119   :  { %1520 = vst [vmem:[%s2698_s4 + $0xc8] sm:$0xff] %v1392_v18  ;;  %1584 = vst [vmem:[%s2698_s4 + $0x2c8] sm:$0xff] %v1456_v19  ;;  %v1254_v24 = vadd.f32 %v2050_v43, %v525_v16  ;;  %v1318_v25 = vadd.f32 %v2050_v43, %v717_v17  ;;  %v1393_v26 = vmax.f32 %v1253_v20, %v2048_v42 }
 0x11a   :  { %v529_v22 = vpop.f32.mrf.mxu0  ;;  %v721_v23 = vpop.f32.mrf.mxu1  ;;  %v1457_v27 = vmax.f32 %v1317_v21, %v2048_v42 }
 0x11b   :  { %v1394_v30 = vmax.f32 %v1254_v24, %v2052_v45  ;;  %v1458_v31 = vmax.f32 %v1318_v25, %v2052_v45  ;;  %v1255_v32 = vadd.f32 %v2046_v39, %v529_v22  ;;  %v1319_v33 = vadd.f32 %v2046_v39, %v721_v23  ;;  %1521 = vst [vmem:[%s2698_s4 + $0xd0] sm:$0xff] %v1393_v26 }
 0x11c   :  { %v531_v28 = vpop.f32.mrf.mxu0  ;;  %v723_v29 = vpop.f32.mrf.mxu1  ;;  %1585 = vst [vmem:[%s2698_s4 + $0x2d0] sm:$0xff] %v1457_v27 }
 0x11d   :  { %1522 = vst [vmem:[%s2698_s4 + $0xd8] sm:$0xff] %v1394_v30  ;;  %1586 = vst [vmem:[%s2698_s4 + $0x2d8] sm:$0xff] %v1458_v31  ;;  %v1395_v36 = vmax.f32 %v1255_v32, %v2048_v42  ;;  %v1459_v37 = vmax.f32 %v1319_v33, %v2048_v42  ;;  %v1256_v38 = vadd.f32 %v2050_v43, %v531_v28 }
 0x11e   :  { %v535_v34 = vpop.f32.mrf.mxu0  ;;  %v727_v35 = vpop.f32.mrf.mxu1  ;;  %v1320_v3 = vadd.f32 %v2050_v43, %v723_v29 }
 0x11f   :  { %1523 = vst [vmem:[%s2698_s4 + $0xe0] sm:$0xff] %v1395_v36  ;;  %1587 = vst [vmem:[%s2698_s4 + $0x2e0] sm:$0xff] %v1459_v37  ;;  %v1257_v44 = vadd.f32 %v2046_v39, %v535_v34  ;;  %v1321_v46 = vadd.f32 %v2046_v39, %v727_v35  ;;  %v1396_v47 = vmax.f32 %v1256_v38, %v2052_v45 }
 0x120   :  { %v537_v40 = vpop.f32.mrf.mxu0  ;;  %v729_v41 = vpop.f32.mrf.mxu1  ;;  %v1460_v48 = vmax.f32 %v1320_v3, %v2052_v45 }
 0x121   :  { %v1397_v51 = vmax.f32 %v1257_v44, %v2048_v42  ;;  %v1461_v52 = vmax.f32 %v1321_v46, %v2048_v42  ;;  %v1258_v53 = vadd.f32 %v2050_v43, %v537_v40  ;;  %v1322_v54 = vadd.f32 %v2050_v43, %v729_v41  ;;  %1524 = vst [vmem:[%s2698_s4 + $0xe8] sm:$0xff] %v1396_v47 }
 0x122   :  { %v541_v49 = vpop.f32.mrf.mxu0  ;;  %v733_v50 = vpop.f32.mrf.mxu1  ;;  %1588 = vst [vmem:[%s2698_s4 + $0x2e8] sm:$0xff] %v1460_v48 }
 0x123   :  { %1525 = vst [vmem:[%s2698_s4 + $0xf0] sm:$0xff] %v1397_v51  ;;  %1589 = vst [vmem:[%s2698_s4 + $0x2f0] sm:$0xff] %v1461_v52  ;;  %v1398_v57 = vmax.f32 %v1258_v53, %v2052_v45  ;;  %v1462_v58 = vmax.f32 %v1322_v54, %v2052_v45  ;;  %v1259_v59 = vadd.f32 %v2046_v39, %v541_v49 }
 0x124   :  { %v543_v55 = vpop.f32.mrf.mxu0  ;;  %v735_v56 = vpop.f32.mrf.mxu1  ;;  %v1323_v60 = vadd.f32 %v2046_v39, %v733_v50 }
 0x125   :  { %1526 = vst [vmem:[%s2698_s4 + $0xf8] sm:$0xff] %v1398_v57  ;;  %1590 = vst [vmem:[%s2698_s4 + $0x2f8] sm:$0xff] %v1462_v58  ;;  %v1260_v63 = vadd.f32 %v2050_v43, %v543_v55  ;;  %v1324_v0 = vadd.f32 %v2050_v43, %v735_v56  ;;  %v1399_v1 = vmax.f32 %v1259_v59, %v2048_v42 }
 0x126   :  { %v547_v61 = vpop.f32.mrf.mxu0  ;;  %v739_v62 = vpop.f32.mrf.mxu1  ;;  %v1463_v2 = vmax.f32 %v1323_v60, %v2048_v42 }
 0x127   :  { %v1400_v6 = vmax.f32 %v1260_v63, %v2052_v45  ;;  %v1464_v7 = vmax.f32 %v1324_v0, %v2052_v45  ;;  %v1261_v8 = vadd.f32 %v2046_v39, %v547_v61  ;;  %v1325_v9 = vadd.f32 %v2046_v39, %v739_v62  ;;  %1527 = vst [vmem:[%s2698_s4 + $0x100] sm:$0xff] %v1399_v1 }
 0x128   :  { %v549_v4 = vpop.f32.mrf.mxu0  ;;  %v741_v5 = vpop.f32.mrf.mxu1  ;;  %1591 = vst [vmem:[%s2698_s4 + $0x300] sm:$0xff] %v1463_v2 }
 0x129   :  { %1528 = vst [vmem:[%s2698_s4 + $0x108] sm:$0xff] %v1400_v6  ;;  %1592 = vst [vmem:[%s2698_s4 + $0x308] sm:$0xff] %v1464_v7  ;;  %v1401_v12 = vmax.f32 %v1261_v8, %v2048_v42  ;;  %v1465_v13 = vmax.f32 %v1325_v9, %v2048_v42  ;;  %v1262_v14 = vadd.f32 %v2050_v43, %v549_v4 }
 0x12a   :  { %v553_v10 = vpop.f32.mrf.mxu0  ;;  %v745_v11 = vpop.f32.mrf.mxu1  ;;  %v1326_v15 = vadd.f32 %v2050_v43, %v741_v5 }
 0x12b   :  { %1529 = vst [vmem:[%s2698_s4 + $0x110] sm:$0xff] %v1401_v12  ;;  %1593 = vst [vmem:[%s2698_s4 + $0x310] sm:$0xff] %v1465_v13  ;;  %v1263_v18 = vadd.f32 %v2046_v39, %v553_v10  ;;  %v1327_v19 = vadd.f32 %v2046_v39, %v745_v11  ;;  %v1402_v20 = vmax.f32 %v1262_v14, %v2052_v45 }
 0x12c   :  { %v555_v16 = vpop.f32.mrf.mxu0  ;;  %v747_v17 = vpop.f32.mrf.mxu1  ;;  %v1466_v21 = vmax.f32 %v1326_v15, %v2052_v45 }
 0x12d   :  { %v1403_v24 = vmax.f32 %v1263_v18, %v2048_v42  ;;  %v1467_v25 = vmax.f32 %v1327_v19, %v2048_v42  ;;  %v1264_v26 = vadd.f32 %v2050_v43, %v555_v16  ;;  %v1328_v27 = vadd.f32 %v2050_v43, %v747_v17  ;;  %1530 = vst [vmem:[%s2698_s4 + $0x118] sm:$0xff] %v1402_v20 }
 0x12e   :  { %v559_v22 = vpop.f32.mrf.mxu0  ;;  %v751_v23 = vpop.f32.mrf.mxu1  ;;  %1594 = vst [vmem:[%s2698_s4 + $0x318] sm:$0xff] %v1466_v21 }
 0x12f   :  { %1531 = vst [vmem:[%s2698_s4 + $0x120] sm:$0xff] %v1403_v24  ;;  %1595 = vst [vmem:[%s2698_s4 + $0x320] sm:$0xff] %v1467_v25  ;;  %v1404_v30 = vmax.f32 %v1264_v26, %v2052_v45  ;;  %v1468_v31 = vmax.f32 %v1328_v27, %v2052_v45  ;;  %v1265_v32 = vadd.f32 %v2046_v39, %v559_v22 }
 0x130   :  { %v561_v28 = vpop.f32.mrf.mxu0  ;;  %v753_v29 = vpop.f32.mrf.mxu1  ;;  %v1329_v33 = vadd.f32 %v2046_v39, %v751_v23 }
 0x131   :  { %1532 = vst [vmem:[%s2698_s4 + $0x128] sm:$0xff] %v1404_v30  ;;  %1596 = vst [vmem:[%s2698_s4 + $0x328] sm:$0xff] %v1468_v31  ;;  %v1266_v36 = vadd.f32 %v2050_v43, %v561_v28  ;;  %v1330_v37 = vadd.f32 %v2050_v43, %v753_v29  ;;  %v1405_v38 = vmax.f32 %v1265_v32, %v2048_v42 }
 0x132   :  { %v565_v34 = vpop.f32.mrf.mxu0  ;;  %v757_v35 = vpop.f32.mrf.mxu1  ;;  %v1469_v3 = vmax.f32 %v1329_v33, %v2048_v42 }
 0x133   :  { %v1406_v44 = vmax.f32 %v1266_v36, %v2052_v45  ;;  %v1470_v46 = vmax.f32 %v1330_v37, %v2052_v45  ;;  %v1267_v47 = vadd.f32 %v2046_v39, %v565_v34  ;;  %v1331_v48 = vadd.f32 %v2046_v39, %v757_v35  ;;  %1533 = vst [vmem:[%s2698_s4 + $0x130] sm:$0xff] %v1405_v38 }
 0x134   :  { %v567_v40 = vpop.f32.mrf.mxu0  ;;  %v759_v41 = vpop.f32.mrf.mxu1  ;;  %1597 = vst [vmem:[%s2698_s4 + $0x330] sm:$0xff] %v1469_v3 }
 0x135   :  { %1534 = vst [vmem:[%s2698_s4 + $0x138] sm:$0xff] %v1406_v44  ;;  %1598 = vst [vmem:[%s2698_s4 + $0x338] sm:$0xff] %v1470_v46  ;;  %v1407_v51 = vmax.f32 %v1267_v47, %v2048_v42  ;;  %v1471_v52 = vmax.f32 %v1331_v48, %v2048_v42  ;;  %v1268_v53 = vadd.f32 %v2050_v43, %v567_v40 }
 0x136   :  { %v571_v49 = vpop.f32.mrf.mxu0  ;;  %v763_v50 = vpop.f32.mrf.mxu1  ;;  %v1332_v54 = vadd.f32 %v2050_v43, %v759_v41 }
 0x137   :  { %1535 = vst [vmem:[%s2698_s4 + $0x140] sm:$0xff] %v1407_v51  ;;  %1599 = vst [vmem:[%s2698_s4 + $0x340] sm:$0xff] %v1471_v52  ;;  %v1269_v57 = vadd.f32 %v2046_v39, %v571_v49  ;;  %v1333_v58 = vadd.f32 %v2046_v39, %v763_v50  ;;  %v1408_v59 = vmax.f32 %v1268_v53, %v2052_v45 }
 0x138   :  { %v573_v55 = vpop.f32.mrf.mxu0  ;;  %v765_v56 = vpop.f32.mrf.mxu1  ;;  %v1472_v60 = vmax.f32 %v1332_v54, %v2052_v45 }
 0x139   :  { %v1409_v63 = vmax.f32 %v1269_v57, %v2048_v42  ;;  %v1473_v0 = vmax.f32 %v1333_v58, %v2048_v42  ;;  %v1270_v1 = vadd.f32 %v2050_v43, %v573_v55  ;;  %v1334_v2 = vadd.f32 %v2050_v43, %v765_v56  ;;  %1536 = vst [vmem:[%s2698_s4 + $0x148] sm:$0xff] %v1408_v59 }
 0x13a   :  { %v577_v61 = vpop.f32.mrf.mxu0  ;;  %v769_v62 = vpop.f32.mrf.mxu1  ;;  %1600 = vst [vmem:[%s2698_s4 + $0x348] sm:$0xff] %v1472_v60 }
 0x13b   :  { %1537 = vst [vmem:[%s2698_s4 + $0x150] sm:$0xff] %v1409_v63  ;;  %1601 = vst [vmem:[%s2698_s4 + $0x350] sm:$0xff] %v1473_v0  ;;  %v1410_v6 = vmax.f32 %v1270_v1, %v2052_v45  ;;  %v1474_v7 = vmax.f32 %v1334_v2, %v2052_v45  ;;  %v1271_v8 = vadd.f32 %v2046_v39, %v577_v61 }
 0x13c   :  { %v579_v4 = vpop.f32.mrf.mxu0  ;;  %v771_v5 = vpop.f32.mrf.mxu1  ;;  %v1335_v9 = vadd.f32 %v2046_v39, %v769_v62 }
 0x13d   :  { %1538 = vst [vmem:[%s2698_s4 + $0x158] sm:$0xff] %v1410_v6  ;;  %1602 = vst [vmem:[%s2698_s4 + $0x358] sm:$0xff] %v1474_v7  ;;  %v1272_v12 = vadd.f32 %v2050_v43, %v579_v4  ;;  %v1336_v13 = vadd.f32 %v2050_v43, %v771_v5  ;;  %v1411_v14 = vmax.f32 %v1271_v8, %v2048_v42 }
 0x13e   :  { %v583_v10 = vpop.f32.mrf.mxu0  ;;  %v775_v11 = vpop.f32.mrf.mxu1  ;;  %v1475_v15 = vmax.f32 %v1335_v9, %v2048_v42 }
 0x13f   :  { %v1412_v18 = vmax.f32 %v1272_v12, %v2052_v45  ;;  %v1476_v19 = vmax.f32 %v1336_v13, %v2052_v45  ;;  %v1273_v20 = vadd.f32 %v2046_v39, %v583_v10  ;;  %v1337_v21 = vadd.f32 %v2046_v39, %v775_v11  ;;  %1539 = vst [vmem:[%s2698_s4 + $0x160] sm:$0xff] %v1411_v14 }
 0x140   :  { %v585_v16 = vpop.f32.mrf.mxu0  ;;  %v777_v17 = vpop.f32.mrf.mxu1  ;;  %1603 = vst [vmem:[%s2698_s4 + $0x360] sm:$0xff] %v1475_v15 }
 0x141   :  { %1540 = vst [vmem:[%s2698_s4 + $0x168] sm:$0xff] %v1412_v18  ;;  %1604 = vst [vmem:[%s2698_s4 + $0x368] sm:$0xff] %v1476_v19  ;;  %v1413_v24 = vmax.f32 %v1273_v20, %v2048_v42  ;;  %v1477_v25 = vmax.f32 %v1337_v21, %v2048_v42  ;;  %v1274_v26 = vadd.f32 %v2050_v43, %v585_v16 }
 0x142   :  { %v589_v22 = vpop.f32.mrf.mxu0  ;;  %v781_v23 = vpop.f32.mrf.mxu1  ;;  %v1338_v27 = vadd.f32 %v2050_v43, %v777_v17 }
 0x143   :  { %1541 = vst [vmem:[%s2698_s4 + $0x170] sm:$0xff] %v1413_v24  ;;  %1605 = vst [vmem:[%s2698_s4 + $0x370] sm:$0xff] %v1477_v25  ;;  %v1275_v30 = vadd.f32 %v2046_v39, %v589_v22  ;;  %v1339_v31 = vadd.f32 %v2046_v39, %v781_v23  ;;  %v1414_v32 = vmax.f32 %v1274_v26, %v2052_v45 }
 0x144   :  { %v591_v28 = vpop.f32.mrf.mxu0  ;;  %v783_v29 = vpop.f32.mrf.mxu1  ;;  %v1478_v33 = vmax.f32 %v1338_v27, %v2052_v45 }
 0x145   :  { %v1415_v36 = vmax.f32 %v1275_v30, %v2048_v42  ;;  %v1479_v37 = vmax.f32 %v1339_v31, %v2048_v42  ;;  %v1276_v38 = vadd.f32 %v2050_v43, %v591_v28  ;;  %v1340_v3 = vadd.f32 %v2050_v43, %v783_v29  ;;  %1542 = vst [vmem:[%s2698_s4 + $0x178] sm:$0xff] %v1414_v32 }
 0x146   :  { %v595_v34 = vpop.f32.mrf.mxu0  ;;  %v787_v35 = vpop.f32.mrf.mxu1  ;;  %1606 = vst [vmem:[%s2698_s4 + $0x378] sm:$0xff] %v1478_v33 }
 0x147   :  { %1543 = vst [vmem:[%s2698_s4 + $0x180] sm:$0xff] %v1415_v36  ;;  %1607 = vst [vmem:[%s2698_s4 + $0x380] sm:$0xff] %v1479_v37  ;;  %v1416_v44 = vmax.f32 %v1276_v38, %v2052_v45  ;;  %v1480_v46 = vmax.f32 %v1340_v3, %v2052_v45  ;;  %v1277_v47 = vadd.f32 %v2046_v39, %v595_v34 }
 0x148   :  { %v597_v40 = vpop.f32.mrf.mxu0  ;;  %v789_v41 = vpop.f32.mrf.mxu1  ;;  %v1341_v48 = vadd.f32 %v2046_v39, %v787_v35 }
 0x149   :  { %1544 = vst [vmem:[%s2698_s4 + $0x188] sm:$0xff] %v1416_v44  ;;  %1608 = vst [vmem:[%s2698_s4 + $0x388] sm:$0xff] %v1480_v46  ;;  %v1278_v51 = vadd.f32 %v2050_v43, %v597_v40  ;;  %v1342_v52 = vadd.f32 %v2050_v43, %v789_v41  ;;  %v1417_v53 = vmax.f32 %v1277_v47, %v2048_v42 }
 0x14a   :  { %v601_v49 = vpop.f32.mrf.mxu0  ;;  %v793_v50 = vpop.f32.mrf.mxu1  ;;  %v1481_v54 = vmax.f32 %v1341_v48, %v2048_v42 }
 0x14b   :  { %v1418_v57 = vmax.f32 %v1278_v51, %v2052_v45  ;;  %v1482_v58 = vmax.f32 %v1342_v52, %v2052_v45  ;;  %v1279_v59 = vadd.f32 %v2046_v39, %v601_v49  ;;  %v1343_v60 = vadd.f32 %v2046_v39, %v793_v50  ;;  %1545 = vst [vmem:[%s2698_s4 + $0x190] sm:$0xff] %v1417_v53 }
 0x14c   :  { %v603_v55 = vpop.f32.mrf.mxu0  ;;  %v795_v56 = vpop.f32.mrf.mxu1  ;;  %1609 = vst [vmem:[%s2698_s4 + $0x390] sm:$0xff] %v1481_v54 }
 0x14d   :  { %1546 = vst [vmem:[%s2698_s4 + $0x198] sm:$0xff] %v1418_v57  ;;  %1610 = vst [vmem:[%s2698_s4 + $0x398] sm:$0xff] %v1482_v58  ;;  %v1419_v63 = vmax.f32 %v1279_v59, %v2048_v42  ;;  %v1483_v0 = vmax.f32 %v1343_v60, %v2048_v42  ;;  %v1280_v1 = vadd.f32 %v2050_v43, %v603_v55 }
 0x14e   :  { %v607_v61 = vpop.f32.mrf.mxu0  ;;  %v799_v62 = vpop.f32.mrf.mxu1  ;;  %v1344_v2 = vadd.f32 %v2050_v43, %v795_v56 }
 0x14f   :  { %1547 = vst [vmem:[%s2698_s4 + $0x1a0] sm:$0xff] %v1419_v63  ;;  %1611 = vst [vmem:[%s2698_s4 + $0x3a0] sm:$0xff] %v1483_v0  ;;  %v1281_v6 = vadd.f32 %v2046_v39, %v607_v61  ;;  %v1345_v7 = vadd.f32 %v2046_v39, %v799_v62  ;;  %v1420_v8 = vmax.f32 %v1280_v1, %v2052_v45 }
 0x150   :  { %v609_v4 = vpop.f32.mrf.mxu0  ;;  %v801_v5 = vpop.f32.mrf.mxu1  ;;  %v1484_v9 = vmax.f32 %v1344_v2, %v2052_v45 }
 0x151   :  { %v1421_v12 = vmax.f32 %v1281_v6, %v2048_v42  ;;  %v1485_v13 = vmax.f32 %v1345_v7, %v2048_v42  ;;  %v1282_v14 = vadd.f32 %v2050_v43, %v609_v4  ;;  %v1346_v15 = vadd.f32 %v2050_v43, %v801_v5  ;;  %1548 = vst [vmem:[%s2698_s4 + $0x1a8] sm:$0xff] %v1420_v8 }
 0x152   :  { %v613_v10 = vpop.f32.mrf.mxu0  ;;  %v805_v11 = vpop.f32.mrf.mxu1  ;;  %1612 = vst [vmem:[%s2698_s4 + $0x3a8] sm:$0xff] %v1484_v9 }
 0x153   :  { %1549 = vst [vmem:[%s2698_s4 + $0x1b0] sm:$0xff] %v1421_v12  ;;  %1613 = vst [vmem:[%s2698_s4 + $0x3b0] sm:$0xff] %v1485_v13  ;;  %v1422_v18 = vmax.f32 %v1282_v14, %v2052_v45  ;;  %v1486_v19 = vmax.f32 %v1346_v15, %v2052_v45  ;;  %v1283_v20 = vadd.f32 %v2046_v39, %v613_v10 }
 0x154   :  { %v615_v16 = vpop.f32.mrf.mxu0  ;;  %v807_v17 = vpop.f32.mrf.mxu1  ;;  %v1347_v21 = vadd.f32 %v2046_v39, %v805_v11 }
 0x155   :  { %1550 = vst [vmem:[%s2698_s4 + $0x1b8] sm:$0xff] %v1422_v18  ;;  %1614 = vst [vmem:[%s2698_s4 + $0x3b8] sm:$0xff] %v1486_v19  ;;  %v1284_v24 = vadd.f32 %v2050_v43, %v615_v16  ;;  %v1348_v25 = vadd.f32 %v2050_v43, %v807_v17  ;;  %v1423_v26 = vmax.f32 %v1283_v20, %v2048_v42 }
 0x156   :  { %v619_v22 = vpop.f32.mrf.mxu0  ;;  %v811_v23 = vpop.f32.mrf.mxu1  ;;  %v1487_v27 = vmax.f32 %v1347_v21, %v2048_v42 }
 0x157   :  { %v1424_v30 = vmax.f32 %v1284_v24, %v2052_v45  ;;  %v1488_v31 = vmax.f32 %v1348_v25, %v2052_v45  ;;  %v1285_v32 = vadd.f32 %v2046_v39, %v619_v22  ;;  %v1349_v33 = vadd.f32 %v2046_v39, %v811_v23  ;;  %1551 = vst [vmem:[%s2698_s4 + $0x1c0] sm:$0xff] %v1423_v26 }
 0x158   :  { %v621_v28 = vpop.f32.mrf.mxu0  ;;  %v813_v29 = vpop.f32.mrf.mxu1  ;;  %1615 = vst [vmem:[%s2698_s4 + $0x3c0] sm:$0xff] %v1487_v27 }
 0x159   :  { %1552 = vst [vmem:[%s2698_s4 + $0x1c8] sm:$0xff] %v1424_v30  ;;  %1616 = vst [vmem:[%s2698_s4 + $0x3c8] sm:$0xff] %v1488_v31  ;;  %v1425_v36 = vmax.f32 %v1285_v32, %v2048_v42  ;;  %v1489_v37 = vmax.f32 %v1349_v33, %v2048_v42  ;;  %v1286_v38 = vadd.f32 %v2050_v43, %v621_v28 }
 0x15a   :  { %v625_v34 = vpop.f32.mrf.mxu0  ;;  %v817_v35 = vpop.f32.mrf.mxu1  ;;  %v1350_v3 = vadd.f32 %v2050_v43, %v813_v29 }
 0x15b   :  { %1553 = vst [vmem:[%s2698_s4 + $0x1d0] sm:$0xff] %v1425_v36  ;;  %1617 = vst [vmem:[%s2698_s4 + $0x3d0] sm:$0xff] %v1489_v37  ;;  %v1287_v44 = vadd.f32 %v2046_v39, %v625_v34  ;;  %v1351_v46 = vadd.f32 %v2046_v39, %v817_v35  ;;  %v1426_v47 = vmax.f32 %v1286_v38, %v2052_v45 }
 0x15c   :  { %v627_v40 = vpop.f32.mrf.mxu0  ;;  %v819_v41 = vpop.f32.mrf.mxu1  ;;  %v1490_v48 = vmax.f32 %v1350_v3, %v2052_v45 }
 0x15d   :  { %v1427_v51 = vmax.f32 %v1287_v44, %v2048_v42  ;;  %v1491_v52 = vmax.f32 %v1351_v46, %v2048_v42  ;;  %v1288_v53 = vadd.f32 %v2050_v43, %v627_v40  ;;  %v1352_v54 = vadd.f32 %v2050_v43, %v819_v41  ;;  %1554 = vst [vmem:[%s2698_s4 + $0x1d8] sm:$0xff] %v1426_v47 }
 0x15e   :  { %v631_v49 = vpop.f32.mrf.mxu0  ;;  %v823_v50 = vpop.f32.mrf.mxu1  ;;  %1618 = vst [vmem:[%s2698_s4 + $0x3d8] sm:$0xff] %v1490_v48 }
 0x15f   :  { %1555 = vst [vmem:[%s2698_s4 + $0x1e0] sm:$0xff] %v1427_v51  ;;  %1619 = vst [vmem:[%s2698_s4 + $0x3e0] sm:$0xff] %v1491_v52  ;;  %v1428_v57 = vmax.f32 %v1288_v53, %v2052_v45  ;;  %v1492_v58 = vmax.f32 %v1352_v54, %v2052_v45  ;;  %v1289_v59 = vadd.f32 %v2046_v39, %v631_v49 }
 0x160   :  { %v633_v55 = vpop.f32.mrf.mxu0  ;;  %v825_v56 = vpop.f32.mrf.mxu1  ;;  %v1353_v60 = vadd.f32 %v2046_v39, %v823_v50 }
 0x161   :  { %1556 = vst [vmem:[%s2698_s4 + $0x1e8] sm:$0xff] %v1428_v57  ;;  %1620 = vst [vmem:[%s2698_s4 + $0x3e8] sm:$0xff] %v1492_v58  ;;  %v1290_v61 = vadd.f32 %v2050_v43, %v633_v55  ;;  %v1354_v62 = vadd.f32 %v2050_v43, %v825_v56  ;;  %v1429_v63 = vmax.f32 %v1289_v59, %v2048_v42 }
 0x162   :  { %v1493_v0 = vmax.f32 %v1353_v60, %v2048_v42 }
 0x163   :  { %v1430_v1 = vmax.f32 %v1290_v61, %v2052_v45  ;;  %v1494_v39 = vmax.f32 %v1354_v62, %v2052_v45  ;;  %1557 = vst [vmem:[%s2698_s4 + $0x1f0] sm:$0xff] %v1429_v63 }
 0x164   :  { %1621 = vst [vmem:[%s2698_s4 + $0x3f0] sm:$0xff] %v1493_v0 }
 0x165   :  { %1558 = vst [vmem:[%s2698_s4 + $0x1f8] sm:$0xff] %v1430_v1  ;;  %1622 = vst [vmem:[%s2698_s4 + $0x3f8] sm:$0xff] %v1494_v39 }

// kernel: encoder_forward.12
= control target key start
LH: loop header
LB: loop body
LE: loop exit
PB: predicated region body
PF: predicated region fallthrough
CT: control target
= control target key end

     0   :  { %v1651_v0 = vmov 0.0   ;;  %s3041_s1 = inlined_call_operand.vmem [shape: f32[512,128], index: 1, kind: input, shape index: {}]   ;;  %s3042_s0 = inlined_call_operand.vmem [shape: f32[512,512], index: 0, kind: input, shape index: {}]   ;;  %s3043_s2 = inlined_call_operand.vmem [shape: f32[1,128], index: 2, kind: input, shape index: {}]   ;;  %s3044_s3 = inlined_call_operand.vmem [shape: f32[1,128], index: 3, kind: input, shape index: {}]   ;;  %s3045_s4 = inlined_call_operand.vmem [shape: f32[512,128], index: 4, kind: output, shape index: {}]  }
   0x1   :  { %471 = vmatprep.subr.mxu0 %v1651_v0  ;;  %856 = vmatprep.subr.mxu1 %v1651_v0  ;;  %v102_v1 = vld [vmem:[%s3041_s1 + $0x78] sm:$0xff]  ;;  %v101_v3 = vld [vmem:[%s3041_s1 + $0x70] sm:$0xff]  ;;  %v100_v5 = vld [vmem:[%s3041_s1 + $0x68] sm:$0xff] }
   0x2   :  { %v134_v2 = vld [vmem:[%s3041_s1 + $0x178] sm:$0xff]  ;;  %472 = vmatpush1.msra.mxu0 %v102_v1  ;;  %v133_v4 = vld [vmem:[%s3041_s1 + $0x170] sm:$0xff]  ;;  %v132_v6 = vld [vmem:[%s3041_s1 + $0x168] sm:$0xff] }
   0x3   :  { %857 = vmatpush1.msra.mxu1 %v134_v2  ;;  %473 = vmatprep.subr.mxu0 %v1651_v0  ;;  %v99_v7 = vld [vmem:[%s3041_s1 + $0x60] sm:$0xff]  ;;  %v98_v9 = vld [vmem:[%s3041_s1 + $0x58] sm:$0xff]  ;;  %v97_v11 = vld [vmem:[%s3041_s1 + $0x50] sm:$0xff] }
   0x4   :  { %858 = vmatprep.subr.mxu1 %v1651_v0  ;;  %474 = vmatpush1.msra.mxu0 %v101_v3  ;;  %v131_v8 = vld [vmem:[%s3041_s1 + $0x160] sm:$0xff]  ;;  %v130_v10 = vld [vmem:[%s3041_s1 + $0x158] sm:$0xff]  ;;  %v129_v12 = vld [vmem:[%s3041_s1 + $0x150] sm:$0xff] }
   0x5   :  { %859 = vmatpush1.msra.mxu1 %v133_v4  ;;  %475 = vmatprep.subr.mxu0 %v1651_v0  ;;  %v96_v13 = vld [vmem:[%s3041_s1 + $0x48] sm:$0xff]  ;;  %v95_v15 = vld [vmem:[%s3041_s1 + $0x40] sm:$0xff]  ;;  %v94_v17 = vld [vmem:[%s3041_s1 + $0x38] sm:$0xff] }
   0x6   :  { %860 = vmatprep.subr.mxu1 %v1651_v0  ;;  %476 = vmatpush1.msra.mxu0 %v100_v5  ;;  %v128_v14 = vld [vmem:[%s3041_s1 + $0x148] sm:$0xff]  ;;  %v127_v16 = vld [vmem:[%s3041_s1 + $0x140] sm:$0xff]  ;;  %v126_v18 = vld [vmem:[%s3041_s1 + $0x138] sm:$0xff] }
   0x7   :  { %861 = vmatpush1.msra.mxu1 %v132_v6  ;;  %477 = vmatprep.subr.mxu0 %v1651_v0  ;;  %v93_v19 = vld [vmem:[%s3041_s1 + $0x30] sm:$0xff]  ;;  %v92_v21 = vld [vmem:[%s3041_s1 + $0x28] sm:$0xff]  ;;  %v91_v23 = vld [vmem:[%s3041_s1 + $0x20] sm:$0xff] }
   0x8   :  { %862 = vmatprep.subr.mxu1 %v1651_v0  ;;  %478 = vmatpush1.msra.mxu0 %v99_v7  ;;  %v125_v20 = vld [vmem:[%s3041_s1 + $0x130] sm:$0xff]  ;;  %v124_v22 = vld [vmem:[%s3041_s1 + $0x128] sm:$0xff]  ;;  %v123_v24 = vld [vmem:[%s3041_s1 + $0x120] sm:$0xff] }
   0x9   :  { %863 = vmatpush1.msra.mxu1 %v131_v8  ;;  %479 = vmatprep.subr.mxu0 %v1651_v0  ;;  %v90_v25 = vld [vmem:[%s3041_s1 + $0x18] sm:$0xff]  ;;  %v89_v27 = vld [vmem:[%s3041_s1 + $0x10] sm:$0xff]  ;;  %v88_v29 = vld [vmem:[%s3041_s1 + $0x8] sm:$0xff] }
   0xa   :  { %864 = vmatprep.subr.mxu1 %v1651_v0  ;;  %480 = vmatpush1.msra.mxu0 %v98_v9  ;;  %v122_v26 = vld [vmem:[%s3041_s1 + $0x118] sm:$0xff]  ;;  %v121_v28 = vld [vmem:[%s3041_s1 + $0x110] sm:$0xff]  ;;  %v120_v30 = vld [vmem:[%s3041_s1 + $0x108] sm:$0xff] }
   0xb   :  { %865 = vmatpush1.msra.mxu1 %v130_v10  ;;  %481 = vmatprep.subr.mxu0 %v1651_v0  ;;  %v87_v31 = vld [vmem:[%s3041_s1] sm:$0xff]  ;;  %v118_v33 = vld [vmem:[%s3041_s1 + $0xf8] sm:$0xff]  ;;  %v117_v35 = vld [vmem:[%s3041_s1 + $0xf0] sm:$0xff] }
   0xc   :  { %866 = vmatprep.subr.mxu1 %v1651_v0  ;;  %482 = vmatpush1.msra.mxu0 %v97_v11  ;;  %v119_v32 = vld [vmem:[%s3041_s1 + $0x100] sm:$0xff]  ;;  %v150_v34 = vld [vmem:[%s3041_s1 + $0x1f8] sm:$0xff]  ;;  %v149_v36 = vld [vmem:[%s3041_s1 + $0x1f0] sm:$0xff] }
   0xd   :  { %867 = vmatpush1.msra.mxu1 %v129_v12  ;;  %483 = vmatprep.subr.mxu0 %v1651_v0  ;;  %v116_v37 = vld [vmem:[%s3041_s1 + $0xe8] sm:$0xff]  ;;  %v115_v39 = vld [vmem:[%s3041_s1 + $0xe0] sm:$0xff]  ;;  %v114_v41 = vld [vmem:[%s3041_s1 + $0xd8] sm:$0xff] }
   0xe   :  { %868 = vmatprep.subr.mxu1 %v1651_v0  ;;  %484 = vmatpush1.msra.mxu0 %v96_v13  ;;  %v148_v38 = vld [vmem:[%s3041_s1 + $0x1e8] sm:$0xff]  ;;  %v147_v40 = vld [vmem:[%s3041_s1 + $0x1e0] sm:$0xff]  ;;  %v146_v42 = vld [vmem:[%s3041_s1 + $0x1d8] sm:$0xff] }
   0xf   :  { %869 = vmatpush1.msra.mxu1 %v128_v14  ;;  %485 = vmatprep.subr.mxu0 %v1651_v0  ;;  %v113_v43 = vld [vmem:[%s3041_s1 + $0xd0] sm:$0xff]  ;;  %v112_v45 = vld [vmem:[%s3041_s1 + $0xc8] sm:$0xff]  ;;  %v111_v47 = vld [vmem:[%s3041_s1 + $0xc0] sm:$0xff] }
  0x10   :  { %870 = vmatprep.subr.mxu1 %v1651_v0  ;;  %486 = vmatpush1.msra.mxu0 %v95_v15  ;;  %v145_v44 = vld [vmem:[%s3041_s1 + $0x1d0] sm:$0xff]  ;;  %v144_v46 = vld [vmem:[%s3041_s1 + $0x1c8] sm:$0xff]  ;;  %v143_v48 = vld [vmem:[%s3041_s1 + $0x1c0] sm:$0xff] }
  0x11   :  { %871 = vmatpush1.msra.mxu1 %v127_v16  ;;  %487 = vmatprep.subr.mxu0 %v1651_v0  ;;  %v110_v49 = vld [vmem:[%s3041_s1 + $0xb8] sm:$0xff]  ;;  %v109_v51 = vld [vmem:[%s3041_s1 + $0xb0] sm:$0xff]  ;;  %v108_v53 = vld [vmem:[%s3041_s1 + $0xa8] sm:$0xff] }
  0x12   :  { %872 = vmatprep.subr.mxu1 %v1651_v0  ;;  %488 = vmatpush1.msra.mxu0 %v94_v17  ;;  %v142_v50 = vld [vmem:[%s3041_s1 + $0x1b8] sm:$0xff]  ;;  %v141_v52 = vld [vmem:[%s3041_s1 + $0x1b0] sm:$0xff]  ;;  %v140_v54 = vld [vmem:[%s3041_s1 + $0x1a8] sm:$0xff] }
  0x13   :  { %873 = vmatpush1.msra.mxu1 %v126_v18  ;;  %489 = vmatprep.subr.mxu0 %v1651_v0  ;;  %v107_v55 = vld [vmem:[%s3041_s1 + $0xa0] sm:$0xff]  ;;  %v106_v57 = vld [vmem:[%s3041_s1 + $0x98] sm:$0xff]  ;;  %v105_v59 = vld [vmem:[%s3041_s1 + $0x90] sm:$0xff] }
  0x14   :  { %874 = vmatprep.subr.mxu1 %v1651_v0  ;;  %490 = vmatpush1.msra.mxu0 %v93_v19  ;;  %v139_v56 = vld [vmem:[%s3041_s1 + $0x1a0] sm:$0xff]  ;;  %v138_v58 = vld [vmem:[%s3041_s1 + $0x198] sm:$0xff]  ;;  %v137_v60 = vld [vmem:[%s3041_s1 + $0x190] sm:$0xff] }
  0x15   :  { %875 = vmatpush1.msra.mxu1 %v125_v20  ;;  %491 = vmatprep.subr.mxu0 %v1651_v0  ;;  %v104_v61 = vld [vmem:[%s3041_s1 + $0x88] sm:$0xff]  ;;  %v103_v63 = vld [vmem:[%s3041_s1 + $0x80] sm:$0xff]  ;;  %v218_v3 = vld [vmem:[%s3042_s0 + $0x18] sm:$0xff] }
  0x16   :  { %876 = vmatprep.subr.mxu1 %v1651_v0  ;;  %492 = vmatpush1.msra.mxu0 %v92_v21  ;;  %v136_v62 = vld [vmem:[%s3041_s1 + $0x188] sm:$0xff]  ;;  %v135_v2 = vld [vmem:[%s3041_s1 + $0x180] sm:$0xff]  ;;  %v217_v5 = vld [vmem:[%s3042_s0 + $0x10] sm:$0xff] }
  0x17   :  { %877 = vmatpush1.msra.mxu1 %v124_v22  ;;  %493 = vmatprep.subr.mxu0 %v1651_v0  ;;  %v216_v1 = vld [vmem:[%s3042_s0 + $0x8] sm:$0xff]  ;;  %v215_v4 = vld [vmem:[%s3042_s0] sm:$0xff]  ;;  %v222_v7 = vld [vmem:[%s3042_s0 + $0x38] sm:$0xff] }
  0x18   :  { %878 = vmatprep.subr.mxu1 %v1651_v0  ;;  %494 = vmatpush1.msra.mxu0 %v91_v23  ;;  %v220_v6 = vld [vmem:[%s3042_s0 + $0x28] sm:$0xff]  ;;  %v221_v8 = vld [vmem:[%s3042_s0 + $0x30] sm:$0xff]  ;;  %v226_v10 = vld [vmem:[%s3042_s0 + $0x58] sm:$0xff] }
  0x19   :  { %879 = vmatpush1.msra.mxu1 %v123_v24  ;;  %495 = vmatprep.subr.mxu0 %v1651_v0  ;;  %v224_v9 = vld [vmem:[%s3042_s0 + $0x48] sm:$0xff]  ;;  %v223_v11 = vld [vmem:[%s3042_s0 + $0x40] sm:$0xff]  ;;  %v225_v12 = vld [vmem:[%s3042_s0 + $0x50] sm:$0xff] }
  0x1a   :  { %880 = vmatprep.subr.mxu1 %v1651_v0  ;;  %496 = vmatpush1.msra.mxu0 %v90_v25  ;;  %v228_v13 = vld [vmem:[%s3042_s0 + $0x68] sm:$0xff]  ;;  %v230_v14 = vld [vmem:[%s3042_s0 + $0x78] sm:$0xff]  ;;  %v227_v15 = vld [vmem:[%s3042_s0 + $0x60] sm:$0xff] }
  0x1b   :  { %881 = vmatpush1.msra.mxu1 %v122_v26  ;;  %497 = vmatprep.subr.mxu0 %v1651_v0  ;;  %v229_v16 = vld [vmem:[%s3042_s0 + $0x70] sm:$0xff]  ;;  %v232_v17 = vld [vmem:[%s3042_s0 + $0x88] sm:$0xff]  ;;  %v234_v18 = vld [vmem:[%s3042_s0 + $0x98] sm:$0xff] }
  0x1c   :  { %882 = vmatprep.subr.mxu1 %v1651_v0  ;;  %498 = vmatpush1.msra.mxu0 %v89_v27  ;;  %v231_v19 = vld [vmem:[%s3042_s0 + $0x80] sm:$0xff]  ;;  %v233_v20 = vld [vmem:[%s3042_s0 + $0x90] sm:$0xff]  ;;  %v236_v21 = vld [vmem:[%s3042_s0 + $0xa8] sm:$0xff] }
  0x1d   :  { %883 = vmatpush1.msra.mxu1 %v121_v28  ;;  %499 = vmatprep.subr.mxu0 %v1651_v0  ;;  %v238_v22 = vld [vmem:[%s3042_s0 + $0xb8] sm:$0xff]  ;;  %v235_v23 = vld [vmem:[%s3042_s0 + $0xa0] sm:$0xff]  ;;  %v237_v24 = vld [vmem:[%s3042_s0 + $0xb0] sm:$0xff] }
  0x1e   :  { %884 = vmatprep.subr.mxu1 %v1651_v0  ;;  %500 = vmatpush1.msra.mxu0 %v88_v29  ;;  %v240_v25 = vld [vmem:[%s3042_s0 + $0xc8] sm:$0xff]  ;;  %v242_v26 = vld [vmem:[%s3042_s0 + $0xd8] sm:$0xff]  ;;  %v239_v27 = vld [vmem:[%s3042_s0 + $0xc0] sm:$0xff] }
  0x1f   :  { %885 = vmatpush1.msra.mxu1 %v120_v30  ;;  %501 = vmatprep.subr.mxu0 %v1651_v0  ;;  %v241_v28 = vld [vmem:[%s3042_s0 + $0xd0] sm:$0xff]  ;;  %v244_v29 = vld [vmem:[%s3042_s0 + $0xe8] sm:$0xff]  ;;  %v246_v30 = vld [vmem:[%s3042_s0 + $0xf8] sm:$0xff] }
  0x20   :  { %886 = vmatprep.subr.mxu1 %v1651_v0  ;;  %502 = vmatpush1.msra.mxu0 %v87_v31  ;;  %v243_v31 = vld [vmem:[%s3042_s0 + $0xe0] sm:$0xff] }
  0x21   :  { %887 = vmatpush1.msra.mxu1 %v119_v32  ;;  %503 = vmatprep.subr.mxu0 %v1651_v0  ;;  %v245_v32 = vld [vmem:[%s3042_s0 + $0xf0] sm:$0xff] }
  0x22   :  { %888 = vmatprep.subr.mxu1 %v1651_v0  ;;  %504 = vmatpush2.msra.mxu0 %v118_v33  ;;  %v248_v33 = vld [vmem:[%s3042_s0 + $0x108] sm:$0xff] }
  0x23   :  { %889 = vmatpush2.msra.mxu1 %v150_v34  ;;  %505 = vmatprep.subr.mxu0 %v1651_v0  ;;  %v250_v34 = vld [vmem:[%s3042_s0 + $0x118] sm:$0xff] }
  0x24   :  { %890 = vmatprep.subr.mxu1 %v1651_v0  ;;  %506 = vmatpush2.msra.mxu0 %v117_v35  ;;  %v247_v35 = vld [vmem:[%s3042_s0 + $0x100] sm:$0xff] }
  0x25   :  { %891 = vmatpush2.msra.mxu1 %v149_v36  ;;  %507 = vmatprep.subr.mxu0 %v1651_v0  ;;  %v249_v36 = vld [vmem:[%s3042_s0 + $0x110] sm:$0xff] }
  0x26   :  { %892 = vmatprep.subr.mxu1 %v1651_v0  ;;  %508 = vmatpush2.msra.mxu0 %v116_v37  ;;  %v252_v37 = vld [vmem:[%s3042_s0 + $0x128] sm:$0xff] }
  0x27   :  { %893 = vmatpush2.msra.mxu1 %v148_v38  ;;  %509 = vmatprep.subr.mxu0 %v1651_v0  ;;  %v254_v38 = vld [vmem:[%s3042_s0 + $0x138] sm:$0xff] }
  0x28   :  { %894 = vmatprep.subr.mxu1 %v1651_v0  ;;  %510 = vmatpush2.msra.mxu0 %v115_v39  ;;  %v251_v39 = vld [vmem:[%s3042_s0 + $0x120] sm:$0xff] }
  0x29   :  { %895 = vmatpush2.msra.mxu1 %v147_v40  ;;  %511 = vmatprep.subr.mxu0 %v1651_v0  ;;  %v253_v40 = vld [vmem:[%s3042_s0 + $0x130] sm:$0xff] }
  0x2a   :  { %896 = vmatprep.subr.mxu1 %v1651_v0  ;;  %512 = vmatpush2.msra.mxu0 %v114_v41  ;;  %v256_v41 = vld [vmem:[%s3042_s0 + $0x148] sm:$0xff] }
  0x2b   :  { %897 = vmatpush2.msra.mxu1 %v146_v42  ;;  %513 = vmatprep.subr.mxu0 %v1651_v0  ;;  %v258_v42 = vld [vmem:[%s3042_s0 + $0x158] sm:$0xff] }
  0x2c   :  { %898 = vmatprep.subr.mxu1 %v1651_v0  ;;  %514 = vmatpush2.msra.mxu0 %v113_v43  ;;  %v255_v43 = vld [vmem:[%s3042_s0 + $0x140] sm:$0xff] }
  0x2d   :  { %899 = vmatpush2.msra.mxu1 %v145_v44  ;;  %515 = vmatprep.subr.mxu0 %v1651_v0  ;;  %v257_v44 = vld [vmem:[%s3042_s0 + $0x150] sm:$0xff] }
  0x2e   :  { %900 = vmatprep.subr.mxu1 %v1651_v0  ;;  %516 = vmatpush2.msra.mxu0 %v112_v45  ;;  %v260_v45 = vld [vmem:[%s3042_s0 + $0x168] sm:$0xff] }
  0x2f   :  { %901 = vmatpush2.msra.mxu1 %v144_v46  ;;  %517 = vmatprep.subr.mxu0 %v1651_v0  ;;  %v262_v46 = vld [vmem:[%s3042_s0 + $0x178] sm:$0xff] }
  0x30   :  { %902 = vmatprep.subr.mxu1 %v1651_v0  ;;  %518 = vmatpush2.msra.mxu0 %v111_v47  ;;  %v259_v47 = vld [vmem:[%s3042_s0 + $0x160] sm:$0xff] }
  0x31   :  { %903 = vmatpush2.msra.mxu1 %v143_v48  ;;  %519 = vmatprep.subr.mxu0 %v1651_v0  ;;  %v261_v48 = vld [vmem:[%s3042_s0 + $0x170] sm:$0xff] }
  0x32   :  { %904 = vmatprep.subr.mxu1 %v1651_v0  ;;  %520 = vmatpush2.msra.mxu0 %v110_v49  ;;  %v264_v49 = vld [vmem:[%s3042_s0 + $0x188] sm:$0xff] }
  0x33   :  { %905 = vmatpush2.msra.mxu1 %v142_v50  ;;  %521 = vmatprep.subr.mxu0 %v1651_v0  ;;  %v266_v50 = vld [vmem:[%s3042_s0 + $0x198] sm:$0xff] }
  0x34   :  { %906 = vmatprep.subr.mxu1 %v1651_v0  ;;  %522 = vmatpush2.msra.mxu0 %v109_v51  ;;  %v263_v51 = vld [vmem:[%s3042_s0 + $0x180] sm:$0xff] }
  0x35   :  { %907 = vmatpush2.msra.mxu1 %v141_v52  ;;  %523 = vmatprep.subr.mxu0 %v1651_v0  ;;  %v265_v52 = vld [vmem:[%s3042_s0 + $0x190] sm:$0xff] }
  0x36   :  { %908 = vmatprep.subr.mxu1 %v1651_v0  ;;  %524 = vmatpush2.msra.mxu0 %v108_v53  ;;  %v268_v53 = vld [vmem:[%s3042_s0 + $0x1a8] sm:$0xff] }
  0x37   :  { %909 = vmatpush2.msra.mxu1 %v140_v54  ;;  %525 = vmatprep.subr.mxu0 %v1651_v0  ;;  %v270_v54 = vld [vmem:[%s3042_s0 + $0x1b8] sm:$0xff] }
  0x38   :  { %910 = vmatprep.subr.mxu1 %v1651_v0  ;;  %526 = vmatpush2.msra.mxu0 %v107_v55  ;;  %v267_v55 = vld [vmem:[%s3042_s0 + $0x1a0] sm:$0xff] }
  0x39   :  { %911 = vmatpush2.msra.mxu1 %v139_v56  ;;  %527 = vmatprep.subr.mxu0 %v1651_v0  ;;  %v269_v56 = vld [vmem:[%s3042_s0 + $0x1b0] sm:$0xff] }
  0x3a   :  { %912 = vmatprep.subr.mxu1 %v1651_v0  ;;  %528 = vmatpush2.msra.mxu0 %v106_v57  ;;  %v272_v57 = vld [vmem:[%s3042_s0 + $0x1c8] sm:$0xff] }
  0x3b   :  { %913 = vmatpush2.msra.mxu1 %v138_v58  ;;  %529 = vmatprep.subr.mxu0 %v1651_v0  ;;  %v274_v58 = vld [vmem:[%s3042_s0 + $0x1d8] sm:$0xff] }
  0x3c   :  { %914 = vmatprep.subr.mxu1 %v1651_v0  ;;  %530 = vmatpush2.msra.mxu0 %v105_v59  ;;  %v271_v59 = vld [vmem:[%s3042_s0 + $0x1c0] sm:$0xff] }
  0x3d   :  { %915 = vmatpush2.msra.mxu1 %v137_v60  ;;  %531 = vmatprep.subr.mxu0 %v1651_v0  ;;  %v273_v60 = vld [vmem:[%s3042_s0 + $0x1d0] sm:$0xff] }
  0x3e   :  { %916 = vmatprep.subr.mxu1 %v1651_v0  ;;  %532 = vmatpush2.msra.mxu0 %v104_v61  ;;  %v276_v61 = vld [vmem:[%s3042_s0 + $0x1e8] sm:$0xff] }
  0x3f   :  { %917 = vmatpush2.msra.mxu1 %v136_v62  ;;  %533 = vmatprep.subr.mxu0 %v1651_v0  ;;  %v278_v62 = vld [vmem:[%s3042_s0 + $0x1f8] sm:$0xff] }
  0x40   :  { %918 = vmatprep.subr.mxu1 %v1651_v0  ;;  %534 = vmatpush2.msra.mxu0 %v103_v63  ;;  %v219_v0 = vld [vmem:[%s3042_s0 + $0x20] sm:$0xff] }
  0x41   :  { %535 = vmatprep.mubr.f32.mxu0 %v216_v1  ;;  %919 = vmatpush2.msra.mxu1 %v135_v2  ;;  %v275_v63 = vld [vmem:[%s3042_s0 + $0x1e0] sm:$0xff]  ;;  %v277_v1 = vld [vmem:[%s3042_s0 + $0x1f0] sm:$0xff]  ;;  %v280_v2 = vld [vmem:[%s3042_s0 + $0x208] sm:$0xff] }
  0x42   :  { %920 = vmatprep.mubr.f32.mxu1 %v218_v3  ;;  %536 = vmatmul.mubr.f32.vlgmr.msra.gmra.mxu0 %v215_v4  ;;  %v282_v3 = vld [vmem:[%s3042_s0 + $0x218] sm:$0xff]  ;;  %v279_v4 = vld [vmem:[%s3042_s0 + $0x200] sm:$0xff] }
  0x43   :  { %921 = vmatmul.mubr.f32.vlgmr.msra.gmra.mxu1 %v217_v5  ;;  %540 = vmatprep.mubr.f32.mxu0 %v220_v6  ;;  %v281_v5 = vld [vmem:[%s3042_s0 + $0x210] sm:$0xff]  ;;  %v284_v6 = vld [vmem:[%s3042_s0 + $0x228] sm:$0xff] }
  0x44   :  { %925 = vmatprep.mubr.f32.mxu1 %v222_v7  ;;  %v286_v7 = vld [vmem:[%s3042_s0 + $0x238] sm:$0xff] }
  0x46   :  { %541 = vmatmul.mubr.f32.gmra.mxu0 %v219_v0  ;;  %v283_v0 = vld [vmem:[%s3042_s0 + $0x220] sm:$0xff] }
  0x47   :  { %926 = vmatmul.mubr.f32.gmra.mxu1 %v221_v8  ;;  %545 = vmatprep.mubr.f32.mxu0 %v224_v9  ;;  %v285_v8 = vld [vmem:[%s3042_s0 + $0x230] sm:$0xff]  ;;  %v288_v9 = vld [vmem:[%s3042_s0 + $0x248] sm:$0xff] }
  0x48   :  { %930 = vmatprep.mubr.f32.mxu1 %v226_v10  ;;  %v290_v10 = vld [vmem:[%s3042_s0 + $0x258] sm:$0xff] }
  0x4a   :  { %546 = vmatmul.mubr.f32.gmra.mxu0 %v223_v11  ;;  %v287_v11 = vld [vmem:[%s3042_s0 + $0x240] sm:$0xff] }
  0x4b   :  { %931 = vmatmul.mubr.f32.gmra.mxu1 %v225_v12  ;;  %550 = vmatprep.mubr.f32.mxu0 %v228_v13  ;;  %v289_v12 = vld [vmem:[%s3042_s0 + $0x250] sm:$0xff]  ;;  %v292_v13 = vld [vmem:[%s3042_s0 + $0x268] sm:$0xff] }
  0x4c   :  { %935 = vmatprep.mubr.f32.mxu1 %v230_v14  ;;  %v294_v14 = vld [vmem:[%s3042_s0 + $0x278] sm:$0xff] }
  0x4e   :  { %551 = vmatmul.mubr.f32.gmra.mxu0 %v227_v15  ;;  %v291_v15 = vld [vmem:[%s3042_s0 + $0x260] sm:$0xff] }
  0x4f   :  { %936 = vmatmul.mubr.f32.gmra.mxu1 %v229_v16  ;;  %555 = vmatprep.mubr.f32.mxu0 %v232_v17  ;;  %v293_v16 = vld [vmem:[%s3042_s0 + $0x270] sm:$0xff]  ;;  %v296_v17 = vld [vmem:[%s3042_s0 + $0x288] sm:$0xff] }
  0x50   :  { %940 = vmatprep.mubr.f32.mxu1 %v234_v18  ;;  %v298_v18 = vld [vmem:[%s3042_s0 + $0x298] sm:$0xff] }
  0x52   :  { %556 = vmatmul.mubr.f32.gmra.mxu0 %v231_v19  ;;  %v295_v19 = vld [vmem:[%s3042_s0 + $0x280] sm:$0xff] }
  0x53   :  { %941 = vmatmul.mubr.f32.gmra.mxu1 %v233_v20  ;;  %560 = vmatprep.mubr.f32.mxu0 %v236_v21  ;;  %v297_v20 = vld [vmem:[%s3042_s0 + $0x290] sm:$0xff]  ;;  %v300_v21 = vld [vmem:[%s3042_s0 + $0x2a8] sm:$0xff] }
  0x54   :  { %945 = vmatprep.mubr.f32.mxu1 %v238_v22  ;;  %v302_v22 = vld [vmem:[%s3042_s0 + $0x2b8] sm:$0xff] }
  0x56   :  { %561 = vmatmul.mubr.f32.gmra.mxu0 %v235_v23  ;;  %v299_v23 = vld [vmem:[%s3042_s0 + $0x2a0] sm:$0xff] }
  0x57   :  { %946 = vmatmul.mubr.f32.gmra.mxu1 %v237_v24  ;;  %565 = vmatprep.mubr.f32.mxu0 %v240_v25  ;;  %v301_v24 = vld [vmem:[%s3042_s0 + $0x2b0] sm:$0xff]  ;;  %v304_v25 = vld [vmem:[%s3042_s0 + $0x2c8] sm:$0xff] }
  0x58   :  { %950 = vmatprep.mubr.f32.mxu1 %v242_v26  ;;  %v306_v26 = vld [vmem:[%s3042_s0 + $0x2d8] sm:$0xff] }
  0x5a   :  { %566 = vmatmul.mubr.f32.gmra.mxu0 %v239_v27  ;;  %v303_v27 = vld [vmem:[%s3042_s0 + $0x2c0] sm:$0xff] }
  0x5b   :  { %951 = vmatmul.mubr.f32.gmra.mxu1 %v241_v28  ;;  %570 = vmatprep.mubr.f32.mxu0 %v244_v29  ;;  %v305_v28 = vld [vmem:[%s3042_s0 + $0x2d0] sm:$0xff]  ;;  %v308_v29 = vld [vmem:[%s3042_s0 + $0x2e8] sm:$0xff] }
  0x5c   :  { %955 = vmatprep.mubr.f32.mxu1 %v246_v30  ;;  %v310_v30 = vld [vmem:[%s3042_s0 + $0x2f8] sm:$0xff] }
  0x5e   :  { %571 = vmatmul.mubr.f32.gmra.mxu0 %v243_v31  ;;  %v307_v31 = vld [vmem:[%s3042_s0 + $0x2e0] sm:$0xff] }
  0x5f   :  { %956 = vmatmul.mubr.f32.gmra.mxu1 %v245_v32  ;;  %575 = vmatprep.mubr.f32.mxu0 %v248_v33  ;;  %v309_v32 = vld [vmem:[%s3042_s0 + $0x2f0] sm:$0xff]  ;;  %v312_v33 = vld [vmem:[%s3042_s0 + $0x308] sm:$0xff] }
  0x60   :  { %960 = vmatprep.mubr.f32.mxu1 %v250_v34  ;;  %v314_v34 = vld [vmem:[%s3042_s0 + $0x318] sm:$0xff] }
  0x62   :  { %576 = vmatmul.mubr.f32.gmra.mxu0 %v247_v35  ;;  %v311_v35 = vld [vmem:[%s3042_s0 + $0x300] sm:$0xff] }
  0x63   :  { %961 = vmatmul.mubr.f32.gmra.mxu1 %v249_v36  ;;  %580 = vmatprep.mubr.f32.mxu0 %v252_v37  ;;  %v313_v36 = vld [vmem:[%s3042_s0 + $0x310] sm:$0xff]  ;;  %v316_v37 = vld [vmem:[%s3042_s0 + $0x328] sm:$0xff] }
  0x64   :  { %965 = vmatprep.mubr.f32.mxu1 %v254_v38  ;;  %v318_v38 = vld [vmem:[%s3042_s0 + $0x338] sm:$0xff] }
  0x66   :  { %581 = vmatmul.mubr.f32.gmra.mxu0 %v251_v39  ;;  %v315_v39 = vld [vmem:[%s3042_s0 + $0x320] sm:$0xff] }
  0x67   :  { %966 = vmatmul.mubr.f32.gmra.mxu1 %v253_v40  ;;  %585 = vmatprep.mubr.f32.mxu0 %v256_v41  ;;  %v317_v40 = vld [vmem:[%s3042_s0 + $0x330] sm:$0xff]  ;;  %v320_v41 = vld [vmem:[%s3042_s0 + $0x348] sm:$0xff] }
  0x68   :  { %970 = vmatprep.mubr.f32.mxu1 %v258_v42  ;;  %v322_v42 = vld [vmem:[%s3042_s0 + $0x358] sm:$0xff] }
  0x6a   :  { %586 = vmatmul.mubr.f32.gmra.mxu0 %v255_v43  ;;  %v319_v43 = vld [vmem:[%s3042_s0 + $0x340] sm:$0xff] }
  0x6b   :  { %971 = vmatmul.mubr.f32.gmra.mxu1 %v257_v44  ;;  %590 = vmatprep.mubr.f32.mxu0 %v260_v45  ;;  %v321_v44 = vld [vmem:[%s3042_s0 + $0x350] sm:$0xff]  ;;  %v324_v45 = vld [vmem:[%s3042_s0 + $0x368] sm:$0xff] }
  0x6c   :  { %975 = vmatprep.mubr.f32.mxu1 %v262_v46  ;;  %v326_v46 = vld [vmem:[%s3042_s0 + $0x378] sm:$0xff] }
  0x6e   :  { %591 = vmatmul.mubr.f32.gmra.mxu0 %v259_v47  ;;  %v323_v47 = vld [vmem:[%s3042_s0 + $0x360] sm:$0xff] }
  0x6f   :  { %976 = vmatmul.mubr.f32.gmra.mxu1 %v261_v48  ;;  %595 = vmatprep.mubr.f32.mxu0 %v264_v49  ;;  %v325_v48 = vld [vmem:[%s3042_s0 + $0x370] sm:$0xff]  ;;  %v328_v49 = vld [vmem:[%s3042_s0 + $0x388] sm:$0xff] }
  0x70   :  { %980 = vmatprep.mubr.f32.mxu1 %v266_v50  ;;  %v330_v50 = vld [vmem:[%s3042_s0 + $0x398] sm:$0xff] }
  0x72   :  { %596 = vmatmul.mubr.f32.gmra.mxu0 %v263_v51  ;;  %v327_v51 = vld [vmem:[%s3042_s0 + $0x380] sm:$0xff] }
  0x73   :  { %981 = vmatmul.mubr.f32.gmra.mxu1 %v265_v52  ;;  %600 = vmatprep.mubr.f32.mxu0 %v268_v53  ;;  %v329_v52 = vld [vmem:[%s3042_s0 + $0x390] sm:$0xff]  ;;  %v332_v53 = vld [vmem:[%s3042_s0 + $0x3a8] sm:$0xff] }
  0x74   :  { %985 = vmatprep.mubr.f32.mxu1 %v270_v54  ;;  %v334_v54 = vld [vmem:[%s3042_s0 + $0x3b8] sm:$0xff] }
  0x76   :  { %601 = vmatmul.mubr.f32.gmra.mxu0 %v267_v55  ;;  %v331_v55 = vld [vmem:[%s3042_s0 + $0x3a0] sm:$0xff] }
  0x77   :  { %986 = vmatmul.mubr.f32.gmra.mxu1 %v269_v56  ;;  %605 = vmatprep.mubr.f32.mxu0 %v272_v57  ;;  %v333_v56 = vld [vmem:[%s3042_s0 + $0x3b0] sm:$0xff]  ;;  %v336_v57 = vld [vmem:[%s3042_s0 + $0x3c8] sm:$0xff] }
  0x78   :  { %990 = vmatprep.mubr.f32.mxu1 %v274_v58  ;;  %v338_v58 = vld [vmem:[%s3042_s0 + $0x3d8] sm:$0xff] }
  0x7a   :  { %606 = vmatmul.mubr.f32.gmra.mxu0 %v271_v59  ;;  %v335_v59 = vld [vmem:[%s3042_s0 + $0x3c0] sm:$0xff] }
  0x7b   :  { %991 = vmatmul.mubr.f32.gmra.mxu1 %v273_v60  ;;  %610 = vmatprep.mubr.f32.mxu0 %v276_v61  ;;  %v337_v60 = vld [vmem:[%s3042_s0 + $0x3d0] sm:$0xff]  ;;  %v340_v61 = vld [vmem:[%s3042_s0 + $0x3e8] sm:$0xff] }
  0x7c   :  { %995 = vmatprep.mubr.f32.mxu1 %v278_v62  ;;  %v342_v62 = vld [vmem:[%s3042_s0 + $0x3f8] sm:$0xff] }
  0x7e   :  { %611 = vmatmul.mubr.f32.gmra.mxu0 %v275_v63  ;;  %v339_v63 = vld [vmem:[%s3042_s0 + $0x3e0] sm:$0xff] }
  0x7f   :  { %996 = vmatmul.mubr.f32.gmra.mxu1 %v277_v1  ;;  %615 = vmatprep.mubr.f32.mxu0 %v280_v2  ;;  %v341_v1 = vld [vmem:[%s3042_s0 + $0x3f0] sm:$0xff]  ;;  %v344_v2 = vld [vmem:[%s3042_s0 + $0x408] sm:$0xff] }
  0x80   :  { %1000 = vmatprep.mubr.f32.mxu1 %v282_v3  ;;  %v346_v3 = vld [vmem:[%s3042_s0 + $0x418] sm:$0xff] }
  0x82   :  { %616 = vmatmul.mubr.f32.gmra.mxu0 %v279_v4  ;;  %v343_v4 = vld [vmem:[%s3042_s0 + $0x400] sm:$0xff] }
  0x83   :  { %1001 = vmatmul.mubr.f32.gmra.mxu1 %v281_v5  ;;  %620 = vmatprep.mubr.f32.mxu0 %v284_v6  ;;  %v345_v5 = vld [vmem:[%s3042_s0 + $0x410] sm:$0xff]  ;;  %v348_v6 = vld [vmem:[%s3042_s0 + $0x428] sm:$0xff] }
  0x84   :  { %1005 = vmatprep.mubr.f32.mxu1 %v286_v7  ;;  %v350_v7 = vld [vmem:[%s3042_s0 + $0x438] sm:$0xff] }
  0x86   :  { %621 = vmatmul.mubr.f32.gmra.mxu0 %v283_v0  ;;  %v347_v0 = vld [vmem:[%s3042_s0 + $0x420] sm:$0xff] }
  0x87   :  { %1006 = vmatmul.mubr.f32.gmra.mxu1 %v285_v8  ;;  %625 = vmatprep.mubr.f32.mxu0 %v288_v9  ;;  %v349_v8 = vld [vmem:[%s3042_s0 + $0x430] sm:$0xff]  ;;  %v352_v9 = vld [vmem:[%s3042_s0 + $0x448] sm:$0xff] }
  0x88   :  { %1010 = vmatprep.mubr.f32.mxu1 %v290_v10  ;;  %v354_v10 = vld [vmem:[%s3042_s0 + $0x458] sm:$0xff] }
  0x8a   :  { %626 = vmatmul.mubr.f32.gmra.mxu0 %v287_v11  ;;  %v351_v11 = vld [vmem:[%s3042_s0 + $0x440] sm:$0xff] }
  0x8b   :  { %1011 = vmatmul.mubr.f32.gmra.mxu1 %v289_v12  ;;  %630 = vmatprep.mubr.f32.mxu0 %v292_v13  ;;  %v353_v12 = vld [vmem:[%s3042_s0 + $0x450] sm:$0xff]  ;;  %v356_v13 = vld [vmem:[%s3042_s0 + $0x468] sm:$0xff] }
  0x8c   :  { %1015 = vmatprep.mubr.f32.mxu1 %v294_v14  ;;  %v358_v14 = vld [vmem:[%s3042_s0 + $0x478] sm:$0xff] }
  0x8e   :  { %631 = vmatmul.mubr.f32.gmra.mxu0 %v291_v15  ;;  %v355_v15 = vld [vmem:[%s3042_s0 + $0x460] sm:$0xff] }
  0x8f   :  { %1016 = vmatmul.mubr.f32.gmra.mxu1 %v293_v16  ;;  %635 = vmatprep.mubr.f32.mxu0 %v296_v17  ;;  %v357_v16 = vld [vmem:[%s3042_s0 + $0x470] sm:$0xff]  ;;  %v360_v17 = vld [vmem:[%s3042_s0 + $0x488] sm:$0xff] }
  0x90   :  { %1020 = vmatprep.mubr.f32.mxu1 %v298_v18  ;;  %v362_v18 = vld [vmem:[%s3042_s0 + $0x498] sm:$0xff] }
  0x92   :  { %636 = vmatmul.mubr.f32.gmra.mxu0 %v295_v19  ;;  %v359_v19 = vld [vmem:[%s3042_s0 + $0x480] sm:$0xff] }
  0x93   :  { %1021 = vmatmul.mubr.f32.gmra.mxu1 %v297_v20  ;;  %640 = vmatprep.mubr.f32.mxu0 %v300_v21  ;;  %v361_v20 = vld [vmem:[%s3042_s0 + $0x490] sm:$0xff]  ;;  %v364_v21 = vld [vmem:[%s3042_s0 + $0x4a8] sm:$0xff] }
  0x94   :  { %1025 = vmatprep.mubr.f32.mxu1 %v302_v22  ;;  %v366_v22 = vld [vmem:[%s3042_s0 + $0x4b8] sm:$0xff] }
  0x96   :  { %641 = vmatmul.mubr.f32.gmra.mxu0 %v299_v23  ;;  %v363_v23 = vld [vmem:[%s3042_s0 + $0x4a0] sm:$0xff] }
  0x97   :  { %1026 = vmatmul.mubr.f32.gmra.mxu1 %v301_v24  ;;  %645 = vmatprep.mubr.f32.mxu0 %v304_v25  ;;  %v365_v24 = vld [vmem:[%s3042_s0 + $0x4b0] sm:$0xff]  ;;  %v368_v25 = vld [vmem:[%s3042_s0 + $0x4c8] sm:$0xff] }
  0x98   :  { %1030 = vmatprep.mubr.f32.mxu1 %v306_v26  ;;  %v370_v26 = vld [vmem:[%s3042_s0 + $0x4d8] sm:$0xff] }
  0x9a   :  { %646 = vmatmul.mubr.f32.gmra.mxu0 %v303_v27  ;;  %v367_v27 = vld [vmem:[%s3042_s0 + $0x4c0] sm:$0xff] }
  0x9b   :  { %1031 = vmatmul.mubr.f32.gmra.mxu1 %v305_v28  ;;  %650 = vmatprep.mubr.f32.mxu0 %v308_v29  ;;  %v369_v28 = vld [vmem:[%s3042_s0 + $0x4d0] sm:$0xff]  ;;  %v372_v29 = vld [vmem:[%s3042_s0 + $0x4e8] sm:$0xff] }
  0x9c   :  { %1035 = vmatprep.mubr.f32.mxu1 %v310_v30  ;;  %v374_v30 = vld [vmem:[%s3042_s0 + $0x4f8] sm:$0xff] }
  0x9e   :  { %651 = vmatmul.mubr.f32.gmra.mxu0 %v307_v31  ;;  %v371_v31 = vld [vmem:[%s3042_s0 + $0x4e0] sm:$0xff] }
  0x9f   :  { %1036 = vmatmul.mubr.f32.gmra.mxu1 %v309_v32  ;;  %655 = vmatprep.mubr.f32.mxu0 %v312_v33  ;;  %v373_v32 = vld [vmem:[%s3042_s0 + $0x4f0] sm:$0xff]  ;;  %v376_v33 = vld [vmem:[%s3042_s0 + $0x508] sm:$0xff] }
  0xa0   :  { %1040 = vmatprep.mubr.f32.mxu1 %v314_v34  ;;  %v378_v34 = vld [vmem:[%s3042_s0 + $0x518] sm:$0xff] }
  0xa2   :  { %656 = vmatmul.mubr.f32.gmra.mxu0 %v311_v35  ;;  %v375_v35 = vld [vmem:[%s3042_s0 + $0x500] sm:$0xff] }
  0xa3   :  { %1041 = vmatmul.mubr.f32.gmra.mxu1 %v313_v36  ;;  %660 = vmatprep.mubr.f32.mxu0 %v316_v37  ;;  %v377_v36 = vld [vmem:[%s3042_s0 + $0x510] sm:$0xff]  ;;  %v380_v37 = vld [vmem:[%s3042_s0 + $0x528] sm:$0xff] }
  0xa4   :  { %1045 = vmatprep.mubr.f32.mxu1 %v318_v38  ;;  %v382_v38 = vld [vmem:[%s3042_s0 + $0x538] sm:$0xff] }
  0xa6   :  { %661 = vmatmul.mubr.f32.gmra.mxu0 %v315_v39  ;;  %v379_v39 = vld [vmem:[%s3042_s0 + $0x520] sm:$0xff] }
  0xa7   :  { %1046 = vmatmul.mubr.f32.gmra.mxu1 %v317_v40  ;;  %665 = vmatprep.mubr.f32.mxu0 %v320_v41  ;;  %v381_v40 = vld [vmem:[%s3042_s0 + $0x530] sm:$0xff]  ;;  %v384_v41 = vld [vmem:[%s3042_s0 + $0x548] sm:$0xff] }
  0xa8   :  { %1050 = vmatprep.mubr.f32.mxu1 %v322_v42  ;;  %v386_v42 = vld [vmem:[%s3042_s0 + $0x558] sm:$0xff] }
  0xaa   :  { %666 = vmatmul.mubr.f32.gmra.mxu0 %v319_v43  ;;  %v383_v43 = vld [vmem:[%s3042_s0 + $0x540] sm:$0xff] }
  0xab   :  { %1051 = vmatmul.mubr.f32.gmra.mxu1 %v321_v44  ;;  %670 = vmatprep.mubr.f32.mxu0 %v324_v45  ;;  %v385_v44 = vld [vmem:[%s3042_s0 + $0x550] sm:$0xff]  ;;  %v388_v45 = vld [vmem:[%s3042_s0 + $0x568] sm:$0xff] }
  0xac   :  { %1055 = vmatprep.mubr.f32.mxu1 %v326_v46  ;;  %v390_v46 = vld [vmem:[%s3042_s0 + $0x578] sm:$0xff] }
  0xae   :  { %671 = vmatmul.mubr.f32.gmra.mxu0 %v323_v47  ;;  %v387_v47 = vld [vmem:[%s3042_s0 + $0x560] sm:$0xff] }
  0xaf   :  { %1056 = vmatmul.mubr.f32.gmra.mxu1 %v325_v48  ;;  %675 = vmatprep.mubr.f32.mxu0 %v328_v49  ;;  %v389_v48 = vld [vmem:[%s3042_s0 + $0x570] sm:$0xff]  ;;  %v392_v49 = vld [vmem:[%s3042_s0 + $0x588] sm:$0xff] }
  0xb0   :  { %1060 = vmatprep.mubr.f32.mxu1 %v330_v50  ;;  %v394_v50 = vld [vmem:[%s3042_s0 + $0x598] sm:$0xff] }
  0xb2   :  { %676 = vmatmul.mubr.f32.gmra.mxu0 %v327_v51  ;;  %v391_v51 = vld [vmem:[%s3042_s0 + $0x580] sm:$0xff] }
  0xb3   :  { %1061 = vmatmul.mubr.f32.gmra.mxu1 %v329_v52  ;;  %680 = vmatprep.mubr.f32.mxu0 %v332_v53  ;;  %v393_v52 = vld [vmem:[%s3042_s0 + $0x590] sm:$0xff]  ;;  %v396_v53 = vld [vmem:[%s3042_s0 + $0x5a8] sm:$0xff] }
  0xb4   :  { %1065 = vmatprep.mubr.f32.mxu1 %v334_v54  ;;  %v398_v54 = vld [vmem:[%s3042_s0 + $0x5b8] sm:$0xff] }
  0xb6   :  { %681 = vmatmul.mubr.f32.gmra.mxu0 %v331_v55  ;;  %v395_v55 = vld [vmem:[%s3042_s0 + $0x5a0] sm:$0xff] }
  0xb7   :  { %1066 = vmatmul.mubr.f32.gmra.mxu1 %v333_v56  ;;  %685 = vmatprep.mubr.f32.mxu0 %v336_v57  ;;  %v397_v56 = vld [vmem:[%s3042_s0 + $0x5b0] sm:$0xff]  ;;  %v400_v57 = vld [vmem:[%s3042_s0 + $0x5c8] sm:$0xff] }
  0xb8   :  { %1070 = vmatprep.mubr.f32.mxu1 %v338_v58  ;;  %v402_v58 = vld [vmem:[%s3042_s0 + $0x5d8] sm:$0xff] }
  0xba   :  { %686 = vmatmul.mubr.f32.gmra.mxu0 %v335_v59  ;;  %v399_v59 = vld [vmem:[%s3042_s0 + $0x5c0] sm:$0xff] }
  0xbb   :  { %1071 = vmatmul.mubr.f32.gmra.mxu1 %v337_v60  ;;  %690 = vmatprep.mubr.f32.mxu0 %v340_v61  ;;  %v401_v60 = vld [vmem:[%s3042_s0 + $0x5d0] sm:$0xff]  ;;  %v404_v61 = vld [vmem:[%s3042_s0 + $0x5e8] sm:$0xff] }
  0xbc   :  { %1075 = vmatprep.mubr.f32.mxu1 %v342_v62  ;;  %v406_v62 = vld [vmem:[%s3042_s0 + $0x5f8] sm:$0xff] }
  0xbe   :  { %691 = vmatmul.mubr.f32.gmra.mxu0 %v339_v63  ;;  %v403_v63 = vld [vmem:[%s3042_s0 + $0x5e0] sm:$0xff] }
  0xbf   :  { %1076 = vmatmul.mubr.f32.gmra.mxu1 %v341_v1  ;;  %695 = vmatprep.mubr.f32.mxu0 %v344_v2  ;;  %v405_v1 = vld [vmem:[%s3042_s0 + $0x5f0] sm:$0xff]  ;;  %v408_v2 = vld [vmem:[%s3042_s0 + $0x608] sm:$0xff] }
  0xc0   :  { %1080 = vmatprep.mubr.f32.mxu1 %v346_v3  ;;  %v410_v3 = vld [vmem:[%s3042_s0 + $0x618] sm:$0xff] }
  0xc2   :  { %696 = vmatmul.mubr.f32.gmra.mxu0 %v343_v4  ;;  %v407_v4 = vld [vmem:[%s3042_s0 + $0x600] sm:$0xff] }
  0xc3   :  { %1081 = vmatmul.mubr.f32.gmra.mxu1 %v345_v5  ;;  %700 = vmatprep.mubr.f32.mxu0 %v348_v6  ;;  %v409_v5 = vld [vmem:[%s3042_s0 + $0x610] sm:$0xff]  ;;  %v412_v6 = vld [vmem:[%s3042_s0 + $0x628] sm:$0xff] }
  0xc4   :  { %1085 = vmatprep.mubr.f32.mxu1 %v350_v7  ;;  %v414_v7 = vld [vmem:[%s3042_s0 + $0x638] sm:$0xff] }
  0xc6   :  { %701 = vmatmul.mubr.f32.gmra.mxu0 %v347_v0 }
  0xc7   :  { %1086 = vmatmul.mubr.f32.gmra.mxu1 %v349_v8  ;;  %705 = vmatprep.mubr.f32.mxu0 %v352_v9 }
  0xc8   :  { %1090 = vmatprep.mubr.f32.mxu1 %v354_v10  ;;  %v411_v10 = vld [vmem:[%s3042_s0 + $0x620] sm:$0xff] }
  0xca   :  { %706 = vmatmul.mubr.f32.gmra.mxu0 %v351_v11  ;;  %v413_v11 = vld [vmem:[%s3042_s0 + $0x630] sm:$0xff] }
  0xcb   :  { %1091 = vmatmul.mubr.f32.gmra.mxu1 %v353_v12  ;;  %710 = vmatprep.mubr.f32.mxu0 %v356_v13  ;;  %v2536_v12 = vld [vmem:[%s3043_s2] ss:$0 sm:$0xff] }
  0xcc   :  { %1095 = vmatprep.mubr.f32.mxu1 %v358_v14 }
  0xce   :  { %711 = vmatmul.mubr.f32.gmra.mxu0 %v355_v15  ;;  %v416_v15 = vld [vmem:[%s3042_s0 + $0x648] sm:$0xff] }
  0xcf   :  { %1096 = vmatmul.mubr.f32.gmra.mxu1 %v357_v16  ;;  %715 = vmatprep.mubr.f32.mxu0 %v360_v17  ;;  %v418_v16 = vld [vmem:[%s3042_s0 + $0x658] sm:$0xff]  ;;  %v2547_v17 = vld [vmem:[%s3044_s3] ss:$0 sm:$0xff] }
  0xd0   :  { %1100 = vmatprep.mubr.f32.mxu1 %v362_v18 }
  0xd2   :  { %716 = vmatmul.mubr.f32.gmra.mxu0 %v359_v19 }
  0xd3   :  { %1101 = vmatmul.mubr.f32.gmra.mxu1 %v361_v20  ;;  %720 = vmatprep.mubr.f32.mxu0 %v364_v21 }
  0xd4   :  { %1105 = vmatprep.mubr.f32.mxu1 %v366_v22  ;;  %v415_v22 = vld [vmem:[%s3042_s0 + $0x640] sm:$0xff] }
  0xd6   :  { %721 = vmatmul.mubr.f32.gmra.mxu0 %v363_v23  ;;  %v417_v23 = vld [vmem:[%s3042_s0 + $0x650] sm:$0xff] }
  0xd7   :  { %1106 = vmatmul.mubr.f32.gmra.mxu1 %v365_v24  ;;  %725 = vmatprep.mubr.f32.mxu0 %v368_v25 }
  0xd8   :  { %1110 = vmatprep.mubr.f32.mxu1 %v370_v26  ;;  %v420_v26 = vld [vmem:[%s3042_s0 + $0x668] sm:$0xff] }
  0xda   :  { %726 = vmatmul.mubr.f32.gmra.mxu0 %v367_v27  ;;  %v422_v27 = vld [vmem:[%s3042_s0 + $0x678] sm:$0xff] }
  0xdb   :  { %1111 = vmatmul.mubr.f32.gmra.mxu1 %v369_v28  ;;  %730 = vmatprep.mubr.f32.mxu0 %v372_v29 }
  0xdc   :  { %1115 = vmatprep.mubr.f32.mxu1 %v374_v30 }
  0xde   :  { %731 = vmatmul.mubr.f32.gmra.mxu0 %v371_v31 }
  0xdf   :  { %1116 = vmatmul.mubr.f32.gmra.mxu1 %v373_v32  ;;  %735 = vmatprep.mubr.f32.mxu0 %v376_v33  ;;  %v419_v33 = vld [vmem:[%s3042_s0 + $0x660] sm:$0xff] }
  0xe0   :  { %1120 = vmatprep.mubr.f32.mxu1 %v378_v34  ;;  %v421_v34 = vld [vmem:[%s3042_s0 + $0x670] sm:$0xff] }
  0xe2   :  { %736 = vmatmul.mubr.f32.gmra.mxu0 %v375_v35 }
  0xe3   :  { %1121 = vmatmul.mubr.f32.gmra.mxu1 %v377_v36  ;;  %740 = vmatprep.mubr.f32.mxu0 %v380_v37  ;;  %v424_v37 = vld [vmem:[%s3042_s0 + $0x688] sm:$0xff] }
  0xe4   :  { %1125 = vmatprep.mubr.f32.mxu1 %v382_v38  ;;  %v426_v38 = vld [vmem:[%s3042_s0 + $0x698] sm:$0xff] }
  0xe6   :  { %741 = vmatmul.mubr.f32.gmra.mxu0 %v379_v39 }
  0xe7   :  { %1126 = vmatmul.mubr.f32.gmra.mxu1 %v381_v40  ;;  %745 = vmatprep.mubr.f32.mxu0 %v384_v41 }
  0xe8   :  { %1130 = vmatprep.mubr.f32.mxu1 %v386_v42 }
  0xea   :  { %746 = vmatmul.mubr.f32.gmra.mxu0 %v383_v43 }
  0xeb   :  { %1131 = vmatmul.mubr.f32.gmra.mxu1 %v385_v44  ;;  %750 = vmatprep.mubr.f32.mxu0 %v388_v45  ;;  %v423_v44 = vld [vmem:[%s3042_s0 + $0x680] sm:$0xff]  ;;  %v425_v45 = vld [vmem:[%s3042_s0 + $0x690] sm:$0xff] }
  0xec   :  { %1135 = vmatprep.mubr.f32.mxu1 %v390_v46 }
  0xee   :  { %751 = vmatmul.mubr.f32.gmra.mxu0 %v387_v47 }
  0xef   :  { %1136 = vmatmul.mubr.f32.gmra.mxu1 %v389_v48  ;;  %755 = vmatprep.mubr.f32.mxu0 %v392_v49  ;;  %v428_v48 = vld [vmem:[%s3042_s0 + $0x6a8] sm:$0xff]  ;;  %v430_v49 = vld [vmem:[%s3042_s0 + $0x6b8] sm:$0xff] }
  0xf0   :  { %1140 = vmatprep.mubr.f32.mxu1 %v394_v50 }
  0xf2   :  { %756 = vmatmul.mubr.f32.gmra.mxu0 %v391_v51 }
  0xf3   :  { %1141 = vmatmul.mubr.f32.gmra.mxu1 %v393_v52  ;;  %760 = vmatprep.mubr.f32.mxu0 %v396_v53 }
  0xf4   :  { %1145 = vmatprep.mubr.f32.mxu1 %v398_v54 }
  0xf6   :  { %761 = vmatmul.mubr.f32.gmra.mxu0 %v395_v55  ;;  %v427_v55 = vld [vmem:[%s3042_s0 + $0x6a0] sm:$0xff] }
  0xf7   :  { %1146 = vmatmul.mubr.f32.gmra.mxu1 %v397_v56  ;;  %765 = vmatprep.mubr.f32.mxu0 %v400_v57  ;;  %v429_v56 = vld [vmem:[%s3042_s0 + $0x6b0] sm:$0xff] }
  0xf8   :  { %1150 = vmatprep.mubr.f32.mxu1 %v402_v58 }
  0xfa   :  { %766 = vmatmul.mubr.f32.gmra.mxu0 %v399_v59  ;;  %v432_v59 = vld [vmem:[%s3042_s0 + $0x6c8] sm:$0xff] }
  0xfb   :  { %1151 = vmatmul.mubr.f32.gmra.mxu1 %v401_v60  ;;  %770 = vmatprep.mubr.f32.mxu0 %v404_v61  ;;  %v434_v60 = vld [vmem:[%s3042_s0 + $0x6d8] sm:$0xff] }
  0xfc   :  { %1155 = vmatprep.mubr.f32.mxu1 %v406_v62 }
  0xfe   :  { %771 = vmatmul.mubr.f32.gmra.mxu0 %v403_v63 }
  0xff   :  { %1156 = vmatmul.mubr.f32.gmra.mxu1 %v405_v1  ;;  %775 = vmatprep.mubr.f32.mxu0 %v408_v2 }
 0x100   :  { %1160 = vmatprep.mubr.f32.mxu1 %v410_v3  ;;  %v431_v3 = vld [vmem:[%s3042_s0 + $0x6c0] sm:$0xff] }
 0x102   :  { %v537_v0 = vpop.f32.mrf.mxu0  ;;  %776 = vmatmul.mubr.f32.gmra.mxu0 %v407_v4  ;;  %v433_v4 = vld [vmem:[%s3042_s0 + $0x6d0] sm:$0xff] }
 0x103   :  { %v922_v8 = vpop.f32.mrf.mxu1  ;;  %1161 = vmatmul.mubr.f32.gmra.mxu1 %v409_v5  ;;  %780 = vmatprep.mubr.f32.mxu0 %v412_v6 }
 0x104   :  { %v923_v9 = vadd.f32 %v922_v8, %v537_v0  ;;  %1165 = vmatprep.mubr.f32.mxu1 %v414_v7  ;;  %v539_v13 = vpop.f32.mrf.mxu0  ;;  %v436_v7 = vld [vmem:[%s3042_s0 + $0x6e8] sm:$0xff]  ;;  %v438_v0 = vld [vmem:[%s3042_s0 + $0x6f8] sm:$0xff] }
 0x105   :  { %v924_v14 = vpop.f32.mrf.mxu1 }
 0x106   :  { %v542_v18 = vpop.f32.mrf.mxu0  ;;  %781 = vmatmul.mubr.f32.gmra.mxu0 %v411_v10  ;;  %v1443_v20 = vadd.f32 %v2536_v12, %v923_v9  ;;  %v435_v14 = vld [vmem:[%s3042_s0 + $0x6e0] sm:$0xff] }
 0x107   :  { %v927_v19 = vpop.f32.mrf.mxu1  ;;  %1166 = vmatmul.mubr.f32.gmra.mxu1 %v413_v11  ;;  %785 = vmatprep.mubr.f32.mxu0 %v416_v15  ;;  %v437_v15 = vld [vmem:[%s3042_s0 + $0x6f0] sm:$0xff] }
 0x108   :  { %v928_v21 = vadd.f32 %v927_v19, %v542_v18  ;;  %1170 = vmatprep.mubr.f32.mxu1 %v418_v16  ;;  %v544_v24 = vpop.f32.mrf.mxu0  ;;  %v1514_v28 = vmax.f32 %v1443_v20, %v2547_v17  ;;  %v440_v19 = vld [vmem:[%s3042_s0 + $0x708] sm:$0xff]  ;;  %v442_v20 = vld [vmem:[%s3042_s0 + $0x718] sm:$0xff] }
 0x109   :  { %v929_v25 = vpop.f32.mrf.mxu1 }
 0x10a   :  { %v547_v29 = vpop.f32.mrf.mxu0  ;;  %786 = vmatmul.mubr.f32.gmra.mxu0 %v415_v22  ;;  %1578 = vst [vmem:[%s3045_s4] sm:$0xff] %v1514_v28  ;;  %v1444_v31 = vadd.f32 %v2536_v12, %v928_v21 }
 0x10b   :  { %v932_v30 = vpop.f32.mrf.mxu1  ;;  %1171 = vmatmul.mubr.f32.gmra.mxu1 %v417_v23  ;;  %790 = vmatprep.mubr.f32.mxu0 %v420_v26  ;;  %v439_v26 = vld [vmem:[%s3042_s0 + $0x700] sm:$0xff] }
 0x10c   :  { %v933_v32 = vadd.f32 %v932_v30, %v547_v29  ;;  %1175 = vmatprep.mubr.f32.mxu1 %v422_v27  ;;  %v549_v35 = vpop.f32.mrf.mxu0  ;;  %v1515_v39 = vmax.f32 %v1444_v31, %v2547_v17  ;;  %v441_v27 = vld [vmem:[%s3042_s0 + $0x710] sm:$0xff]  ;;  %v444_v30 = vld [vmem:[%s3042_s0 + $0x728] sm:$0xff]  ;;  %v446_v31 = vld [vmem:[%s3042_s0 + $0x738] sm:$0xff] }
 0x10d   :  { %v934_v36 = vpop.f32.mrf.mxu1 }
 0x10e   :  { %v552_v40 = vpop.f32.mrf.mxu0  ;;  %791 = vmatmul.mubr.f32.gmra.mxu0 %v419_v33  ;;  %1579 = vst [vmem:[%s3045_s4 + $0x8] sm:$0xff] %v1515_v39  ;;  %v1445_v42 = vadd.f32 %v2536_v12, %v933_v32 }
 0x10f   :  { %v937_v41 = vpop.f32.mrf.mxu1  ;;  %1176 = vmatmul.mubr.f32.gmra.mxu1 %v421_v34  ;;  %795 = vmatprep.mubr.f32.mxu0 %v424_v37  ;;  %v443_v37 = vld [vmem:[%s3042_s0 + $0x720] sm:$0xff] }
 0x110   :  { %v938_v43 = vadd.f32 %v937_v41, %v552_v40  ;;  %1180 = vmatprep.mubr.f32.mxu1 %v426_v38  ;;  %v554_v46 = vpop.f32.mrf.mxu0  ;;  %v1516_v50 = vmax.f32 %v1445_v42, %v2547_v17  ;;  %v445_v38 = vld [vmem:[%s3042_s0 + $0x730] sm:$0xff]  ;;  %v448_v41 = vld [vmem:[%s3042_s0 + $0x748] sm:$0xff]  ;;  %v450_v42 = vld [vmem:[%s3042_s0 + $0x758] sm:$0xff] }
 0x111   :  { %v939_v47 = vpop.f32.mrf.mxu1 }
 0x112   :  { %v557_v51 = vpop.f32.mrf.mxu0  ;;  %796 = vmatmul.mubr.f32.gmra.mxu0 %v423_v44  ;;  %1580 = vst [vmem:[%s3045_s4 + $0x10] sm:$0xff] %v1516_v50  ;;  %v1446_v53 = vadd.f32 %v2536_v12, %v938_v43 }
 0x113   :  { %v942_v52 = vpop.f32.mrf.mxu1  ;;  %1181 = vmatmul.mubr.f32.gmra.mxu1 %v425_v45  ;;  %800 = vmatprep.mubr.f32.mxu0 %v428_v48  ;;  %v447_v48 = vld [vmem:[%s3042_s0 + $0x740] sm:$0xff] }
 0x114   :  { %v943_v54 = vadd.f32 %v942_v52, %v557_v51  ;;  %1185 = vmatprep.mubr.f32.mxu1 %v430_v49  ;;  %v559_v57 = vpop.f32.mrf.mxu0  ;;  %v1517_v61 = vmax.f32 %v1446_v53, %v2547_v17  ;;  %v449_v49 = vld [vmem:[%s3042_s0 + $0x750] sm:$0xff]  ;;  %v452_v52 = vld [vmem:[%s3042_s0 + $0x768] sm:$0xff]  ;;  %v454_v53 = vld [vmem:[%s3042_s0 + $0x778] sm:$0xff] }
 0x115   :  { %v944_v58 = vpop.f32.mrf.mxu1 }
 0x116   :  { %v562_v62 = vpop.f32.mrf.mxu0  ;;  %801 = vmatmul.mubr.f32.gmra.mxu0 %v427_v55  ;;  %1581 = vst [vmem:[%s3045_s4 + $0x18] sm:$0xff] %v1517_v61  ;;  %v1447_v1 = vadd.f32 %v2536_v12, %v943_v54 }
 0x117   :  { %v947_v63 = vpop.f32.mrf.mxu1  ;;  %1186 = vmatmul.mubr.f32.gmra.mxu1 %v429_v56  ;;  %805 = vmatprep.mubr.f32.mxu0 %v432_v59  ;;  %v451_v59 = vld [vmem:[%s3042_s0 + $0x760] sm:$0xff] }
 0x118   :  { %v948_v2 = vadd.f32 %v947_v63, %v562_v62  ;;  %1190 = vmatprep.mubr.f32.mxu1 %v434_v60  ;;  %v564_v5 = vpop.f32.mrf.mxu0  ;;  %v1518_v8 = vmax.f32 %v1447_v1, %v2547_v17  ;;  %v453_v60 = vld [vmem:[%s3042_s0 + $0x770] sm:$0xff]  ;;  %v456_v63 = vld [vmem:[%s3042_s0 + $0x788] sm:$0xff]  ;;  %v458_v1 = vld [vmem:[%s3042_s0 + $0x798] sm:$0xff] }
 0x119   :  { %v949_v6 = vpop.f32.mrf.mxu1 }
 0x11a   :  { %v567_v9 = vpop.f32.mrf.mxu0  ;;  %806 = vmatmul.mubr.f32.gmra.mxu0 %v431_v3  ;;  %1582 = vst [vmem:[%s3045_s4 + $0x20] sm:$0xff] %v1518_v8  ;;  %v1448_v11 = vadd.f32 %v2536_v12, %v948_v2 }
 0x11b   :  { %v952_v10 = vpop.f32.mrf.mxu1  ;;  %1191 = vmatmul.mubr.f32.gmra.mxu1 %v433_v4  ;;  %810 = vmatprep.mubr.f32.mxu0 %v436_v7  ;;  %v455_v7 = vld [vmem:[%s3042_s0 + $0x780] sm:$0xff] }
 0x11c   :  { %v953_v13 = vadd.f32 %v952_v10, %v567_v9  ;;  %1195 = vmatprep.mubr.f32.mxu1 %v438_v0  ;;  %v569_v16 = vpop.f32.mrf.mxu0  ;;  %v1519_v21 = vmax.f32 %v1448_v11, %v2547_v17  ;;  %v457_v0 = vld [vmem:[%s3042_s0 + $0x790] sm:$0xff]  ;;  %v460_v10 = vld [vmem:[%s3042_s0 + $0x7a8] sm:$0xff]  ;;  %v462_v11 = vld [vmem:[%s3042_s0 + $0x7b8] sm:$0xff] }
 0x11d   :  { %v954_v18 = vpop.f32.mrf.mxu1 }
 0x11e   :  { %v572_v22 = vpop.f32.mrf.mxu0  ;;  %811 = vmatmul.mubr.f32.gmra.mxu0 %v435_v14  ;;  %1583 = vst [vmem:[%s3045_s4 + $0x28] sm:$0xff] %v1519_v21  ;;  %v1449_v24 = vadd.f32 %v2536_v12, %v953_v13 }
 0x11f   :  { %v957_v23 = vpop.f32.mrf.mxu1  ;;  %1196 = vmatmul.mubr.f32.gmra.mxu1 %v437_v15  ;;  %815 = vmatprep.mubr.f32.mxu0 %v440_v19  ;;  %v459_v19 = vld [vmem:[%s3042_s0 + $0x7a0] sm:$0xff] }
 0x120   :  { %v958_v25 = vadd.f32 %v957_v23, %v572_v22  ;;  %1200 = vmatprep.mubr.f32.mxu1 %v442_v20  ;;  %v574_v28 = vpop.f32.mrf.mxu0  ;;  %v1520_v32 = vmax.f32 %v1449_v24, %v2547_v17  ;;  %v461_v20 = vld [vmem:[%s3042_s0 + $0x7b0] sm:$0xff]  ;;  %v464_v23 = vld [vmem:[%s3042_s0 + $0x7c8] sm:$0xff]  ;;  %v466_v24 = vld [vmem:[%s3042_s0 + $0x7d8] sm:$0xff] }
 0x121   :  { %v959_v29 = vpop.f32.mrf.mxu1 }
 0x122   :  { %v577_v33 = vpop.f32.mrf.mxu0  ;;  %816 = vmatmul.mubr.f32.gmra.mxu0 %v439_v26  ;;  %1584 = vst [vmem:[%s3045_s4 + $0x30] sm:$0xff] %v1520_v32  ;;  %v1450_v35 = vadd.f32 %v2536_v12, %v958_v25 }
 0x123   :  { %v962_v34 = vpop.f32.mrf.mxu1  ;;  %1201 = vmatmul.mubr.f32.gmra.mxu1 %v441_v27  ;;  %820 = vmatprep.mubr.f32.mxu0 %v444_v30  ;;  %v463_v30 = vld [vmem:[%s3042_s0 + $0x7c0] sm:$0xff] }
 0x124   :  { %v963_v36 = vadd.f32 %v962_v34, %v577_v33  ;;  %1205 = vmatprep.mubr.f32.mxu1 %v446_v31  ;;  %v579_v39 = vpop.f32.mrf.mxu0  ;;  %v1521_v43 = vmax.f32 %v1450_v35, %v2547_v17  ;;  %v465_v31 = vld [vmem:[%s3042_s0 + $0x7d0] sm:$0xff]  ;;  %v468_v34 = vld [vmem:[%s3042_s0 + $0x7e8] sm:$0xff]  ;;  %v470_v35 = vld [vmem:[%s3042_s0 + $0x7f8] sm:$0xff] }
 0x125   :  { %v964_v40 = vpop.f32.mrf.mxu1 }
 0x126   :  { %v582_v44 = vpop.f32.mrf.mxu0  ;;  %821 = vmatmul.mubr.f32.gmra.mxu0 %v443_v37  ;;  %1585 = vst [vmem:[%s3045_s4 + $0x38] sm:$0xff] %v1521_v43  ;;  %v1451_v46 = vadd.f32 %v2536_v12, %v963_v36 }
 0x127   :  { %v967_v45 = vpop.f32.mrf.mxu1  ;;  %1206 = vmatmul.mubr.f32.gmra.mxu1 %v445_v38  ;;  %825 = vmatprep.mubr.f32.mxu0 %v448_v41  ;;  %v467_v41 = vld [vmem:[%s3042_s0 + $0x7e0] sm:$0xff] }
 0x128   :  { %v968_v47 = vadd.f32 %v967_v45, %v582_v44  ;;  %1210 = vmatprep.mubr.f32.mxu1 %v450_v42  ;;  %v584_v50 = vpop.f32.mrf.mxu0  ;;  %v1522_v54 = vmax.f32 %v1451_v46, %v2547_v17  ;;  %v469_v42 = vld [vmem:[%s3042_s0 + $0x7f0] sm:$0xff] }
 0x129   :  { %v969_v51 = vpop.f32.mrf.mxu1 }
 0x12a   :  { %v587_v55 = vpop.f32.mrf.mxu0  ;;  %826 = vmatmul.mubr.f32.gmra.mxu0 %v447_v48  ;;  %1586 = vst [vmem:[%s3045_s4 + $0x40] sm:$0xff] %v1522_v54  ;;  %v1452_v57 = vadd.f32 %v2536_v12, %v968_v47 }
 0x12b   :  { %v972_v56 = vpop.f32.mrf.mxu1  ;;  %1211 = vmatmul.mubr.f32.gmra.mxu1 %v449_v49  ;;  %830 = vmatprep.mubr.f32.mxu0 %v452_v52 }
 0x12c   :  { %v973_v58 = vadd.f32 %v972_v56, %v587_v55  ;;  %1215 = vmatprep.mubr.f32.mxu1 %v454_v53  ;;  %v589_v61 = vpop.f32.mrf.mxu0  ;;  %v1523_v2 = vmax.f32 %v1452_v57, %v2547_v17 }
 0x12d   :  { %v974_v62 = vpop.f32.mrf.mxu1 }
 0x12e   :  { %v592_v3 = vpop.f32.mrf.mxu0  ;;  %831 = vmatmul.mubr.f32.gmra.mxu0 %v451_v59  ;;  %1587 = vst [vmem:[%s3045_s4 + $0x48] sm:$0xff] %v1523_v2  ;;  %v1453_v5 = vadd.f32 %v2536_v12, %v973_v58 }
 0x12f   :  { %v977_v4 = vpop.f32.mrf.mxu1  ;;  %1216 = vmatmul.mubr.f32.gmra.mxu1 %v453_v60  ;;  %835 = vmatprep.mubr.f32.mxu0 %v456_v63 }
 0x130   :  { %v978_v6 = vadd.f32 %v977_v4, %v592_v3  ;;  %1220 = vmatprep.mubr.f32.mxu1 %v458_v1  ;;  %v594_v8 = vpop.f32.mrf.mxu0  ;;  %v1524_v13 = vmax.f32 %v1453_v5, %v2547_v17 }
 0x131   :  { %v979_v9 = vpop.f32.mrf.mxu1 }
 0x132   :  { %v597_v14 = vpop.f32.mrf.mxu0  ;;  %836 = vmatmul.mubr.f32.gmra.mxu0 %v455_v7  ;;  %1588 = vst [vmem:[%s3045_s4 + $0x50] sm:$0xff] %v1524_v13  ;;  %v1454_v16 = vadd.f32 %v2536_v12, %v978_v6 }
 0x133   :  { %v982_v15 = vpop.f32.mrf.mxu1  ;;  %1221 = vmatmul.mubr.f32.gmra.mxu1 %v457_v0  ;;  %840 = vmatprep.mubr.f32.mxu0 %v460_v10 }
 0x134   :  { %v983_v18 = vadd.f32 %v982_v15, %v597_v14  ;;  %1225 = vmatprep.mubr.f32.mxu1 %v462_v11  ;;  %v599_v21 = vpop.f32.mrf.mxu0  ;;  %v1525_v25 = vmax.f32 %v1454_v16, %v2547_v17 }
 0x135   :  { %v984_v22 = vpop.f32.mrf.mxu1 }
 0x136   :  { %v602_v26 = vpop.f32.mrf.mxu0  ;;  %841 = vmatmul.mubr.f32.gmra.mxu0 %v459_v19  ;;  %1589 = vst [vmem:[%s3045_s4 + $0x58] sm:$0xff] %v1525_v25  ;;  %v1455_v28 = vadd.f32 %v2536_v12, %v983_v18 }
 0x137   :  { %v987_v27 = vpop.f32.mrf.mxu1  ;;  %1226 = vmatmul.mubr.f32.gmra.mxu1 %v461_v20  ;;  %845 = vmatprep.mubr.f32.mxu0 %v464_v23 }
 0x138   :  { %v988_v29 = vadd.f32 %v987_v27, %v602_v26  ;;  %1230 = vmatprep.mubr.f32.mxu1 %v466_v24  ;;  %v604_v32 = vpop.f32.mrf.mxu0  ;;  %v1526_v36 = vmax.f32 %v1455_v28, %v2547_v17 }
 0x139   :  { %v989_v33 = vpop.f32.mrf.mxu1 }
 0x13a   :  { %v607_v37 = vpop.f32.mrf.mxu0  ;;  %846 = vmatmul.mubr.f32.gmra.mxu0 %v463_v30  ;;  %1590 = vst [vmem:[%s3045_s4 + $0x60] sm:$0xff] %v1526_v36  ;;  %v1456_v39 = vadd.f32 %v2536_v12, %v988_v29 }
 0x13b   :  { %v992_v38 = vpop.f32.mrf.mxu1  ;;  %1231 = vmatmul.mubr.f32.gmra.mxu1 %v465_v31  ;;  %850 = vmatprep.mubr.f32.mxu0 %v468_v34 }
 0x13c   :  { %v993_v40 = vadd.f32 %v992_v38, %v607_v37  ;;  %1235 = vmatprep.mubr.f32.mxu1 %v470_v35  ;;  %v609_v43 = vpop.f32.mrf.mxu0  ;;  %v1527_v45 = vmax.f32 %v1456_v39, %v2547_v17 }
 0x13d   :  { %v994_v44 = vpop.f32.mrf.mxu1 }
 0x13e   :  { %v612_v46 = vpop.f32.mrf.mxu0  ;;  %851 = vmatmul.mubr.f32.gmra.mxu0 %v467_v41  ;;  %1591 = vst [vmem:[%s3045_s4 + $0x68] sm:$0xff] %v1527_v45  ;;  %v1457_v48 = vadd.f32 %v2536_v12, %v993_v40 }
 0x13f   :  { %v997_v47 = vpop.f32.mrf.mxu1  ;;  %1236 = vmatmul.mubr.f32.gmra.mxu1 %v469_v42 }
 0x140   :  { %v998_v49 = vadd.f32 %v997_v47, %v612_v46  ;;  %v614_v50 = vpop.f32.mrf.mxu0  ;;  %v1528_v52 = vmax.f32 %v1457_v48, %v2547_v17 }
 0x141   :  { %v999_v51 = vpop.f32.mrf.mxu1 }
 0x142   :  { %v617_v53 = vpop.f32.mrf.mxu0  ;;  %1592 = vst [vmem:[%s3045_s4 + $0x70] sm:$0xff] %v1528_v52  ;;  %v1458_v55 = vadd.f32 %v2536_v12, %v998_v49 }
 0x143   :  { %v1002_v54 = vpop.f32.mrf.mxu1 }
 0x144   :  { %v1003_v56 = vadd.f32 %v1002_v54, %v617_v53  ;;  %v619_v57 = vpop.f32.mrf.mxu0  ;;  %v1529_v59 = vmax.f32 %v1458_v55, %v2547_v17 }
 0x145   :  { %v1004_v58 = vpop.f32.mrf.mxu1 }
 0x146   :  { %v622_v60 = vpop.f32.mrf.mxu0  ;;  %1593 = vst [vmem:[%s3045_s4 + $0x78] sm:$0xff] %v1529_v59  ;;  %v1459_v62 = vadd.f32 %v2536_v12, %v1003_v56 }
 0x147   :  { %v1007_v61 = vpop.f32.mrf.mxu1 }
 0x148   :  { %v1008_v63 = vadd.f32 %v1007_v61, %v622_v60  ;;  %v624_v1 = vpop.f32.mrf.mxu0  ;;  %v1530_v3 = vmax.f32 %v1459_v62, %v2547_v17 }
 0x149   :  { %v1009_v2 = vpop.f32.mrf.mxu1 }
 0x14a   :  { %v627_v4 = vpop.f32.mrf.mxu0  ;;  %1594 = vst [vmem:[%s3045_s4 + $0x80] sm:$0xff] %v1530_v3  ;;  %v1460_v6 = vadd.f32 %v2536_v12, %v1008_v63 }
 0x14b   :  { %v1012_v5 = vpop.f32.mrf.mxu1 }
 0x14c   :  { %v1013_v7 = vadd.f32 %v1012_v5, %v627_v4  ;;  %v629_v0 = vpop.f32.mrf.mxu0  ;;  %v1531_v9 = vmax.f32 %v1460_v6, %v2547_v17 }
 0x14d   :  { %v1014_v8 = vpop.f32.mrf.mxu1 }
 0x14e   :  { %v632_v10 = vpop.f32.mrf.mxu0  ;;  %1595 = vst [vmem:[%s3045_s4 + $0x88] sm:$0xff] %v1531_v9  ;;  %v1461_v13 = vadd.f32 %v2536_v12, %v1013_v7 }
 0x14f   :  { %v1017_v11 = vpop.f32.mrf.mxu1 }
 0x150   :  { %v1018_v14 = vadd.f32 %v1017_v11, %v632_v10  ;;  %v634_v15 = vpop.f32.mrf.mxu0  ;;  %v1532_v18 = vmax.f32 %v1461_v13, %v2547_v17 }
 0x151   :  { %v1019_v16 = vpop.f32.mrf.mxu1 }
 0x152   :  { %v637_v19 = vpop.f32.mrf.mxu0  ;;  %1596 = vst [vmem:[%s3045_s4 + $0x90] sm:$0xff] %v1532_v18  ;;  %v1462_v21 = vadd.f32 %v2536_v12, %v1018_v14 }
 0x153   :  { %v1022_v20 = vpop.f32.mrf.mxu1 }
 0x154   :  { %v1023_v22 = vadd.f32 %v1022_v20, %v637_v19  ;;  %v639_v23 = vpop.f32.mrf.mxu0  ;;  %v1533_v25 = vmax.f32 %v1462_v21, %v2547_v17 }
 0x155   :  { %v1024_v24 = vpop.f32.mrf.mxu1 }
 0x156   :  { %v642_v26 = vpop.f32.mrf.mxu0  ;;  %1597 = vst [vmem:[%s3045_s4 + $0x98] sm:$0xff] %v1533_v25  ;;  %v1463_v28 = vadd.f32 %v2536_v12, %v1023_v22 }
 0x157   :  { %v1027_v27 = vpop.f32.mrf.mxu1 }
 0x158   :  { %v1028_v29 = vadd.f32 %v1027_v27, %v642_v26  ;;  %v644_v30 = vpop.f32.mrf.mxu0  ;;  %v1534_v32 = vmax.f32 %v1463_v28, %v2547_v17 }
 0x159   :  { %v1029_v31 = vpop.f32.mrf.mxu1 }
 0x15a   :  { %v647_v33 = vpop.f32.mrf.mxu0  ;;  %1598 = vst [vmem:[%s3045_s4 + $0xa0] sm:$0xff] %v1534_v32  ;;  %v1464_v35 = vadd.f32 %v2536_v12, %v1028_v29 }
 0x15b   :  { %v1032_v34 = vpop.f32.mrf.mxu1 }
 0x15c   :  { %v1033_v36 = vadd.f32 %v1032_v34, %v647_v33  ;;  %v649_v37 = vpop.f32.mrf.mxu0  ;;  %v1535_v39 = vmax.f32 %v1464_v35, %v2547_v17 }
 0x15d   :  { %v1034_v38 = vpop.f32.mrf.mxu1 }
 0x15e   :  { %v652_v40 = vpop.f32.mrf.mxu0  ;;  %1599 = vst [vmem:[%s3045_s4 + $0xa8] sm:$0xff] %v1535_v39  ;;  %v1465_v42 = vadd.f32 %v2536_v12, %v1033_v36 }
 0x15f   :  { %v1037_v41 = vpop.f32.mrf.mxu1 }
 0x160   :  { %v1038_v43 = vadd.f32 %v1037_v41, %v652_v40  ;;  %v654_v44 = vpop.f32.mrf.mxu0  ;;  %v1536_v46 = vmax.f32 %v1465_v42, %v2547_v17 }
 0x161   :  { %v1039_v45 = vpop.f32.mrf.mxu1 }
 0x162   :  { %v657_v47 = vpop.f32.mrf.mxu0  ;;  %1600 = vst [vmem:[%s3045_s4 + $0xb0] sm:$0xff] %v1536_v46  ;;  %v1466_v49 = vadd.f32 %v2536_v12, %v1038_v43 }
 0x163   :  { %v1042_v48 = vpop.f32.mrf.mxu1 }
 0x164   :  { %v1043_v50 = vadd.f32 %v1042_v48, %v657_v47  ;;  %v659_v51 = vpop.f32.mrf.mxu0  ;;  %v1537_v53 = vmax.f32 %v1466_v49, %v2547_v17 }
 0x165   :  { %v1044_v52 = vpop.f32.mrf.mxu1 }
 0x166   :  { %v662_v54 = vpop.f32.mrf.mxu0  ;;  %1601 = vst [vmem:[%s3045_s4 + $0xb8] sm:$0xff] %v1537_v53  ;;  %v1467_v56 = vadd.f32 %v2536_v12, %v1043_v50 }
 0x167   :  { %v1047_v55 = vpop.f32.mrf.mxu1 }
 0x168   :  { %v1048_v57 = vadd.f32 %v1047_v55, %v662_v54  ;;  %v664_v58 = vpop.f32.mrf.mxu0  ;;  %v1538_v60 = vmax.f32 %v1467_v56, %v2547_v17 }
 0x169   :  { %v1049_v59 = vpop.f32.mrf.mxu1 }
 0x16a   :  { %v667_v61 = vpop.f32.mrf.mxu0  ;;  %1602 = vst [vmem:[%s3045_s4 + $0xc0] sm:$0xff] %v1538_v60  ;;  %v1468_v63 = vadd.f32 %v2536_v12, %v1048_v57 }
 0x16b   :  { %v1052_v62 = vpop.f32.mrf.mxu1 }
 0x16c   :  { %v1053_v1 = vadd.f32 %v1052_v62, %v667_v61  ;;  %v669_v2 = vpop.f32.mrf.mxu0  ;;  %v1539_v4 = vmax.f32 %v1468_v63, %v2547_v17 }
 0x16d   :  { %v1054_v3 = vpop.f32.mrf.mxu1 }
 0x16e   :  { %v672_v5 = vpop.f32.mrf.mxu0  ;;  %1603 = vst [vmem:[%s3045_s4 + $0xc8] sm:$0xff] %v1539_v4  ;;  %v1469_v7 = vadd.f32 %v2536_v12, %v1053_v1 }
 0x16f   :  { %v1057_v6 = vpop.f32.mrf.mxu1 }
 0x170   :  { %v1058_v0 = vadd.f32 %v1057_v6, %v672_v5  ;;  %v674_v8 = vpop.f32.mrf.mxu0  ;;  %v1540_v10 = vmax.f32 %v1469_v7, %v2547_v17 }
 0x171   :  { %v1059_v9 = vpop.f32.mrf.mxu1 }
 0x172   :  { %v677_v11 = vpop.f32.mrf.mxu0  ;;  %1604 = vst [vmem:[%s3045_s4 + $0xd0] sm:$0xff] %v1540_v10  ;;  %v1470_v14 = vadd.f32 %v2536_v12, %v1058_v0 }
 0x173   :  { %v1062_v13 = vpop.f32.mrf.mxu1 }
 0x174   :  { %v1063_v15 = vadd.f32 %v1062_v13, %v677_v11  ;;  %v679_v16 = vpop.f32.mrf.mxu0  ;;  %v1541_v19 = vmax.f32 %v1470_v14, %v2547_v17 }
 0x175   :  { %v1064_v18 = vpop.f32.mrf.mxu1 }
 0x176   :  { %v682_v20 = vpop.f32.mrf.mxu0  ;;  %1605 = vst [vmem:[%s3045_s4 + $0xd8] sm:$0xff] %v1541_v19  ;;  %v1471_v22 = vadd.f32 %v2536_v12, %v1063_v15 }
 0x177   :  { %v1067_v21 = vpop.f32.mrf.mxu1 }
 0x178   :  { %v1068_v23 = vadd.f32 %v1067_v21, %v682_v20  ;;  %v684_v24 = vpop.f32.mrf.mxu0  ;;  %v1542_v26 = vmax.f32 %v1471_v22, %v2547_v17 }
 0x179   :  { %v1069_v25 = vpop.f32.mrf.mxu1 }
 0x17a   :  { %v687_v27 = vpop.f32.mrf.mxu0  ;;  %1606 = vst [vmem:[%s3045_s4 + $0xe0] sm:$0xff] %v1542_v26  ;;  %v1472_v29 = vadd.f32 %v2536_v12, %v1068_v23 }
 0x17b   :  { %v1072_v28 = vpop.f32.mrf.mxu1 }
 0x17c   :  { %v1073_v30 = vadd.f32 %v1072_v28, %v687_v27  ;;  %v689_v31 = vpop.f32.mrf.mxu0  ;;  %v1543_v33 = vmax.f32 %v1472_v29, %v2547_v17 }
 0x17d   :  { %v1074_v32 = vpop.f32.mrf.mxu1 }
 0x17e   :  { %v692_v34 = vpop.f32.mrf.mxu0  ;;  %1607 = vst [vmem:[%s3045_s4 + $0xe8] sm:$0xff] %v1543_v33  ;;  %v1473_v36 = vadd.f32 %v2536_v12, %v1073_v30 }
 0x17f   :  { %v1077_v35 = vpop.f32.mrf.mxu1 }
 0x180   :  { %v1078_v37 = vadd.f32 %v1077_v35, %v692_v34  ;;  %v694_v38 = vpop.f32.mrf.mxu0  ;;  %v1544_v40 = vmax.f32 %v1473_v36, %v2547_v17 }
 0x181   :  { %v1079_v39 = vpop.f32.mrf.mxu1 }
 0x182   :  { %v697_v41 = vpop.f32.mrf.mxu0  ;;  %1608 = vst [vmem:[%s3045_s4 + $0xf0] sm:$0xff] %v1544_v40  ;;  %v1474_v43 = vadd.f32 %v2536_v12, %v1078_v37 }
 0x183   :  { %v1082_v42 = vpop.f32.mrf.mxu1 }
 0x184   :  { %v1083_v44 = vadd.f32 %v1082_v42, %v697_v41  ;;  %v699_v45 = vpop.f32.mrf.mxu0  ;;  %v1545_v47 = vmax.f32 %v1474_v43, %v2547_v17 }
 0x185   :  { %v1084_v46 = vpop.f32.mrf.mxu1 }
 0x186   :  { %v702_v48 = vpop.f32.mrf.mxu0  ;;  %1609 = vst [vmem:[%s3045_s4 + $0xf8] sm:$0xff] %v1545_v47  ;;  %v1475_v50 = vadd.f32 %v2536_v12, %v1083_v44 }
 0x187   :  { %v1087_v49 = vpop.f32.mrf.mxu1 }
 0x188   :  { %v1088_v51 = vadd.f32 %v1087_v49, %v702_v48  ;;  %v704_v52 = vpop.f32.mrf.mxu0  ;;  %v1546_v54 = vmax.f32 %v1475_v50, %v2547_v17 }
 0x189   :  { %v1089_v53 = vpop.f32.mrf.mxu1 }
 0x18a   :  { %v707_v55 = vpop.f32.mrf.mxu0  ;;  %1610 = vst [vmem:[%s3045_s4 + $0x100] sm:$0xff] %v1546_v54  ;;  %v1476_v57 = vadd.f32 %v2536_v12, %v1088_v51 }
 0x18b   :  { %v1092_v56 = vpop.f32.mrf.mxu1 }
 0x18c   :  { %v1093_v58 = vadd.f32 %v1092_v56, %v707_v55  ;;  %v709_v59 = vpop.f32.mrf.mxu0  ;;  %v1547_v61 = vmax.f32 %v1476_v57, %v2547_v17 }
 0x18d   :  { %v1094_v60 = vpop.f32.mrf.mxu1 }
 0x18e   :  { %v712_v62 = vpop.f32.mrf.mxu0  ;;  %1611 = vst [vmem:[%s3045_s4 + $0x108] sm:$0xff] %v1547_v61  ;;  %v1477_v1 = vadd.f32 %v2536_v12, %v1093_v58 }
 0x18f   :  { %v1097_v63 = vpop.f32.mrf.mxu1 }
 0x190   :  { %v1098_v2 = vadd.f32 %v1097_v63, %v712_v62  ;;  %v714_v3 = vpop.f32.mrf.mxu0  ;;  %v1548_v5 = vmax.f32 %v1477_v1, %v2547_v17 }
 0x191   :  { %v1099_v4 = vpop.f32.mrf.mxu1 }
 0x192   :  { %v717_v6 = vpop.f32.mrf.mxu0  ;;  %1612 = vst [vmem:[%s3045_s4 + $0x110] sm:$0xff] %v1548_v5  ;;  %v1478_v0 = vadd.f32 %v2536_v12, %v1098_v2 }
 0x193   :  { %v1102_v7 = vpop.f32.mrf.mxu1 }
 0x194   :  { %v1103_v8 = vadd.f32 %v1102_v7, %v717_v6  ;;  %v719_v9 = vpop.f32.mrf.mxu0  ;;  %v1549_v11 = vmax.f32 %v1478_v0, %v2547_v17 }
 0x195   :  { %v1104_v10 = vpop.f32.mrf.mxu1 }
 0x196   :  { %v722_v13 = vpop.f32.mrf.mxu0  ;;  %1613 = vst [vmem:[%s3045_s4 + $0x118] sm:$0xff] %v1549_v11  ;;  %v1479_v15 = vadd.f32 %v2536_v12, %v1103_v8  ;;  %v2934_v8 = vld [vmem:[%s3043_s2] ss:$0 sm:$0xff] }
 0x197   :  { %v1107_v14 = vpop.f32.mrf.mxu1 }
 0x198   :  { %v1108_v16 = vadd.f32 %v1107_v14, %v722_v13  ;;  %v724_v18 = vpop.f32.mrf.mxu0  ;;  %v1550_v20 = vmax.f32 %v1479_v15, %v2547_v17 }
 0x199   :  { %v1109_v19 = vpop.f32.mrf.mxu1 }
 0x19a   :  { %v727_v21 = vpop.f32.mrf.mxu0  ;;  %1614 = vst [vmem:[%s3045_s4 + $0x120] sm:$0xff] %v1550_v20  ;;  %v1480_v23 = vadd.f32 %v2536_v12, %v1108_v16 }
 0x19b   :  { %v1112_v22 = vpop.f32.mrf.mxu1 }
 0x19c   :  { %v1113_v24 = vadd.f32 %v1112_v22, %v727_v21  ;;  %v729_v25 = vpop.f32.mrf.mxu0  ;;  %v1551_v27 = vmax.f32 %v1480_v23, %v2547_v17 }
 0x19d   :  { %v1114_v26 = vpop.f32.mrf.mxu1 }
 0x19e   :  { %v732_v28 = vpop.f32.mrf.mxu0  ;;  %1615 = vst [vmem:[%s3045_s4 + $0x128] sm:$0xff] %v1551_v27  ;;  %v1481_v30 = vadd.f32 %v2536_v12, %v1113_v24 }
 0x19f   :  { %v1117_v29 = vpop.f32.mrf.mxu1 }
 0x1a0   :  { %v1118_v31 = vadd.f32 %v1117_v29, %v732_v28  ;;  %v734_v32 = vpop.f32.mrf.mxu0  ;;  %v1552_v34 = vmax.f32 %v1481_v30, %v2547_v17 }
 0x1a1   :  { %v1119_v33 = vpop.f32.mrf.mxu1 }
 0x1a2   :  { %v737_v35 = vpop.f32.mrf.mxu0  ;;  %1616 = vst [vmem:[%s3045_s4 + $0x130] sm:$0xff] %v1552_v34  ;;  %v1482_v37 = vadd.f32 %v2536_v12, %v1118_v31 }
 0x1a3   :  { %v1122_v36 = vpop.f32.mrf.mxu1 }
 0x1a4   :  { %v1123_v38 = vadd.f32 %v1122_v36, %v737_v35  ;;  %v739_v39 = vpop.f32.mrf.mxu0  ;;  %v1553_v41 = vmax.f32 %v1482_v37, %v2547_v17 }
 0x1a5   :  { %v1124_v40 = vpop.f32.mrf.mxu1 }
 0x1a6   :  { %v742_v42 = vpop.f32.mrf.mxu0  ;;  %1617 = vst [vmem:[%s3045_s4 + $0x138] sm:$0xff] %v1553_v41  ;;  %v1483_v44 = vadd.f32 %v2536_v12, %v1123_v38 }
 0x1a7   :  { %v1127_v43 = vpop.f32.mrf.mxu1 }
 0x1a8   :  { %v1128_v45 = vadd.f32 %v1127_v43, %v742_v42  ;;  %v744_v46 = vpop.f32.mrf.mxu0  ;;  %v1554_v48 = vmax.f32 %v1483_v44, %v2547_v17 }
 0x1a9   :  { %v1129_v47 = vpop.f32.mrf.mxu1 }
 0x1aa   :  { %v747_v49 = vpop.f32.mrf.mxu0  ;;  %1618 = vst [vmem:[%s3045_s4 + $0x140] sm:$0xff] %v1554_v48  ;;  %v1484_v51 = vadd.f32 %v2536_v12, %v1128_v45 }
 0x1ab   :  { %v1132_v50 = vpop.f32.mrf.mxu1 }
 0x1ac   :  { %v1133_v52 = vadd.f32 %v1132_v50, %v747_v49  ;;  %v749_v53 = vpop.f32.mrf.mxu0  ;;  %v1555_v55 = vmax.f32 %v1484_v51, %v2547_v17 }
 0x1ad   :  { %v1134_v54 = vpop.f32.mrf.mxu1 }
 0x1ae   :  { %v752_v56 = vpop.f32.mrf.mxu0  ;;  %1619 = vst [vmem:[%s3045_s4 + $0x148] sm:$0xff] %v1555_v55  ;;  %v1485_v58 = vadd.f32 %v2536_v12, %v1133_v52 }
 0x1af   :  { %v1137_v57 = vpop.f32.mrf.mxu1 }
 0x1b0   :  { %v1138_v59 = vadd.f32 %v1137_v57, %v752_v56  ;;  %v754_v60 = vpop.f32.mrf.mxu0  ;;  %v1556_v62 = vmax.f32 %v1485_v58, %v2547_v17 }
 0x1b1   :  { %v1139_v61 = vpop.f32.mrf.mxu1 }
 0x1b2   :  { %v757_v63 = vpop.f32.mrf.mxu0  ;;  %1620 = vst [vmem:[%s3045_s4 + $0x150] sm:$0xff] %v1556_v62  ;;  %v1486_v2 = vadd.f32 %v2536_v12, %v1138_v59 }
 0x1b3   :  { %v1142_v1 = vpop.f32.mrf.mxu1 }
 0x1b4   :  { %v1143_v3 = vadd.f32 %v1142_v1, %v757_v63  ;;  %v759_v4 = vpop.f32.mrf.mxu0  ;;  %v1557_v6 = vmax.f32 %v1486_v2, %v2547_v17  ;;  %v2940_v17 = vld [vmem:[%s3044_s3] ss:$0 sm:$0xff] }
 0x1b5   :  { %v1144_v5 = vpop.f32.mrf.mxu1 }
 0x1b6   :  { %v762_v7 = vpop.f32.mrf.mxu0  ;;  %1621 = vst [vmem:[%s3045_s4 + $0x158] sm:$0xff] %v1557_v6  ;;  %v1487_v9 = vadd.f32 %v2934_v8, %v1143_v3 }
 0x1b7   :  { %v1147_v0 = vpop.f32.mrf.mxu1 }
 0x1b8   :  { %v1148_v10 = vadd.f32 %v1147_v0, %v762_v7  ;;  %v764_v12 = vpop.f32.mrf.mxu0  ;;  %v1558_v13 = vmax.f32 %v1487_v9, %v2940_v17 }
 0x1b9   :  { %v1149_v11 = vpop.f32.mrf.mxu1 }
 0x1ba   :  { %v767_v14 = vpop.f32.mrf.mxu0  ;;  %1622 = vst [vmem:[%s3045_s4 + $0x160] sm:$0xff] %v1558_v13  ;;  %v1488_v16 = vadd.f32 %v2934_v8, %v1148_v10 }
 0x1bb   :  { %v1152_v15 = vpop.f32.mrf.mxu1 }
 0x1bc   :  { %v1153_v18 = vadd.f32 %v1152_v15, %v767_v14  ;;  %v769_v19 = vpop.f32.mrf.mxu0  ;;  %v1559_v21 = vmax.f32 %v1488_v16, %v2940_v17 }
 0x1bd   :  { %v1154_v20 = vpop.f32.mrf.mxu1 }
 0x1be   :  { %v772_v22 = vpop.f32.mrf.mxu0  ;;  %1623 = vst [vmem:[%s3045_s4 + $0x168] sm:$0xff] %v1559_v21  ;;  %v1489_v24 = vadd.f32 %v2934_v8, %v1153_v18 }
 0x1bf   :  { %v1157_v23 = vpop.f32.mrf.mxu1 }
 0x1c0   :  { %v1158_v25 = vadd.f32 %v1157_v23, %v772_v22  ;;  %v774_v26 = vpop.f32.mrf.mxu0  ;;  %v1560_v28 = vmax.f32 %v1489_v24, %v2940_v17 }
 0x1c1   :  { %v1159_v27 = vpop.f32.mrf.mxu1 }
 0x1c2   :  { %v777_v29 = vpop.f32.mrf.mxu0  ;;  %1624 = vst [vmem:[%s3045_s4 + $0x170] sm:$0xff] %v1560_v28  ;;  %v1490_v31 = vadd.f32 %v2934_v8, %v1158_v25 }
 0x1c3   :  { %v1162_v30 = vpop.f32.mrf.mxu1 }
 0x1c4   :  { %v1163_v32 = vadd.f32 %v1162_v30, %v777_v29  ;;  %v779_v33 = vpop.f32.mrf.mxu0  ;;  %v1561_v35 = vmax.f32 %v1490_v31, %v2940_v17 }
 0x1c5   :  { %v1164_v34 = vpop.f32.mrf.mxu1 }
 0x1c6   :  { %v782_v36 = vpop.f32.mrf.mxu0  ;;  %1625 = vst [vmem:[%s3045_s4 + $0x178] sm:$0xff] %v1561_v35  ;;  %v1491_v38 = vadd.f32 %v2934_v8, %v1163_v32 }
 0x1c7   :  { %v1167_v37 = vpop.f32.mrf.mxu1 }
 0x1c8   :  { %v1168_v39 = vadd.f32 %v1167_v37, %v782_v36  ;;  %v784_v40 = vpop.f32.mrf.mxu0  ;;  %v1562_v42 = vmax.f32 %v1491_v38, %v2940_v17 }
 0x1c9   :  { %v1169_v41 = vpop.f32.mrf.mxu1 }
 0x1ca   :  { %v787_v43 = vpop.f32.mrf.mxu0  ;;  %1626 = vst [vmem:[%s3045_s4 + $0x180] sm:$0xff] %v1562_v42  ;;  %v1492_v45 = vadd.f32 %v2934_v8, %v1168_v39 }
 0x1cb   :  { %v1172_v44 = vpop.f32.mrf.mxu1 }
 0x1cc   :  { %v1173_v46 = vadd.f32 %v1172_v44, %v787_v43  ;;  %v789_v47 = vpop.f32.mrf.mxu0  ;;  %v1563_v49 = vmax.f32 %v1492_v45, %v2940_v17 }
 0x1cd   :  { %v1174_v48 = vpop.f32.mrf.mxu1 }
 0x1ce   :  { %v792_v50 = vpop.f32.mrf.mxu0  ;;  %1627 = vst [vmem:[%s3045_s4 + $0x188] sm:$0xff] %v1563_v49  ;;  %v1493_v52 = vadd.f32 %v2934_v8, %v1173_v46 }
 0x1cf   :  { %v1177_v51 = vpop.f32.mrf.mxu1 }
 0x1d0   :  { %v1178_v53 = vadd.f32 %v1177_v51, %v792_v50  ;;  %v794_v54 = vpop.f32.mrf.mxu0  ;;  %v1564_v56 = vmax.f32 %v1493_v52, %v2940_v17 }
 0x1d1   :  { %v1179_v55 = vpop.f32.mrf.mxu1 }
 0x1d2   :  { %v797_v57 = vpop.f32.mrf.mxu0  ;;  %1628 = vst [vmem:[%s3045_s4 + $0x190] sm:$0xff] %v1564_v56  ;;  %v1494_v59 = vadd.f32 %v2934_v8, %v1178_v53 }
 0x1d3   :  { %v1182_v58 = vpop.f32.mrf.mxu1 }
 0x1d4   :  { %v1183_v60 = vadd.f32 %v1182_v58, %v797_v57  ;;  %v799_v61 = vpop.f32.mrf.mxu0  ;;  %v1565_v63 = vmax.f32 %v1494_v59, %v2940_v17 }
 0x1d5   :  { %v1184_v62 = vpop.f32.mrf.mxu1 }
 0x1d6   :  { %v802_v1 = vpop.f32.mrf.mxu0  ;;  %1629 = vst [vmem:[%s3045_s4 + $0x198] sm:$0xff] %v1565_v63  ;;  %v1495_v3 = vadd.f32 %v2934_v8, %v1183_v60 }
 0x1d7   :  { %v1187_v2 = vpop.f32.mrf.mxu1 }
 0x1d8   :  { %v1188_v4 = vadd.f32 %v1187_v2, %v802_v1  ;;  %v804_v5 = vpop.f32.mrf.mxu0  ;;  %v1566_v7 = vmax.f32 %v1495_v3, %v2940_v17 }
 0x1d9   :  { %v1189_v6 = vpop.f32.mrf.mxu1 }
 0x1da   :  { %v807_v0 = vpop.f32.mrf.mxu0  ;;  %1630 = vst [vmem:[%s3045_s4 + $0x1a0] sm:$0xff] %v1566_v7  ;;  %v1496_v10 = vadd.f32 %v2934_v8, %v1188_v4 }
 0x1db   :  { %v1192_v9 = vpop.f32.mrf.mxu1 }
 0x1dc   :  { %v1193_v12 = vadd.f32 %v1192_v9, %v807_v0  ;;  %v809_v11 = vpop.f32.mrf.mxu0  ;;  %v1567_v14 = vmax.f32 %v1496_v10, %v2940_v17 }
 0x1dd   :  { %v1194_v13 = vpop.f32.mrf.mxu1 }
 0x1de   :  { %v812_v15 = vpop.f32.mrf.mxu0  ;;  %1631 = vst [vmem:[%s3045_s4 + $0x1a8] sm:$0xff] %v1567_v14  ;;  %v1497_v18 = vadd.f32 %v2934_v8, %v1193_v12 }
 0x1df   :  { %v1197_v16 = vpop.f32.mrf.mxu1 }
 0x1e0   :  { %v1198_v19 = vadd.f32 %v1197_v16, %v812_v15  ;;  %v814_v20 = vpop.f32.mrf.mxu0  ;;  %v1568_v22 = vmax.f32 %v1497_v18, %v2940_v17 }
 0x1e1   :  { %v1199_v21 = vpop.f32.mrf.mxu1 }
 0x1e2   :  { %v817_v23 = vpop.f32.mrf.mxu0  ;;  %1632 = vst [vmem:[%s3045_s4 + $0x1b0] sm:$0xff] %v1568_v22  ;;  %v1498_v25 = vadd.f32 %v2934_v8, %v1198_v19 }
 0x1e3   :  { %v1202_v24 = vpop.f32.mrf.mxu1 }
 0x1e4   :  { %v1203_v26 = vadd.f32 %v1202_v24, %v817_v23  ;;  %v819_v27 = vpop.f32.mrf.mxu0  ;;  %v1569_v29 = vmax.f32 %v1498_v25, %v2940_v17 }
 0x1e5   :  { %v1204_v28 = vpop.f32.mrf.mxu1 }
 0x1e6   :  { %v822_v30 = vpop.f32.mrf.mxu0  ;;  %1633 = vst [vmem:[%s3045_s4 + $0x1b8] sm:$0xff] %v1569_v29  ;;  %v1499_v32 = vadd.f32 %v2934_v8, %v1203_v26 }
 0x1e7   :  { %v1207_v31 = vpop.f32.mrf.mxu1 }
 0x1e8   :  { %v1208_v33 = vadd.f32 %v1207_v31, %v822_v30  ;;  %v824_v34 = vpop.f32.mrf.mxu0  ;;  %v1570_v36 = vmax.f32 %v1499_v32, %v2940_v17 }
 0x1e9   :  { %v1209_v35 = vpop.f32.mrf.mxu1 }
 0x1ea   :  { %v827_v37 = vpop.f32.mrf.mxu0  ;;  %1634 = vst [vmem:[%s3045_s4 + $0x1c0] sm:$0xff] %v1570_v36  ;;  %v1500_v39 = vadd.f32 %v2934_v8, %v1208_v33 }
 0x1eb   :  { %v1212_v38 = vpop.f32.mrf.mxu1 }
 0x1ec   :  { %v1213_v40 = vadd.f32 %v1212_v38, %v827_v37  ;;  %v829_v41 = vpop.f32.mrf.mxu0  ;;  %v1571_v43 = vmax.f32 %v1500_v39, %v2940_v17 }
 0x1ed   :  { %v1214_v42 = vpop.f32.mrf.mxu1 }
 0x1ee   :  { %v832_v44 = vpop.f32.mrf.mxu0  ;;  %1635 = vst [vmem:[%s3045_s4 + $0x1c8] sm:$0xff] %v1571_v43  ;;  %v1501_v46 = vadd.f32 %v2934_v8, %v1213_v40 }
 0x1ef   :  { %v1217_v45 = vpop.f32.mrf.mxu1 }
 0x1f0   :  { %v1218_v47 = vadd.f32 %v1217_v45, %v832_v44  ;;  %v834_v48 = vpop.f32.mrf.mxu0  ;;  %v1572_v50 = vmax.f32 %v1501_v46, %v2940_v17 }
 0x1f1   :  { %v1219_v49 = vpop.f32.mrf.mxu1 }
 0x1f2   :  { %v837_v51 = vpop.f32.mrf.mxu0  ;;  %1636 = vst [vmem:[%s3045_s4 + $0x1d0] sm:$0xff] %v1572_v50  ;;  %v1502_v53 = vadd.f32 %v2934_v8, %v1218_v47 }
 0x1f3   :  { %v1222_v52 = vpop.f32.mrf.mxu1 }
 0x1f4   :  { %v1223_v54 = vadd.f32 %v1222_v52, %v837_v51  ;;  %v839_v55 = vpop.f32.mrf.mxu0  ;;  %v1573_v57 = vmax.f32 %v1502_v53, %v2940_v17 }
 0x1f5   :  { %v1224_v56 = vpop.f32.mrf.mxu1 }
 0x1f6   :  { %v842_v58 = vpop.f32.mrf.mxu0  ;;  %1637 = vst [vmem:[%s3045_s4 + $0x1d8] sm:$0xff] %v1573_v57  ;;  %v1503_v60 = vadd.f32 %v2934_v8, %v1223_v54 }
 0x1f7   :  { %v1227_v59 = vpop.f32.mrf.mxu1 }
 0x1f8   :  { %v1228_v61 = vadd.f32 %v1227_v59, %v842_v58  ;;  %v844_v62 = vpop.f32.mrf.mxu0  ;;  %v1574_v1 = vmax.f32 %v1503_v60, %v2940_v17 }
 0x1f9   :  { %v1229_v63 = vpop.f32.mrf.mxu1 }
 0x1fa   :  { %v847_v2 = vpop.f32.mrf.mxu0  ;;  %1638 = vst [vmem:[%s3045_s4 + $0x1e0] sm:$0xff] %v1574_v1  ;;  %v1504_v4 = vadd.f32 %v2934_v8, %v1228_v61 }
 0x1fb   :  { %v1232_v3 = vpop.f32.mrf.mxu1 }
 0x1fc   :  { %v1233_v5 = vadd.f32 %v1232_v3, %v847_v2  ;;  %v849_v6 = vpop.f32.mrf.mxu0  ;;  %v1575_v0 = vmax.f32 %v1504_v4, %v2940_v17 }
 0x1fd   :  { %v1234_v7 = vpop.f32.mrf.mxu1 }
 0x1fe   :  { %v852_v9 = vpop.f32.mrf.mxu0  ;;  %1639 = vst [vmem:[%s3045_s4 + $0x1e8] sm:$0xff] %v1575_v0  ;;  %v1505_v12 = vadd.f32 %v2934_v8, %v1233_v5 }
 0x1ff   :  { %v1237_v10 = vpop.f32.mrf.mxu1 }
 0x200   :  { %v1238_v11 = vadd.f32 %v1237_v10, %v852_v9  ;;  %v854_v13 = vpop.f32.mrf.mxu0  ;;  %v1576_v15 = vmax.f32 %v1505_v12, %v2940_v17 }
 0x201   :  { %v1239_v14 = vpop.f32.mrf.mxu1 }
 0x202   :  { %1640 = vst [vmem:[%s3045_s4 + $0x1f0] sm:$0xff] %v1576_v15  ;;  %v1506_v16 = vadd.f32 %v2934_v8, %v1238_v11 }
 0x204   :  { %v1577_v18 = vmax.f32 %v1506_v16, %v2940_v17 }
 0x206   :  { %1641 = vst [vmem:[%s3045_s4 + $0x1f8] sm:$0xff] %v1577_v18 }

// kernel: encoder_forward.13
= control target key start
LH: loop header
LB: loop body
LE: loop exit
PB: predicated region body
PF: predicated region fallthrough
CT: control target
= control target key end

     0   :  { %s1859_s1 = inlined_call_operand.vmem [shape: f32[128,128], index: 1, kind: input, shape index: {}]   ;;  %s1860_s0 = inlined_call_operand.vmem [shape: f32[512,128], index: 0, kind: input, shape index: {}]   ;;  %s1861_s2 = inlined_call_operand.vmem [shape: f32[1,128], index: 2, kind: input, shape index: {}]   ;;  %s1862_s3 = inlined_call_operand.vmem [shape: f32[1,128], index: 3, kind: input, shape index: {}]   ;;  %s1863_s4 = inlined_call_operand.vmem [shape: f32[512,128], index: 4, kind: output, shape index: {}]  }
   0x1   :  { %v102_v0 = vld [vmem:[%s1859_s1 + $0x78] sm:$0xff]  ;;  %v101_v1 = vld [vmem:[%s1859_s1 + $0x70] sm:$0xff]  ;;  %v100_v2 = vld [vmem:[%s1859_s1 + $0x68] sm:$0xff] }
   0x2   :  { %1103 = vmatprep.subr.mxu0 %v102_v0  ;;  %1231 = vmatprep.subr.mxu1 %v102_v0  ;;  %v99_v3 = vld [vmem:[%s1859_s1 + $0x60] sm:$0xff]  ;;  %v98_v4 = vld [vmem:[%s1859_s1 + $0x58] sm:$0xff]  ;;  %v97_v5 = vld [vmem:[%s1859_s1 + $0x50] sm:$0xff] }
   0x3   :  { %1104 = vmatpush3.msra.mxu0 %v102_v0  ;;  %1247 = vmatpush3.msra.mxu1 %v102_v0  ;;  %v96_v6 = vld [vmem:[%s1859_s1 + $0x48] sm:$0xff]  ;;  %v95_v7 = vld [vmem:[%s1859_s1 + $0x40] sm:$0xff]  ;;  %v94_v8 = vld [vmem:[%s1859_s1 + $0x38] sm:$0xff] }
   0x4   :  { %1105 = vmatprep.subr.mxu0 %v101_v1  ;;  %1232 = vmatprep.subr.mxu1 %v101_v1  ;;  %v93_v9 = vld [vmem:[%s1859_s1 + $0x30] sm:$0xff]  ;;  %v92_v10 = vld [vmem:[%s1859_s1 + $0x28] sm:$0xff]  ;;  %v91_v11 = vld [vmem:[%s1859_s1 + $0x20] sm:$0xff] }
   0x5   :  { %1106 = vmatpush3.msra.mxu0 %v101_v1  ;;  %1248 = vmatpush3.msra.mxu1 %v101_v1  ;;  %v90_v12 = vld [vmem:[%s1859_s1 + $0x18] sm:$0xff]  ;;  %v89_v13 = vld [vmem:[%s1859_s1 + $0x10] sm:$0xff]  ;;  %v88_v14 = vld [vmem:[%s1859_s1 + $0x8] sm:$0xff] }
   0x6   :  { %1107 = vmatprep.subr.mxu0 %v100_v2  ;;  %1233 = vmatprep.subr.mxu1 %v100_v2  ;;  %v87_v15 = vld [vmem:[%s1859_s1] sm:$0xff]  ;;  %v168_v18 = vld [vmem:[%s1860_s0 + $0x8] sm:$0xff]  ;;  %v169_v20 = vld [vmem:[%s1860_s0 + $0x10] sm:$0xff] }
   0x7   :  { %1108 = vmatpush3.msra.mxu0 %v100_v2  ;;  %1249 = vmatpush3.msra.mxu1 %v100_v2  ;;  %v167_v16 = vld [vmem:[%s1860_s0] sm:$0xff]  ;;  %v200_v19 = vld [vmem:[%s1860_s0 + $0x108] sm:$0xff]  ;;  %v201_v21 = vld [vmem:[%s1860_s0 + $0x110] sm:$0xff] }
   0x8   :  { %1109 = vmatprep.subr.mxu0 %v99_v3  ;;  %1234 = vmatprep.subr.mxu1 %v99_v3  ;;  %v199_v17 = vld [vmem:[%s1860_s0 + $0x100] sm:$0xff]  ;;  %v170_v22 = vld [vmem:[%s1860_s0 + $0x18] sm:$0xff]  ;;  %v172_v26 = vld [vmem:[%s1860_s0 + $0x28] sm:$0xff] }
   0x9   :  { %1110 = vmatpush3.msra.mxu0 %v99_v3  ;;  %1250 = vmatpush3.msra.mxu1 %v99_v3  ;;  %v202_v23 = vld [vmem:[%s1860_s0 + $0x118] sm:$0xff]  ;;  %v171_v24 = vld [vmem:[%s1860_s0 + $0x20] sm:$0xff]  ;;  %v204_v27 = vld [vmem:[%s1860_s0 + $0x128] sm:$0xff] }
   0xa   :  { %1111 = vmatprep.subr.mxu0 %v98_v4  ;;  %1235 = vmatprep.subr.mxu1 %v98_v4  ;;  %v203_v25 = vld [vmem:[%s1860_s0 + $0x120] sm:$0xff]  ;;  %v173_v28 = vld [vmem:[%s1860_s0 + $0x30] sm:$0xff]  ;;  %v174_v30 = vld [vmem:[%s1860_s0 + $0x38] sm:$0xff] }
   0xb   :  { %1112 = vmatpush3.msra.mxu0 %v98_v4  ;;  %1251 = vmatpush3.msra.mxu1 %v98_v4  ;;  %v205_v29 = vld [vmem:[%s1860_s0 + $0x130] sm:$0xff]  ;;  %v206_v31 = vld [vmem:[%s1860_s0 + $0x138] sm:$0xff]  ;;  %v175_v32 = vld [vmem:[%s1860_s0 + $0x40] sm:$0xff] }
   0xc   :  { %1113 = vmatprep.subr.mxu0 %v97_v5  ;;  %1236 = vmatprep.subr.mxu1 %v97_v5  ;;  %v207_v33 = vld [vmem:[%s1860_s0 + $0x140] sm:$0xff]  ;;  %v176_v34 = vld [vmem:[%s1860_s0 + $0x48] sm:$0xff]  ;;  %v177_v36 = vld [vmem:[%s1860_s0 + $0x50] sm:$0xff] }
   0xd   :  { %1114 = vmatpush3.msra.mxu0 %v97_v5  ;;  %1252 = vmatpush3.msra.mxu1 %v97_v5  ;;  %v208_v35 = vld [vmem:[%s1860_s0 + $0x148] sm:$0xff]  ;;  %v209_v37 = vld [vmem:[%s1860_s0 + $0x150] sm:$0xff]  ;;  %v178_v38 = vld [vmem:[%s1860_s0 + $0x58] sm:$0xff] }
   0xe   :  { %1115 = vmatprep.subr.mxu0 %v96_v6  ;;  %1237 = vmatprep.subr.mxu1 %v96_v6  ;;  %v210_v39 = vld [vmem:[%s1860_s0 + $0x158] sm:$0xff]  ;;  %v179_v40 = vld [vmem:[%s1860_s0 + $0x60] sm:$0xff]  ;;  %v180_v42 = vld [vmem:[%s1860_s0 + $0x68] sm:$0xff] }
   0xf   :  { %1116 = vmatpush3.msra.mxu0 %v96_v6  ;;  %1253 = vmatpush3.msra.mxu1 %v96_v6  ;;  %v211_v41 = vld [vmem:[%s1860_s0 + $0x160] sm:$0xff]  ;;  %v212_v43 = vld [vmem:[%s1860_s0 + $0x168] sm:$0xff]  ;;  %v181_v44 = vld [vmem:[%s1860_s0 + $0x70] sm:$0xff] }
  0x10   :  { %1117 = vmatprep.subr.mxu0 %v95_v7  ;;  %1238 = vmatprep.subr.mxu1 %v95_v7  ;;  %v213_v45 = vld [vmem:[%s1860_s0 + $0x170] sm:$0xff]  ;;  %v182_v46 = vld [vmem:[%s1860_s0 + $0x78] sm:$0xff]  ;;  %v183_v48 = vld [vmem:[%s1860_s0 + $0x80] sm:$0xff] }
  0x11   :  { %1118 = vmatpush3.msra.mxu0 %v95_v7  ;;  %1254 = vmatpush3.msra.mxu1 %v95_v7  ;;  %v214_v47 = vld [vmem:[%s1860_s0 + $0x178] sm:$0xff]  ;;  %v215_v49 = vld [vmem:[%s1860_s0 + $0x180] sm:$0xff]  ;;  %v184_v50 = vld [vmem:[%s1860_s0 + $0x88] sm:$0xff] }
  0x12   :  { %1119 = vmatprep.subr.mxu0 %v94_v8  ;;  %1239 = vmatprep.subr.mxu1 %v94_v8  ;;  %v216_v51 = vld [vmem:[%s1860_s0 + $0x188] sm:$0xff]  ;;  %v185_v52 = vld [vmem:[%s1860_s0 + $0x90] sm:$0xff]  ;;  %v186_v54 = vld [vmem:[%s1860_s0 + $0x98] sm:$0xff] }
  0x13   :  { %1120 = vmatpush3.msra.mxu0 %v94_v8  ;;  %1255 = vmatpush3.msra.mxu1 %v94_v8  ;;  %v217_v53 = vld [vmem:[%s1860_s0 + $0x190] sm:$0xff]  ;;  %v218_v55 = vld [vmem:[%s1860_s0 + $0x198] sm:$0xff]  ;;  %v187_v56 = vld [vmem:[%s1860_s0 + $0xa0] sm:$0xff] }
  0x14   :  { %1121 = vmatprep.subr.mxu0 %v93_v9  ;;  %1240 = vmatprep.subr.mxu1 %v93_v9  ;;  %v219_v57 = vld [vmem:[%s1860_s0 + $0x1a0] sm:$0xff]  ;;  %v188_v58 = vld [vmem:[%s1860_s0 + $0xa8] sm:$0xff]  ;;  %v189_v60 = vld [vmem:[%s1860_s0 + $0xb0] sm:$0xff] }
  0x15   :  { %1122 = vmatpush3.msra.mxu0 %v93_v9  ;;  %1256 = vmatpush3.msra.mxu1 %v93_v9  ;;  %v220_v59 = vld [vmem:[%s1860_s0 + $0x1a8] sm:$0xff]  ;;  %v221_v61 = vld [vmem:[%s1860_s0 + $0x1b0] sm:$0xff]  ;;  %v190_v62 = vld [vmem:[%s1860_s0 + $0xb8] sm:$0xff] }
  0x16   :  { %1123 = vmatprep.subr.mxu0 %v92_v10  ;;  %1241 = vmatprep.subr.mxu1 %v92_v10  ;;  %v222_v63 = vld [vmem:[%s1860_s0 + $0x1b8] sm:$0xff]  ;;  %v191_v0 = vld [vmem:[%s1860_s0 + $0xc0] sm:$0xff]  ;;  %v192_v2 = vld [vmem:[%s1860_s0 + $0xc8] sm:$0xff] }
  0x17   :  { %1124 = vmatpush3.msra.mxu0 %v92_v10  ;;  %1257 = vmatpush3.msra.mxu1 %v92_v10  ;;  %v223_v1 = vld [vmem:[%s1860_s0 + $0x1c0] sm:$0xff]  ;;  %v224_v3 = vld [vmem:[%s1860_s0 + $0x1c8] sm:$0xff]  ;;  %v193_v4 = vld [vmem:[%s1860_s0 + $0xd0] sm:$0xff] }
  0x18   :  { %1125 = vmatprep.subr.mxu0 %v91_v11  ;;  %1242 = vmatprep.subr.mxu1 %v91_v11  ;;  %v225_v5 = vld [vmem:[%s1860_s0 + $0x1d0] sm:$0xff]  ;;  %v194_v6 = vld [vmem:[%s1860_s0 + $0xd8] sm:$0xff]  ;;  %v195_v8 = vld [vmem:[%s1860_s0 + $0xe0] sm:$0xff] }
  0x19   :  { %1126 = vmatpush3.msra.mxu0 %v91_v11  ;;  %1258 = vmatpush3.msra.mxu1 %v91_v11  ;;  %v226_v7 = vld [vmem:[%s1860_s0 + $0x1d8] sm:$0xff]  ;;  %v227_v9 = vld [vmem:[%s1860_s0 + $0x1e0] sm:$0xff]  ;;  %v196_v10 = vld [vmem:[%s1860_s0 + $0xe8] sm:$0xff] }
  0x1a   :  { %1127 = vmatprep.subr.mxu0 %v90_v12  ;;  %1243 = vmatprep.subr.mxu1 %v90_v12  ;;  %v228_v11 = vld [vmem:[%s1860_s0 + $0x1e8] sm:$0xff] }
  0x1b   :  { %1128 = vmatpush3.msra.mxu0 %v90_v12  ;;  %1259 = vmatpush3.msra.mxu1 %v90_v12  ;;  %v197_v12 = vld [vmem:[%s1860_s0 + $0xf0] sm:$0xff] }
  0x1c   :  { %1129 = vmatprep.subr.mxu0 %v89_v13  ;;  %1244 = vmatprep.subr.mxu1 %v89_v13 }
  0x1d   :  { %1130 = vmatpush3.msra.mxu0 %v89_v13  ;;  %1260 = vmatpush3.msra.mxu1 %v89_v13  ;;  %v229_v13 = vld [vmem:[%s1860_s0 + $0x1f0] sm:$0xff] }
  0x1e   :  { %1131 = vmatprep.subr.mxu0 %v88_v14  ;;  %1245 = vmatprep.subr.mxu1 %v88_v14 }
  0x1f   :  { %1132 = vmatpush3.msra.mxu0 %v88_v14  ;;  %1261 = vmatpush3.msra.mxu1 %v88_v14  ;;  %v198_v14 = vld [vmem:[%s1860_s0 + $0xf8] sm:$0xff] }
  0x20   :  { %1133 = vmatprep.subr.mxu0 %v87_v15  ;;  %1246 = vmatprep.subr.mxu1 %v87_v15 }
  0x21   :  { %1134 = vmatpush3.msra.mxu0 %v87_v15  ;;  %1262 = vmatpush3.msra.mxu1 %v87_v15  ;;  %v230_v15 = vld [vmem:[%s1860_s0 + $0x1f8] sm:$0xff] }
  0x22   :  { %1135 = vmatprep.mubr.f32.mxu0 %v167_v16  ;;  %1183 = vmatprep.mubr.f32.mxu1 %v199_v17  ;;  %v1532_v17 = vld [vmem:[%s1861_s2] ss:$0 sm:$0xff] }
  0x23   :  { %1136 = vmatmul.mubr.f32.vlgmr.msra.gmra.mxu0 %v168_v18  ;;  %1184 = vmatmul.mubr.f32.vlgmr.msra.gmra.mxu1 %v200_v19  ;;  %v1537_v19 = vld [vmem:[%s1862_s3] ss:$0 sm:$0xff] }
  0x24   :  { %1138 = vmatprep.mubr.f32.mxu0 %v169_v20  ;;  %1186 = vmatprep.mubr.f32.mxu1 %v201_v21 }
  0x27   :  { %1139 = vmatmul.mubr.f32.gmra.mxu0 %v170_v22  ;;  %1187 = vmatmul.mubr.f32.gmra.mxu1 %v202_v23 }
  0x28   :  { %1141 = vmatprep.mubr.f32.mxu0 %v171_v24  ;;  %1189 = vmatprep.mubr.f32.mxu1 %v203_v25 }
  0x2b   :  { %1142 = vmatmul.mubr.f32.gmra.mxu0 %v172_v26  ;;  %1190 = vmatmul.mubr.f32.gmra.mxu1 %v204_v27 }
  0x2c   :  { %1144 = vmatprep.mubr.f32.mxu0 %v173_v28  ;;  %1192 = vmatprep.mubr.f32.mxu1 %v205_v29 }
  0x2f   :  { %1145 = vmatmul.mubr.f32.gmra.mxu0 %v174_v30  ;;  %1193 = vmatmul.mubr.f32.gmra.mxu1 %v206_v31 }
  0x30   :  { %1147 = vmatprep.mubr.f32.mxu0 %v175_v32  ;;  %1195 = vmatprep.mubr.f32.mxu1 %v207_v33 }
  0x33   :  { %1148 = vmatmul.mubr.f32.gmra.mxu0 %v176_v34  ;;  %1196 = vmatmul.mubr.f32.gmra.mxu1 %v208_v35 }
  0x34   :  { %1150 = vmatprep.mubr.f32.mxu0 %v177_v36  ;;  %1198 = vmatprep.mubr.f32.mxu1 %v209_v37 }
  0x37   :  { %1151 = vmatmul.mubr.f32.gmra.mxu0 %v178_v38  ;;  %1199 = vmatmul.mubr.f32.gmra.mxu1 %v210_v39 }
  0x38   :  { %1153 = vmatprep.mubr.f32.mxu0 %v179_v40  ;;  %1201 = vmatprep.mubr.f32.mxu1 %v211_v41 }
  0x3b   :  { %1154 = vmatmul.mubr.f32.gmra.mxu0 %v180_v42  ;;  %1202 = vmatmul.mubr.f32.gmra.mxu1 %v212_v43 }
  0x3c   :  { %1156 = vmatprep.mubr.f32.mxu0 %v181_v44  ;;  %1204 = vmatprep.mubr.f32.mxu1 %v213_v45 }
  0x3f   :  { %1157 = vmatmul.mubr.f32.gmra.mxu0 %v182_v46  ;;  %1205 = vmatmul.mubr.f32.gmra.mxu1 %v214_v47 }
  0x40   :  { %1159 = vmatprep.mubr.f32.mxu0 %v183_v48  ;;  %1207 = vmatprep.mubr.f32.mxu1 %v215_v49 }
  0x43   :  { %1160 = vmatmul.mubr.f32.gmra.mxu0 %v184_v50  ;;  %1208 = vmatmul.mubr.f32.gmra.mxu1 %v216_v51 }
  0x44   :  { %1162 = vmatprep.mubr.f32.mxu0 %v185_v52  ;;  %1210 = vmatprep.mubr.f32.mxu1 %v217_v53 }
  0x47   :  { %1163 = vmatmul.mubr.f32.gmra.mxu0 %v186_v54  ;;  %1211 = vmatmul.mubr.f32.gmra.mxu1 %v218_v55 }
  0x48   :  { %1165 = vmatprep.mubr.f32.mxu0 %v187_v56  ;;  %1213 = vmatprep.mubr.f32.mxu1 %v219_v57 }
  0x4b   :  { %1166 = vmatmul.mubr.f32.gmra.mxu0 %v188_v58  ;;  %1214 = vmatmul.mubr.f32.gmra.mxu1 %v220_v59 }
  0x4c   :  { %1168 = vmatprep.mubr.f32.mxu0 %v189_v60  ;;  %1216 = vmatprep.mubr.f32.mxu1 %v221_v61 }
  0x4f   :  { %1169 = vmatmul.mubr.f32.gmra.mxu0 %v190_v62  ;;  %1217 = vmatmul.mubr.f32.gmra.mxu1 %v222_v63 }
  0x50   :  { %1171 = vmatprep.mubr.f32.mxu0 %v191_v0  ;;  %1219 = vmatprep.mubr.f32.mxu1 %v223_v1 }
  0x53   :  { %1172 = vmatmul.mubr.f32.gmra.mxu0 %v192_v2  ;;  %1220 = vmatmul.mubr.f32.gmra.mxu1 %v224_v3 }
  0x54   :  { %1174 = vmatprep.mubr.f32.mxu0 %v193_v4  ;;  %1222 = vmatprep.mubr.f32.mxu1 %v225_v5 }
  0x57   :  { %1175 = vmatmul.mubr.f32.gmra.mxu0 %v194_v6  ;;  %1223 = vmatmul.mubr.f32.gmra.mxu1 %v226_v7 }
  0x58   :  { %1177 = vmatprep.mubr.f32.mxu0 %v195_v8  ;;  %1225 = vmatprep.mubr.f32.mxu1 %v227_v9 }
  0x5b   :  { %1178 = vmatmul.mubr.f32.gmra.mxu0 %v196_v10  ;;  %1226 = vmatmul.mubr.f32.gmra.mxu1 %v228_v11 }
  0x5c   :  { %1180 = vmatprep.mubr.f32.mxu0 %v197_v12  ;;  %1228 = vmatprep.mubr.f32.mxu1 %v229_v13 }
  0x5f   :  { %1181 = vmatmul.mubr.f32.gmra.mxu0 %v198_v14  ;;  %1229 = vmatmul.mubr.f32.gmra.mxu1 %v230_v15 }
  0xe3   :  { %v1137_v16 = vpop.f32.mrf.mxu0  ;;  %v1185_v18 = vpop.f32.mrf.mxu1 }
  0xe4   :  { %v819_v22 = vadd.f32 %v1137_v16, %v1532_v17  ;;  %v851_v23 = vadd.f32 %v1185_v18, %v1532_v17 }
  0xe5   :  { %v297_v20 = vpop.f32.mrf.mxu0  ;;  %v457_v21 = vpop.f32.mrf.mxu1 }
  0xe6   :  { %v890_v26 = vmax.f32 %v819_v22, %v1537_v19  ;;  %v922_v27 = vmax.f32 %v851_v23, %v1537_v19  ;;  %v818_v28 = vadd.f32 %v1532_v17, %v297_v20  ;;  %v850_v29 = vadd.f32 %v1532_v17, %v457_v21 }
  0xe7   :  { %v1140_v24 = vpop.f32.mrf.mxu0  ;;  %v1188_v25 = vpop.f32.mrf.mxu1 }
  0xe8   :  { %954 = vst [vmem:[%s1863_s4 + $0x8] sm:$0xff] %v890_v26  ;;  %986 = vst [vmem:[%s1863_s4 + $0x108] sm:$0xff] %v922_v27  ;;  %v889_v32 = vmax.f32 %v818_v28, %v1537_v19  ;;  %v921_v33 = vmax.f32 %v850_v29, %v1537_v19  ;;  %v821_v34 = vadd.f32 %v1140_v24, %v1532_v17 }
  0xe9   :  { %v307_v30 = vpop.f32.mrf.mxu0  ;;  %v467_v31 = vpop.f32.mrf.mxu1  ;;  %v853_v35 = vadd.f32 %v1188_v25, %v1532_v17 }
  0xea   :  { %953 = vst [vmem:[%s1863_s4] sm:$0xff] %v889_v32  ;;  %985 = vst [vmem:[%s1863_s4 + $0x100] sm:$0xff] %v921_v33  ;;  %v820_v38 = vadd.f32 %v1532_v17, %v307_v30  ;;  %v852_v39 = vadd.f32 %v1532_v17, %v467_v31  ;;  %v892_v40 = vmax.f32 %v821_v34, %v1537_v19 }
  0xeb   :  { %v1143_v36 = vpop.f32.mrf.mxu0  ;;  %v1191_v37 = vpop.f32.mrf.mxu1  ;;  %v924_v41 = vmax.f32 %v853_v35, %v1537_v19 }
  0xec   :  { %v891_v44 = vmax.f32 %v820_v38, %v1537_v19  ;;  %v923_v45 = vmax.f32 %v852_v39, %v1537_v19  ;;  %v823_v46 = vadd.f32 %v1143_v36, %v1532_v17  ;;  %v855_v47 = vadd.f32 %v1191_v37, %v1532_v17  ;;  %956 = vst [vmem:[%s1863_s4 + $0x18] sm:$0xff] %v892_v40 }
  0xed   :  { %v317_v42 = vpop.f32.mrf.mxu0  ;;  %v477_v43 = vpop.f32.mrf.mxu1  ;;  %988 = vst [vmem:[%s1863_s4 + $0x118] sm:$0xff] %v924_v41 }
  0xee   :  { %955 = vst [vmem:[%s1863_s4 + $0x10] sm:$0xff] %v891_v44  ;;  %987 = vst [vmem:[%s1863_s4 + $0x110] sm:$0xff] %v923_v45  ;;  %v894_v50 = vmax.f32 %v823_v46, %v1537_v19  ;;  %v926_v51 = vmax.f32 %v855_v47, %v1537_v19  ;;  %v822_v52 = vadd.f32 %v1532_v17, %v317_v42 }
  0xef   :  { %v1146_v48 = vpop.f32.mrf.mxu0  ;;  %v1194_v49 = vpop.f32.mrf.mxu1  ;;  %v854_v53 = vadd.f32 %v1532_v17, %v477_v43 }
  0xf0   :  { %958 = vst [vmem:[%s1863_s4 + $0x28] sm:$0xff] %v894_v50  ;;  %990 = vst [vmem:[%s1863_s4 + $0x128] sm:$0xff] %v926_v51  ;;  %v825_v56 = vadd.f32 %v1146_v48, %v1532_v17  ;;  %v857_v57 = vadd.f32 %v1194_v49, %v1532_v17  ;;  %v893_v58 = vmax.f32 %v822_v52, %v1537_v19 }
  0xf1   :  { %v327_v54 = vpop.f32.mrf.mxu0  ;;  %v487_v55 = vpop.f32.mrf.mxu1  ;;  %v925_v59 = vmax.f32 %v854_v53, %v1537_v19 }
  0xf2   :  { %v896_v62 = vmax.f32 %v825_v56, %v1537_v19  ;;  %v928_v63 = vmax.f32 %v857_v57, %v1537_v19  ;;  %v824_v0 = vadd.f32 %v1532_v17, %v327_v54  ;;  %v856_v1 = vadd.f32 %v1532_v17, %v487_v55  ;;  %957 = vst [vmem:[%s1863_s4 + $0x20] sm:$0xff] %v893_v58 }
  0xf3   :  { %v1149_v60 = vpop.f32.mrf.mxu0  ;;  %v1197_v61 = vpop.f32.mrf.mxu1  ;;  %989 = vst [vmem:[%s1863_s4 + $0x120] sm:$0xff] %v925_v59 }
  0xf4   :  { %960 = vst [vmem:[%s1863_s4 + $0x38] sm:$0xff] %v896_v62  ;;  %992 = vst [vmem:[%s1863_s4 + $0x138] sm:$0xff] %v928_v63  ;;  %v895_v4 = vmax.f32 %v824_v0, %v1537_v19  ;;  %v927_v5 = vmax.f32 %v856_v1, %v1537_v19  ;;  %v827_v6 = vadd.f32 %v1149_v60, %v1532_v17 }
  0xf5   :  { %v337_v2 = vpop.f32.mrf.mxu0  ;;  %v497_v3 = vpop.f32.mrf.mxu1  ;;  %v859_v7 = vadd.f32 %v1197_v61, %v1532_v17 }
  0xf6   :  { %959 = vst [vmem:[%s1863_s4 + $0x30] sm:$0xff] %v895_v4  ;;  %991 = vst [vmem:[%s1863_s4 + $0x130] sm:$0xff] %v927_v5  ;;  %v826_v10 = vadd.f32 %v1532_v17, %v337_v2  ;;  %v858_v11 = vadd.f32 %v1532_v17, %v497_v3  ;;  %v898_v12 = vmax.f32 %v827_v6, %v1537_v19 }
  0xf7   :  { %v1152_v8 = vpop.f32.mrf.mxu0  ;;  %v1200_v9 = vpop.f32.mrf.mxu1  ;;  %v930_v13 = vmax.f32 %v859_v7, %v1537_v19 }
  0xf8   :  { %v897_v16 = vmax.f32 %v826_v10, %v1537_v19  ;;  %v929_v18 = vmax.f32 %v858_v11, %v1537_v19  ;;  %v829_v20 = vadd.f32 %v1152_v8, %v1532_v17  ;;  %v861_v21 = vadd.f32 %v1200_v9, %v1532_v17  ;;  %962 = vst [vmem:[%s1863_s4 + $0x48] sm:$0xff] %v898_v12 }
  0xf9   :  { %v347_v14 = vpop.f32.mrf.mxu0  ;;  %v507_v15 = vpop.f32.mrf.mxu1  ;;  %994 = vst [vmem:[%s1863_s4 + $0x148] sm:$0xff] %v930_v13 }
  0xfa   :  { %961 = vst [vmem:[%s1863_s4 + $0x40] sm:$0xff] %v897_v16  ;;  %993 = vst [vmem:[%s1863_s4 + $0x140] sm:$0xff] %v929_v18  ;;  %v900_v24 = vmax.f32 %v829_v20, %v1537_v19  ;;  %v932_v25 = vmax.f32 %v861_v21, %v1537_v19  ;;  %v828_v26 = vadd.f32 %v1532_v17, %v347_v14 }
  0xfb   :  { %v1155_v22 = vpop.f32.mrf.mxu0  ;;  %v1203_v23 = vpop.f32.mrf.mxu1  ;;  %v860_v27 = vadd.f32 %v1532_v17, %v507_v15 }
  0xfc   :  { %964 = vst [vmem:[%s1863_s4 + $0x58] sm:$0xff] %v900_v24  ;;  %996 = vst [vmem:[%s1863_s4 + $0x158] sm:$0xff] %v932_v25  ;;  %v831_v30 = vadd.f32 %v1155_v22, %v1532_v17  ;;  %v863_v31 = vadd.f32 %v1203_v23, %v1532_v17  ;;  %v899_v32 = vmax.f32 %v828_v26, %v1537_v19 }
  0xfd   :  { %v357_v28 = vpop.f32.mrf.mxu0  ;;  %v517_v29 = vpop.f32.mrf.mxu1  ;;  %v931_v33 = vmax.f32 %v860_v27, %v1537_v19 }
  0xfe   :  { %v902_v36 = vmax.f32 %v831_v30, %v1537_v19  ;;  %v934_v37 = vmax.f32 %v863_v31, %v1537_v19  ;;  %v830_v38 = vadd.f32 %v1532_v17, %v357_v28  ;;  %v862_v39 = vadd.f32 %v1532_v17, %v517_v29  ;;  %963 = vst [vmem:[%s1863_s4 + $0x50] sm:$0xff] %v899_v32 }
  0xff   :  { %v1158_v34 = vpop.f32.mrf.mxu0  ;;  %v1206_v35 = vpop.f32.mrf.mxu1  ;;  %995 = vst [vmem:[%s1863_s4 + $0x150] sm:$0xff] %v931_v33 }
 0x100   :  { %966 = vst [vmem:[%s1863_s4 + $0x68] sm:$0xff] %v902_v36  ;;  %998 = vst [vmem:[%s1863_s4 + $0x168] sm:$0xff] %v934_v37  ;;  %v901_v42 = vmax.f32 %v830_v38, %v1537_v19  ;;  %v933_v43 = vmax.f32 %v862_v39, %v1537_v19  ;;  %v833_v44 = vadd.f32 %v1158_v34, %v1532_v17 }
 0x101   :  { %v367_v40 = vpop.f32.mrf.mxu0  ;;  %v527_v41 = vpop.f32.mrf.mxu1  ;;  %v865_v45 = vadd.f32 %v1206_v35, %v1532_v17 }
 0x102   :  { %965 = vst [vmem:[%s1863_s4 + $0x60] sm:$0xff] %v901_v42  ;;  %997 = vst [vmem:[%s1863_s4 + $0x160] sm:$0xff] %v933_v43  ;;  %v832_v48 = vadd.f32 %v1532_v17, %v367_v40  ;;  %v864_v49 = vadd.f32 %v1532_v17, %v527_v41  ;;  %v904_v50 = vmax.f32 %v833_v44, %v1537_v19 }
 0x103   :  { %v1161_v46 = vpop.f32.mrf.mxu0  ;;  %v1209_v47 = vpop.f32.mrf.mxu1  ;;  %v936_v51 = vmax.f32 %v865_v45, %v1537_v19 }
 0x104   :  { %v903_v54 = vmax.f32 %v832_v48, %v1537_v19  ;;  %v935_v55 = vmax.f32 %v864_v49, %v1537_v19  ;;  %v835_v56 = vadd.f32 %v1161_v46, %v1532_v17  ;;  %v867_v57 = vadd.f32 %v1209_v47, %v1532_v17  ;;  %968 = vst [vmem:[%s1863_s4 + $0x78] sm:$0xff] %v904_v50 }
 0x105   :  { %v377_v52 = vpop.f32.mrf.mxu0  ;;  %v537_v53 = vpop.f32.mrf.mxu1  ;;  %1000 = vst [vmem:[%s1863_s4 + $0x178] sm:$0xff] %v936_v51 }
 0x106   :  { %967 = vst [vmem:[%s1863_s4 + $0x70] sm:$0xff] %v903_v54  ;;  %999 = vst [vmem:[%s1863_s4 + $0x170] sm:$0xff] %v935_v55  ;;  %v906_v60 = vmax.f32 %v835_v56, %v1537_v19  ;;  %v938_v61 = vmax.f32 %v867_v57, %v1537_v19  ;;  %v834_v62 = vadd.f32 %v1532_v17, %v377_v52 }
 0x107   :  { %v1164_v58 = vpop.f32.mrf.mxu0  ;;  %v1212_v59 = vpop.f32.mrf.mxu1  ;;  %v866_v63 = vadd.f32 %v1532_v17, %v537_v53 }
 0x108   :  { %970 = vst [vmem:[%s1863_s4 + $0x88] sm:$0xff] %v906_v60  ;;  %1002 = vst [vmem:[%s1863_s4 + $0x188] sm:$0xff] %v938_v61  ;;  %v837_v2 = vadd.f32 %v1164_v58, %v1532_v17  ;;  %v869_v3 = vadd.f32 %v1212_v59, %v1532_v17  ;;  %v905_v4 = vmax.f32 %v834_v62, %v1537_v19 }
 0x109   :  { %v387_v0 = vpop.f32.mrf.mxu0  ;;  %v547_v1 = vpop.f32.mrf.mxu1  ;;  %v937_v5 = vmax.f32 %v866_v63, %v1537_v19 }
 0x10a   :  { %v908_v8 = vmax.f32 %v837_v2, %v1537_v19  ;;  %v940_v9 = vmax.f32 %v869_v3, %v1537_v19  ;;  %v836_v10 = vadd.f32 %v1532_v17, %v387_v0  ;;  %v868_v11 = vadd.f32 %v1532_v17, %v547_v1  ;;  %969 = vst [vmem:[%s1863_s4 + $0x80] sm:$0xff] %v905_v4 }
 0x10b   :  { %v1167_v6 = vpop.f32.mrf.mxu0  ;;  %v1215_v7 = vpop.f32.mrf.mxu1  ;;  %1001 = vst [vmem:[%s1863_s4 + $0x180] sm:$0xff] %v937_v5 }
 0x10c   :  { %972 = vst [vmem:[%s1863_s4 + $0x98] sm:$0xff] %v908_v8  ;;  %1004 = vst [vmem:[%s1863_s4 + $0x198] sm:$0xff] %v940_v9  ;;  %v907_v14 = vmax.f32 %v836_v10, %v1537_v19  ;;  %v939_v15 = vmax.f32 %v868_v11, %v1537_v19  ;;  %v839_v16 = vadd.f32 %v1167_v6, %v1532_v17 }
 0x10d   :  { %v397_v12 = vpop.f32.mrf.mxu0  ;;  %v557_v13 = vpop.f32.mrf.mxu1  ;;  %v871_v18 = vadd.f32 %v1215_v7, %v1532_v17 }
 0x10e   :  { %971 = vst [vmem:[%s1863_s4 + $0x90] sm:$0xff] %v907_v14  ;;  %1003 = vst [vmem:[%s1863_s4 + $0x190] sm:$0xff] %v939_v15  ;;  %v838_v22 = vadd.f32 %v1532_v17, %v397_v12  ;;  %v870_v23 = vadd.f32 %v1532_v17, %v557_v13  ;;  %v910_v24 = vmax.f32 %v839_v16, %v1537_v19 }
 0x10f   :  { %v1170_v20 = vpop.f32.mrf.mxu0  ;;  %v1218_v21 = vpop.f32.mrf.mxu1  ;;  %v942_v25 = vmax.f32 %v871_v18, %v1537_v19 }
 0x110   :  { %v909_v28 = vmax.f32 %v838_v22, %v1537_v19  ;;  %v941_v29 = vmax.f32 %v870_v23, %v1537_v19  ;;  %v841_v30 = vadd.f32 %v1170_v20, %v1532_v17  ;;  %v873_v31 = vadd.f32 %v1218_v21, %v1532_v17  ;;  %974 = vst [vmem:[%s1863_s4 + $0xa8] sm:$0xff] %v910_v24 }
 0x111   :  { %v407_v26 = vpop.f32.mrf.mxu0  ;;  %v567_v27 = vpop.f32.mrf.mxu1  ;;  %1006 = vst [vmem:[%s1863_s4 + $0x1a8] sm:$0xff] %v942_v25 }
 0x112   :  { %973 = vst [vmem:[%s1863_s4 + $0xa0] sm:$0xff] %v909_v28  ;;  %1005 = vst [vmem:[%s1863_s4 + $0x1a0] sm:$0xff] %v941_v29  ;;  %v912_v34 = vmax.f32 %v841_v30, %v1537_v19  ;;  %v944_v35 = vmax.f32 %v873_v31, %v1537_v19  ;;  %v840_v36 = vadd.f32 %v1532_v17, %v407_v26 }
 0x113   :  { %v1173_v32 = vpop.f32.mrf.mxu0  ;;  %v1221_v33 = vpop.f32.mrf.mxu1  ;;  %v872_v37 = vadd.f32 %v1532_v17, %v567_v27 }
 0x114   :  { %976 = vst [vmem:[%s1863_s4 + $0xb8] sm:$0xff] %v912_v34  ;;  %1008 = vst [vmem:[%s1863_s4 + $0x1b8] sm:$0xff] %v944_v35  ;;  %v843_v40 = vadd.f32 %v1173_v32, %v1532_v17  ;;  %v875_v41 = vadd.f32 %v1221_v33, %v1532_v17  ;;  %v911_v42 = vmax.f32 %v840_v36, %v1537_v19 }
 0x115   :  { %v417_v38 = vpop.f32.mrf.mxu0  ;;  %v577_v39 = vpop.f32.mrf.mxu1  ;;  %v943_v43 = vmax.f32 %v872_v37, %v1537_v19 }
 0x116   :  { %v914_v46 = vmax.f32 %v843_v40, %v1537_v19  ;;  %v946_v47 = vmax.f32 %v875_v41, %v1537_v19  ;;  %v842_v48 = vadd.f32 %v1532_v17, %v417_v38  ;;  %v874_v49 = vadd.f32 %v1532_v17, %v577_v39  ;;  %975 = vst [vmem:[%s1863_s4 + $0xb0] sm:$0xff] %v911_v42 }
 0x117   :  { %v1176_v44 = vpop.f32.mrf.mxu0  ;;  %v1224_v45 = vpop.f32.mrf.mxu1  ;;  %1007 = vst [vmem:[%s1863_s4 + $0x1b0] sm:$0xff] %v943_v43 }
 0x118   :  { %978 = vst [vmem:[%s1863_s4 + $0xc8] sm:$0xff] %v914_v46  ;;  %1010 = vst [vmem:[%s1863_s4 + $0x1c8] sm:$0xff] %v946_v47  ;;  %v913_v52 = vmax.f32 %v842_v48, %v1537_v19  ;;  %v945_v53 = vmax.f32 %v874_v49, %v1537_v19  ;;  %v845_v54 = vadd.f32 %v1176_v44, %v1532_v17 }
 0x119   :  { %v427_v50 = vpop.f32.mrf.mxu0  ;;  %v587_v51 = vpop.f32.mrf.mxu1  ;;  %v877_v55 = vadd.f32 %v1224_v45, %v1532_v17 }
 0x11a   :  { %977 = vst [vmem:[%s1863_s4 + $0xc0] sm:$0xff] %v913_v52  ;;  %1009 = vst [vmem:[%s1863_s4 + $0x1c0] sm:$0xff] %v945_v53  ;;  %v844_v58 = vadd.f32 %v1532_v17, %v427_v50  ;;  %v876_v59 = vadd.f32 %v1532_v17, %v587_v51  ;;  %v916_v60 = vmax.f32 %v845_v54, %v1537_v19 }
 0x11b   :  { %v1179_v56 = vpop.f32.mrf.mxu0  ;;  %v1227_v57 = vpop.f32.mrf.mxu1  ;;  %v948_v61 = vmax.f32 %v877_v55, %v1537_v19 }
 0x11c   :  { %v915_v0 = vmax.f32 %v844_v58, %v1537_v19  ;;  %v947_v1 = vmax.f32 %v876_v59, %v1537_v19  ;;  %v847_v2 = vadd.f32 %v1179_v56, %v1532_v17  ;;  %v879_v3 = vadd.f32 %v1227_v57, %v1532_v17  ;;  %980 = vst [vmem:[%s1863_s4 + $0xd8] sm:$0xff] %v916_v60 }
 0x11d   :  { %v437_v62 = vpop.f32.mrf.mxu0  ;;  %v597_v63 = vpop.f32.mrf.mxu1  ;;  %1012 = vst [vmem:[%s1863_s4 + $0x1d8] sm:$0xff] %v948_v61 }
 0x11e   :  { %979 = vst [vmem:[%s1863_s4 + $0xd0] sm:$0xff] %v915_v0  ;;  %1011 = vst [vmem:[%s1863_s4 + $0x1d0] sm:$0xff] %v947_v1  ;;  %v918_v6 = vmax.f32 %v847_v2, %v1537_v19  ;;  %v950_v7 = vmax.f32 %v879_v3, %v1537_v19  ;;  %v846_v8 = vadd.f32 %v1532_v17, %v437_v62 }
 0x11f   :  { %v1182_v4 = vpop.f32.mrf.mxu0  ;;  %v1230_v5 = vpop.f32.mrf.mxu1  ;;  %v878_v9 = vadd.f32 %v1532_v17, %v597_v63 }
 0x120   :  { %982 = vst [vmem:[%s1863_s4 + $0xe8] sm:$0xff] %v918_v6  ;;  %1014 = vst [vmem:[%s1863_s4 + $0x1e8] sm:$0xff] %v950_v7  ;;  %v849_v12 = vadd.f32 %v1182_v4, %v1532_v17  ;;  %v881_v13 = vadd.f32 %v1230_v5, %v1532_v17  ;;  %v917_v14 = vmax.f32 %v846_v8, %v1537_v19 }
 0x121   :  { %v447_v10 = vpop.f32.mrf.mxu0  ;;  %v607_v11 = vpop.f32.mrf.mxu1  ;;  %v949_v15 = vmax.f32 %v878_v9, %v1537_v19 }
 0x122   :  { %v920_v16 = vmax.f32 %v849_v12, %v1537_v19  ;;  %v952_v18 = vmax.f32 %v881_v13, %v1537_v19  ;;  %v848_v20 = vadd.f32 %v1532_v17, %v447_v10  ;;  %v880_v21 = vadd.f32 %v1532_v17, %v607_v11  ;;  %981 = vst [vmem:[%s1863_s4 + $0xe0] sm:$0xff] %v917_v14 }
 0x123   :  { %1013 = vst [vmem:[%s1863_s4 + $0x1e0] sm:$0xff] %v949_v15 }
 0x124   :  { %984 = vst [vmem:[%s1863_s4 + $0xf8] sm:$0xff] %v920_v16  ;;  %1016 = vst [vmem:[%s1863_s4 + $0x1f8] sm:$0xff] %v952_v18  ;;  %v919_v22 = vmax.f32 %v848_v20, %v1537_v19  ;;  %v951_v17 = vmax.f32 %v880_v21, %v1537_v19 }
 0x126   :  { %983 = vst [vmem:[%s1863_s4 + $0xf0] sm:$0xff] %v919_v22  ;;  %1015 = vst [vmem:[%s1863_s4 + $0x1f0] sm:$0xff] %v951_v17 }

// kernel: encoder_forward.15
= control target key start
LH: loop header
LB: loop body
LE: loop exit
PB: predicated region body
PF: predicated region fallthrough
CT: control target
= control target key end

     0   :  { %s4399_s0 = inlined_call_operand.vmem [shape: f32[512,128], index: 0, kind: input, shape index: {}]   ;;  %s4400_s2 = inlined_call_operand.vmem [shape: f32[1,128], index: 2, kind: input, shape index: {}]   ;;  %s4401_s1 = inlined_call_operand.vmem [shape: f32[512,128], index: 1, kind: input, shape index: {}]   ;;  %s4402_s3 = inlined_call_operand.<no memory space> [shape: f32[1,1], index: 3, kind: input, shape index: {}]   ;;  %s4403_s4 = inlined_call_operand.vmem [shape: f32[512,128], index: 4, kind: output, shape index: {}]  }
   0x1   :  { %v20_v0 = vld [vmem:[%s4399_s0 + $0x10] sm:$0xff]  ;;  %v2174_v1 = vld [vmem:[%s4400_s2] ss:$0 sm:$0xff]  ;;  %v21_v5 = vld [vmem:[%s4399_s0 + $0x18] sm:$0xff] }
   0x2   :  { %v18_v2 = vld [vmem:[%s4399_s0] sm:$0xff]  ;;  %v156_v3 = vmul.f32 %v2174_v1, %v20_v0  ;;  %v19_v6 = vld [vmem:[%s4399_s0 + $0x8] sm:$0xff]  ;;  %v157_v7 = vmul.f32 %v2174_v1, %v21_v5  ;;  %v25_v13 = vld [vmem:[%s4399_s0 + $0x38] sm:$0xff] }
   0x3   :  { %v154_v4 = vmul.f32 %v2174_v1, %v18_v2  ;;  %v155_v8 = vmul.f32 %v2174_v1, %v19_v6  ;;  %v23_v9 = vld [vmem:[%s4399_s0 + $0x28] sm:$0xff]  ;;  %v22_v10 = vld [vmem:[%s4399_s0 + $0x20] sm:$0xff]  ;;  %v24_v14 = vld [vmem:[%s4399_s0 + $0x30] sm:$0xff]  ;;  %v161_v15 = vmul.f32 %v2174_v1, %v25_v13 }
   0x4   :  { %222 = vadd.xlane.f32.xlu1 %v156_v3  ;;  %v159_v11 = vmul.f32 %v2174_v1, %v23_v9  ;;  %v158_v12 = vmul.f32 %v2174_v1, %v22_v10  ;;  %v160_v16 = vmul.f32 %v2174_v1, %v24_v14  ;;  %v27_v17 = vld [vmem:[%s4399_s0 + $0x48] sm:$0xff]  ;;  %v26_v18 = vld [vmem:[%s4399_s0 + $0x40] sm:$0xff]  ;;  %v29_v21 = vld [vmem:[%s4399_s0 + $0x58] sm:$0xff] }
   0x5   :  { %218 = vadd.xlane.f32.xlu0 %v154_v4  ;;  %v163_v19 = vmul.f32 %v2174_v1, %v27_v17  ;;  %v162_v20 = vmul.f32 %v2174_v1, %v26_v18  ;;  %v28_v22 = vld [vmem:[%s4399_s0 + $0x50] sm:$0xff]  ;;  %v165_v23 = vmul.f32 %v2174_v1, %v29_v21  ;;  %v31_v25 = vld [vmem:[%s4399_s0 + $0x68] sm:$0xff]  ;;  %v30_v26 = vld [vmem:[%s4399_s0 + $0x60] sm:$0xff] }
   0x6   :  { %v164_v24 = vmul.f32 %v2174_v1, %v28_v22  ;;  %v167_v27 = vmul.f32 %v2174_v1, %v31_v25  ;;  %v166_v28 = vmul.f32 %v2174_v1, %v30_v26  ;;  %v33_v29 = vld [vmem:[%s4399_s0 + $0x78] sm:$0xff]  ;;  %v32_v30 = vld [vmem:[%s4399_s0 + $0x70] sm:$0xff]  ;;  %v35_v33 = vld [vmem:[%s4399_s0 + $0x88] sm:$0xff] }
   0x7   :  { %v169_v31 = vmul.f32 %v2174_v1, %v33_v29  ;;  %v168_v32 = vmul.f32 %v2174_v1, %v32_v30  ;;  %v34_v34 = vld [vmem:[%s4399_s0 + $0x80] sm:$0xff]  ;;  %v171_v35 = vmul.f32 %v2174_v1, %v35_v33  ;;  %v37_v37 = vld [vmem:[%s4399_s0 + $0x98] sm:$0xff]  ;;  %v36_v38 = vld [vmem:[%s4399_s0 + $0x90] sm:$0xff] }
   0x8   :  { %224 = vadd.xlane.f32.xlu1 %v157_v7  ;;  %v170_v36 = vmul.f32 %v2174_v1, %v34_v34  ;;  %v173_v39 = vmul.f32 %v2174_v1, %v37_v37  ;;  %v172_v40 = vmul.f32 %v2174_v1, %v36_v38  ;;  %v39_v41 = vld [vmem:[%s4399_s0 + $0xa8] sm:$0xff]  ;;  %v38_v42 = vld [vmem:[%s4399_s0 + $0xa0] sm:$0xff]  ;;  %v41_v45 = vld [vmem:[%s4399_s0 + $0xb8] sm:$0xff] }
   0x9   :  { %220 = vadd.xlane.f32.xlu0 %v155_v8  ;;  %v175_v43 = vmul.f32 %v2174_v1, %v39_v41  ;;  %v174_v44 = vmul.f32 %v2174_v1, %v38_v42  ;;  %v40_v46 = vld [vmem:[%s4399_s0 + $0xb0] sm:$0xff]  ;;  %v177_v47 = vmul.f32 %v2174_v1, %v41_v45  ;;  %v43_v49 = vld [vmem:[%s4399_s0 + $0xc8] sm:$0xff]  ;;  %v42_v50 = vld [vmem:[%s4399_s0 + $0xc0] sm:$0xff] }
   0xa   :  { %v176_v48 = vmul.f32 %v2174_v1, %v40_v46  ;;  %v179_v51 = vmul.f32 %v2174_v1, %v43_v49  ;;  %v178_v52 = vmul.f32 %v2174_v1, %v42_v50  ;;  %v45_v53 = vld [vmem:[%s4399_s0 + $0xd8] sm:$0xff]  ;;  %v44_v54 = vld [vmem:[%s4399_s0 + $0xd0] sm:$0xff]  ;;  %v47_v57 = vld [vmem:[%s4399_s0 + $0xe8] sm:$0xff] }
   0xb   :  { %v181_v55 = vmul.f32 %v2174_v1, %v45_v53  ;;  %v180_v56 = vmul.f32 %v2174_v1, %v44_v54  ;;  %v46_v58 = vld [vmem:[%s4399_s0 + $0xe0] sm:$0xff]  ;;  %v183_v59 = vmul.f32 %v2174_v1, %v47_v57  ;;  %v49_v61 = vld [vmem:[%s4399_s0 + $0xf8] sm:$0xff]  ;;  %v48_v62 = vld [vmem:[%s4399_s0 + $0xf0] sm:$0xff] }
   0xc   :  { %228 = vadd.xlane.f32.xlu1 %v159_v11  ;;  %v182_v60 = vmul.f32 %v2174_v1, %v46_v58  ;;  %v185_v63 = vmul.f32 %v2174_v1, %v49_v61  ;;  %v184_v0 = vmul.f32 %v2174_v1, %v48_v62  ;;  %v51_v2 = vld [vmem:[%s4399_s0 + $0x108] sm:$0xff]  ;;  %v50_v3 = vld [vmem:[%s4399_s0 + $0x100] sm:$0xff]  ;;  %v53_v6 = vld [vmem:[%s4399_s0 + $0x118] sm:$0xff] }
   0xd   :  { %226 = vadd.xlane.f32.xlu0 %v158_v12  ;;  %v187_v4 = vmul.f32 %v2174_v1, %v51_v2  ;;  %v186_v5 = vmul.f32 %v2174_v1, %v50_v3  ;;  %v52_v7 = vld [vmem:[%s4399_s0 + $0x110] sm:$0xff]  ;;  %v189_v8 = vmul.f32 %v2174_v1, %v53_v6  ;;  %v55_v10 = vld [vmem:[%s4399_s0 + $0x128] sm:$0xff]  ;;  %v54_v11 = vld [vmem:[%s4399_s0 + $0x120] sm:$0xff] }
   0xe   :  { %v188_v9 = vmul.f32 %v2174_v1, %v52_v7  ;;  %v191_v12 = vmul.f32 %v2174_v1, %v55_v10  ;;  %v190_v13 = vmul.f32 %v2174_v1, %v54_v11  ;;  %v57_v14 = vld [vmem:[%s4399_s0 + $0x138] sm:$0xff]  ;;  %v59_v18 = vld [vmem:[%s4399_s0 + $0x148] sm:$0xff] }
   0xf   :  { %v61_v22 = vld [vmem:[%s4399_s0 + $0x158] sm:$0xff]  ;;  %v63_v26 = vld [vmem:[%s4399_s0 + $0x168] sm:$0xff] }
  0x10   :  { %232 = vadd.xlane.f32.xlu1 %v161_v15  ;;  %v56_v15 = vld [vmem:[%s4399_s0 + $0x130] sm:$0xff]  ;;  %v65_v30 = vld [vmem:[%s4399_s0 + $0x178] sm:$0xff]  ;;  %v67_v34 = vld [vmem:[%s4399_s0 + $0x188] sm:$0xff] }
  0x11   :  { %230 = vadd.xlane.f32.xlu0 %v160_v16  ;;  %v193_v16 = vmul.f32 %v2174_v1, %v57_v14  ;;  %v192_v17 = vmul.f32 %v2174_v1, %v56_v15  ;;  %v69_v38 = vld [vmem:[%s4399_s0 + $0x198] sm:$0xff]  ;;  %v71_v42 = vld [vmem:[%s4399_s0 + $0x1a8] sm:$0xff] }
  0x12   :  { %v73_v46 = vld [vmem:[%s4399_s0 + $0x1b8] sm:$0xff]  ;;  %v75_v50 = vld [vmem:[%s4399_s0 + $0x1c8] sm:$0xff] }
  0x13   :  { %v77_v54 = vld [vmem:[%s4399_s0 + $0x1d8] sm:$0xff]  ;;  %v79_v58 = vld [vmem:[%s4399_s0 + $0x1e8] sm:$0xff] }
  0x14   :  { %236 = vadd.xlane.f32.xlu1 %v163_v19  ;;  %v58_v19 = vld [vmem:[%s4399_s0 + $0x140] sm:$0xff]  ;;  %v81_v62 = vld [vmem:[%s4399_s0 + $0x1f8] sm:$0xff]  ;;  %v2432_v3 = vld [vmem:[%s4401_s1 + $0x8] sm:$0xff] }
  0x15   :  { %234 = vadd.xlane.f32.xlu0 %v162_v20  ;;  %v195_v20 = vmul.f32 %v2174_v1, %v59_v18  ;;  %v194_v21 = vmul.f32 %v2174_v1, %v58_v19  ;;  %4433 = vst [vmem:[#allocation3_spill] sm:$0xff] %v2432_v3  ;;  %v85_v7 = vld [vmem:[%s4401_s1 + $0x18] sm:$0xff]  ;;  %v87_v11 = vld [vmem:[%s4401_s1 + $0x28] sm:$0xff] }
  0x16   :  { %v89_v15 = vld [vmem:[%s4401_s1 + $0x38] sm:$0xff] }
  0x18   :  { %240 = vadd.xlane.f32.xlu1 %v165_v23  ;;  %v60_v23 = vld [vmem:[%s4399_s0 + $0x150] sm:$0xff] }
  0x19   :  { %238 = vadd.xlane.f32.xlu0 %v164_v24  ;;  %v197_v24 = vmul.f32 %v2174_v1, %v61_v22  ;;  %v196_v25 = vmul.f32 %v2174_v1, %v60_v23  ;;  %v90_v22 = vld [vmem:[%s4401_s1 + $0x40] sm:$0xff] }
  0x1c   :  { %244 = vadd.xlane.f32.xlu1 %v167_v27  ;;  %v62_v27 = vld [vmem:[%s4399_s0 + $0x160] sm:$0xff] }
  0x1d   :  { %242 = vadd.xlane.f32.xlu0 %v166_v28  ;;  %v199_v28 = vmul.f32 %v2174_v1, %v63_v26  ;;  %v198_v29 = vmul.f32 %v2174_v1, %v62_v27  ;;  %v93_v27 = vld [vmem:[%s4401_s1 + $0x58] sm:$0xff] }
  0x20   :  { %248 = vadd.xlane.f32.xlu1 %v169_v31  ;;  %v64_v31 = vld [vmem:[%s4399_s0 + $0x170] sm:$0xff] }
  0x21   :  { %246 = vadd.xlane.f32.xlu0 %v168_v32  ;;  %v201_v32 = vmul.f32 %v2174_v1, %v65_v30  ;;  %v200_v33 = vmul.f32 %v2174_v1, %v64_v31 }
  0x24   :  { %252 = vadd.xlane.f32.xlu1 %v171_v35  ;;  %v66_v35 = vld [vmem:[%s4399_s0 + $0x180] sm:$0xff] }
  0x25   :  { %250 = vadd.xlane.f32.xlu0 %v170_v36  ;;  %v203_v36 = vmul.f32 %v2174_v1, %v67_v34  ;;  %v202_v37 = vmul.f32 %v2174_v1, %v66_v35  ;;  %v94_v34 = vld [vmem:[%s4401_s1 + $0x60] sm:$0xff] }
  0x28   :  { %256 = vadd.xlane.f32.xlu1 %v173_v39  ;;  %v68_v39 = vld [vmem:[%s4399_s0 + $0x190] sm:$0xff] }
  0x29   :  { %254 = vadd.xlane.f32.xlu0 %v172_v40  ;;  %v205_v40 = vmul.f32 %v2174_v1, %v69_v38  ;;  %v204_v41 = vmul.f32 %v2174_v1, %v68_v39  ;;  %v97_v39 = vld [vmem:[%s4401_s1 + $0x78] sm:$0xff] }
  0x2c   :  { %260 = vadd.xlane.f32.xlu1 %v175_v43  ;;  %v70_v43 = vld [vmem:[%s4399_s0 + $0x1a0] sm:$0xff] }
  0x2d   :  { %258 = vadd.xlane.f32.xlu0 %v174_v44  ;;  %v207_v44 = vmul.f32 %v2174_v1, %v71_v42  ;;  %v206_v45 = vmul.f32 %v2174_v1, %v70_v43 }
  0x30   :  { %264 = vadd.xlane.f32.xlu1 %v177_v47  ;;  %v72_v47 = vld [vmem:[%s4399_s0 + $0x1b0] sm:$0xff] }
  0x31   :  { %262 = vadd.xlane.f32.xlu0 %v176_v48  ;;  %v209_v48 = vmul.f32 %v2174_v1, %v73_v46  ;;  %v208_v49 = vmul.f32 %v2174_v1, %v72_v47  ;;  %v98_v46 = vld [vmem:[%s4401_s1 + $0x80] sm:$0xff] }
  0x34   :  { %268 = vadd.xlane.f32.xlu1 %v179_v51  ;;  %v74_v51 = vld [vmem:[%s4399_s0 + $0x1c0] sm:$0xff] }
  0x35   :  { %266 = vadd.xlane.f32.xlu0 %v178_v52  ;;  %v211_v52 = vmul.f32 %v2174_v1, %v75_v50  ;;  %v210_v53 = vmul.f32 %v2174_v1, %v74_v51  ;;  %v101_v51 = vld [vmem:[%s4401_s1 + $0x98] sm:$0xff] }
  0x38   :  { %272 = vadd.xlane.f32.xlu1 %v181_v55  ;;  %v76_v55 = vld [vmem:[%s4399_s0 + $0x1d0] sm:$0xff] }
  0x39   :  { %270 = vadd.xlane.f32.xlu0 %v180_v56  ;;  %v213_v56 = vmul.f32 %v2174_v1, %v77_v54  ;;  %v212_v57 = vmul.f32 %v2174_v1, %v76_v55 }
  0x3c   :  { %276 = vadd.xlane.f32.xlu1 %v183_v59  ;;  %v78_v59 = vld [vmem:[%s4399_s0 + $0x1e0] sm:$0xff] }
  0x3d   :  { %274 = vadd.xlane.f32.xlu0 %v182_v60  ;;  %v215_v60 = vmul.f32 %v2174_v1, %v79_v58  ;;  %v214_v61 = vmul.f32 %v2174_v1, %v78_v59  ;;  %v102_v58 = vld [vmem:[%s4401_s1 + $0xa0] sm:$0xff] }
  0x40   :  { %280 = vadd.xlane.f32.xlu1 %v185_v63  ;;  %v80_v63 = vld [vmem:[%s4399_s0 + $0x1f0] sm:$0xff] }
  0x41   :  { %278 = vadd.xlane.f32.xlu0 %v184_v0  ;;  %v217_v0 = vmul.f32 %v2174_v1, %v81_v62  ;;  %v216_v2 = vmul.f32 %v2174_v1, %v80_v63  ;;  %v105_v63 = vld [vmem:[%s4401_s1 + $0xb8] sm:$0xff] }
  0x44   :  { %284 = vadd.xlane.f32.xlu1 %v187_v4  ;;  %v82_v4 = vld [vmem:[%s4401_s1] sm:$0xff] }
  0x45   :  { %282 = vadd.xlane.f32.xlu0 %v186_v5  ;;  %v412_v5 = vmul.f32 %v2174_v1, %v2432_v3  ;;  %v411_v6 = vmul.f32 %v2174_v1, %v82_v4  ;;  %v145_v3 = vld [vmem:[%s4401_s1 + $0x1f8] sm:$0xff] }
  0x48   :  { %288 = vadd.xlane.f32.xlu1 %v189_v8  ;;  %v84_v8 = vld [vmem:[%s4401_s1 + $0x10] sm:$0xff] }
  0x49   :  { %286 = vadd.xlane.f32.xlu0 %v188_v9  ;;  %v414_v9 = vmul.f32 %v2174_v1, %v85_v7  ;;  %v413_v10 = vmul.f32 %v2174_v1, %v84_v8  ;;  %v107_v7 = vld [vmem:[%s4401_s1 + $0xc8] sm:$0xff]  ;;  %v106_v8 = vld [vmem:[%s4401_s1 + $0xc0] sm:$0xff] }
  0x4c   :  { %292 = vadd.xlane.f32.xlu1 %v191_v12  ;;  %v86_v12 = vld [vmem:[%s4401_s1 + $0x20] sm:$0xff] }
  0x4d   :  { %290 = vadd.xlane.f32.xlu0 %v190_v13  ;;  %v416_v13 = vmul.f32 %v2174_v1, %v87_v11  ;;  %v415_v14 = vmul.f32 %v2174_v1, %v86_v12 }
  0x50   :  { %296 = vadd.xlane.f32.xlu1 %v193_v16  ;;  %v88_v16 = vld [vmem:[%s4401_s1 + $0x30] sm:$0xff] }
  0x51   :  { %294 = vadd.xlane.f32.xlu0 %v192_v17  ;;  %v418_v17 = vmul.f32 %v2174_v1, %v89_v15  ;;  %v417_v18 = vmul.f32 %v2174_v1, %v88_v16 }
  0x54   :  { %300 = vadd.xlane.f32.xlu1 %v195_v20 }
  0x55   :  { %298 = vadd.xlane.f32.xlu0 %v194_v21  ;;  %v91_v21 = vld [vmem:[%s4401_s1 + $0x48] sm:$0xff] }
  0x56   :  { %v420_v23 = vmul.f32 %v2174_v1, %v91_v21  ;;  %v111_v21 = vld [vmem:[%s4401_s1 + $0xe8] sm:$0xff] }
  0x58   :  { %304 = vadd.xlane.f32.xlu1 %v197_v24  ;;  %v419_v24 = vmul.f32 %v2174_v1, %v90_v22  ;;  %v110_v22 = vld [vmem:[%s4401_s1 + $0xe0] sm:$0xff] }
  0x59   :  { %302 = vadd.xlane.f32.xlu0 %v196_v25 }
  0x5c   :  { %308 = vadd.xlane.f32.xlu1 %v199_v28  ;;  %v92_v28 = vld [vmem:[%s4401_s1 + $0x50] sm:$0xff] }
  0x5d   :  { %306 = vadd.xlane.f32.xlu0 %v198_v29  ;;  %v422_v29 = vmul.f32 %v2174_v1, %v93_v27  ;;  %v421_v30 = vmul.f32 %v2174_v1, %v92_v28 }
  0x60   :  { %312 = vadd.xlane.f32.xlu1 %v201_v32 }
  0x61   :  { %310 = vadd.xlane.f32.xlu0 %v200_v33  ;;  %v95_v33 = vld [vmem:[%s4401_s1 + $0x68] sm:$0xff] }
  0x62   :  { %v424_v35 = vmul.f32 %v2174_v1, %v95_v33 }
  0x64   :  { %316 = vadd.xlane.f32.xlu1 %v203_v36  ;;  %v423_v36 = vmul.f32 %v2174_v1, %v94_v34 }
  0x65   :  { %314 = vadd.xlane.f32.xlu0 %v202_v37 }
  0x68   :  { %320 = vadd.xlane.f32.xlu1 %v205_v40  ;;  %v96_v40 = vld [vmem:[%s4401_s1 + $0x70] sm:$0xff] }
  0x69   :  { %318 = vadd.xlane.f32.xlu0 %v204_v41  ;;  %v426_v41 = vmul.f32 %v2174_v1, %v97_v39  ;;  %v425_v42 = vmul.f32 %v2174_v1, %v96_v40  ;;  %v115_v39 = vld [vmem:[%s4401_s1 + $0x108] sm:$0xff]  ;;  %v114_v40 = vld [vmem:[%s4401_s1 + $0x100] sm:$0xff] }
  0x6c   :  { %324 = vadd.xlane.f32.xlu1 %v207_v44 }
  0x6d   :  { %322 = vadd.xlane.f32.xlu0 %v206_v45  ;;  %v99_v45 = vld [vmem:[%s4401_s1 + $0x88] sm:$0xff] }
  0x6e   :  { %v428_v47 = vmul.f32 %v2174_v1, %v99_v45 }
  0x70   :  { %328 = vadd.xlane.f32.xlu1 %v209_v48  ;;  %v427_v48 = vmul.f32 %v2174_v1, %v98_v46 }
  0x71   :  { %326 = vadd.xlane.f32.xlu0 %v208_v49 }
  0x74   :  { %332 = vadd.xlane.f32.xlu1 %v211_v52  ;;  %v100_v52 = vld [vmem:[%s4401_s1 + $0x90] sm:$0xff] }
  0x75   :  { %330 = vadd.xlane.f32.xlu0 %v210_v53  ;;  %v430_v53 = vmul.f32 %v2174_v1, %v101_v51  ;;  %v429_v54 = vmul.f32 %v2174_v1, %v100_v52 }
  0x78   :  { %336 = vadd.xlane.f32.xlu1 %v213_v56 }
  0x79   :  { %334 = vadd.xlane.f32.xlu0 %v212_v57  ;;  %v103_v57 = vld [vmem:[%s4401_s1 + $0xa8] sm:$0xff] }
  0x7a   :  { %v432_v59 = vmul.f32 %v2174_v1, %v103_v57  ;;  %v119_v57 = vld [vmem:[%s4401_s1 + $0x128] sm:$0xff] }
  0x7c   :  { %340 = vadd.xlane.f32.xlu1 %v215_v60  ;;  %v431_v60 = vmul.f32 %v2174_v1, %v102_v58  ;;  %v118_v58 = vld [vmem:[%s4401_s1 + $0x120] sm:$0xff] }
  0x7d   :  { %338 = vadd.xlane.f32.xlu0 %v214_v61 }
  0x80   :  { %344 = vadd.xlane.f32.xlu1 %v217_v0  ;;  %v104_v0 = vld [vmem:[%s4401_s1 + $0xb0] sm:$0xff] }
  0x81   :  { %342 = vadd.xlane.f32.xlu0 %v216_v2  ;;  %v434_v2 = vmul.f32 %v2174_v1, %v105_v63  ;;  %v433_v4 = vmul.f32 %v2174_v1, %v104_v0 }
  0x84   :  { %477 = vadd.xlane.f32.xlu1 %v412_v5 }
  0x85   :  { %475 = vadd.xlane.f32.xlu0 %v411_v6 }
  0x88   :  { %481 = vadd.xlane.f32.xlu1 %v414_v9  ;;  %v436_v9 = vmul.f32 %v2174_v1, %v107_v7 }
  0x89   :  { %479 = vadd.xlane.f32.xlu0 %v413_v10  ;;  %v435_v10 = vmul.f32 %v2174_v1, %v106_v8 }
  0x8c   :  { %485 = vadd.xlane.f32.xlu1 %v416_v13  ;;  %v109_v13 = vld [vmem:[%s4401_s1 + $0xd8] sm:$0xff] }
  0x8d   :  { %483 = vadd.xlane.f32.xlu0 %v415_v14  ;;  %v2464_v19 = vpop.xlane.xlu1 %222  ;;  %v108_v14 = vld [vmem:[%s4401_s1 + $0xd0] sm:$0xff]  ;;  %v438_v15 = vmul.f32 %v2174_v1, %v109_v13  ;;  %v123_v13 = vld [vmem:[%s4401_s1 + $0x148] sm:$0xff] }
  0x8e   :  { %v2466_v20 = vpop.xlane.xlu0 %218  ;;  %v437_v16 = vmul.f32 %v2174_v1, %v108_v14  ;;  %v122_v14 = vld [vmem:[%s4401_s1 + $0x140] sm:$0xff] }
  0x90   :  { %489 = vadd.xlane.f32.xlu1 %v418_v17 }
  0x91   :  { %487 = vadd.xlane.f32.xlu0 %v417_v18  ;;  %v2476_v25 = vpop.xlane.xlu1 %224 }
  0x92   :  { %v2478_v26 = vpop.xlane.xlu0 %220 }
  0x94   :  { %493 = vadd.xlane.f32.xlu1 %v420_v23  ;;  %v440_v23 = vmul.f32 %v2174_v1, %v111_v21 }
  0x95   :  { %491 = vadd.xlane.f32.xlu0 %v419_v24  ;;  %v2488_v31 = vpop.xlane.xlu1 %228  ;;  %v439_v24 = vmul.f32 %v2174_v1, %v110_v22 }
  0x96   :  { %v2490_v32 = vpop.xlane.xlu0 %226 }
  0x98   :  { %497 = vadd.xlane.f32.xlu1 %v422_v29  ;;  %v113_v29 = vld [vmem:[%s4401_s1 + $0xf8] sm:$0xff] }
  0x99   :  { %495 = vadd.xlane.f32.xlu0 %v421_v30  ;;  %v2500_v37 = vpop.xlane.xlu1 %232  ;;  %v112_v30 = vld [vmem:[%s4401_s1 + $0xf0] sm:$0xff]  ;;  %v442_v33 = vmul.f32 %v2174_v1, %v113_v29 }
  0x9a   :  { %v2502_v38 = vpop.xlane.xlu0 %230  ;;  %v441_v34 = vmul.f32 %v2174_v1, %v112_v30 }
  0x9c   :  { %501 = vadd.xlane.f32.xlu1 %v424_v35 }
  0x9d   :  { %499 = vadd.xlane.f32.xlu0 %v423_v36  ;;  %v2512_v43 = vpop.xlane.xlu1 %236 }
  0x9e   :  { %v2514_v44 = vpop.xlane.xlu0 %234 }
  0xa0   :  { %505 = vadd.xlane.f32.xlu1 %v426_v41  ;;  %v444_v41 = vmul.f32 %v2174_v1, %v115_v39  ;;  %v127_v39 = vld [vmem:[%s4401_s1 + $0x168] sm:$0xff] }
  0xa1   :  { %503 = vadd.xlane.f32.xlu0 %v425_v42  ;;  %v2524_v49 = vpop.xlane.xlu1 %240  ;;  %v443_v42 = vmul.f32 %v2174_v1, %v114_v40  ;;  %v126_v40 = vld [vmem:[%s4401_s1 + $0x160] sm:$0xff] }
  0xa2   :  { %v2526_v50 = vpop.xlane.xlu0 %238 }
  0xa4   :  { %509 = vadd.xlane.f32.xlu1 %v428_v47  ;;  %v117_v47 = vld [vmem:[%s4401_s1 + $0x118] sm:$0xff] }
  0xa5   :  { %507 = vadd.xlane.f32.xlu0 %v427_v48  ;;  %v2536_v55 = vpop.xlane.xlu1 %244  ;;  %v116_v48 = vld [vmem:[%s4401_s1 + $0x110] sm:$0xff]  ;;  %v446_v51 = vmul.f32 %v2174_v1, %v117_v47 }
  0xa6   :  { %v2538_v56 = vpop.xlane.xlu0 %242  ;;  %v445_v52 = vmul.f32 %v2174_v1, %v116_v48 }
  0xa8   :  { %513 = vadd.xlane.f32.xlu1 %v430_v53 }
  0xa9   :  { %511 = vadd.xlane.f32.xlu0 %v429_v54  ;;  %v2548_v61 = vpop.xlane.xlu1 %248 }
  0xaa   :  { %v2550_v62 = vpop.xlane.xlu0 %246 }
  0xac   :  { %517 = vadd.xlane.f32.xlu1 %v432_v59  ;;  %v448_v59 = vmul.f32 %v2174_v1, %v119_v57 }
  0xad   :  { %515 = vadd.xlane.f32.xlu0 %v431_v60  ;;  %v2560_v5 = vpop.xlane.xlu1 %252  ;;  %v447_v60 = vmul.f32 %v2174_v1, %v118_v58 }
  0xae   :  { %v2562_v6 = vpop.xlane.xlu0 %250 }
  0xb0   :  { %521 = vadd.xlane.f32.xlu1 %v434_v2  ;;  %v121_v2 = vld [vmem:[%s4401_s1 + $0x138] sm:$0xff] }
  0xb1   :  { %519 = vadd.xlane.f32.xlu0 %v433_v4  ;;  %v2572_v11 = vpop.xlane.xlu1 %256  ;;  %v120_v4 = vld [vmem:[%s4401_s1 + $0x130] sm:$0xff]  ;;  %v450_v7 = vmul.f32 %v2174_v1, %v121_v2  ;;  %v131_v2 = vld [vmem:[%s4401_s1 + $0x188] sm:$0xff] }
  0xb2   :  { %v2574_v12 = vpop.xlane.xlu0 %254  ;;  %v449_v8 = vmul.f32 %v2174_v1, %v120_v4  ;;  %v130_v4 = vld [vmem:[%s4401_s1 + $0x180] sm:$0xff] }
  0xb4   :  { %525 = vadd.xlane.f32.xlu1 %v436_v9 }
  0xb5   :  { %523 = vadd.xlane.f32.xlu0 %v435_v10  ;;  %v2584_v17 = vpop.xlane.xlu1 %260 }
  0xb6   :  { %v2586_v18 = vpop.xlane.xlu0 %258 }
  0xb8   :  { %529 = vadd.xlane.f32.xlu1 %v438_v15  ;;  %v452_v15 = vmul.f32 %v2174_v1, %v123_v13 }
  0xb9   :  { %527 = vadd.xlane.f32.xlu0 %v437_v16  ;;  %v2596_v27 = vpop.xlane.xlu1 %264  ;;  %v451_v16 = vmul.f32 %v2174_v1, %v122_v14 }
  0xba   :  { %v2598_v28 = vpop.xlane.xlu0 %262 }
  0xbc   :  { %533 = vadd.xlane.f32.xlu1 %v440_v23  ;;  %v125_v23 = vld [vmem:[%s4401_s1 + $0x158] sm:$0xff] }
  0xbd   :  { %531 = vadd.xlane.f32.xlu0 %v439_v24  ;;  %v2608_v35 = vpop.xlane.xlu1 %268  ;;  %v124_v24 = vld [vmem:[%s4401_s1 + $0x150] sm:$0xff]  ;;  %v454_v29 = vmul.f32 %v2174_v1, %v125_v23 }
  0xbe   :  { %v2610_v36 = vpop.xlane.xlu0 %266  ;;  %v453_v30 = vmul.f32 %v2174_v1, %v124_v24 }
  0xc0   :  { %537 = vadd.xlane.f32.xlu1 %v442_v33 }
  0xc1   :  { %535 = vadd.xlane.f32.xlu0 %v441_v34  ;;  %v2620_v45 = vpop.xlane.xlu1 %272 }
  0xc2   :  { %v2622_v46 = vpop.xlane.xlu0 %270 }
  0xc4   :  { %541 = vadd.xlane.f32.xlu1 %v444_v41  ;;  %v456_v41 = vmul.f32 %v2174_v1, %v127_v39  ;;  %v135_v39 = vld [vmem:[%s4401_s1 + $0x1a8] sm:$0xff] }
  0xc5   :  { %539 = vadd.xlane.f32.xlu0 %v443_v42  ;;  %v2632_v53 = vpop.xlane.xlu1 %276  ;;  %v455_v42 = vmul.f32 %v2174_v1, %v126_v40  ;;  %v134_v40 = vld [vmem:[%s4401_s1 + $0x1a0] sm:$0xff] }
  0xc6   :  { %v2634_v54 = vpop.xlane.xlu0 %274 }
  0xc8   :  { %545 = vadd.xlane.f32.xlu1 %v446_v51  ;;  %v129_v51 = vld [vmem:[%s4401_s1 + $0x178] sm:$0xff] }
  0xc9   :  { %543 = vadd.xlane.f32.xlu0 %v445_v52  ;;  %v2644_v63 = vpop.xlane.xlu1 %280  ;;  %v128_v52 = vld [vmem:[%s4401_s1 + $0x170] sm:$0xff]  ;;  %v458_v57 = vmul.f32 %v2174_v1, %v129_v51 }
  0xca   :  { %v2646_v0 = vpop.xlane.xlu0 %278  ;;  %v457_v58 = vmul.f32 %v2174_v1, %v128_v52 }
  0xcc   :  { %549 = vadd.xlane.f32.xlu1 %v448_v59 }
  0xcd   :  { %547 = vadd.xlane.f32.xlu0 %v447_v60  ;;  %v2656_v9 = vpop.xlane.xlu1 %284 }
  0xce   :  { %v2658_v10 = vpop.xlane.xlu0 %282 }
  0xd0   :  { %553 = vadd.xlane.f32.xlu1 %v450_v7  ;;  %v460_v7 = vmul.f32 %v2174_v1, %v131_v2 }
  0xd1   :  { %551 = vadd.xlane.f32.xlu0 %v449_v8  ;;  %v2668_v21 = vpop.xlane.xlu1 %288  ;;  %v459_v8 = vmul.f32 %v2174_v1, %v130_v4 }
  0xd2   :  { %v2670_v22 = vpop.xlane.xlu0 %286 }
  0xd4   :  { %557 = vadd.xlane.f32.xlu1 %v452_v15  ;;  %v133_v15 = vld [vmem:[%s4401_s1 + $0x198] sm:$0xff] }
  0xd5   :  { %555 = vadd.xlane.f32.xlu0 %v451_v16  ;;  %v2680_v33 = vpop.xlane.xlu1 %292  ;;  %v132_v16 = vld [vmem:[%s4401_s1 + $0x190] sm:$0xff]  ;;  %v462_v23 = vmul.f32 %v2174_v1, %v133_v15  ;;  %v139_v15 = vld [vmem:[%s4401_s1 + $0x1c8] sm:$0xff] }
  0xd6   :  { %v2682_v34 = vpop.xlane.xlu0 %290  ;;  %v461_v24 = vmul.f32 %v2174_v1, %v132_v16  ;;  %v138_v16 = vld [vmem:[%s4401_s1 + $0x1c0] sm:$0xff] }
  0xd8   :  { %561 = vadd.xlane.f32.xlu1 %v454_v29 }
  0xd9   :  { %559 = vadd.xlane.f32.xlu0 %v453_v30  ;;  %v2692_v47 = vpop.xlane.xlu1 %296 }
  0xda   :  { %v2694_v48 = vpop.xlane.xlu0 %294 }
  0xdc   :  { %565 = vadd.xlane.f32.xlu1 %v456_v41  ;;  %v464_v41 = vmul.f32 %v2174_v1, %v135_v39 }
  0xdd   :  { %563 = vadd.xlane.f32.xlu0 %v455_v42  ;;  %v2704_v59 = vpop.xlane.xlu1 %300  ;;  %v463_v42 = vmul.f32 %v2174_v1, %v134_v40 }
  0xde   :  { %v2706_v60 = vpop.xlane.xlu0 %298 }
  0xe0   :  { %569 = vadd.xlane.f32.xlu1 %v458_v57  ;;  %v137_v57 = vld [vmem:[%s4401_s1 + $0x1b8] sm:$0xff] }
  0xe1   :  { %567 = vadd.xlane.f32.xlu0 %v457_v58  ;;  %v2716_v13 = vpop.xlane.xlu1 %304  ;;  %v136_v58 = vld [vmem:[%s4401_s1 + $0x1b0] sm:$0xff]  ;;  %v466_v2 = vmul.f32 %v2174_v1, %v137_v57 }
  0xe2   :  { %v2718_v14 = vpop.xlane.xlu0 %302  ;;  %v465_v4 = vmul.f32 %v2174_v1, %v136_v58 }
  0xe4   :  { %573 = vadd.xlane.f32.xlu1 %v460_v7 }
  0xe5   :  { %571 = vadd.xlane.f32.xlu0 %v459_v8  ;;  %v2728_v29 = vpop.xlane.xlu1 %308 }
  0xe6   :  { %v2730_v30 = vpop.xlane.xlu0 %306 }
  0xe8   :  { %577 = vadd.xlane.f32.xlu1 %v462_v23  ;;  %v468_v23 = vmul.f32 %v2174_v1, %v139_v15  ;;  %v143_v15 = vld [vmem:[%s4401_s1 + $0x1e8] sm:$0xff] }
  0xe9   :  { %575 = vadd.xlane.f32.xlu0 %v461_v24  ;;  %v2740_v51 = vpop.xlane.xlu1 %312  ;;  %v467_v24 = vmul.f32 %v2174_v1, %v138_v16  ;;  %v142_v16 = vld [vmem:[%s4401_s1 + $0x1e0] sm:$0xff] }
  0xea   :  { %v2742_v52 = vpop.xlane.xlu0 %310 }
  0xec   :  { %581 = vadd.xlane.f32.xlu1 %v464_v41  ;;  %v141_v41 = vld [vmem:[%s4401_s1 + $0x1d8] sm:$0xff] }
  0xed   :  { %579 = vadd.xlane.f32.xlu0 %v463_v42  ;;  %v2752_v7 = vpop.xlane.xlu1 %316  ;;  %v140_v42 = vld [vmem:[%s4401_s1 + $0x1d0] sm:$0xff]  ;;  %v470_v57 = vmul.f32 %v2174_v1, %v141_v41 }
  0xee   :  { %v2754_v8 = vpop.xlane.xlu0 %314  ;;  %v469_v58 = vmul.f32 %v2174_v1, %v140_v42 }
  0xf0   :  { %585 = vadd.xlane.f32.xlu1 %v466_v2 }
  0xf1   :  { %583 = vadd.xlane.f32.xlu0 %v465_v4  ;;  %v2764_v39 = vpop.xlane.xlu1 %320 }
  0xf2   :  { %v2766_v40 = vpop.xlane.xlu0 %318 }
  0xf4   :  { %589 = vadd.xlane.f32.xlu1 %v468_v23  ;;  %v472_v23 = vmul.f32 %v2174_v1, %v143_v15 }
  0xf5   :  { %587 = vadd.xlane.f32.xlu0 %v467_v24  ;;  %v2776_v2 = vpop.xlane.xlu1 %324  ;;  %v471_v24 = vmul.f32 %v2174_v1, %v142_v16 }
  0xf6   :  { %4434 = vst [vmem:[#allocation4_spill] sm:$0xff] %v2776_v2  ;;  %v2778_v4 = vpop.xlane.xlu0 %322 }
  0xf7   :  { %4435 = vst [vmem:[#allocation5_spill] sm:$0xff] %v2778_v4  ;;  %v144_v4 = vld [vmem:[%s4401_s1 + $0x1f0] sm:$0xff] }
  0xf8   :  { %593 = vadd.xlane.f32.xlu1 %v470_v57  ;;  %v474_v57 = vmul.f32 %v2174_v1, %v145_v3 }
  0xf9   :  { %591 = vadd.xlane.f32.xlu0 %v469_v58  ;;  %v2788_v41 = vpop.xlane.xlu1 %328  ;;  %v473_v58 = vmul.f32 %v2174_v1, %v144_v4 }
  0xfa   :  { %4436 = vst [vmem:[#allocation6_spill] sm:$0xff] %v2788_v41  ;;  %v2790_v42 = vpop.xlane.xlu0 %326 }
  0xfb   :  { %4437 = vst [vmem:[#allocation7_spill] sm:$0xff] %v2790_v42  ;;  %v2807_v42 = vstv %s4402_s3 }
  0xfc   :  { %597 = vadd.xlane.f32.xlu1 %v472_v23  ;;  %v2815_v3 = vadd.f32 %v2807_v42, %v2464_v19  ;;  %v2819_v1 = vadd.f32 %v2807_v42, %v2466_v20  ;;  %v2823_v4 = vadd.f32 %v2807_v42, %v2476_v25  ;;  %v2827_v23 = vadd.f32 %v2807_v42, %v2478_v26 }
  0xfd   :  { %595 = vadd.xlane.f32.xlu0 %v471_v24  ;;  %v2800_v15 = vpop.xlane.xlu1 %332  ;;  %v2831_v24 = vadd.f32 %v2807_v42, %v2488_v31  ;;  %v2835_v19 = vadd.f32 %v2807_v42, %v2490_v32  ;;  %v2839_v20 = vadd.f32 %v2807_v42, %v2500_v37  ;;  %v2843_v25 = vadd.f32 %v2807_v42, %v2502_v38 }
  0xfe   :  { %v2802_v16 = vpop.xlane.xlu0 %330  ;;  %v2847_v26 = vadd.f32 %v2807_v42, %v2512_v43  ;;  %v2851_v31 = vadd.f32 %v2807_v42, %v2514_v44  ;;  %v2855_v32 = vadd.f32 %v2807_v42, %v2524_v49  ;;  %v2859_v37 = vadd.f32 %v2807_v42, %v2526_v50 }
  0xff   :  { %v2863_v38 = vadd.f32 %v2807_v42, %v2536_v55  ;;  %v2871_v44 = vadd.f32 %v2807_v42, %v2538_v56  ;;  %v2875_v49 = vadd.f32 %v2807_v42, %v2548_v61  ;;  %v2879_v50 = vadd.f32 %v2807_v42, %v2550_v62 }
 0x100   :  { %601 = vadd.xlane.f32.xlu1 %v474_v57  ;;  %v2883_v55 = vadd.f32 %v2807_v42, %v2560_v5  ;;  %v2891_v56 = vadd.f32 %v2807_v42, %v2572_v11  ;;  %v2895_v61 = vadd.f32 %v2807_v42, %v2574_v12  ;;  %v2899_v62 = vadd.f32 %v2807_v42, %v2584_v17 }
 0x101   :  { %599 = vadd.xlane.f32.xlu0 %v473_v58  ;;  %v2809_v41 = vpop.xlane.xlu1 %336  ;;  %v2887_v58 = vadd.f32 %v2807_v42, %v2562_v6  ;;  %v2903_v5 = vadd.f32 %v2807_v42, %v2586_v18  ;;  %v2907_v6 = vadd.f32 %v2807_v42, %v2596_v27  ;;  %v2911_v11 = vadd.f32 %v2807_v42, %v2598_v28 }
 0x102   :  { %v2811_v2 = vpop.xlane.xlu0 %334  ;;  %v2915_v12 = vadd.f32 %v2807_v42, %v2608_v35  ;;  %v2919_v17 = vadd.f32 %v2807_v42, %v2610_v36  ;;  %v2923_v18 = vadd.f32 %v2807_v42, %v2620_v45  ;;  %v2927_v27 = vadd.f32 %v2807_v42, %v2622_v46 }
 0x103   :  { %4438 = vst [vmem:[#allocation8_spill] sm:$0xff] %v2911_v11  ;;  %v2931_v28 = vadd.f32 %v2807_v42, %v2632_v53  ;;  %v2939_v36 = vadd.f32 %v2807_v42, %v2634_v54  ;;  %v2943_v45 = vadd.f32 %v2807_v42, %v2644_v63  ;;  %v2947_v46 = vadd.f32 %v2807_v42, %v2646_v0 }
 0x104   :  { %v2951_v53 = vadd.f32 %v2807_v42, %v2656_v9  ;;  %v2959_v54 = vadd.f32 %v2807_v42, %v2668_v21  ;;  %v2963_v63 = vadd.f32 %v2807_v42, %v2670_v22  ;;  %v2967_v0 = vadd.f32 %v2807_v42, %v2680_v33 }
 0x105   :  { %v2865_v57 = vpop.xlane.xlu1 %340  ;;  %4439 = vst [vmem:[#allocation9_spill] sm:$0xff] %v2931_v28  ;;  %v2955_v28 = vadd.f32 %v2807_v42, %v2658_v10  ;;  %v2971_v9 = vadd.f32 %v2807_v42, %v2682_v34  ;;  %v2975_v10 = vadd.f32 %v2807_v42, %v2692_v47  ;;  %v2979_v21 = vadd.f32 %v2807_v42, %v2694_v48 }
 0x106   :  { %v2867_v43 = vpop.xlane.xlu0 %338  ;;  %v2983_v22 = vadd.f32 %v2807_v42, %v2704_v59  ;;  %v2987_v33 = vadd.f32 %v2807_v42, %v2706_v60  ;;  %v2991_v34 = vadd.f32 %v2807_v42, %v2716_v13  ;;  %v2995_v47 = vadd.f32 %v2807_v42, %v2718_v14 }
 0x107   :  { %4440 = vst [vmem:[#allocation10_spill] sm:$0xff] %v2975_v10  ;;  %4441 = vst [vmem:[#allocation11_spill] sm:$0xff] %v2979_v21  ;;  %v2999_v48 = vadd.f32 %v2807_v42, %v2728_v29  ;;  %v3003_v59 = vadd.f32 %v2807_v42, %v2730_v30  ;;  %v3007_v60 = vadd.f32 %v2807_v42, %v2740_v51 }
 0x108   :  { %4442 = vst [vmem:[#allocation12_spill] sm:$0xff] %v2983_v22  ;;  %4443 = vst [vmem:[#allocation13_spill] sm:$0xff] %v2987_v33  ;;  %v3013_v14 = vadd.f32 %v2807_v42, %v2742_v52  ;;  %v3017_v29 = vadd.f32 %v2807_v42, %v2752_v7  ;;  %v3021_v30 = vadd.f32 %v2807_v42, %v2754_v8 }
 0x109   :  { %v2933_v11 = vpop.xlane.xlu1 %344  ;;  %4444 = vst [vmem:[#allocation14_spill] sm:$0xff] %v2991_v34  ;;  %4445 = vst [vmem:[#allocation15_spill] sm:$0xff] %v2995_v47  ;;  %v3025_v51 = vadd.f32 %v2807_v42, %v2764_v39 }
 0x10a   :  { %v2935_v35 = vpop.xlane.xlu0 %342  ;;  %4446 = vst [vmem:[#allocation16_spill] sm:$0xff] %v2999_v48  ;;  %4447 = vst [vmem:[#allocation17_spill] sm:$0xff] %v3003_v59 }
 0x10b   :  { %4448 = vst [vmem:[#allocation18_spill] sm:$0xff] %v3007_v60  ;;  %4449 = vst [vmem:[#allocation19_spill] sm:$0xff] %v3013_v14 }
 0x10c   :  { %4450 = vst [vmem:[#allocation20_spill] sm:$0xff] %v3017_v29  ;;  %4451 = vst [vmem:[#allocation21_spill] sm:$0xff] %v3021_v30  ;;  %v4456_v29 = vld [vmem:[#allocation5_spill] sm:$0xff]  ;;  %v4458_v30 = vld [vmem:[#allocation6_spill] sm:$0xff] }
 0x10d   :  { %v478_v21 = vpop.xlane.xlu1 %477  ;;  %4452 = vst [vmem:[#allocation22_spill] sm:$0xff] %v3025_v51  ;;  %v3039_v8 = vadd.f32 %v2807_v42, %v4456_v29  ;;  %v3043_v39 = vadd.f32 %v2807_v42, %v4458_v30  ;;  %v4460_v51 = vld [vmem:[#allocation7_spill] sm:$0xff]  ;;  %v3057_v30 = vadd.f32 %v2807_v42, %v2802_v16 }
 0x10e   :  { %v476_v10 = vpop.xlane.xlu0 %475  ;;  %v604_v13 = vadd.f32 %v478_v21, %v2807_v42  ;;  %v3029_v21 = vadd.f32 %v2807_v42, %v2766_v40  ;;  %v3047_v40 = vadd.f32 %v2807_v42, %v4460_v51  ;;  %v3061_v51 = vadd.f32 %v2807_v42, %v2809_v41 }
 0x10f   :  { %v603_v34 = vadd.f32 %v476_v10, %v2807_v42  ;;  %v4454_v10 = vld [vmem:[#allocation4_spill] sm:$0xff]  ;;  %4457 = vst [vmem:[#allocation5_spill] sm:$0xff] %v3039_v8  ;;  %4459 = vst [vmem:[#allocation6_spill] sm:$0xff] %v3043_v39 }
 0x110   :  { %4453 = vst [vmem:[#allocation23_spill] sm:$0xff] %v3029_v21  ;;  %v3033_v52 = vadd.f32 %v2807_v42, %v4454_v10  ;;  %v668_v14 = vmax.f32 %v2827_v23, %v604_v13  ;;  %4461 = vst [vmem:[#allocation7_spill] sm:$0xff] %v3047_v40  ;;  %v3051_v10 = vadd.f32 %v2807_v42, %v2800_v15 }
 0x111   :  { %v667_v7 = vmax.f32 %v2819_v1, %v603_v34  ;;  %4463 = vst [vmem:[#allocation25_spill] sm:$0xff] %v3057_v30  ;;  %4464 = vst [vmem:[#allocation26_spill] sm:$0xff] %v3061_v51 }
 0x112   :  { %4455 = vst [vmem:[#allocation4_spill] sm:$0xff] %v3033_v52  ;;  %4462 = vst [vmem:[#allocation24_spill] sm:$0xff] %v3051_v10  ;;  %v482_v52 = vpop.xlane.xlu1 %481  ;;  %v480_v21 = vpop.xlane.xlu0 %479  ;;  %v732_v60 = vsub.f32 %v2827_v23, %v668_v14  ;;  %v924_v59 = vsub.f32 %v604_v13, %v668_v14  ;;  %v3067_v10 = vadd.f32 %v2807_v42, %v2811_v2 }
 0x113   :  { %v731_v29 = vsub.f32 %v2819_v1, %v667_v7  ;;  %v923_v8 = vsub.f32 %v603_v34, %v667_v7  ;;  %v606_v40 = vadd.f32 %v482_v52, %v2807_v42  ;;  %v605_v15 = vadd.f32 %v480_v21, %v2807_v42 }
 0x114   :  { %4465 = vst [vmem:[#allocation27_spill] sm:$0xff] %v3067_v10  ;;  %v797_v23 = vmul.f32 1.442695, %v732_v60  ;;  %v989_v13 = vmul.f32 1.442695, %v924_v59  ;;  %v3071_v34 = vadd.f32 %v2807_v42, %v2865_v57  ;;  %v3077_v21 = vadd.f32 %v2807_v42, %v2867_v43 }
 0x115   :  { %v795_v1 = vmul.f32 1.442695, %v731_v29  ;;  %v987_v16 = vmul.f32 1.442695, %v923_v8  ;;  %v670_v14 = vmax.f32 %v2823_v4, %v606_v40  ;;  %v669_v41 = vmax.f32 %v2815_v3, %v605_v15 }
 0x116   :  { %4466 = vst [vmem:[#allocation28_spill] sm:$0xff] %v3071_v34  ;;  %v486_v7 = vpop.xlane.xlu1 %485  ;;  %v484_v52 = vpop.xlane.xlu0 %483  ;;  %4467 = vst [vmem:[#allocation29_spill] sm:$0xff] %v3077_v21  ;;  %1632 = vpow2.f32 %v797_v23 }
 0x117   :  { %v608_v2 = vadd.f32 %v486_v7, %v2807_v42  ;;  %v607_v59 = vadd.f32 %v484_v52, %v2807_v42  ;;  %1634 = vpow2.f32 %v989_v13  ;;  %v734_v57 = vsub.f32 %v2823_v4, %v670_v14 }
 0x118   :  { %v926_v60 = vsub.f32 %v606_v40, %v670_v14  ;;  %v733_v8 = vsub.f32 %v2815_v3, %v669_v41  ;;  %1636 = vpow2.f32 %v795_v1  ;;  %v925_v29 = vsub.f32 %v605_v15, %v669_v41 }
 0x119   :  { %v672_v34 = vmax.f32 %v2831_v24, %v608_v2  ;;  %v671_v10 = vmax.f32 %v2835_v19, %v607_v59  ;;  %1638 = vpow2.f32 %v987_v16  ;;  %v801_v43 = vmul.f32 1.442695, %v734_v57 }
 0x11a   :  { %v993_v21 = vmul.f32 1.442695, %v926_v60  ;;  %v799_v23 = vmul.f32 1.442695, %v733_v8  ;;  %v490_v51 = vpop.xlane.xlu1 %489  ;;  %v488_v7 = vpop.xlane.xlu0 %487  ;;  %v991_v30 = vmul.f32 1.442695, %v925_v29  ;;  %v3091_v1 = vadd.f32 %v2807_v42, %v2933_v11 }
 0x11b   :  { %v736_v13 = vsub.f32 %v2831_v24, %v672_v34  ;;  %v928_v52 = vsub.f32 %v608_v2, %v672_v34  ;;  %v735_v4 = vsub.f32 %v2835_v19, %v671_v10  ;;  %1640 = vpow2.f32 %v801_v43 }
 0x11c   :  { %v927_v3 = vsub.f32 %v607_v59, %v671_v10  ;;  %v610_v40 = vadd.f32 %v490_v51, %v2807_v42  ;;  %v609_v15 = vadd.f32 %v488_v7, %v2807_v42  ;;  %4468 = vst [vmem:[#allocation30_spill] sm:$0xff] %v3091_v1  ;;  %1642 = vpow2.f32 %v993_v21 }
 0x11d   :  { %v805_v16 = vmul.f32 1.442695, %v736_v13  ;;  %v997_v14 = vmul.f32 1.442695, %v928_v52  ;;  %1644 = vpow2.f32 %v799_v23  ;;  %v803_v41 = vmul.f32 1.442695, %v735_v4 }
 0x11e   :  { %v674_v24 = vmax.f32 %v2839_v20, %v610_v40  ;;  %v673_v34 = vmax.f32 %v2843_v25, %v609_v15  ;;  %v494_v19 = vpop.xlane.xlu1 %493  ;;  %v492_v2 = vpop.xlane.xlu0 %491  ;;  %1646 = vpow2.f32 %v991_v30  ;;  %v995_v10 = vmul.f32 1.442695, %v927_v3 }
 0x11f   :  { %v612_v51 = vadd.f32 %v494_v19, %v2807_v42  ;;  %v611_v59 = vadd.f32 %v492_v2, %v2807_v42  ;;  %1648 = vpow2.f32 %v805_v16 }
 0x120   :  { %v738_v11 = vsub.f32 %v2839_v20, %v674_v24  ;;  %v930_v21 = vsub.f32 %v610_v40, %v674_v24  ;;  %v737_v57 = vsub.f32 %v2843_v25, %v673_v34  ;;  %1650 = vpow2.f32 %v997_v14 }
 0x121   :  { %v929_v60 = vsub.f32 %v609_v15, %v673_v34  ;;  %v676_v8 = vmax.f32 %v2847_v26, %v612_v51  ;;  %v675_v29 = vmax.f32 %v2851_v31, %v611_v59  ;;  %1652 = vpow2.f32 %v803_v41 }
 0x122   :  { %v809_v43 = vmul.f32 1.442695, %v738_v11  ;;  %v1001_v30 = vmul.f32 1.442695, %v930_v21  ;;  %v807_v23 = vmul.f32 1.442695, %v737_v57  ;;  %v498_v7 = vpop.xlane.xlu1 %497  ;;  %v496_v13 = vpop.xlane.xlu0 %495  ;;  %1654 = vpow2.f32 %v995_v10 }
 0x123   :  { %v999_v52 = vmul.f32 1.442695, %v929_v60  ;;  %v740_v4 = vsub.f32 %v2847_v26, %v676_v8  ;;  %v932_v20 = vsub.f32 %v612_v51, %v676_v8  ;;  %v3102_v3 = vpop.eup %1632  ;;  %v739_v25 = vsub.f32 %v2851_v31, %v675_v29 }
 0x124   :  { %1656 = vpow2.f32 %v809_v43  ;;  %v931_v40 = vsub.f32 %v611_v59, %v675_v29  ;;  %v614_v15 = vadd.f32 %v498_v7, %v2807_v42  ;;  %v3106_v16 = vpop.eup %1634  ;;  %v3110_v14 = vadd.f32 %v2807_v42, %v2935_v35 }
 0x125   :  { %1658 = vpow2.f32 %v1001_v30  ;;  %v813_v41 = vmul.f32 1.442695, %v740_v4  ;;  %v613_v24 = vadd.f32 %v496_v13, %v2807_v42  ;;  %v3113_v26 = vpop.eup %1636  ;;  %v1116_v34 = vadd.f32 %v3106_v16, %v3102_v3 }
 0x126   :  { %4469 = vst [vmem:[#allocation31_spill] sm:$0xff] %v3110_v14  ;;  %1660 = vpow2.f32 %v807_v23  ;;  %v1005_v31 = vmul.f32 1.442695, %v932_v20  ;;  %v811_v19 = vmul.f32 1.442695, %v739_v25  ;;  %v502_v2 = vpop.xlane.xlu1 %501  ;;  %v500_v10 = vpop.xlane.xlu0 %499  ;;  %v678_v35 = vmax.f32 %v2855_v32, %v614_v15 }
 0x127   :  { %v3117_v51 = vpop.eup %1638  ;;  %1662 = vpow2.f32 %v999_v52  ;;  %v677_v59 = vmax.f32 %v2859_v37, %v613_v24  ;;  %v616_v11 = vadd.f32 %v502_v2, %v2807_v42  ;;  %v1003_v57 = vmul.f32 1.442695, %v931_v40 }
 0x128   :  { %1664 = vrcp.f32 %v1116_v34  ;;  %v1115_v21 = vadd.f32 %v3117_v51, %v3113_v26  ;;  %v615_v60 = vadd.f32 %v500_v10, %v2807_v42  ;;  %v3125_v8 = vpop.eup %1640  ;;  %v742_v29 = vsub.f32 %v2855_v32, %v678_v35 }
 0x129   :  { %1666 = vpow2.f32 %v813_v41  ;;  %v934_v43 = vsub.f32 %v614_v15, %v678_v35  ;;  %v741_v30 = vsub.f32 %v2859_v37, %v677_v59  ;;  %v3129_v23 = vpop.eup %1642  ;;  %v933_v7 = vsub.f32 %v613_v24, %v677_v59 }
 0x12a   :  { %1668 = vrcp.f32 %v1115_v21  ;;  %v680_v13 = vmax.f32 %v2863_v38, %v616_v11  ;;  %v679_v52 = vmax.f32 %v2871_v44, %v615_v60  ;;  %v506_v4 = vpop.xlane.xlu1 %505  ;;  %v504_v20 = vpop.xlane.xlu0 %503  ;;  %v1118_v40 = vadd.f32 %v3129_v23, %v3125_v8 }
 0x12b   :  { %v3133_v25 = vpop.eup %1644  ;;  %1670 = vpow2.f32 %v1005_v31  ;;  %v817_v32 = vmul.f32 1.442695, %v742_v29  ;;  %v1009_v15 = vmul.f32 1.442695, %v934_v43  ;;  %v815_v37 = vmul.f32 1.442695, %v741_v30 }
 0x12c   :  { %v3137_v41 = vpop.eup %1646  ;;  %1672 = vpow2.f32 %v811_v19  ;;  %v1007_v34 = vmul.f32 1.442695, %v933_v7  ;;  %v744_v24 = vsub.f32 %v2863_v38, %v680_v13  ;;  %v936_v35 = vsub.f32 %v616_v11, %v680_v13 }
 0x12d   :  { %v3140_v2 = vpop.eup %1648  ;;  %1674 = vrcp.f32 %v1118_v40  ;;  %v1117_v10 = vadd.f32 %v3137_v41, %v3133_v25  ;;  %v743_v59 = vsub.f32 %v2871_v44, %v679_v52  ;;  %v935_v29 = vsub.f32 %v615_v60, %v679_v52 }
 0x12e   :  { %v3145_v21 = vpop.eup %1650  ;;  %1676 = vpow2.f32 %v1003_v57  ;;  %v821_v31 = vmul.f32 1.442695, %v744_v24  ;;  %v618_v19 = vadd.f32 %v506_v4, %v2807_v42  ;;  %v510_v43 = vpop.xlane.xlu1 %509  ;;  %v1013_v40 = vmul.f32 1.442695, %v936_v35 }
 0x12f   :  { %v508_v30 = vpop.xlane.xlu0 %507  ;;  %v3148_v7 = vpop.eup %1652  ;;  %1678 = vrcp.f32 %v1117_v10  ;;  %v1120_v38 = vadd.f32 %v3145_v21, %v3140_v2  ;;  %v3152_v14 = vmul.f32 1.442695, %v743_v59  ;;  %v3156_v44 = vmul.f32 1.442695, %v935_v29 }
 0x130   :  { %v3154_v11 = vpop.eup %1654  ;;  %1680 = vpow2.f32 %v817_v32  ;;  %v682_v57 = vmax.f32 %v2875_v49, %v618_v19  ;;  %v617_v60 = vadd.f32 %v504_v20, %v2807_v42  ;;  %v620_v4 = vadd.f32 %v510_v43, %v2807_v42 }
 0x131   :  { %v3160_v13 = vpop.eup %1656  ;;  %1682 = vrcp.f32 %v1120_v38  ;;  %v1119_v52 = vadd.f32 %v3154_v11, %v3148_v7  ;;  %v3166_v24 = vadd.f32 %v508_v30, %v2807_v42 }
 0x132   :  { %v3168_v10 = vpop.eup %1658  ;;  %1684 = vpow2.f32 %v1009_v15  ;;  %v746_v32 = vsub.f32 %v2875_v49, %v682_v57  ;;  %v938_v35 = vsub.f32 %v618_v19, %v682_v57  ;;  %v681_v59 = vmax.f32 %v2879_v50, %v617_v60 }
 0x133   :  { %v3172_v20 = vpop.eup %1660  ;;  %1686 = vrcp.f32 %v1119_v52  ;;  %v1122_v29 = vadd.f32 %v3168_v10, %v3160_v13  ;;  %v684_v38 = vmax.f32 %v2883_v55, %v620_v4  ;;  %v3179_v43 = vmax.f32 %v2887_v58, %v3166_v24 }
 0x134   :  { %v3181_v30 = vpop.eup %1662  ;;  %1688 = vpow2.f32 %v815_v37  ;;  %v3183_v15 = vmul.f32 1.442695, %v746_v32  ;;  %v3185_v49 = vmul.f32 1.442695, %v938_v35  ;;  %v745_v19 = vsub.f32 %v2879_v50, %v681_v59 }
 0x135   :  { %v1665_v57 = vpop.eup %1664  ;;  %1690 = vrcp.f32 %v1122_v29  ;;  %v1121_v52 = vadd.f32 %v3181_v30, %v3172_v20  ;;  %v937_v1 = vsub.f32 %v617_v60, %v681_v59  ;;  %v748_v39 = vsub.f32 %v2883_v55, %v684_v38  ;;  %v2016_v55 = vld [vmem:[%s4399_s0 + $0x8] sm:$0xff] }
 0x136   :  { %v3191_v48 = vpop.eup %1666  ;;  %v1244_v47 = vmul.f32 %v1665_v57, %v3102_v3  ;;  %v1372_v37 = vmul.f32 %v1665_v57, %v3106_v16  ;;  %1692 = vpow2.f32 %v1007_v34  ;;  %v3195_v32 = vmul.f32 1.442695, %v745_v19  ;;  %v4470_v3 = vld [vmem:[#allocation3_spill] sm:$0xff] }
 0x137   :  { %v1669_v35 = vpop.eup %1668  ;;  %1694 = vrcp.f32 %v1121_v52  ;;  %v3197_v50 = vmul.f32 1.442695, %v937_v1  ;;  %v3199_v29 = vmul.f32 1.442695, %v748_v39  ;;  %v940_v33 = vsub.f32 %v620_v4, %v684_v38 }
 0x138   :  { %v3201_v22 = vpop.eup %1670  ;;  %v1308_v60 = vmul.f32 %v2016_v55, %v1244_v47  ;;  %v1436_v59 = vmul.f32 %v1372_v37, %v4470_v3  ;;  %v1243_v16 = vmul.f32 %v1669_v35, %v3113_v26  ;;  %v1371_v34 = vmul.f32 %v1669_v35, %v3117_v51  ;;  %v2017_v47 = vld [vmem:[%s4399_s0] sm:$0xff]  ;;  %v514_v35 = vpop.xlane.xlu1 %513 }
 0x139   :  { %v3209_v19 = vpop.eup %1672  ;;  %v1124_v39 = vadd.f32 %v3201_v22, %v3191_v48  ;;  %1696 = vpow2.f32 %v821_v31  ;;  %v3213_v1 = vmul.f32 1.442695, %v940_v33  ;;  %v747_v4 = vsub.f32 %v2887_v58, %v3179_v43  ;;  %v2018_v51 = vld [vmem:[%s4401_s1] sm:$0xff]  ;;  %v512_v55 = vpop.xlane.xlu0 %511 }
 0x13a   :  { %v1675_v38 = vpop.eup %1674  ;;  %v1500_v57 = vadd.f32 %v1436_v59, %v1308_v60  ;;  %v1307_v26 = vmul.f32 %v2017_v47, %v1243_v16  ;;  %v1435_v52 = vmul.f32 %v2018_v51, %v1371_v34  ;;  %1698 = vpow2.f32 %v1013_v40  ;;  %v2019_v59 = vld [vmem:[%s4399_s0 + $0x18] sm:$0xff]  ;;  %v2022_v51 = vld [vmem:[%s4401_s1 + $0x10] sm:$0xff] }
 0x13b   :  { %v3223_v37 = vpop.eup %1676  ;;  %v1246_v33 = vmul.f32 %v1675_v38, %v3125_v8  ;;  %v1374_v31 = vmul.f32 %v1675_v38, %v3129_v23  ;;  %1700 = vrcp.f32 %v1124_v39  ;;  %v3227_v58 = vmul.f32 1.442695, %v747_v4  ;;  %v2020_v34 = vld [vmem:[%s4401_s1 + $0x18] sm:$0xff] }
 0x13c   :  { %v1679_v60 = vpop.eup %1678  ;;  %1564 = vst [vmem:[%s4403_s4 + $0x8] sm:$0xff] %v1500_v57  ;;  %v1499_v3 = vadd.f32 %v1435_v52, %v1307_v26  ;;  %v1123_v40 = vadd.f32 %v3223_v37, %v3209_v19  ;;  %1702 = vpow2.f32 %v3152_v14  ;;  %v939_v8 = vsub.f32 %v3166_v24, %v3179_v43 }
 0x13d   :  { %v3237_v23 = vpop.eup %1680  ;;  %v1310_v16 = vmul.f32 %v2019_v59, %v1246_v33  ;;  %v1438_v39 = vmul.f32 %v2020_v34, %v1374_v31  ;;  %v1245_v4 = vmul.f32 %v1679_v60, %v3133_v25  ;;  %v1373_v38 = vmul.f32 %v1679_v60, %v3137_v41  ;;  %v2021_v25 = vld [vmem:[%s4399_s0 + $0x10] sm:$0xff] }
 0x13e   :  { %v1683_v14 = vpop.eup %1682  ;;  %1563 = vst [vmem:[%s4403_s4] sm:$0xff] %v1499_v3  ;;  %1704 = vrcp.f32 %v1123_v40  ;;  %v3250_v24 = vmul.f32 1.442695, %v939_v8  ;;  %v622_v43 = vadd.f32 %v514_v35, %v2807_v42  ;;  %v3254_v57 = vadd.f32 %v512_v55, %v2807_v42 }
 0x13f   :  { %v3256_v47 = vpop.eup %1684  ;;  %v1502_v26 = vadd.f32 %v1438_v39, %v1310_v16  ;;  %v1309_v41 = vmul.f32 %v2021_v25, %v1245_v4  ;;  %v1437_v52 = vmul.f32 %v2022_v51, %v1373_v38  ;;  %v1248_v33 = vmul.f32 %v1683_v14, %v3140_v2  ;;  %v2023_v2 = vld [vmem:[%s4399_s0 + $0x28] sm:$0xff] }
 0x140   :  { %v1687_v31 = vpop.eup %1686  ;;  %v1376_v35 = vmul.f32 %v1683_v14, %v3145_v21  ;;  %v1126_v55 = vadd.f32 %v3256_v47, %v3237_v23  ;;  %1706 = vpow2.f32 %v3156_v44  ;;  %v686_v60 = vmax.f32 %v2891_v56, %v622_v43  ;;  %v2024_v44 = vld [vmem:[%s4401_s1 + $0x28] sm:$0xff]  ;;  %v2026_v14 = vld [vmem:[%s4401_s1 + $0x20] sm:$0xff] }
 0x141   :  { %v3270_v3 = vpop.eup %1688  ;;  %1566 = vst [vmem:[%s4403_s4 + $0x18] sm:$0xff] %v1502_v26  ;;  %v1501_v40 = vadd.f32 %v1437_v52, %v1309_v41  ;;  %v1312_v8 = vmul.f32 %v2023_v2, %v1248_v33  ;;  %v1247_v21 = vmul.f32 %v1687_v31, %v3148_v7  ;;  %v1375_v59 = vmul.f32 %v1687_v31, %v3154_v11  ;;  %v2025_v7 = vld [vmem:[%s4399_s0 + $0x20] sm:$0xff]  ;;  %v518_v33 = vpop.xlane.xlu1 %517 }
 0x142   :  { %v1691_v16 = vpop.eup %1690  ;;  %v1440_v34 = vmul.f32 %v2024_v44, %v1376_v35  ;;  %1708 = vrcp.f32 %v1126_v55  ;;  %v750_v39 = vsub.f32 %v2891_v56, %v686_v60  ;;  %v942_v4 = vsub.f32 %v622_v43, %v686_v60  ;;  %v2027_v35 = vld [vmem:[%s4399_s0 + $0x38] sm:$0xff] }
 0x143   :  { %v3284_v38 = vpop.eup %1692  ;;  %1565 = vst [vmem:[%s4403_s4 + $0x10] sm:$0xff] %v1501_v40  ;;  %v1311_v11 = vmul.f32 %v2025_v7, %v1247_v21  ;;  %v1439_v26 = vmul.f32 %v2026_v14, %v1375_v59  ;;  %v1250_v25 = vmul.f32 %v1691_v16, %v3160_v13  ;;  %v1378_v56 = vmul.f32 %v1691_v16, %v3168_v10  ;;  %v2028_v13 = vld [vmem:[%s4401_s1 + $0x38] sm:$0xff]  ;;  %v2029_v59 = vld [vmem:[%s4399_s0 + $0x30] sm:$0xff] }
 0x144   :  { %v1695_v43 = vpop.eup %1694  ;;  %v1504_v41 = vadd.f32 %v1440_v34, %v1312_v8  ;;  %v1125_v51 = vadd.f32 %v3284_v38, %v3270_v3  ;;  %1710 = vpow2.f32 %v3183_v15  ;;  %v3300_v52 = vmul.f32 1.442695, %v750_v39  ;;  %v2030_v34 = vld [vmem:[%s4401_s1 + $0x30] sm:$0xff] }
 0x145   :  { %v1503_v31 = vadd.f32 %v1439_v26, %v1311_v11  ;;  %v1314_v55 = vmul.f32 %v2027_v35, %v1250_v25  ;;  %v1442_v10 = vmul.f32 %v2028_v13, %v1378_v56  ;;  %v1249_v60 = vmul.f32 %v1695_v43, %v3172_v20  ;;  %v516_v25 = vpop.xlane.xlu0 %515 }
 0x146   :  { %v3309_v40 = vpop.eup %1696  ;;  %1568 = vst [vmem:[%s4403_s4 + $0x28] sm:$0xff] %v1504_v41  ;;  %v1377_v15 = vmul.f32 %v1695_v43, %v3181_v30  ;;  %1712 = vrcp.f32 %v1125_v51  ;;  %v1025_v2 = vmul.f32 1.442695, %v942_v4  ;;  %v685_v8 = vmax.f32 %v2895_v61, %v3254_v57  ;;  %v2031_v41 = vld [vmem:[%s4399_s0 + $0x48] sm:$0xff] }
 0x147   :  { %v3317_v21 = vpop.eup %1698  ;;  %1567 = vst [vmem:[%s4403_s4 + $0x20] sm:$0xff] %v1503_v31  ;;  %v1506_v20 = vadd.f32 %v1442_v10, %v1314_v55  ;;  %v1313_v16 = vmul.f32 %v2029_v59, %v1249_v60  ;;  %1714 = vpow2.f32 %v3185_v49  ;;  %v624_v30 = vadd.f32 %v518_v33, %v2807_v42  ;;  %v2033_v10 = vld [vmem:[%s4399_s0 + $0x40] sm:$0xff] }
 0x148   :  { %v1701_v44 = vpop.eup %1700  ;;  %v1441_v39 = vmul.f32 %v2030_v34, %v1377_v15  ;;  %v1128_v4 = vadd.f32 %v3317_v21, %v3309_v40  ;;  %1716 = vpow2.f32 %v3195_v32  ;;  %v749_v7 = vsub.f32 %v2895_v61, %v685_v8 }
 0x149   :  { %v3334_v11 = vpop.eup %1702  ;;  %1570 = vst [vmem:[%s4403_s4 + $0x38] sm:$0xff] %v1506_v20  ;;  %v1252_v49 = vmul.f32 %v1701_v44, %v3191_v48  ;;  %v1380_v14 = vmul.f32 %v1701_v44, %v3201_v22  ;;  %1718 = vpow2.f32 %v3197_v50  ;;  %v941_v26 = vsub.f32 %v3254_v57, %v685_v8  ;;  %v2032_v22 = vld [vmem:[%s4401_s1 + $0x48] sm:$0xff]  ;;  %v520_v59 = vpop.xlane.xlu0 %519 }
 0x14a   :  { %v1505_v56 = vadd.f32 %v1441_v39, %v1313_v16  ;;  %1720 = vrcp.f32 %v1128_v4  ;;  %v831_v32 = vmul.f32 1.442695, %v749_v7  ;;  %v688_v61 = vmax.f32 %v2899_v62, %v624_v30 }
 0x14b   :  { %v1705_v43 = vpop.eup %1704  ;;  %v1316_v51 = vmul.f32 %v2031_v41, %v1252_v49  ;;  %v1444_v48 = vmul.f32 %v2032_v22, %v1380_v14  ;;  %1722 = vpow2.f32 %v3199_v29  ;;  %v1023_v50 = vmul.f32 1.442695, %v941_v26 }
 0x14c   :  { %1569 = vst [vmem:[%s4403_s4 + $0x30] sm:$0xff] %v1505_v56  ;;  %v1251_v57 = vmul.f32 %v1705_v43, %v3209_v19  ;;  %v1379_v33 = vmul.f32 %v1705_v43, %v3223_v37  ;;  %1724 = vpow2.f32 %v3213_v1  ;;  %v752_v31 = vsub.f32 %v2899_v62, %v688_v61  ;;  %v2034_v19 = vld [vmem:[%s4401_s1 + $0x40] sm:$0xff]  ;;  %v522_v37 = vpop.xlane.xlu1 %521 }
 0x14d   :  { %v3358_v35 = vpop.eup %1706  ;;  %v1508_v55 = vadd.f32 %v1444_v48, %v1316_v51  ;;  %1726 = vpow2.f32 %v3227_v58  ;;  %v944_v13 = vsub.f32 %v624_v30, %v688_v61  ;;  %v623_v29 = vadd.f32 %v516_v25, %v2807_v42 }
 0x14e   :  { %v1315_v60 = vmul.f32 %v2033_v10, %v1251_v57  ;;  %v1443_v1 = vmul.f32 %v2034_v19, %v1379_v33  ;;  %v1127_v62 = vadd.f32 %v3358_v35, %v3334_v11  ;;  %1728 = vpow2.f32 %v3250_v24  ;;  %v2038_v33 = vld [vmem:[%s4401_s1 + $0x50] sm:$0xff] }
 0x14f   :  { %v1709_v58 = vpop.eup %1708  ;;  %1572 = vst [vmem:[%s4403_s4 + $0x48] sm:$0xff] %v1508_v55  ;;  %1730 = vpow2.f32 %v3300_v52  ;;  %v837_v15 = vmul.f32 1.442695, %v752_v31  ;;  %v1029_v8 = vmul.f32 1.442695, %v944_v13  ;;  %v687_v20 = vmax.f32 %v2903_v5, %v623_v29  ;;  %v2035_v52 = vld [vmem:[%s4399_s0 + $0x58] sm:$0xff] }
 0x150   :  { %v1507_v16 = vadd.f32 %v1443_v1, %v1315_v60  ;;  %v1254_v30 = vmul.f32 %v1709_v58, %v3237_v23  ;;  %v1382_v44 = vmul.f32 %v1709_v58, %v3256_v47  ;;  %1732 = vrcp.f32 %v1127_v62  ;;  %v2036_v47 = vld [vmem:[%s4401_s1 + $0x58] sm:$0xff]  ;;  %v526_v41 = vpop.xlane.xlu1 %525 }
 0x151   :  { %v3378_v24 = vpop.eup %1710  ;;  %1734 = vpow2.f32 %v1025_v2  ;;  %v751_v34 = vsub.f32 %v2903_v5, %v687_v20  ;;  %v943_v39 = vsub.f32 %v623_v29, %v687_v20  ;;  %v626_v4 = vadd.f32 %v522_v37, %v2807_v42 }
 0x152   :  { %1571 = vst [vmem:[%s4403_s4 + $0x40] sm:$0xff] %v1507_v16  ;;  %v1318_v23 = vmul.f32 %v2035_v52, %v1254_v30  ;;  %v1446_v7 = vmul.f32 %v2036_v47, %v1382_v44  ;;  %1736 = vpow2.f32 %v831_v32  ;;  %v625_v5 = vadd.f32 %v520_v59, %v2807_v42  ;;  %v2040_v16 = vld [vmem:[%s4401_s1 + $0x68] sm:$0xff] }
 0x153   :  { %v1713_v2 = vpop.eup %1712  ;;  %1738 = vpow2.f32 %v1023_v50  ;;  %v835_v49 = vmul.f32 1.442695, %v751_v34  ;;  %v1027_v14 = vmul.f32 1.442695, %v943_v39  ;;  %v690_v26 = vmax.f32 %v2907_v6, %v626_v4  ;;  %v524_v50 = vpop.xlane.xlu0 %523 }
 0x154   :  { %v3393_v25 = vpop.eup %1714  ;;  %v1510_v56 = vadd.f32 %v1446_v7, %v1318_v23  ;;  %v1253_v61 = vmul.f32 %v1713_v2, %v3270_v3  ;;  %v1381_v43 = vmul.f32 %v1713_v2, %v3284_v38  ;;  %1740 = vpow2.f32 %v837_v15  ;;  %v2037_v3 = vld [vmem:[%s4399_s0 + $0x50] sm:$0xff]  ;;  %v530_v34 = vpop.xlane.xlu1 %529 }
 0x155   :  { %v3397_v51 = vpop.eup %1716  ;;  %v1130_v32 = vadd.f32 %v3393_v25, %v3378_v24  ;;  %1742 = vpow2.f32 %v1029_v8  ;;  %v754_v22 = vsub.f32 %v2907_v6, %v690_v26  ;;  %v946_v48 = vsub.f32 %v626_v4, %v690_v26  ;;  %v4471_v6 = vld [vmem:[#allocation8_spill] sm:$0xff] }
 0x156   :  { %v3402_v57 = vpop.eup %1718  ;;  %1574 = vst [vmem:[%s4403_s4 + $0x58] sm:$0xff] %v1510_v56  ;;  %v1317_v38 = vmul.f32 %v2037_v3, %v1253_v61  ;;  %v1445_v31 = vmul.f32 %v2038_v33, %v1381_v43  ;;  %1744 = vpow2.f32 %v835_v49  ;;  %v689_v55 = vmax.f32 %v4471_v6, %v625_v5  ;;  %v2041_v33 = vld [vmem:[%s4399_s0 + $0x60] sm:$0xff] }
 0x157   :  { %v1721_v13 = vpop.eup %1720  ;;  %1746 = vrcp.f32 %v1130_v32  ;;  %v1129_v29 = vadd.f32 %v3402_v57, %v3397_v51  ;;  %v841_v10 = vmul.f32 1.442695, %v754_v22  ;;  %v1033_v60 = vmul.f32 1.442695, %v946_v48  ;;  %v528_v47 = vpop.xlane.xlu0 %527 }
 0x158   :  { %v3416_v19 = vpop.eup %1722  ;;  %v1509_v1 = vadd.f32 %v1445_v31, %v1317_v38  ;;  %v1256_v62 = vmul.f32 %v1721_v13, %v3309_v40  ;;  %v1384_v37 = vmul.f32 %v1721_v13, %v3317_v21  ;;  %1748 = vpow2.f32 %v1027_v14  ;;  %v2039_v40 = vld [vmem:[%s4399_s0 + $0x68] sm:$0xff] }
 0x159   :  { %v3420_v58 = vpop.eup %1724  ;;  %1750 = vrcp.f32 %v1129_v29  ;;  %v753_v15 = vsub.f32 %v4471_v6, %v689_v55  ;;  %v945_v8 = vsub.f32 %v625_v5, %v689_v55  ;;  %v628_v20 = vadd.f32 %v526_v41, %v2807_v42 }
 0x15a   :  { %v3424_v59 = vpop.eup %1726  ;;  %1573 = vst [vmem:[%s4403_s4 + $0x50] sm:$0xff] %v1509_v1  ;;  %v1320_v21 = vmul.f32 %v2039_v40, %v1256_v62  ;;  %v1448_v30 = vmul.f32 %v2040_v16, %v1384_v37  ;;  %v1132_v44 = vadd.f32 %v3420_v58, %v3416_v19  ;;  %1752 = vpow2.f32 %v841_v10  ;;  %v534_v1 = vpop.xlane.xlu1 %533 }
 0x15b   :  { %v3437_v39 = vpop.eup %1728  ;;  %1754 = vpow2.f32 %v1033_v60  ;;  %v839_v4 = vmul.f32 1.442695, %v753_v15  ;;  %v1031_v52 = vmul.f32 1.442695, %v945_v8  ;;  %v692_v23 = vmax.f32 %v2915_v12, %v628_v20  ;;  %v532_v62 = vpop.xlane.xlu0 %531 }
 0x15c   :  { %v3440_v7 = vpop.eup %1730  ;;  %v1512_v5 = vadd.f32 %v1448_v30, %v1320_v21  ;;  %1756 = vrcp.f32 %v1132_v44  ;;  %v1131_v2 = vadd.f32 %v3437_v39, %v3424_v59  ;;  %v627_v49 = vadd.f32 %v524_v50, %v2807_v42 }
 0x15d   :  { %v1733_v14 = vpop.eup %1732  ;;  %1758 = vpow2.f32 %v839_v4  ;;  %v756_v26 = vsub.f32 %v2915_v12, %v692_v23  ;;  %v948_v56 = vsub.f32 %v628_v20, %v692_v23  ;;  %v630_v61 = vadd.f32 %v530_v34, %v2807_v42 }
 0x15e   :  { %v3447_v43 = vpop.eup %1734  ;;  %1576 = vst [vmem:[%s4403_s4 + $0x68] sm:$0xff] %v1512_v5  ;;  %v1255_v41 = vmul.f32 %v1733_v14, %v3334_v11  ;;  %v1383_v32 = vmul.f32 %v1733_v14, %v3358_v35  ;;  %1760 = vrcp.f32 %v1131_v2  ;;  %v691_v22 = vmax.f32 %v2919_v17, %v627_v49  ;;  %v2042_v35 = vld [vmem:[%s4401_s1 + $0x60] sm:$0xff] }
 0x15f   :  { %v3455_v48 = vpop.eup %1736  ;;  %v1134_v12 = vadd.f32 %v3447_v43, %v3440_v7  ;;  %1762 = vpow2.f32 %v1031_v52  ;;  %v845_v50 = vmul.f32 1.442695, %v756_v26  ;;  %v1037_v3 = vmul.f32 1.442695, %v948_v56  ;;  %v2043_v56 = vld [vmem:[%s4399_s0 + $0x78] sm:$0xff] }
 0x160   :  { %v3459_v38 = vpop.eup %1738  ;;  %v1319_v11 = vmul.f32 %v2041_v33, %v1255_v41  ;;  %v1447_v31 = vmul.f32 %v2042_v35, %v1383_v32  ;;  %v755_v6 = vsub.f32 %v2919_v17, %v691_v22  ;;  %v947_v55 = vsub.f32 %v627_v49, %v691_v22  ;;  %v2045_v35 = vld [vmem:[%s4399_s0 + $0x70] sm:$0xff] }
 0x161   :  { %v3468_v13 = vpop.eup %1740  ;;  %1764 = vrcp.f32 %v1134_v12  ;;  %v1133_v29 = vadd.f32 %v3459_v38, %v3455_v48  ;;  %v694_v10 = vmax.f32 %v2923_v18, %v630_v61  ;;  %v629_v60 = vadd.f32 %v528_v47, %v2807_v42 }
 0x162   :  { %v3474_v37 = vpop.eup %1742  ;;  %v1511_v15 = vadd.f32 %v1447_v31, %v1319_v11  ;;  %1766 = vpow2.f32 %v845_v50  ;;  %v843_v8 = vmul.f32 1.442695, %v755_v6  ;;  %v1035_v20 = vmul.f32 1.442695, %v947_v55  ;;  %v4472_v50 = vld [vmem:[#allocation9_spill] sm:$0xff] }
 0x163   :  { %v3476_v17 = vpop.eup %1744  ;;  %1768 = vrcp.f32 %v1133_v29  ;;  %v1136_v40 = vadd.f32 %v3474_v37, %v3468_v13  ;;  %v758_v21 = vsub.f32 %v2923_v18, %v694_v10  ;;  %v950_v16 = vsub.f32 %v630_v61, %v694_v10 }
 0x164   :  { %v1747_v30 = vpop.eup %1746  ;;  %1575 = vst [vmem:[%s4403_s4 + $0x60] sm:$0xff] %v1511_v15  ;;  %1770 = vpow2.f32 %v1037_v3  ;;  %v693_v44 = vmax.f32 %v2927_v27, %v629_v60  ;;  %v632_v34 = vadd.f32 %v534_v1, %v2807_v42  ;;  %v3487_v4 = vadd.f32 %v532_v62, %v2807_v42 }
 0x165   :  { %v3489_v52 = vpop.eup %1748  ;;  %v1258_v23 = vmul.f32 %v1747_v30, %v3378_v24  ;;  %v1386_v18 = vmul.f32 %v1747_v30, %v3393_v25  ;;  %1772 = vrcp.f32 %v1136_v40  ;;  %v849_v47 = vmul.f32 1.442695, %v758_v21  ;;  %v2044_v24 = vld [vmem:[%s4401_s1 + $0x78] sm:$0xff] }
 0x166   :  { %v1751_v5 = vpop.eup %1750  ;;  %v1135_v2 = vadd.f32 %v3489_v52, %v3476_v17  ;;  %1774 = vpow2.f32 %v843_v8  ;;  %v1041_v49 = vmul.f32 1.442695, %v950_v16  ;;  %v757_v14 = vsub.f32 %v2927_v27, %v693_v44 }
 0x167   :  { %v3496_v26 = vpop.eup %1752  ;;  %v1322_v61 = vmul.f32 %v2043_v56, %v1258_v23  ;;  %v1450_v25 = vmul.f32 %v2044_v24, %v1386_v18  ;;  %v1257_v41 = vmul.f32 %v1751_v5, %v3397_v51  ;;  %v1385_v32 = vmul.f32 %v1751_v5, %v3402_v57  ;;  %v2046_v51 = vld [vmem:[%s4401_s1 + $0x70] sm:$0xff]  ;;  %v538_v18 = vpop.xlane.xlu1 %537 }
 0x168   :  { %v3506_v22 = vpop.eup %1754  ;;  %1776 = vrcp.f32 %v1135_v2  ;;  %v847_v27 = vmul.f32 1.442695, %v757_v14  ;;  %v949_v12 = vsub.f32 %v629_v60, %v693_v44  ;;  %v696_v3 = vmax.f32 %v4472_v50, %v632_v34  ;;  %v536_v5 = vpop.xlane.xlu0 %535 }
 0x169   :  { %v1757_v33 = vpop.eup %1756  ;;  %v1514_v11 = vadd.f32 %v1450_v25, %v1322_v61  ;;  %v1321_v31 = vmul.f32 %v2045_v35, %v1257_v41  ;;  %v1449_v6 = vmul.f32 %v2046_v51, %v1385_v32  ;;  %v1138_v57 = vadd.f32 %v3506_v22, %v3496_v26 }
 0x16a   :  { %v3517_v55 = vpop.eup %1758  ;;  %v1260_v29 = vmul.f32 %v1757_v33, %v3416_v19  ;;  %v1388_v10 = vmul.f32 %v1757_v33, %v3420_v58  ;;  %1778 = vpow2.f32 %v1035_v20  ;;  %v1039_v60 = vmul.f32 1.442695, %v949_v12  ;;  %v2047_v19 = vld [vmem:[%s4399_s0 + $0x88] sm:$0xff]  ;;  %v2052_v33 = vld [vmem:[%s4401_s1 + $0x98] sm:$0xff] }
 0x16b   :  { %v1761_v1 = vpop.eup %1760  ;;  %1578 = vst [vmem:[%s4403_s4 + $0x78] sm:$0xff] %v1514_v11  ;;  %v1513_v62 = vadd.f32 %v1449_v6, %v1321_v31  ;;  %1780 = vrcp.f32 %v1138_v57  ;;  %v760_v15 = vsub.f32 %v4472_v50, %v696_v3  ;;  %v952_v8 = vsub.f32 %v632_v34, %v696_v3  ;;  %v2048_v58 = vld [vmem:[%s4401_s1 + $0x88] sm:$0xff] }
 0x16c   :  { %v3525_v40 = vpop.eup %1762  ;;  %v1324_v21 = vmul.f32 %v2047_v19, %v1260_v29  ;;  %v1452_v20 = vmul.f32 %v2048_v58, %v1388_v10  ;;  %v1259_v16 = vmul.f32 %v1761_v1, %v3424_v59  ;;  %v1387_v30 = vmul.f32 %v1761_v1, %v3437_v39  ;;  %v2049_v59 = vld [vmem:[%s4399_s0 + $0x80] sm:$0xff]  ;;  %v2054_v1 = vld [vmem:[%s4401_s1 + $0x90] sm:$0xff] }
 0x16d   :  { %1577 = vst [vmem:[%s4403_s4 + $0x70] sm:$0xff] %v1513_v62  ;;  %v1137_v44 = vadd.f32 %v3525_v40, %v3517_v55  ;;  %1782 = vpow2.f32 %v849_v47  ;;  %v853_v34 = vmul.f32 1.442695, %v760_v15  ;;  %v1045_v23 = vmul.f32 1.442695, %v952_v8  ;;  %v2050_v39 = vld [vmem:[%s4401_s1 + $0x80] sm:$0xff] }
 0x16e   :  { %v1765_v2 = vpop.eup %1764  ;;  %v1516_v14 = vadd.f32 %v1452_v20, %v1324_v21  ;;  %v1323_v56 = vmul.f32 %v2049_v59, %v1259_v16  ;;  %v1451_v61 = vmul.f32 %v2050_v39, %v1387_v30  ;;  %1784 = vpow2.f32 %v1041_v49  ;;  %v2055_v21 = vld [vmem:[%s4399_s0 + $0xa8] sm:$0xff] }
 0x16f   :  { %v3546_v24 = vpop.eup %1766  ;;  %v1262_v47 = vmul.f32 %v1765_v2, %v3440_v7  ;;  %v1390_v25 = vmul.f32 %v1765_v2, %v3447_v43  ;;  %1786 = vrcp.f32 %v1137_v44  ;;  %v695_v41 = vmax.f32 %v2939_v36, %v3487_v4  ;;  %v2051_v7 = vld [vmem:[%s4399_s0 + $0x98] sm:$0xff] }
 0x170   :  { %v1769_v32 = vpop.eup %1768  ;;  %1580 = vst [vmem:[%s4403_s4 + $0x88] sm:$0xff] %v1516_v14  ;;  %v1515_v12 = vadd.f32 %v1451_v61, %v1323_v56  ;;  %1788 = vpow2.f32 %v847_v27  ;;  %v634_v50 = vadd.f32 %v538_v18, %v2807_v42  ;;  %v3557_v49 = vadd.f32 %v536_v5, %v2807_v42  ;;  %v540_v18 = vpop.xlane.xlu0 %539 }
 0x171   :  { %v3559_v3 = vpop.eup %1770  ;;  %v1326_v43 = vmul.f32 %v2051_v7, %v1262_v47  ;;  %v1454_v11 = vmul.f32 %v2052_v33, %v1390_v25  ;;  %v1261_v35 = vmul.f32 %v1769_v32, %v3455_v48  ;;  %v1389_v27 = vmul.f32 %v1769_v32, %v3459_v38  ;;  %v2053_v48 = vld [vmem:[%s4399_s0 + $0x90] sm:$0xff] }
 0x172   :  { %v1773_v31 = vpop.eup %1772  ;;  %1579 = vst [vmem:[%s4403_s4 + $0x80] sm:$0xff] %v1515_v12  ;;  %v1140_v51 = vadd.f32 %v3559_v3, %v3546_v24  ;;  %1790 = vpow2.f32 %v1039_v60  ;;  %v759_v6 = vsub.f32 %v2939_v36, %v695_v41  ;;  %v951_v57 = vsub.f32 %v3487_v4, %v695_v41 }
 0x173   :  { %v3576_v29 = vpop.eup %1774  ;;  %v1518_v10 = vadd.f32 %v1454_v11, %v1326_v43  ;;  %v1325_v38 = vmul.f32 %v2053_v48, %v1261_v35  ;;  %v1453_v62 = vmul.f32 %v2054_v1, %v1389_v27  ;;  %v1264_v15 = vmul.f32 %v1773_v31, %v3468_v13  ;;  %v542_v13 = vpop.xlane.xlu1 %541  ;;  %v2060_v43 = vld [vmem:[%s4401_s1 + $0xb8] sm:$0xff] }
 0x174   :  { %v1392_v60 = vmul.f32 %v1773_v31, %v3474_v37  ;;  %1792 = vrcp.f32 %v1140_v51  ;;  %v851_v36 = vmul.f32 1.442695, %v759_v6  ;;  %v1043_v4 = vmul.f32 1.442695, %v951_v57  ;;  %v2056_v37 = vld [vmem:[%s4401_s1 + $0xa8] sm:$0xff]  ;;  %v544_v6 = vpop.xlane.xlu0 %543 }
 0x175   :  { %v1777_v8 = vpop.eup %1776  ;;  %1582 = vst [vmem:[%s4403_s4 + $0x98] sm:$0xff] %v1518_v10  ;;  %v1517_v19 = vadd.f32 %v1453_v62, %v1325_v38  ;;  %v1328_v58 = vmul.f32 %v2055_v21, %v1264_v15  ;;  %1794 = vpow2.f32 %v853_v34  ;;  %v698_v20 = vmax.f32 %v2943_v45, %v634_v50 }
 0x176   :  { %v1456_v16 = vmul.f32 %v2056_v37, %v1392_v60  ;;  %v1263_v30 = vmul.f32 %v1777_v8, %v3476_v17  ;;  %v1391_v44 = vmul.f32 %v1777_v8, %v3489_v52  ;;  %1796 = vpow2.f32 %v1045_v23  ;;  %v2057_v17 = vld [vmem:[%s4399_s0 + $0xa0] sm:$0xff] }
 0x177   :  { %v3598_v5 = vpop.eup %1778  ;;  %1581 = vst [vmem:[%s4403_s4 + $0x90] sm:$0xff] %v1517_v19  ;;  %1798 = vpow2.f32 %v851_v36  ;;  %v762_v34 = vsub.f32 %v2943_v45, %v698_v20  ;;  %v954_v2 = vsub.f32 %v634_v50, %v698_v20  ;;  %v697_v14 = vmax.f32 %v2947_v46, %v3557_v49  ;;  %v2058_v23 = vld [vmem:[%s4401_s1 + $0xa0] sm:$0xff]  ;;  %v546_v35 = vpop.xlane.xlu1 %545 }
 0x178   :  { %v1781_v59 = vpop.eup %1780  ;;  %v1520_v56 = vadd.f32 %v1456_v16, %v1328_v58  ;;  %v1327_v52 = vmul.f32 %v2057_v17, %v1263_v30  ;;  %v1455_v39 = vmul.f32 %v2058_v23, %v1391_v44  ;;  %v1139_v61 = vadd.f32 %v3598_v5, %v3576_v29 }
 0x179   :  { %v1266_v45 = vmul.f32 %v1781_v59, %v3496_v26  ;;  %v1394_v47 = vmul.f32 %v1781_v59, %v3506_v22  ;;  %1800 = vpow2.f32 %v1043_v4  ;;  %v857_v25 = vmul.f32 1.442695, %v762_v34  ;;  %v2059_v26 = vld [vmem:[%s4399_s0 + $0xb8] sm:$0xff] }
 0x17a   :  { %v3616_v41 = vpop.eup %1782  ;;  %1584 = vst [vmem:[%s4403_s4 + $0xa8] sm:$0xff] %v1520_v56  ;;  %v1519_v32 = vadd.f32 %v1455_v39, %v1327_v52  ;;  %1802 = vrcp.f32 %v1139_v61  ;;  %v1049_v12 = vmul.f32 1.442695, %v954_v2  ;;  %v761_v50 = vsub.f32 %v2947_v46, %v697_v14  ;;  %v2064_v39 = vld [vmem:[%s4401_s1 + $0xc8] sm:$0xff] }
 0x17b   :  { %v3622_v7 = vpop.eup %1784  ;;  %v1330_v22 = vmul.f32 %v2059_v26, %v1266_v45  ;;  %v1458_v33 = vmul.f32 %v2060_v43, %v1394_v47  ;;  %1804 = vpow2.f32 %v857_v25  ;;  %v953_v11 = vsub.f32 %v3557_v49, %v697_v14  ;;  %v550_v52 = vpop.xlane.xlu1 %549 }
 0x17c   :  { %v1787_v27 = vpop.eup %1786  ;;  %1583 = vst [vmem:[%s4403_s4 + $0xa0] sm:$0xff] %v1519_v32  ;;  %v1142_v46 = vadd.f32 %v3622_v7, %v3616_v41  ;;  %1806 = vpow2.f32 %v1049_v12  ;;  %v855_v31 = vmul.f32 1.442695, %v761_v50  ;;  %v636_v51 = vadd.f32 %v542_v13, %v2807_v42 }
 0x17d   :  { %v3637_v57 = vpop.eup %1788  ;;  %v1522_v10 = vadd.f32 %v1458_v33, %v1330_v22  ;;  %v1265_v48 = vmul.f32 %v1787_v27, %v3517_v55  ;;  %v1393_v49 = vmul.f32 %v1787_v27, %v3525_v40  ;;  %v1047_v38 = vmul.f32 1.442695, %v953_v11  ;;  %v2061_v55 = vld [vmem:[%s4399_s0 + $0xb0] sm:$0xff] }
 0x17e   :  { %1808 = vrcp.f32 %v1142_v46  ;;  %v700_v1 = vmax.f32 %v2951_v53, %v636_v51  ;;  %v635_v62 = vadd.f32 %v540_v18, %v2807_v42  ;;  %v638_v15 = vadd.f32 %v546_v35, %v2807_v42  ;;  %v2062_v40 = vld [vmem:[%s4401_s1 + $0xb0] sm:$0xff]  ;;  %v548_v46 = vpop.xlane.xlu0 %547 }
 0x17f   :  { %v3644_v60 = vpop.eup %1790  ;;  %1586 = vst [vmem:[%s4403_s4 + $0xb8] sm:$0xff] %v1522_v10  ;;  %v1329_v36 = vmul.f32 %v2061_v55, %v1265_v48  ;;  %v1457_v4 = vmul.f32 %v2062_v40, %v1393_v49  ;;  %1810 = vpow2.f32 %v855_v31  ;;  %v637_v8 = vadd.f32 %v544_v6, %v2807_v42  ;;  %v554_v48 = vpop.xlane.xlu1 %553  ;;  %v2065_v49 = vld [vmem:[%s4399_s0 + $0xc0] sm:$0xff] }
 0x180   :  { %v1141_v19 = vadd.f32 %v3644_v60, %v3637_v57  ;;  %1812 = vpow2.f32 %v1047_v38  ;;  %v764_v21 = vsub.f32 %v2951_v53, %v700_v1  ;;  %v956_v58 = vsub.f32 %v636_v51, %v700_v1 }
 0x181   :  { %v1793_v20 = vpop.eup %1792  ;;  %v1521_v13 = vadd.f32 %v1457_v4, %v1329_v36  ;;  %v699_v37 = vmax.f32 %v2955_v28, %v635_v62  ;;  %v702_v16 = vmax.f32 %v2959_v54, %v638_v15  ;;  %v701_v30 = vmax.f32 %v2963_v63, %v637_v8 }
 0x182   :  { %v3662_v44 = vpop.eup %1794  ;;  %v1268_v18 = vmul.f32 %v1793_v20, %v3546_v24  ;;  %v1396_v34 = vmul.f32 %v1793_v20, %v3559_v3  ;;  %1814 = vrcp.f32 %v1141_v19  ;;  %v861_v2 = vmul.f32 1.442695, %v764_v21  ;;  %v2063_v24 = vld [vmem:[%s4399_s0 + $0xc8] sm:$0xff] }
 0x183   :  { %v3666_v14 = vpop.eup %1796  ;;  %1585 = vst [vmem:[%s4403_s4 + $0xb0] sm:$0xff] %v1521_v13  ;;  %v1053_v53 = vmul.f32 1.442695, %v956_v58  ;;  %v763_v59 = vsub.f32 %v2955_v28, %v699_v37  ;;  %v955_v56 = vsub.f32 %v635_v62, %v699_v37  ;;  %v766_v17 = vsub.f32 %v2959_v54, %v702_v16 }
 0x184   :  { %v3673_v23 = vpop.eup %1798  ;;  %v1332_v3 = vmul.f32 %v2063_v24, %v1268_v18  ;;  %v1460_v61 = vmul.f32 %v2064_v39, %v1396_v34  ;;  %v1144_v45 = vadd.f32 %v3666_v14, %v3662_v44  ;;  %1816 = vpow2.f32 %v861_v2 }
 0x185   :  { %1818 = vpow2.f32 %v1053_v53  ;;  %v859_v28 = vmul.f32 1.442695, %v763_v59  ;;  %v1051_v54 = vmul.f32 1.442695, %v955_v56  ;;  %v865_v47 = vmul.f32 1.442695, %v766_v17  ;;  %v552_v53 = vpop.xlane.xlu0 %551  ;;  %v558_v59 = vpop.xlane.xlu1 %557 }
 0x186   :  { %v3683_v25 = vpop.eup %1800  ;;  %v1524_v32 = vadd.f32 %v1460_v61, %v1332_v3  ;;  %1820 = vrcp.f32 %v1144_v45  ;;  %v958_v12 = vsub.f32 %v638_v15, %v702_v16  ;;  %v765_v50 = vsub.f32 %v2963_v63, %v701_v30  ;;  %v4473_v61 = vld [vmem:[#allocation10_spill] sm:$0xff] }
 0x187   :  { %v1803_v26 = vpop.eup %1802  ;;  %v1143_v22 = vadd.f32 %v3683_v25, %v3673_v23  ;;  %1822 = vpow2.f32 %v859_v28  ;;  %v957_v43 = vsub.f32 %v637_v8, %v701_v30  ;;  %v640_v33 = vadd.f32 %v550_v52, %v2807_v42 }
 0x188   :  { %v3689_v11 = vpop.eup %1804  ;;  %1588 = vst [vmem:[%s4403_s4 + $0xc8] sm:$0xff] %v1524_v32  ;;  %v1267_v35 = vmul.f32 %v1803_v26, %v3576_v29  ;;  %v1395_v27 = vmul.f32 %v1803_v26, %v3598_v5  ;;  %1824 = vpow2.f32 %v1051_v54  ;;  %v1057_v63 = vmul.f32 1.442695, %v958_v12  ;;  %v2066_v29 = vld [vmem:[%s4401_s1 + $0xc0] sm:$0xff] }
 0x189   :  { %v3696_v31 = vpop.eup %1806  ;;  %1826 = vrcp.f32 %v1143_v22  ;;  %v863_v51 = vmul.f32 1.442695, %v765_v50  ;;  %v1055_v6 = vmul.f32 1.442695, %v957_v43  ;;  %v704_v10 = vmax.f32 %v2967_v0, %v640_v33 }
 0x18a   :  { %v1331_v38 = vmul.f32 %v2065_v49, %v1267_v35  ;;  %v1459_v5 = vmul.f32 %v2066_v29, %v1395_v27  ;;  %v1146_v1 = vadd.f32 %v3696_v31, %v3689_v11  ;;  %1828 = vpow2.f32 %v865_v47  ;;  %v2071_v49 = vld [vmem:[%s4399_s0 + $0xe8] sm:$0xff] }
 0x18b   :  { %v1809_v62 = vpop.eup %1808  ;;  %1830 = vpow2.f32 %v1057_v63  ;;  %v768_v15 = vsub.f32 %v2967_v0, %v704_v10  ;;  %v960_v55 = vsub.f32 %v640_v33, %v704_v10  ;;  %v639_v36 = vadd.f32 %v548_v46, %v2807_v42  ;;  %v2067_v0 = vld [vmem:[%s4399_s0 + $0xd8] sm:$0xff] }
 0x18c   :  { %v3709_v40 = vpop.eup %1810  ;;  %v1523_v4 = vadd.f32 %v1459_v5, %v1331_v38  ;;  %v1270_v8 = vmul.f32 %v1809_v62, %v3616_v41  ;;  %v1398_v19 = vmul.f32 %v1809_v62, %v3622_v7  ;;  %1832 = vrcp.f32 %v1146_v1  ;;  %v2068_v41 = vld [vmem:[%s4401_s1 + $0xd8] sm:$0xff]  ;;  %v4475_v5 = vld [vmem:[#allocation12_spill] sm:$0xff] }
 0x18d   :  { %v3713_v21 = vpop.eup %1812  ;;  %1834 = vpow2.f32 %v863_v51  ;;  %v869_v58 = vmul.f32 1.442695, %v768_v15  ;;  %v1061_v20 = vmul.f32 1.442695, %v960_v55  ;;  %v703_v13 = vmax.f32 %v2971_v9, %v639_v36 }
 0x18e   :  { %1587 = vst [vmem:[%s4403_s4 + $0xc0] sm:$0xff] %v1523_v4  ;;  %v1334_v37 = vmul.f32 %v2067_v0, %v1270_v8  ;;  %v1462_v7 = vmul.f32 %v2068_v41, %v1398_v19  ;;  %v1145_v16 = vadd.f32 %v3713_v21, %v3709_v40  ;;  %1836 = vpow2.f32 %v1055_v6  ;;  %v4474_v6 = vld [vmem:[#allocation11_spill] sm:$0xff]  ;;  %v556_v4 = vpop.xlane.xlu0 %555 }
 0x18f   :  { %v1815_v30 = vpop.eup %1814  ;;  %1838 = vpow2.f32 %v869_v58  ;;  %v767_v18 = vsub.f32 %v2971_v9, %v703_v13  ;;  %v959_v34 = vsub.f32 %v639_v36, %v703_v13  ;;  %v642_v2 = vadd.f32 %v554_v48, %v2807_v42  ;;  %v2069_v9 = vld [vmem:[%s4399_s0 + $0xd0] sm:$0xff]  ;;  %v2073_v0 = vld [vmem:[%s4399_s0 + $0xe0] sm:$0xff] }
 0x190   :  { %v1526_v56 = vadd.f32 %v1462_v7, %v1334_v37  ;;  %v1269_v17 = vmul.f32 %v1815_v30, %v3637_v57  ;;  %v1397_v52 = vmul.f32 %v1815_v30, %v3644_v60  ;;  %1840 = vrcp.f32 %v1145_v16  ;;  %v2070_v60 = vld [vmem:[%s4401_s1 + $0xd0] sm:$0xff] }
 0x191   :  { %v3731_v24 = vpop.eup %1816  ;;  %1842 = vpow2.f32 %v1061_v20  ;;  %v867_v3 = vmul.f32 1.442695, %v767_v18  ;;  %v1059_v39 = vmul.f32 1.442695, %v959_v34  ;;  %v706_v45 = vmax.f32 %v4473_v61, %v642_v2 }
 0x192   :  { %v3734_v28 = vpop.eup %1818  ;;  %1590 = vst [vmem:[%s4403_s4 + $0xd8] sm:$0xff] %v1526_v56  ;;  %v1333_v57 = vmul.f32 %v2069_v9, %v1269_v17  ;;  %v1461_v54 = vmul.f32 %v2070_v60, %v1397_v52  ;;  %v641_v47 = vadd.f32 %v552_v53, %v2807_v42  ;;  %v3747_v32 = vadd.f32 %v558_v59, %v2807_v42 }
 0x193   :  { %v1821_v12 = vpop.eup %1820  ;;  %v1148_v50 = vadd.f32 %v3734_v28, %v3731_v24  ;;  %1844 = vpow2.f32 %v867_v3  ;;  %v770_v26 = vsub.f32 %v4473_v61, %v706_v45  ;;  %v962_v22 = vsub.f32 %v642_v2, %v706_v45  ;;  %v562_v2 = vpop.xlane.xlu1 %561  ;;  %v2075_v3 = vld [vmem:[%s4399_s0 + $0xf8] sm:$0xff] }
 0x194   :  { %v3752_v43 = vpop.eup %1822  ;;  %v1525_v33 = vadd.f32 %v1461_v54, %v1333_v57  ;;  %v1272_v35 = vmul.f32 %v1821_v12, %v3662_v44  ;;  %v1400_v27 = vmul.f32 %v1821_v12, %v3666_v14  ;;  %1846 = vpow2.f32 %v1059_v39  ;;  %v2072_v14 = vld [vmem:[%s4401_s1 + $0xe8] sm:$0xff]  ;;  %v560_v54 = vpop.xlane.xlu0 %559 }
 0x195   :  { %v3756_v63 = vpop.eup %1824  ;;  %1848 = vrcp.f32 %v1148_v50  ;;  %v873_v46 = vmul.f32 1.442695, %v770_v26  ;;  %v1065_v51 = vmul.f32 1.442695, %v962_v22  ;;  %v705_v10 = vmax.f32 %v4474_v6, %v641_v47  ;;  %v4476_v22 = vld [vmem:[#allocation13_spill] sm:$0xff] }
 0x196   :  { %v1827_v48 = vpop.eup %1826  ;;  %1589 = vst [vmem:[%s4403_s4 + $0xd0] sm:$0xff] %v1525_v33  ;;  %v1336_v44 = vmul.f32 %v2071_v49, %v1272_v35  ;;  %v1464_v38 = vmul.f32 %v2072_v14, %v1400_v27  ;;  %v1147_v29 = vadd.f32 %v3756_v63, %v3752_v43  ;;  %v708_v1 = vmax.f32 %v4475_v5, %v3747_v32  ;;  %v4477_v35 = vld [vmem:[#allocation14_spill] sm:$0xff] }
 0x197   :  { %v3772_v62 = vpop.eup %1828  ;;  %v1271_v15 = vmul.f32 %v1827_v48, %v3673_v23  ;;  %v1399_v55 = vmul.f32 %v1827_v48, %v3683_v25  ;;  %1850 = vpow2.f32 %v873_v46  ;;  %v769_v36 = vsub.f32 %v4474_v6, %v705_v10  ;;  %v2074_v23 = vld [vmem:[%s4401_s1 + $0xe0] sm:$0xff] }
 0x198   :  { %v3777_v8 = vpop.eup %1830  ;;  %v1528_v19 = vadd.f32 %v1464_v38, %v1336_v44  ;;  %1852 = vrcp.f32 %v1147_v29  ;;  %v961_v58 = vsub.f32 %v641_v47, %v705_v10  ;;  %v772_v20 = vsub.f32 %v4475_v5, %v708_v1  ;;  %v566_v38 = vpop.xlane.xlu1 %565 }
 0x199   :  { %v1833_v13 = vpop.eup %1832  ;;  %v1335_v37 = vmul.f32 %v2073_v0, %v1271_v15  ;;  %v1463_v25 = vmul.f32 %v2074_v23, %v1399_v55  ;;  %v1150_v41 = vadd.f32 %v3777_v8, %v3772_v62  ;;  %1854 = vpow2.f32 %v1065_v51  ;;  %v2078_v51 = vld [vmem:[%s4401_s1 + $0xf0] sm:$0xff]  ;;  %v4478_v55 = vld [vmem:[#allocation15_spill] sm:$0xff] }
 0x19a   :  { %v3788_v7 = vpop.eup %1834  ;;  %1592 = vst [vmem:[%s4403_s4 + $0xe8] sm:$0xff] %v1528_v19  ;;  %v1274_v16 = vmul.f32 %v1833_v13, %v3689_v11  ;;  %v1402_v30 = vmul.f32 %v1833_v13, %v3696_v31  ;;  %v871_v18 = vmul.f32 1.442695, %v769_v36  ;;  %v1063_v34 = vmul.f32 1.442695, %v961_v58  ;;  %v2076_v11 = vld [vmem:[%s4401_s1 + $0xf8] sm:$0xff] }
 0x19b   :  { %v3795_v53 = vpop.eup %1836  ;;  %v1527_v59 = vadd.f32 %v1463_v25, %v1335_v37  ;;  %1856 = vrcp.f32 %v1150_v41  ;;  %v877_v56 = vmul.f32 1.442695, %v772_v20  ;;  %v964_v17 = vsub.f32 %v3747_v32, %v708_v1 }
 0x19c   :  { %v3798_v52 = vpop.eup %1838  ;;  %v1338_v39 = vmul.f32 %v2075_v3, %v1274_v16  ;;  %v1466_v31 = vmul.f32 %v2076_v11, %v1402_v30  ;;  %v1149_v61 = vadd.f32 %v3795_v53, %v3788_v7  ;;  %1858 = vpow2.f32 %v871_v18  ;;  %v570_v11 = vpop.xlane.xlu1 %569 }
 0x19d   :  { %v1841_v45 = vpop.eup %1840  ;;  %1591 = vst [vmem:[%s4403_s4 + $0xe0] sm:$0xff] %v1527_v59  ;;  %1860 = vpow2.f32 %v1063_v34  ;;  %v1069_v9 = vmul.f32 1.442695, %v964_v17  ;;  %v643_v57 = vadd.f32 %v556_v4, %v2807_v42  ;;  %v646_v60 = vadd.f32 %v562_v2, %v2807_v42 }
 0x19e   :  { %v3813_v47 = vpop.eup %1842  ;;  %v1530_v32 = vadd.f32 %v1466_v31, %v1338_v39  ;;  %v1273_v12 = vmul.f32 %v1841_v45, %v3709_v40  ;;  %v1401_v50 = vmul.f32 %v1841_v45, %v3713_v21  ;;  %1862 = vrcp.f32 %v1149_v61  ;;  %v2077_v40 = vld [vmem:[%s4399_s0 + $0xf0] sm:$0xff]  ;;  %v2081_v61 = vld [vmem:[%s4399_s0 + $0x100] sm:$0xff] }
 0x19f   :  { %v1152_v26 = vadd.f32 %v3813_v47, %v3798_v52  ;;  %1864 = vpow2.f32 %v877_v56  ;;  %v707_v33 = vmax.f32 %v4476_v22, %v643_v57  ;;  %v710_v27 = vmax.f32 %v4477_v35, %v646_v60  ;;  %v564_v56 = vpop.xlane.xlu0 %563 }
 0x1a0   :  { %v3821_v46 = vpop.eup %1844  ;;  %1594 = vst [vmem:[%s4403_s4 + $0xf8] sm:$0xff] %v1530_v32  ;;  %v1337_v21 = vmul.f32 %v2077_v40, %v1273_v12  ;;  %v1465_v6 = vmul.f32 %v2078_v51, %v1401_v50  ;;  %1866 = vpow2.f32 %v1069_v9  ;;  %v645_v10 = vadd.f32 %v560_v54, %v2807_v42 }
 0x1a1   :  { %v3833_v48 = vpop.eup %1846  ;;  %1868 = vrcp.f32 %v1152_v26  ;;  %v771_v49 = vsub.f32 %v4476_v22, %v707_v33  ;;  %v963_v44 = vsub.f32 %v643_v57, %v707_v33  ;;  %v774_v14 = vsub.f32 %v4477_v35, %v710_v27  ;;  %v4479_v26 = vld [vmem:[#allocation16_spill] sm:$0xff] }
 0x1a2   :  { %v1849_v29 = vpop.eup %1848  ;;  %v1529_v5 = vadd.f32 %v1465_v6, %v1337_v21  ;;  %v1151_v1 = vadd.f32 %v3833_v48, %v3821_v46  ;;  %v966_v15 = vsub.f32 %v646_v60, %v710_v27  ;;  %v709_v36 = vmax.f32 %v4478_v55, %v645_v10  ;;  %v2083_v27 = vld [vmem:[%s4399_s0 + $0x118] sm:$0xff] }
 0x1a3   :  { %v1276_v4 = vmul.f32 %v1849_v29, %v3731_v24  ;;  %v1404_v19 = vmul.f32 %v1849_v29, %v3734_v28  ;;  %v875_v58 = vmul.f32 1.442695, %v771_v49  ;;  %v1067_v20 = vmul.f32 1.442695, %v963_v44  ;;  %v2079_v24 = vld [vmem:[%s4399_s0 + $0x108] sm:$0xff]  ;;  %v4480_v29 = vld [vmem:[#allocation17_spill] sm:$0xff] }
 0x1a4   :  { %v3842_v13 = vpop.eup %1850  ;;  %1593 = vst [vmem:[%s4403_s4 + $0xf0] sm:$0xff] %v1529_v5  ;;  %1870 = vrcp.f32 %v1151_v1  ;;  %v881_v0 = vmul.f32 1.442695, %v774_v14  ;;  %v1073_v37 = vmul.f32 1.442695, %v966_v15  ;;  %v773_v23 = vsub.f32 %v4478_v55, %v709_v36  ;;  %v2080_v28 = vld [vmem:[%s4401_s1 + $0x108] sm:$0xff]  ;;  %v568_v55 = vpop.xlane.xlu0 %567 }
 0x1a5   :  { %v1853_v25 = vpop.eup %1852  ;;  %v1340_v41 = vmul.f32 %v2079_v24, %v1276_v4  ;;  %v1468_v16 = vmul.f32 %v2080_v28, %v1404_v19  ;;  %1872 = vpow2.f32 %v875_v58  ;;  %v965_v30 = vsub.f32 %v645_v10, %v709_v36  ;;  %v4481_v1 = vld [vmem:[#allocation18_spill] sm:$0xff]  ;;  %v574_v24 = vpop.xlane.xlu1 %573 }
 0x1a6   :  { %v3854_v18 = vpop.eup %1854  ;;  %v1275_v34 = vmul.f32 %v1853_v25, %v3752_v43  ;;  %v1403_v2 = vmul.f32 %v1853_v25, %v3756_v63  ;;  %1874 = vpow2.f32 %v1067_v20  ;;  %v879_v59 = vmul.f32 1.442695, %v773_v23  ;;  %v2082_v43 = vld [vmem:[%s4401_s1 + $0x100] sm:$0xff] }
 0x1a7   :  { %v1532_v17 = vadd.f32 %v1468_v16, %v1340_v41  ;;  %v1154_v3 = vadd.f32 %v3854_v18, %v3842_v13  ;;  %1876 = vpow2.f32 %v881_v0  ;;  %v1071_v39 = vmul.f32 1.442695, %v965_v30 }
 0x1a8   :  { %v1857_v31 = vpop.eup %1856  ;;  %v1339_v45 = vmul.f32 %v2081_v61, %v1275_v34  ;;  %v1467_v63 = vmul.f32 %v2082_v43, %v1403_v2  ;;  %1878 = vpow2.f32 %v1073_v37  ;;  %v648_v9 = vadd.f32 %v566_v38, %v2807_v42  ;;  %v2087_v34 = vld [vmem:[%s4399_s0 + $0x128] sm:$0xff]  ;;  %v572_v43 = vpop.xlane.xlu0 %571 }
 0x1a9   :  { %v3867_v57 = vpop.eup %1858  ;;  %1596 = vst [vmem:[%s4403_s4 + $0x108] sm:$0xff] %v1532_v17  ;;  %v1278_v60 = vmul.f32 %v1857_v31, %v3772_v62  ;;  %v1406_v54 = vmul.f32 %v1857_v31, %v3777_v8  ;;  %1880 = vrcp.f32 %v1154_v3  ;;  %v647_v32 = vadd.f32 %v564_v56, %v2807_v42  ;;  %v2084_v8 = vld [vmem:[%s4401_s1 + $0x118] sm:$0xff] }
 0x1aa   :  { %v3875_v12 = vpop.eup %1860  ;;  %v1531_v50 = vadd.f32 %v1467_v63, %v1339_v45  ;;  %1882 = vpow2.f32 %v879_v59  ;;  %v712_v22 = vmax.f32 %v4479_v26, %v648_v9  ;;  %v3879_v33 = vadd.f32 %v570_v11, %v2807_v42 }
 0x1ab   :  { %v1863_v35 = vpop.eup %1862  ;;  %v1342_v62 = vmul.f32 %v2083_v27, %v1278_v60  ;;  %v1470_v40 = vmul.f32 %v2084_v8, %v1406_v54  ;;  %v1153_v21 = vadd.f32 %v3875_v12, %v3867_v57  ;;  %1884 = vpow2.f32 %v1071_v39 }
 0x1ac   :  { %v3889_v51 = vpop.eup %1864  ;;  %1595 = vst [vmem:[%s4403_s4 + $0x100] sm:$0xff] %v1531_v50  ;;  %v1277_v6 = vmul.f32 %v1863_v35, %v3788_v7  ;;  %v1405_v10 = vmul.f32 %v1863_v35, %v3795_v53  ;;  %v776_v49 = vsub.f32 %v4479_v26, %v712_v22  ;;  %v968_v44 = vsub.f32 %v648_v9, %v712_v22  ;;  %v2085_v7 = vld [vmem:[%s4399_s0 + $0x110] sm:$0xff]  ;;  %v2089_v9 = vld [vmem:[%s4399_s0 + $0x120] sm:$0xff] }
 0x1ad   :  { %v3897_v14 = vpop.eup %1866  ;;  %v1534_v38 = vadd.f32 %v1470_v40, %v1342_v62  ;;  %1886 = vrcp.f32 %v1153_v21  ;;  %v711_v5 = vmax.f32 %v4480_v29, %v647_v32  ;;  %v714_v15 = vmax.f32 %v4481_v1, %v3879_v33  ;;  %v2086_v53 = vld [vmem:[%s4401_s1 + $0x110] sm:$0xff] }
 0x1ae   :  { %v1869_v36 = vpop.eup %1868  ;;  %v1341_v4 = vmul.f32 %v2085_v7, %v1277_v6  ;;  %v1469_v19 = vmul.f32 %v2086_v53, %v1405_v10  ;;  %v1156_v58 = vadd.f32 %v3897_v14, %v3889_v51  ;;  %v885_v20 = vmul.f32 1.442695, %v776_v49  ;;  %v4482_v10 = vld [vmem:[#allocation19_spill] sm:$0xff] }
 0x1af   :  { %1598 = vst [vmem:[%s4403_s4 + $0x118] sm:$0xff] %v1534_v38  ;;  %v1280_v0 = vmul.f32 %v1869_v36, %v3798_v52  ;;  %v1408_v37 = vmul.f32 %v1869_v36, %v3813_v47  ;;  %v1077_v23 = vmul.f32 1.442695, %v968_v44  ;;  %v775_v25 = vsub.f32 %v4480_v29, %v711_v5  ;;  %v2088_v52 = vld [vmem:[%s4401_s1 + $0x128] sm:$0xff] }
 0x1b0   :  { %v1533_v41 = vadd.f32 %v1469_v19, %v1341_v4  ;;  %1888 = vrcp.f32 %v1156_v58  ;;  %v967_v28 = vsub.f32 %v647_v32, %v711_v5  ;;  %v778_v16 = vsub.f32 %v4481_v1, %v714_v15  ;;  %v4483_v38 = vld [vmem:[#allocation20_spill] sm:$0xff]  ;;  %v4484_v5 = vld [vmem:[#allocation21_spill] sm:$0xff] }
 0x1b1   :  { %v1871_v30 = vpop.eup %1870  ;;  %v1344_v2 = vmul.f32 %v2087_v34, %v1280_v0  ;;  %v1472_v47 = vmul.f32 %v2088_v52, %v1408_v37  ;;  %1890 = vpow2.f32 %v885_v20  ;;  %v883_v59 = vmul.f32 1.442695, %v775_v25  ;;  %v576_v37 = vpop.xlane.xlu0 %575 }
 0x1b2   :  { %v3923_v56 = vpop.eup %1872  ;;  %1597 = vst [vmem:[%s4403_s4 + $0x110] sm:$0xff] %v1533_v41  ;;  %v1279_v17 = vmul.f32 %v1871_v30, %v3821_v46  ;;  %v1407_v3 = vmul.f32 %v1871_v30, %v3833_v48  ;;  %1892 = vpow2.f32 %v1077_v23  ;;  %v1075_v39 = vmul.f32 1.442695, %v967_v28  ;;  %v2090_v46 = vld [vmem:[%s4401_s1 + $0x120] sm:$0xff] }
 0x1b3   :  { %v3930_v11 = vpop.eup %1874  ;;  %v1536_v31 = vadd.f32 %v1472_v47, %v1344_v2  ;;  %1894 = vpow2.f32 %v883_v59  ;;  %v889_v61 = vmul.f32 1.442695, %v778_v16  ;;  %v970_v45 = vsub.f32 %v3879_v33, %v714_v15  ;;  %v578_v33 = vpop.xlane.xlu1 %577  ;;  %v2093_v2 = vld [vmem:[%s4399_s0 + $0x130] sm:$0xff] }
 0x1b4   :  { %v3933_v63 = vpop.eup %1876  ;;  %v1343_v60 = vmul.f32 %v2089_v9, %v1279_v17  ;;  %v1471_v48 = vmul.f32 %v2090_v46, %v1407_v3  ;;  %v1155_v54 = vadd.f32 %v3930_v11, %v3923_v56  ;;  %1896 = vpow2.f32 %v1075_v39  ;;  %v4485_v9 = vld [vmem:[#allocation22_spill] sm:$0xff] }
 0x1b5   :  { %v3943_v32 = vpop.eup %1878  ;;  %1600 = vst [vmem:[%s4403_s4 + $0x128] sm:$0xff] %v1536_v31  ;;  %1898 = vpow2.f32 %v889_v61  ;;  %v1081_v50 = vmul.f32 1.442695, %v970_v45  ;;  %v649_v26 = vadd.f32 %v568_v55, %v2807_v42  ;;  %v652_v22 = vadd.f32 %v574_v24, %v2807_v42  ;;  %v2092_v55 = vld [vmem:[%s4401_s1 + $0x138] sm:$0xff] }
 0x1b6   :  { %v1881_v35 = vpop.eup %1880  ;;  %v1535_v27 = vadd.f32 %v1471_v48, %v1343_v60  ;;  %1900 = vrcp.f32 %v1155_v54  ;;  %v1158_v62 = vadd.f32 %v3943_v32, %v3933_v63  ;;  %v651_v8 = vadd.f32 %v572_v43, %v2807_v42  ;;  %v2095_v54 = vld [vmem:[%s4399_s0 + $0x148] sm:$0xff] }
 0x1b7   :  { %v3953_v40 = vpop.eup %1882  ;;  %v1282_v21 = vmul.f32 %v1881_v35, %v3842_v13  ;;  %v1410_v6 = vmul.f32 %v1881_v35, %v3854_v18  ;;  %1902 = vpow2.f32 %v1081_v50  ;;  %v713_v49 = vmax.f32 %v4482_v10, %v649_v26  ;;  %v2091_v13 = vld [vmem:[%s4399_s0 + $0x138] sm:$0xff]  ;;  %v582_v17 = vpop.xlane.xlu1 %581 }
 0x1b8   :  { %v3958_v44 = vpop.eup %1884  ;;  %1599 = vst [vmem:[%s4403_s4 + $0x120] sm:$0xff] %v1535_v27  ;;  %1904 = vrcp.f32 %v1158_v62  ;;  %v716_v29 = vmax.f32 %v4483_v38, %v652_v22  ;;  %v715_v1 = vmax.f32 %v4484_v5, %v651_v8  ;;  %v654_v15 = vadd.f32 %v578_v33, %v2807_v42  ;;  %v4486_v62 = vld [vmem:[#allocation23_spill] sm:$0xff] }
 0x1b9   :  { %v1346_v18 = vmul.f32 %v2091_v13, %v1282_v21  ;;  %v1474_v36 = vmul.f32 %v2092_v55, %v1410_v6  ;;  %v1157_v7 = vadd.f32 %v3958_v44, %v3953_v40  ;;  %v777_v4 = vsub.f32 %v4482_v10, %v713_v49 }
 0x1ba   :  { %v1887_v53 = vpop.eup %1886  ;;  %v969_v19 = vsub.f32 %v649_v26, %v713_v49  ;;  %v780_v58 = vsub.f32 %v4483_v38, %v716_v29  ;;  %v972_v20 = vsub.f32 %v652_v22, %v716_v29  ;;  %v779_v0 = vsub.f32 %v4484_v5, %v715_v1  ;;  %v580_v22 = vpop.xlane.xlu0 %579 }
 0x1bb   :  { %v1538_v23 = vadd.f32 %v1474_v36, %v1346_v18  ;;  %v1281_v25 = vmul.f32 %v1887_v53, %v3867_v57  ;;  %v1409_v24 = vmul.f32 %v1887_v53, %v3875_v12  ;;  %1906 = vrcp.f32 %v1157_v7  ;;  %v2094_v57 = vld [vmem:[%s4401_s1 + $0x130] sm:$0xff]  ;;  %v586_v13 = vpop.xlane.xlu1 %585 }
 0x1bc   :  { %v887_v41 = vmul.f32 1.442695, %v777_v4  ;;  %v1079_v28 = vmul.f32 1.442695, %v969_v19  ;;  %v893_v16 = vmul.f32 1.442695, %v780_v58  ;;  %v971_v30 = vsub.f32 %v651_v8, %v715_v1 }
 0x1bd   :  { %v1889_v34 = vpop.eup %1888  ;;  %1602 = vst [vmem:[%s4403_s4 + $0x138] sm:$0xff] %v1538_v23  ;;  %v1345_v52 = vmul.f32 %v2093_v2, %v1281_v25  ;;  %v1473_v12 = vmul.f32 %v2094_v57, %v1409_v24  ;;  %v1085_v47 = vmul.f32 1.442695, %v972_v20  ;;  %v891_v59 = vmul.f32 1.442695, %v779_v0  ;;  %v4487_v19 = vld [vmem:[#allocation4_spill] sm:$0xff] }
 0x1be   :  { %v3988_v3 = vpop.eup %1890  ;;  %v1284_v39 = vmul.f32 %v1889_v34, %v3889_v51  ;;  %v1412_v31 = vmul.f32 %v1889_v34, %v3897_v14  ;;  %1908 = vpow2.f32 %v887_v41  ;;  %v1083_v61 = vmul.f32 1.442695, %v971_v30  ;;  %v2096_v51 = vld [vmem:[%s4401_s1 + $0x148] sm:$0xff]  ;;  %v2097_v20 = vld [vmem:[%s4399_s0 + $0x140] sm:$0xff]  ;;  %v584_v25 = vpop.xlane.xlu0 %583  ;;  %v2099_v34 = vld [vmem:[%s4399_s0 + $0x158] sm:$0xff] }
 0x1bf   :  { %v3992_v45 = vpop.eup %1892  ;;  %v1537_v43 = vadd.f32 %v1473_v12, %v1345_v52  ;;  %1910 = vpow2.f32 %v1079_v28  ;;  %v718_v60 = vmax.f32 %v4485_v9, %v654_v15  ;;  %v653_v46 = vadd.f32 %v576_v37, %v2807_v42  ;;  %v2100_v52 = vld [vmem:[%s4401_s1 + $0x158] sm:$0xff] }
 0x1c0   :  { %v3996_v48 = vpop.eup %1894  ;;  %v1348_v50 = vmul.f32 %v2095_v54, %v1284_v39  ;;  %v1476_v14 = vmul.f32 %v2096_v51, %v1412_v31  ;;  %v1160_v26 = vadd.f32 %v3992_v45, %v3988_v3  ;;  %1912 = vpow2.f32 %v893_v16 }
 0x1c1   :  { %v4006_v33 = vpop.eup %1896  ;;  %1601 = vst [vmem:[%s4403_s4 + $0x130] sm:$0xff] %v1537_v43  ;;  %1914 = vpow2.f32 %v1085_v47  ;;  %v782_v35 = vsub.f32 %v4485_v9, %v718_v60  ;;  %v974_v27 = vsub.f32 %v654_v15, %v718_v60  ;;  %v717_v8 = vmax.f32 %v4486_v62, %v653_v46  ;;  %v590_v47 = vpop.xlane.xlu1 %589 }
 0x1c2   :  { %v4013_v21 = vpop.eup %1898  ;;  %v1540_v6 = vadd.f32 %v1476_v14, %v1348_v50  ;;  %1916 = vrcp.f32 %v1160_v26  ;;  %v1159_v10 = vadd.f32 %v4006_v33, %v3996_v48  ;;  %v656_v49 = vadd.f32 %v582_v17, %v2807_v42  ;;  %v4069_v14 = vpop.xlane.xlu0 %587 }
 0x1c3   :  { %v1901_v38 = vpop.eup %1900  ;;  %1918 = vpow2.f32 %v891_v59  ;;  %v897_v29 = vmul.f32 1.442695, %v782_v35  ;;  %v1089_v5 = vmul.f32 1.442695, %v974_v27  ;;  %v781_v1 = vsub.f32 %v4486_v62, %v717_v8  ;;  %v4489_v27 = vld [vmem:[#allocation6_spill] sm:$0xff] }
 0x1c4   :  { %v4019_v18 = vpop.eup %1902  ;;  %1604 = vst [vmem:[%s4403_s4 + $0x148] sm:$0xff] %v1540_v6  ;;  %v1283_v15 = vmul.f32 %v1901_v38, %v3923_v56  ;;  %v1411_v55 = vmul.f32 %v1901_v38, %v3930_v11  ;;  %1920 = vrcp.f32 %v1159_v10  ;;  %v973_v36 = vsub.f32 %v653_v46, %v717_v8  ;;  %v2098_v56 = vld [vmem:[%s4401_s1 + $0x140] sm:$0xff]  ;;  %v4488_v46 = vld [vmem:[#allocation5_spill] sm:$0xff] }
 0x1c5   :  { %v1905_v7 = vpop.eup %1904  ;;  %v1162_v4 = vadd.f32 %v4019_v18, %v4013_v21  ;;  %1922 = vpow2.f32 %v1083_v61  ;;  %v895_v53 = vmul.f32 1.442695, %v781_v1  ;;  %v720_v58 = vmax.f32 %v4487_v19, %v656_v49 }
 0x1c6   :  { %v1347_v0 = vmul.f32 %v2097_v20, %v1283_v15  ;;  %v1475_v11 = vmul.f32 %v2098_v56, %v1411_v55  ;;  %v1286_v37 = vmul.f32 %v1905_v7, %v3933_v63  ;;  %v1414_v23 = vmul.f32 %v1905_v7, %v3943_v32 }
 0x1c7   :  { %1924 = vrcp.f32 %v1162_v4  ;;  %v1087_v24 = vmul.f32 1.442695, %v973_v36  ;;  %v784_v41 = vsub.f32 %v4487_v19, %v720_v58  ;;  %v976_v28 = vsub.f32 %v656_v49, %v720_v58  ;;  %v4490_v49 = vld [vmem:[#allocation7_spill] sm:$0xff] }
 0x1c8   :  { %v1907_v16 = vpop.eup %1906  ;;  %v1539_v30 = vadd.f32 %v1475_v11, %v1347_v0  ;;  %v1350_v2 = vmul.f32 %v2099_v34, %v1286_v37  ;;  %v1478_v63 = vmul.f32 %v2100_v52, %v1414_v23  ;;  %1926 = vpow2.f32 %v897_v29  ;;  %v4491_v29 = vld [vmem:[#allocation24_spill] sm:$0xff]  ;;  %v594_v11 = vpop.xlane.xlu1 %593 }
 0x1c9   :  { %v1285_v32 = vmul.f32 %v1907_v16, %v3953_v40  ;;  %v1413_v57 = vmul.f32 %v1907_v16, %v3958_v44  ;;  %1928 = vpow2.f32 %v1089_v5  ;;  %v901_v12 = vmul.f32 1.442695, %v784_v41  ;;  %v2101_v40 = vld [vmem:[%s4399_s0 + $0x150] sm:$0xff]  ;;  %v2103_v23 = vld [vmem:[%s4399_s0 + $0x168] sm:$0xff] }
 0x1ca   :  { %1603 = vst [vmem:[%s4403_s4 + $0x140] sm:$0xff] %v1539_v30  ;;  %v1542_v59 = vadd.f32 %v1478_v63, %v1350_v2  ;;  %1930 = vpow2.f32 %v895_v53  ;;  %v1093_v17 = vmul.f32 1.442695, %v976_v28  ;;  %v655_v39 = vadd.f32 %v580_v22, %v2807_v42  ;;  %v2102_v44 = vld [vmem:[%s4401_s1 + $0x150] sm:$0xff]  ;;  %v592_v28 = vpop.xlane.xlu0 %591  ;;  %v2105_v63 = vld [vmem:[%s4399_s0 + $0x160] sm:$0xff] }
 0x1cb   :  { %v4050_v31 = vpop.eup %1908  ;;  %v1349_v61 = vmul.f32 %v2101_v40, %v1285_v32  ;;  %v1477_v43 = vmul.f32 %v2102_v44, %v1413_v57  ;;  %1932 = vpow2.f32 %v1087_v24  ;;  %v658_v9 = vadd.f32 %v586_v13, %v2807_v42 }
 0x1cc   :  { %v4059_v60 = vpop.eup %1910  ;;  %1606 = vst [vmem:[%s4403_s4 + $0x158] sm:$0xff] %v1542_v59  ;;  %1934 = vpow2.f32 %v901_v12  ;;  %v719_v54 = vmax.f32 %v4488_v46, %v655_v39  ;;  %v657_v50 = vadd.f32 %v584_v25, %v2807_v42  ;;  %v4067_v51 = vadd.f32 %v590_v47, %v2807_v42 }
 0x1cd   :  { %v4071_v26 = vpop.eup %1912  ;;  %v1541_v22 = vadd.f32 %v1477_v43, %v1349_v61  ;;  %v1161_v35 = vadd.f32 %v4059_v60, %v4050_v31  ;;  %1936 = vpow2.f32 %v1093_v17  ;;  %v722_v62 = vmax.f32 %v4489_v27, %v658_v9  ;;  %v2108_v43 = vld [vmem:[%s4401_s1 + $0x178] sm:$0xff] }
 0x1ce   :  { %v4076_v8 = vpop.eup %1914  ;;  %v783_v6 = vsub.f32 %v4488_v46, %v719_v54  ;;  %v975_v10 = vsub.f32 %v655_v39, %v719_v54  ;;  %v721_v38 = vmax.f32 %v4490_v49, %v657_v50  ;;  %v724_v5 = vmax.f32 %v4491_v29, %v4067_v51  ;;  %v598_v54 = vpop.xlane.xlu1 %597 }
 0x1cf   :  { %v1917_v1 = vpop.eup %1916  ;;  %1605 = vst [vmem:[%s4403_s4 + $0x150] sm:$0xff] %v1541_v22  ;;  %1938 = vrcp.f32 %v1161_v35  ;;  %v1164_v13 = vadd.f32 %v4076_v8, %v4071_v26  ;;  %v786_v15 = vsub.f32 %v4489_v27, %v722_v62  ;;  %v978_v55 = vsub.f32 %v658_v9, %v722_v62  ;;  %v596_v27 = vpop.xlane.xlu0 %595 }
 0x1d0   :  { %v4088_v36 = vpop.eup %1918  ;;  %v1288_v7 = vmul.f32 %v1917_v1, %v3988_v3  ;;  %v1416_v4 = vmul.f32 %v1917_v1, %v3992_v45  ;;  %v899_v53 = vmul.f32 1.442695, %v783_v6  ;;  %v1091_v19 = vmul.f32 1.442695, %v975_v10  ;;  %v2104_v3 = vld [vmem:[%s4401_s1 + $0x168] sm:$0xff] }
 0x1d1   :  { %v1921_v58 = vpop.eup %1920  ;;  %1940 = vrcp.f32 %v1164_v13  ;;  %v905_v20 = vmul.f32 1.442695, %v786_v15  ;;  %v1097_v0 = vmul.f32 1.442695, %v978_v55  ;;  %v785_v56 = vsub.f32 %v4490_v49, %v721_v38  ;;  %v4493_v15 = vld [vmem:[#allocation26_spill] sm:$0xff] }
 0x1d2   :  { %v4093_v37 = vpop.eup %1922  ;;  %v1352_v25 = vmul.f32 %v2103_v23, %v1288_v7  ;;  %v1480_v45 = vmul.f32 %v2104_v3, %v1416_v4  ;;  %v1287_v24 = vmul.f32 %v1921_v58, %v3996_v48  ;;  %v1415_v41 = vmul.f32 %v1921_v58, %v4006_v33  ;;  %v2106_v48 = vld [vmem:[%s4401_s1 + $0x160] sm:$0xff] }
 0x1d3   :  { %v1163_v16 = vadd.f32 %v4093_v37, %v4088_v36  ;;  %1942 = vpow2.f32 %v899_v53  ;;  %v903_v30 = vmul.f32 1.442695, %v785_v56  ;;  %v977_v34 = vsub.f32 %v657_v50, %v721_v38  ;;  %v4494_v58 = vld [vmem:[#allocation27_spill] sm:$0xff] }
 0x1d4   :  { %v1925_v2 = vpop.eup %1924  ;;  %v1544_v52 = vadd.f32 %v1480_v45, %v1352_v25  ;;  %v1351_v32 = vmul.f32 %v2105_v63, %v1287_v24  ;;  %v1479_v57 = vmul.f32 %v2106_v48, %v1415_v41  ;;  %1944 = vpow2.f32 %v1091_v19  ;;  %v2109_v24 = vld [vmem:[%s4399_s0 + $0x170] sm:$0xff]  ;;  %v2111_v48 = vld [vmem:[%s4399_s0 + $0x188] sm:$0xff] }
 0x1d5   :  { %v4111_v33 = vpop.eup %1926  ;;  %v1290_v12 = vmul.f32 %v1925_v2, %v4013_v21  ;;  %v1418_v47 = vmul.f32 %v1925_v2, %v4019_v18  ;;  %1946 = vrcp.f32 %v1163_v16  ;;  %v1095_v59 = vmul.f32 1.442695, %v977_v34  ;;  %v2107_v21 = vld [vmem:[%s4399_s0 + $0x178] sm:$0xff] }
 0x1d6   :  { %v4115_v17 = vpop.eup %1928  ;;  %1608 = vst [vmem:[%s4403_s4 + $0x168] sm:$0xff] %v1544_v52  ;;  %v1543_v39 = vadd.f32 %v1479_v57, %v1351_v32  ;;  %1948 = vpow2.f32 %v905_v20  ;;  %v788_v40 = vsub.f32 %v4491_v29, %v724_v5  ;;  %v980_v61 = vsub.f32 %v4067_v51, %v724_v5  ;;  %v4492_v29 = vld [vmem:[#allocation25_spill] sm:$0xff] }
 0x1d7   :  { %v4122_v44 = vpop.eup %1930  ;;  %v1354_v18 = vmul.f32 %v2107_v21, %v1290_v12  ;;  %v1482_v9 = vmul.f32 %v2108_v43, %v1418_v47  ;;  %v1166_v46 = vadd.f32 %v4115_v17, %v4111_v33  ;;  %1950 = vpow2.f32 %v1097_v0 }
 0x1d8   :  { %v4132_v50 = vpop.eup %1932  ;;  %1607 = vst [vmem:[%s4403_s4 + $0x160] sm:$0xff] %v1543_v39  ;;  %1952 = vpow2.f32 %v903_v30  ;;  %v909_v51 = vmul.f32 1.442695, %v788_v40  ;;  %v1101_v22 = vmul.f32 1.442695, %v980_v61  ;;  %v659_v35 = vadd.f32 %v4069_v14, %v2807_v42 }
 0x1d9   :  { %v4139_v62 = vpop.eup %1934  ;;  %v1546_v6 = vadd.f32 %v1482_v9, %v1354_v18  ;;  %1954 = vrcp.f32 %v1166_v46  ;;  %v1165_v10 = vadd.f32 %v4132_v50, %v4122_v44  ;;  %v662_v49 = vadd.f32 %v594_v11, %v2807_v42  ;;  %v4495_v46 = vld [vmem:[#allocation28_spill] sm:$0xff] }
 0x1da   :  { %v4144_v38 = vpop.eup %1936  ;;  %1956 = vpow2.f32 %v1095_v59  ;;  %v723_v5 = vmax.f32 %v4492_v29, %v659_v35  ;;  %v661_v1 = vadd.f32 %v592_v28, %v2807_v42  ;;  %v4149_v13 = vadd.f32 %v598_v54, %v2807_v42  ;;  %v2110_v28 = vld [vmem:[%s4401_s1 + $0x170] sm:$0xff] }
 0x1db   :  { %1610 = vst [vmem:[%s4403_s4 + $0x178] sm:$0xff] %v1546_v6  ;;  %1958 = vrcp.f32 %v1165_v10  ;;  %v1168_v14 = vadd.f32 %v4144_v38, %v4139_v62  ;;  %v726_v55 = vmax.f32 %v4493_v15, %v662_v49  ;;  %v4158_v7 = vadd.f32 %v596_v27, %v2807_v42  ;;  %v2114_v27 = vld [vmem:[%s4401_s1 + $0x180] sm:$0xff] }
 0x1dc   :  { %v1939_v4 = vpop.eup %1938  ;;  %1960 = vpow2.f32 %v909_v51  ;;  %v787_v53 = vsub.f32 %v4492_v29, %v723_v5  ;;  %v979_v19 = vsub.f32 %v659_v35, %v723_v5  ;;  %v725_v20 = vmax.f32 %v4494_v58, %v661_v1  ;;  %v4496_v51 = vld [vmem:[#allocation29_spill] sm:$0xff] }
 0x1dd   :  { %v1289_v0 = vmul.f32 %v1939_v4, %v4050_v31  ;;  %v1417_v56 = vmul.f32 %v1939_v4, %v4059_v60  ;;  %1962 = vrcp.f32 %v1168_v14  ;;  %v790_v11 = vsub.f32 %v4493_v15, %v726_v55 }
 0x1de   :  { %v1941_v23 = vpop.eup %1940  ;;  %1964 = vpow2.f32 %v1101_v22  ;;  %v907_v25 = vmul.f32 1.442695, %v787_v53  ;;  %v1099_v3 = vmul.f32 1.442695, %v979_v19  ;;  %v982_v45 = vsub.f32 %v662_v49, %v726_v55  ;;  %v602_v53 = vpop.xlane.xlu1 %601 }
 0x1df   :  { %v1353_v41 = vmul.f32 %v2109_v24, %v1289_v0  ;;  %v1481_v31 = vmul.f32 %v2110_v28, %v1417_v56  ;;  %v1292_v60 = vmul.f32 %v1941_v23, %v4071_v26  ;;  %v1420_v16 = vmul.f32 %v1941_v23, %v4076_v8  ;;  %v2112_v26 = vld [vmem:[%s4401_s1 + $0x188] sm:$0xff]  ;;  %v600_v19 = vpop.xlane.xlu0 %599  ;;  %v2116_v23 = vld [vmem:[%s4401_s1 + $0x198] sm:$0xff] }
 0x1e0   :  { %v4173_v30 = vpop.eup %1942  ;;  %1966 = vpow2.f32 %v907_v25  ;;  %v913_v34 = vmul.f32 1.442695, %v790_v11  ;;  %v1105_v2 = vmul.f32 1.442695, %v982_v45  ;;  %v789_v52 = vsub.f32 %v4494_v58, %v725_v20 }
 0x1e1   :  { %v4176_v63 = vpop.eup %1944  ;;  %v1545_v32 = vadd.f32 %v1481_v31, %v1353_v41  ;;  %v1356_v57 = vmul.f32 %v2111_v48, %v1292_v60  ;;  %v1484_v8 = vmul.f32 %v2112_v26, %v1420_v16  ;;  %1968 = vpow2.f32 %v1099_v3  ;;  %v2119_v26 = vld [vmem:[%s4399_s0 + $0x1a8] sm:$0xff] }
 0x1e2   :  { %v1947_v12 = vpop.eup %1946  ;;  %v1167_v47 = vadd.f32 %v4176_v63, %v4173_v30  ;;  %1970 = vpow2.f32 %v913_v34  ;;  %v911_v59 = vmul.f32 1.442695, %v789_v52  ;;  %v981_v39 = vsub.f32 %v661_v1, %v725_v20  ;;  %v2117_v34 = vld [vmem:[%s4399_s0 + $0x190] sm:$0xff] }
 0x1e3   :  { %v4186_v40 = vpop.eup %1948  ;;  %1609 = vst [vmem:[%s4403_s4 + $0x170] sm:$0xff] %v1545_v32  ;;  %v1548_v61 = vadd.f32 %v1484_v8, %v1356_v57  ;;  %v1291_v21 = vmul.f32 %v1947_v12, %v4088_v36  ;;  %v1419_v18 = vmul.f32 %v1947_v12, %v4093_v37  ;;  %1972 = vpow2.f32 %v1105_v2  ;;  %v2113_v36 = vld [vmem:[%s4399_s0 + $0x180] sm:$0xff] }
 0x1e4   :  { %v4193_v43 = vpop.eup %1950  ;;  %1974 = vrcp.f32 %v1167_v47  ;;  %v1103_v9 = vmul.f32 1.442695, %v981_v39  ;;  %v728_v54 = vmax.f32 %v4495_v46, %v4149_v13  ;;  %v727_v22 = vmax.f32 %v4496_v51, %v4158_v7  ;;  %v2120_v47 = vld [vmem:[%s4401_s1 + $0x1a8] sm:$0xff]  ;;  %v4498_v39 = vld [vmem:[#allocation31_spill] sm:$0xff] }
 0x1e5   :  { %v4199_v35 = vpop.eup %1952  ;;  %1612 = vst [vmem:[%s4403_s4 + $0x188] sm:$0xff] %v1548_v61  ;;  %v1355_v37 = vmul.f32 %v2113_v36, %v1291_v21  ;;  %v1483_v6 = vmul.f32 %v2114_v27, %v1419_v18  ;;  %v1170_v10 = vadd.f32 %v4193_v43, %v4186_v40  ;;  %1976 = vpow2.f32 %v911_v59 }
 0x1e6   :  { %v1955_v49 = vpop.eup %1954  ;;  %1978 = vpow2.f32 %v1103_v9  ;;  %v792_v29 = vsub.f32 %v4495_v46, %v728_v54  ;;  %v984_v5 = vsub.f32 %v4149_v13, %v728_v54  ;;  %v791_v1 = vsub.f32 %v4496_v51, %v727_v22 }
 0x1e7   :  { %v4215_v14 = vpop.eup %1956  ;;  %v1547_v15 = vadd.f32 %v1483_v6, %v1355_v37  ;;  %v1294_v55 = vmul.f32 %v1955_v49, %v4111_v33  ;;  %v1422_v4 = vmul.f32 %v1955_v49, %v4115_v17  ;;  %1980 = vrcp.f32 %v1170_v10  ;;  %v2115_v33 = vld [vmem:[%s4399_s0 + $0x198] sm:$0xff] }
 0x1e8   :  { %v1959_v58 = vpop.eup %1958  ;;  %v1169_v20 = vadd.f32 %v4215_v14, %v4199_v35  ;;  %v917_v0 = vmul.f32 1.442695, %v792_v29  ;;  %v1109_v56 = vmul.f32 1.442695, %v984_v5  ;;  %v915_v11 = vmul.f32 1.442695, %v791_v1 }
 0x1e9   :  { %v4221_v13 = vpop.eup %1960  ;;  %1611 = vst [vmem:[%s4403_s4 + $0x180] sm:$0xff] %v1547_v15  ;;  %v1358_v17 = vmul.f32 %v2115_v33, %v1294_v55  ;;  %v1486_v25 = vmul.f32 %v2116_v23, %v1422_v4  ;;  %v1293_v3 = vmul.f32 %v1959_v58, %v4122_v44  ;;  %v1421_v45 = vmul.f32 %v1959_v58, %v4132_v50  ;;  %v2118_v44 = vld [vmem:[%s4401_s1 + $0x190] sm:$0xff]  ;;  %v2122_v58 = vld [vmem:[%s4401_s1 + $0x1a0] sm:$0xff]  ;;  %v2123_v33 = vld [vmem:[%s4399_s0 + $0x1b8] sm:$0xff] }
 0x1ea   :  { %v1963_v24 = vpop.eup %1962  ;;  %1982 = vrcp.f32 %v1169_v20  ;;  %v983_v41 = vsub.f32 %v4158_v7, %v727_v22  ;;  %v666_v28 = vadd.f32 %v602_v53, %v2807_v42  ;;  %v665_v31 = vadd.f32 %v600_v19, %v2807_v42  ;;  %v2121_v53 = vld [vmem:[%s4399_s0 + $0x1a0] sm:$0xff]  ;;  %v2124_v23 = vld [vmem:[%s4401_s1 + $0x1b8] sm:$0xff] }
 0x1eb   :  { %v4237_v60 = vpop.eup %1964  ;;  %v1550_v16 = vadd.f32 %v1486_v25, %v1358_v17  ;;  %v1357_v2 = vmul.f32 %v2117_v34, %v1293_v3  ;;  %v1485_v50 = vmul.f32 %v2118_v44, %v1421_v45  ;;  %v1296_v52 = vmul.f32 %v1963_v24, %v4139_v62  ;;  %v4497_v62 = vld [vmem:[#allocation30_spill] sm:$0xff] }
 0x1ec   :  { %v1424_v7 = vmul.f32 %v1963_v24, %v4144_v38  ;;  %v1172_v42 = vadd.f32 %v4237_v60, %v4221_v13  ;;  %1984 = vpow2.f32 %v917_v0  ;;  %v1107_v32 = vmul.f32 1.442695, %v983_v41  ;;  %v2125_v41 = vld [vmem:[%s4399_s0 + $0x1b0] sm:$0xff] }
 0x1ed   :  { %v4249_v48 = vpop.eup %1966  ;;  %1614 = vst [vmem:[%s4403_s4 + $0x198] sm:$0xff] %v1550_v16  ;;  %v1549_v57 = vadd.f32 %v1485_v50, %v1357_v2  ;;  %v1360_v8 = vmul.f32 %v2119_v26, %v1296_v52  ;;  %1986 = vpow2.f32 %v1109_v56  ;;  %v730_v38 = vmax.f32 %v4497_v62, %v666_v28 }
 0x1ee   :  { %v4258_v12 = vpop.eup %1968  ;;  %v1488_v59 = vmul.f32 %v2120_v47, %v1424_v7  ;;  %1988 = vrcp.f32 %v1172_v42  ;;  %v729_v61 = vmax.f32 %v4498_v39, %v665_v31  ;;  %v2127_v42 = vld [vmem:[%s4399_s0 + $0x1c8] sm:$0xff] }
 0x1ef   :  { %v4264_v21 = vpop.eup %1970  ;;  %1613 = vst [vmem:[%s4403_s4 + $0x190] sm:$0xff] %v1549_v57  ;;  %v1171_v18 = vadd.f32 %v4258_v12, %v4249_v48  ;;  %1990 = vpow2.f32 %v915_v11  ;;  %v794_v9 = vsub.f32 %v4497_v62, %v730_v38  ;;  %v986_v46 = vsub.f32 %v666_v28, %v730_v38  ;;  %v2128_v57 = vld [vmem:[%s4401_s1 + $0x1c8] sm:$0xff] }
 0x1f0   :  { %v4272_v54 = vpop.eup %1972  ;;  %v1552_v51 = vadd.f32 %v1488_v59, %v1360_v8  ;;  %1992 = vpow2.f32 %v1107_v32  ;;  %v793_v22 = vsub.f32 %v4498_v39, %v729_v61  ;;  %v985_v36 = vsub.f32 %v665_v31, %v729_v61  ;;  %v2126_v31 = vld [vmem:[%s4401_s1 + $0x1b0] sm:$0xff]  ;;  %v2129_v59 = vld [vmem:[%s4399_s0 + $0x1c0] sm:$0xff] }
 0x1f1   :  { %v1975_v37 = vpop.eup %1974  ;;  %1994 = vrcp.f32 %v1171_v18  ;;  %v1174_v27 = vadd.f32 %v4272_v54, %v4264_v21  ;;  %v921_v6 = vmul.f32 1.442695, %v794_v9  ;;  %v1113_v10 = vmul.f32 1.442695, %v986_v46  ;;  %v2130_v61 = vld [vmem:[%s4401_s1 + $0x1c0] sm:$0xff] }
 0x1f2   :  { %v4277_v49 = vpop.eup %1976  ;;  %1616 = vst [vmem:[%s4403_s4 + $0x1a8] sm:$0xff] %v1552_v51  ;;  %v1295_v29 = vmul.f32 %v1975_v37, %v4173_v30  ;;  %v1423_v5 = vmul.f32 %v1975_v37, %v4176_v63  ;;  %v919_v15 = vmul.f32 1.442695, %v793_v22  ;;  %v1111_v55 = vmul.f32 1.442695, %v985_v36  ;;  %v2131_v22 = vld [vmem:[%s4399_s0 + $0x1d8] sm:$0xff] }
 0x1f3   :  { %v4284_v1 = vpop.eup %1978  ;;  %1996 = vrcp.f32 %v1174_v27  ;;  %v2132_v37 = vld [vmem:[%s4401_s1 + $0x1d8] sm:$0xff] }
 0x1f4   :  { %v1981_v4 = vpop.eup %1980  ;;  %v1359_v19 = vmul.f32 %v2121_v53, %v1295_v29  ;;  %v1487_v20 = vmul.f32 %v2122_v58, %v1423_v5  ;;  %v1173_v30 = vadd.f32 %v4284_v1, %v4277_v49  ;;  %1998 = vpow2.f32 %v921_v6 }
 0x1f5   :  { %v1298_v63 = vmul.f32 %v1981_v4, %v4186_v40  ;;  %v1426_v0 = vmul.f32 %v1981_v4, %v4193_v43  ;;  %2000 = vpow2.f32 %v1113_v10  ;;  %v2134_v4 = vld [vmem:[%s4401_s1 + $0x1d0] sm:$0xff] }
 0x1f6   :  { %v1551_v56 = vadd.f32 %v1487_v20, %v1359_v19  ;;  %2002 = vrcp.f32 %v1173_v30 }
 0x1f7   :  { %v1983_v11 = vpop.eup %1982  ;;  %v1362_v17 = vmul.f32 %v2123_v33, %v1298_v63  ;;  %v1490_v25 = vmul.f32 %v2124_v23, %v1426_v0  ;;  %2004 = vpow2.f32 %v919_v15  ;;  %v2133_v15 = vld [vmem:[%s4399_s0 + $0x1d0] sm:$0xff]  ;;  %v2135_v63 = vld [vmem:[%s4399_s0 + $0x1e8] sm:$0xff] }
 0x1f8   :  { %1615 = vst [vmem:[%s4403_s4 + $0x1a0] sm:$0xff] %v1551_v56  ;;  %v1297_v40 = vmul.f32 %v1983_v11, %v4199_v35  ;;  %v1425_v43 = vmul.f32 %v1983_v11, %v4215_v14  ;;  %2006 = vpow2.f32 %v1111_v55  ;;  %v2136_v56 = vld [vmem:[%s4401_s1 + $0x1e8] sm:$0xff] }
 0x1f9   :  { %v1985_v3 = vpop.eup %1984  ;;  %v1554_v45 = vadd.f32 %v1490_v25, %v1362_v17  ;;  %v2137_v25 = vld [vmem:[%s4399_s0 + $0x1e0] sm:$0xff] }
 0x1fa   :  { %v1987_v24 = vpop.eup %1986  ;;  %v1361_v28 = vmul.f32 %v2125_v41, %v1297_v40  ;;  %v1489_v16 = vmul.f32 %v2126_v31, %v1425_v43  ;;  %v2138_v43 = vld [vmem:[%s4401_s1 + $0x1e0] sm:$0xff] }
 0x1fb   :  { %v1989_v34 = vpop.eup %1988  ;;  %1618 = vst [vmem:[%s4403_s4 + $0x1b8] sm:$0xff] %v1554_v45  ;;  %v1176_v35 = vadd.f32 %v1987_v24, %v1985_v3 }
 0x1fc   :  { %v1991_v14 = vpop.eup %1990  ;;  %v1553_v2 = vadd.f32 %v1489_v16, %v1361_v28  ;;  %v1300_v44 = vmul.f32 %v1989_v34, %v4221_v13  ;;  %v1428_v50 = vmul.f32 %v1989_v34, %v4237_v60  ;;  %v2139_v16 = vld [vmem:[%s4399_s0 + $0x1f8] sm:$0xff] }
 0x1fd   :  { %v1993_v52 = vpop.eup %1992  ;;  %2008 = vrcp.f32 %v1176_v35  ;;  %v2140_v35 = vld [vmem:[%s4401_s1 + $0x1f8] sm:$0xff] }
 0x1fe   :  { %v1995_v7 = vpop.eup %1994  ;;  %1617 = vst [vmem:[%s4403_s4 + $0x1b0] sm:$0xff] %v1553_v2  ;;  %v1364_v32 = vmul.f32 %v2127_v42, %v1300_v44  ;;  %v1492_v26 = vmul.f32 %v2128_v57, %v1428_v50  ;;  %v1175_v13 = vadd.f32 %v1993_v52, %v1991_v14  ;;  %v2142_v42 = vld [vmem:[%s4401_s1 + $0x1f0] sm:$0xff] }
 0x1ff   :  { %v1299_v60 = vmul.f32 %v1995_v7, %v4249_v48  ;;  %v1427_v8 = vmul.f32 %v1995_v7, %v4258_v12 }
 0x200   :  { %v1997_v62 = vpop.eup %1996  ;;  %v1556_v38 = vadd.f32 %v1492_v26, %v1364_v32  ;;  %2010 = vrcp.f32 %v1175_v13 }
 0x201   :  { %v1999_v47 = vpop.eup %1998  ;;  %v1363_v39 = vmul.f32 %v2129_v59, %v1299_v60  ;;  %v1491_v18 = vmul.f32 %v2130_v61, %v1427_v8  ;;  %v1302_v9 = vmul.f32 %v1997_v62, %v4264_v21  ;;  %v1430_v48 = vmul.f32 %v1997_v62, %v4272_v54 }
 0x202   :  { %v2001_v46 = vpop.eup %2000  ;;  %1620 = vst [vmem:[%s4403_s4 + $0x1c8] sm:$0xff] %v1556_v38 }
 0x203   :  { %v2003_v12 = vpop.eup %2002  ;;  %v1555_v51 = vadd.f32 %v1491_v18, %v1363_v39  ;;  %v1366_v36 = vmul.f32 %v2131_v22, %v1302_v9  ;;  %v1494_v27 = vmul.f32 %v2132_v37, %v1430_v48  ;;  %v1178_v21 = vadd.f32 %v2001_v46, %v1999_v47 }
 0x204   :  { %v2005_v6 = vpop.eup %2004  ;;  %v1301_v54 = vmul.f32 %v2003_v12, %v4277_v49  ;;  %v1429_v10 = vmul.f32 %v2003_v12, %v4284_v1 }
 0x205   :  { %v2007_v29 = vpop.eup %2006  ;;  %1619 = vst [vmem:[%s4403_s4 + $0x1c0] sm:$0xff] %v1555_v51  ;;  %v1558_v5 = vadd.f32 %v1494_v27, %v1366_v36  ;;  %2012 = vrcp.f32 %v1178_v21 }
 0x206   :  { %v1365_v55 = vmul.f32 %v2133_v15, %v1301_v54  ;;  %v1493_v53 = vmul.f32 %v2134_v4, %v1429_v10  ;;  %v1177_v49 = vadd.f32 %v2007_v29, %v2005_v6 }
 0x207   :  { %1622 = vst [vmem:[%s4403_s4 + $0x1d8] sm:$0xff] %v1558_v5 }
 0x208   :  { %v1557_v1 = vadd.f32 %v1493_v53, %v1365_v55  ;;  %2014 = vrcp.f32 %v1177_v49 }
 0x20a   :  { %v2009_v19 = vpop.eup %2008  ;;  %1621 = vst [vmem:[%s4403_s4 + $0x1d0] sm:$0xff] %v1557_v1 }
 0x20b   :  { %v1304_v58 = vmul.f32 %v2009_v19, %v1985_v3  ;;  %v1432_v20 = vmul.f32 %v2009_v19, %v1987_v24 }
 0x20d   :  { %v2011_v30 = vpop.eup %2010  ;;  %v1368_v0 = vmul.f32 %v2135_v63, %v1304_v58  ;;  %v1496_v11 = vmul.f32 %v2136_v56, %v1432_v20 }
 0x20e   :  { %v1303_v33 = vmul.f32 %v2011_v30, %v1991_v14  ;;  %v1431_v17 = vmul.f32 %v2011_v30, %v1993_v52  ;;  %v2141_v52 = vld [vmem:[%s4399_s0 + $0x1f0] sm:$0xff] }
 0x20f   :  { %v1560_v23 = vadd.f32 %v1496_v11, %v1368_v0 }
 0x210   :  { %v1367_v40 = vmul.f32 %v2137_v25, %v1303_v33  ;;  %v1495_v3 = vmul.f32 %v2138_v43, %v1431_v17 }
 0x211   :  { %1624 = vst [vmem:[%s4403_s4 + $0x1e8] sm:$0xff] %v1560_v23 }
 0x212   :  { %v2013_v45 = vpop.eup %2012  ;;  %v1559_v24 = vadd.f32 %v1495_v3, %v1367_v40 }
 0x213   :  { %v1306_v41 = vmul.f32 %v2013_v45, %v1999_v47  ;;  %v1434_v28 = vmul.f32 %v2013_v45, %v2001_v46 }
 0x214   :  { %1623 = vst [vmem:[%s4403_s4 + $0x1e0] sm:$0xff] %v1559_v24 }
 0x215   :  { %v2015_v31 = vpop.eup %2014  ;;  %v1370_v34 = vmul.f32 %v2139_v16, %v1306_v41  ;;  %v1498_v14 = vmul.f32 %v2140_v35, %v1434_v28 }
 0x216   :  { %v1305_v2 = vmul.f32 %v2015_v31, %v2005_v6  ;;  %v1433_v44 = vmul.f32 %v2015_v31, %v2007_v29 }
 0x217   :  { %v1562_v50 = vadd.f32 %v1498_v14, %v1370_v34 }
 0x218   :  { %v1369_v7 = vmul.f32 %v2141_v52, %v1305_v2  ;;  %v1497_v32 = vmul.f32 %v2142_v42, %v1433_v44 }
 0x219   :  { %1626 = vst [vmem:[%s4403_s4 + $0x1f8] sm:$0xff] %v1562_v50 }
 0x21a   :  { %v1561_v57 = vadd.f32 %v1497_v32, %v1369_v7 }
 0x21c   :  { %1625 = vst [vmem:[%s4403_s4 + $0x1f0] sm:$0xff] %v1561_v57 }

</bundles_post_ra>
